<compile_context>
chip_gen: v7x
topology: tpu7x:2x2x1
jax: 0.10.0
libtpu: 0.0.40
codegen_flags: <defaults>
</compile_context>

<pallas_src>
import numpy as np
import jax
import jax.numpy as jnp
from jax import lax
from jax.experimental import pallas as pl
from jax.experimental.pallas import tpu as pltpu


_TAPS = tuple((dy, dx) for dy in (-1, 0, 1) for dx in (-1, 0, 1))
_PAD = 8   # channel padding so every sublane concat is tile-aligned


def _round_up(v, m):
    return (v + m - 1) // m * m


# ---------------------------------------------------------------------------
# Trace-time constants (small: O(9*L) masks, O(L*L/4) pool/upsample selectors)
# ---------------------------------------------------------------------------
def _make_tap_masks(n, h, w):
    """(9, n*h*w) f32: 1 where the 3x3 tap (dy,dx) stays inside its own image.
    The same masks also kill the roll wrap-around between batch images."""
    idx = np.arange(n * h * w)
    r = (idx // w) % h
    c = idx % w
    m = np.zeros((9, n * h * w), np.float32)
    for t, (dy, dx) in enumerate(_TAPS):
        m[t] = ((r + dy >= 0) & (r + dy < h) & (c + dx >= 0) & (c + dx < w))
    return jnp.asarray(m)


def _make_pool_select(n, h, w):
    """(n*h*w, n*(h/2)*(w/2)) 0/1 bf16: picks the top-left pixel of each 2x2
    block (the block max is rolled onto that pixel first)."""
    hd, wd = h // 2, w // 2
    s = np.zeros((n * h * w, n * hd * wd), np.float32)
    for b in range(n):
        for rr in range(hd):
            for cc in range(wd):
                s[b * h * w + 2 * rr * w + 2 * cc,
                  b * hd * wd + rr * wd + cc] = 1.0
    return jnp.asarray(s, dtype=jnp.bfloat16)


def _make_upsample(n, hd, wd):
    """(n*hd*wd, n*2hd*2wd) 0/1 bf16 nearest-neighbour 2x upsample operator."""
    h, w = 2 * hd, 2 * wd
    u = np.zeros((n * hd * wd, n * h * w), np.float32)
    for b in range(n):
        for rr in range(h):
            for cc in range(w):
                u[b * hd * wd + (rr // 2) * wd + cc // 2,
                  b * h * w + rr * w + cc] = 1.0
    return jnp.asarray(u, dtype=jnp.bfloat16)


# ---------------------------------------------------------------------------
# Fused RRWNet kernel: entire forward (first U-Net + 6 second-U passes) in one
# pallas_call; all activations stay in vregs/VMEM.
# ---------------------------------------------------------------------------
def _build_kernel(h, w, out_ch, head_pad):
    offs_full = tuple(dy * w + dx for dy, dx in _TAPS)
    offs_half = tuple(dy * (w // 2) + dx for dy, dx in _TAPS)
    f32, bf16 = jnp.float32, jnp.bfloat16

    def kernel(*refs):
        x_ref = refs[0]
        first_u = refs[1:15]                 # 7 layers x (weights, bias)
        second_u = refs[15:29]
        maskL_ref, maskS_ref, pool_ref, up_ref = refs[29:33]
        pred1_ref, preds_ref = refs[33], refs[34]

        def sigmoid(v):                      # exact: error must not compound
            return 1.0 / (1.0 + jnp.exp(-v))

        def conv3(x, w_ref, b_ref, mask_ref, offs, relu=True):
            """3x3 'same' conv = one bf16 MXU dot on a rolled+masked im2col
            stack (9*Cin, L).  x: (Cin, L) f32 with Cin a multiple of 8."""
            L = x.shape[1]
            taps = []
            for t, off in enumerate(offs):
                if off == 0:
                    taps.append(x)                               # center tap
                else:
                    shifted = pltpu.roll(x, (-off) % L, axis=1)  # XLU
                    taps.append(shifted * mask_ref[t:t + 1, :])  # VPU mask
            xcol = jnp.concatenate(taps, axis=0).astype(bf16)    # (9*Cin, L)
            out = jnp.dot(w_ref[...], xcol,
                          preferred_element_type=f32) + b_ref[...]
            return jnp.maximum(out, 0.0) if relu else out

        def conv1(x, w_ref, b_ref):          # 1x1 head, no activation
            return jnp.dot(w_ref[...], x.astype(bf16),
                           preferred_element_type=f32) + b_ref[...]

        def maxpool2(x):                     # (C, L) -> (C, L/4)
            L = x.shape[1]
            m = x
            for off in (1, w, w + 1):        # other 3 elems of the 2x2 block
                m = jnp.maximum(m, pltpu.roll(x, (-off) % L, axis=1))
            return jnp.dot(m.astype(bf16), pool_ref[...],
                           preferred_element_type=f32)

        def upsample2(x):                    # (C, L/4) -> (C, L)
            return jnp.dot(x.astype(bf16), up_ref[...],
                           preferred_element_type=f32)

        def unet(x, prm):
            (w1a, b1a, w1b, b1b, wba, bba, wbb, bbb,
             wda, bda, wdb, bdb, wf, bfin) = prm
            e1 = conv3(x, w1a, b1a, maskL_ref, offs_full)
            e1 = conv3(e1, w1b, b1b, maskL_ref, offs_full)
            d = maxpool2(e1)
            bt = conv3(d, wba, bba, maskS_ref, offs_half)
            bt = conv3(bt, wbb, bbb, maskS_ref, offs_half)
            u = upsample2(bt)
            d1 = conv3(jnp.concatenate([u, e1], axis=0), wda, bda,
                       maskL_ref, offs_full)                 # fused skip concat
            d1 = conv3(d1, wdb, bdb, maskL_ref, offs_full)
            return conv1(d1, wf, bfin)       # (head_pad, L); real rows first

        x = x_ref[...]                                       # (in_pad, L) f32
        L = x.shape[1]

        pred1 = unet(x, first_u)                             # (head_pad, L)
        pred1_ref[...] = pred1[0:out_ch, :]

        bv_logits = pred1[2:3, :]
        p1s = sigmoid(pred1)                 # pad rows are dummies (0 weights)
        bv = p1s[2:3, :]

        pred2 = unet(p1s, second_u)                          # rows 0:2 real
        preds_ref[0, 0:2, :] = pred2[0:2, :]
        preds_ref[0, 2:3, :] = bv_logits

        # Refinement input channels: [sig(pred2_0), sig(pred2_1), bv, <pad>]
        row_is_bv = lax.broadcasted_iota(jnp.int32, (head_pad, L), 0) == 2

        def body(k, p2):
            inp = jnp.where(row_is_bv, bv, sigmoid(p2))
            new_p2 = unet(inp, second_u)
            preds_ref[k, 0:2, :] = new_p2[0:2, :]
            preds_ref[k, 2:3, :] = bv_logits
            return new_p2

        lax.fori_loop(1, 6, body, pred2)

    return kernel


# ---------------------------------------------------------------------------
# Parameter prep (bf16 weights, f32 biases, channel padding for alignment)
# ---------------------------------------------------------------------------
def _prep_conv3(w, b, cin_pad=None):
    cout, cin, k, _ = w.shape
    if cin_pad is not None and cin_pad != cin:
        w = jnp.zeros((cout, cin_pad, k, k), w.dtype).at[:, :cin].set(w)
    # columns ordered tap-major then channel: col = (ky*3 + kx)*Cin + ci
    wmat = jnp.transpose(w, (0, 2, 3, 1)).reshape(cout, k * k * w.shape[1])
    return wmat.astype(jnp.bfloat16), b.reshape(cout, 1).astype(jnp.float32)


def _prep_conv1(w, b, cout_pad=None):
    cout, cin = w.shape[0], w.shape[1]
    wmat = w.reshape(cout, cin)
    bcol = b.reshape(cout, 1)
    if cout_pad is not None and cout_pad != cout:
        wmat = jnp.zeros((cout_pad, cin), w.dtype).at[:cout].set(wmat)
        bcol = jnp.zeros((cout_pad, 1), b.dtype).at[:cout].set(bcol)
    return wmat.astype(jnp.bfloat16), bcol.astype(jnp.float32)


def _flatten_unet(u, in_pad, head_pad):
    seq = []
    seq.extend(_prep_conv3(u["enc1a"]["w"], u["enc1a"]["b"], cin_pad=in_pad))
    for name in ("enc1b", "bota", "botb", "deca", "decb"):
        seq.extend(_prep_conv3(u[name]["w"], u[name]["b"]))
    seq.extend(_prep_conv1(u["final"]["w"], u["final"]["b"], cout_pad=head_pad))
    return seq


# ---------------------------------------------------------------------------
# Wrapper
# ---------------------------------------------------------------------------
def rrwnet_forward(params, x_nchw):
    n, cin, h, w = x_nchw.shape
    out_ch = params["first_u"]["final"]["w"].shape[0]
    base = params["first_u"]["enc1a"]["w"].shape[0]
    assert h % 2 == 0 and w % 2 == 0
    assert out_ch == 3, "RRWNet refinement loop requires output_ch == 3"
    assert base % 8 == 0, "base_ch must be a multiple of 8 (tile alignment)"

    L = n * h * w
    in_pad = _round_up(cin, _PAD)
    head_pad = _round_up(max(out_ch, 3), _PAD)

    # lane-dense layout: channels on sublanes, batch folded into the lane axis
    x = jnp.transpose(x_nchw, (1, 0, 2, 3)).reshape(cin, L).astype(jnp.float32)
    x = jnp.zeros((in_pad, L), jnp.float32).at[:cin].set(x)

    fu = _flatten_unet(params["first_u"], in_pad, head_pad)
    su = _flatten_unet(params["second_u"], head_pad, head_pad)
    consts = [_make_tap_masks(n, h, w),
              _make_tap_masks(n, h // 2, w // 2),
              _make_pool_select(n, h, w),
              _make_upsample(n, h // 2, w // 2)]

    inputs = [x] + fu + su + consts
    vmem = pl.BlockSpec(memory_space=pltpu.MemorySpace.VMEM)

    out_shape = (jax.ShapeDtypeStruct((out_ch, L), jnp.float32),
                 jax.ShapeDtypeStruct((6, 3, L), jnp.float32))

    pred1_flat, preds_flat = pl.pallas_call(
        _build_kernel(h, w, out_ch, head_pad),
        out_shape=out_shape,
        in_specs=[vmem] * len(inputs),
        out_specs=(vmem, vmem),
    )(*inputs)

    pred1 = pred1_flat.reshape(out_ch, n, h, w).transpose(1, 0, 2, 3)
    rest = preds_flat.reshape(6, 3, n, h, w).transpose(0, 2, 1, 3, 4)
    return [pred1] + [rest[k] for k in range(6)]


# ---------------------------------------------------------------------------
# Parameter init (deterministic, synthetic)
# ---------------------------------------------------------------------------
def init_conv(key, cin, cout, k):
    kw, kb = jax.random.split(key)
    fan_in = cin * k * k
    w = jax.random.normal(kw, (cout, cin, k, k), jnp.float32) / jnp.sqrt(
        jnp.float32(fan_in))
    b = 0.01 * jax.random.normal(kb, (cout,), jnp.float32)
    return {"w": w, "b": b}


def init_unet(key, in_ch, out_ch, base_ch):
    keys = jax.random.split(key, 7)
    return {
        "enc1a": init_conv(keys[0], in_ch, base_ch, 3),
        "enc1b": init_conv(keys[1], base_ch, base_ch, 3),
        "bota": init_conv(keys[2], base_ch, 2 * base_ch, 3),
        "botb": init_conv(keys[3], 2 * base_ch, 2 * base_ch, 3),
        "deca": init_conv(keys[4], 2 * base_ch + base_ch, base_ch, 3),
        "decb": init_conv(keys[5], base_ch, base_ch, 3),
        "final": init_conv(keys[6], base_ch, out_ch, 1),
    }


# ---------------------------------------------------------------------------
# Main
# ---------------------------------------------------------------------------
if __name__ == "__main__":
    key = jax.random.PRNGKey(0)
    kx, kp1, kp2 = jax.random.split(key, 3)

    input_ch, output_ch, base_ch = 3, 3, 8
    N, H, W = 2, 16, 16

    x = jax.random.normal(kx, (N, input_ch, H, W), jnp.float32)   # NCHW
    params = {
        "first_u": init_unet(kp1, input_ch, output_ch, base_ch),
        "second_u": init_unet(kp2, output_ch, 2, base_ch),
    }

    fwd = jax.jit(rrwnet_forward)
    outs = jax.block_until_ready(fwd(params, x))

    assert len(outs) == 7
    assert outs[0].shape == (N, output_ch, H, W)
    for o in outs[1:]:
        assert o.shape == (N, 3, H, W)

    print("KERNEL_OK")
</pallas_src>

<mosaic_0001>
module attributes {stable_mosaic.version = 11 : i64} {
  func.func @kernel(%arg0: memref<8x512xf32, #tpu.memory_space<vmem>>, %arg1: memref<8x72xbf16, #tpu.memory_space<vmem>>, %arg2: memref<8x1xf32, #tpu.memory_space<vmem>>, %arg3: memref<8x72xbf16, #tpu.memory_space<vmem>>, %arg4: memref<8x1xf32, #tpu.memory_space<vmem>>, %arg5: memref<16x72xbf16, #tpu.memory_space<vmem>>, %arg6: memref<16x1xf32, #tpu.memory_space<vmem>>, %arg7: memref<16x144xbf16, #tpu.memory_space<vmem>>, %arg8: memref<16x1xf32, #tpu.memory_space<vmem>>, %arg9: memref<8x216xbf16, #tpu.memory_space<vmem>>, %arg10: memref<8x1xf32, #tpu.memory_space<vmem>>, %arg11: memref<8x72xbf16, #tpu.memory_space<vmem>>, %arg12: memref<8x1xf32, #tpu.memory_space<vmem>>, %arg13: memref<8x8xbf16, #tpu.memory_space<vmem>>, %arg14: memref<8x1xf32, #tpu.memory_space<vmem>>, %arg15: memref<8x72xbf16, #tpu.memory_space<vmem>>, %arg16: memref<8x1xf32, #tpu.memory_space<vmem>>, %arg17: memref<8x72xbf16, #tpu.memory_space<vmem>>, %arg18: memref<8x1xf32, #tpu.memory_space<vmem>>, %arg19: memref<16x72xbf16, #tpu.memory_space<vmem>>, %arg20: memref<16x1xf32, #tpu.memory_space<vmem>>, %arg21: memref<16x144xbf16, #tpu.memory_space<vmem>>, %arg22: memref<16x1xf32, #tpu.memory_space<vmem>>, %arg23: memref<8x216xbf16, #tpu.memory_space<vmem>>, %arg24: memref<8x1xf32, #tpu.memory_space<vmem>>, %arg25: memref<8x72xbf16, #tpu.memory_space<vmem>>, %arg26: memref<8x1xf32, #tpu.memory_space<vmem>>, %arg27: memref<8x8xbf16, #tpu.memory_space<vmem>>, %arg28: memref<8x1xf32, #tpu.memory_space<vmem>>, %arg29: memref<9x512xf32, #tpu.memory_space<vmem>>, %arg30: memref<9x128xf32, #tpu.memory_space<vmem>>, %arg31: memref<512x128xbf16, #tpu.memory_space<vmem>>, %arg32: memref<128x512xbf16, #tpu.memory_space<vmem>>, %arg33: memref<3x512xf32, #tpu.memory_space<vmem>>, %arg34: memref<6x3x512xf32, #tpu.memory_space<vmem>>) attributes {dimension_semantics = [], scalar_prefetch = 0 : i64, scratch_operands = 0 : i64, tpu.core_type = #tpu.core_type<tc>} {
    %c0 = arith.constant 0 : index
    %c0_0 = arith.constant 0 : index
    %0 = vector.load %arg0[%c0, %c0_0] : memref<8x512xf32, #tpu.memory_space<vmem>>, vector<8x512xf32>
    %c17_i32 = arith.constant 17 : i32
    %1 = tpu.dynamic_rotate %0 by %c17_i32 dim 1 : vector<8x512xf32>, i32 -> vector<8x512xf32>
    %c0_1 = arith.constant 0 : index
    %c0_2 = arith.constant 0 : index
    %2 = vector.load %arg29[%c0_1, %c0_2] : memref<9x512xf32, #tpu.memory_space<vmem>>, vector<1x512xf32>
    %3 = vector.broadcast %2 : vector<1x512xf32> to vector<8x512xf32>
    %4 = arith.mulf %1, %3 : vector<8x512xf32>
    %c16_i32 = arith.constant 16 : i32
    %5 = tpu.dynamic_rotate %0 by %c16_i32 dim 1 : vector<8x512xf32>, i32 -> vector<8x512xf32>
    %c1 = arith.constant 1 : index
    %c0_3 = arith.constant 0 : index
    %6 = vector.load %arg29[%c1, %c0_3] : memref<9x512xf32, #tpu.memory_space<vmem>>, vector<1x512xf32>
    %7 = vector.broadcast %6 : vector<1x512xf32> to vector<8x512xf32>
    %8 = arith.mulf %5, %7 : vector<8x512xf32>
    %c15_i32 = arith.constant 15 : i32
    %9 = tpu.dynamic_rotate %0 by %c15_i32 dim 1 : vector<8x512xf32>, i32 -> vector<8x512xf32>
    %c2 = arith.constant 2 : index
    %c0_4 = arith.constant 0 : index
    %10 = vector.load %arg29[%c2, %c0_4] : memref<9x512xf32, #tpu.memory_space<vmem>>, vector<1x512xf32>
    %11 = vector.broadcast %10 : vector<1x512xf32> to vector<8x512xf32>
    %12 = arith.mulf %9, %11 : vector<8x512xf32>
    %c1_i32 = arith.constant 1 : i32
    %13 = tpu.dynamic_rotate %0 by %c1_i32 dim 1 : vector<8x512xf32>, i32 -> vector<8x512xf32>
    %c3 = arith.constant 3 : index
    %c0_5 = arith.constant 0 : index
    %14 = vector.load %arg29[%c3, %c0_5] : memref<9x512xf32, #tpu.memory_space<vmem>>, vector<1x512xf32>
    %15 = vector.broadcast %14 : vector<1x512xf32> to vector<8x512xf32>
    %16 = arith.mulf %13, %15 : vector<8x512xf32>
    %c511_i32 = arith.constant 511 : i32
    %17 = tpu.dynamic_rotate %0 by %c511_i32 dim 1 : vector<8x512xf32>, i32 -> vector<8x512xf32>
    %c5 = arith.constant 5 : index
    %c0_6 = arith.constant 0 : index
    %18 = vector.load %arg29[%c5, %c0_6] : memref<9x512xf32, #tpu.memory_space<vmem>>, vector<1x512xf32>
    %19 = vector.broadcast %18 : vector<1x512xf32> to vector<8x512xf32>
    %20 = arith.mulf %17, %19 : vector<8x512xf32>
    %c497_i32 = arith.constant 497 : i32
    %21 = tpu.dynamic_rotate %0 by %c497_i32 dim 1 : vector<8x512xf32>, i32 -> vector<8x512xf32>
    %c6 = arith.constant 6 : index
    %c0_7 = arith.constant 0 : index
    %22 = vector.load %arg29[%c6, %c0_7] : memref<9x512xf32, #tpu.memory_space<vmem>>, vector<1x512xf32>
    %23 = vector.broadcast %22 : vector<1x512xf32> to vector<8x512xf32>
    %24 = arith.mulf %21, %23 : vector<8x512xf32>
    %c496_i32 = arith.constant 496 : i32
    %25 = tpu.dynamic_rotate %0 by %c496_i32 dim 1 : vector<8x512xf32>, i32 -> vector<8x512xf32>
    %c7 = arith.constant 7 : index
    %c0_8 = arith.constant 0 : index
    %26 = vector.load %arg29[%c7, %c0_8] : memref<9x512xf32, #tpu.memory_space<vmem>>, vector<1x512xf32>
    %27 = vector.broadcast %26 : vector<1x512xf32> to vector<8x512xf32>
    %28 = arith.mulf %25, %27 : vector<8x512xf32>
    %c495_i32 = arith.constant 495 : i32
    %29 = tpu.dynamic_rotate %0 by %c495_i32 dim 1 : vector<8x512xf32>, i32 -> vector<8x512xf32>
    %c8 = arith.constant 8 : index
    %c0_9 = arith.constant 0 : index
    %30 = vector.load %arg29[%c8, %c0_9] : memref<9x512xf32, #tpu.memory_space<vmem>>, vector<1x512xf32>
    %31 = vector.broadcast %30 : vector<1x512xf32> to vector<8x512xf32>
    %32 = arith.mulf %29, %31 : vector<8x512xf32>
    %33 = tpu.concatenate %4, %8, %12, %16, %0, %20, %24, %28, %32 in 0 : vector<8x512xf32>, vector<8x512xf32>, vector<8x512xf32>, vector<8x512xf32>, vector<8x512xf32>, vector<8x512xf32>, vector<8x512xf32>, vector<8x512xf32>, vector<8x512xf32> -> vector<72x512xf32>
    %34 = arith.truncf %33 : vector<72x512xf32> to vector<72x512xbf16>
    %c0_10 = arith.constant 0 : index
    %c0_11 = arith.constant 0 : index
    %35 = vector.load %arg1[%c0_10, %c0_11] : memref<8x72xbf16, #tpu.memory_space<vmem>>, vector<8x72xbf16>
    %cst = arith.constant dense<0.000000e+00> : vector<8x512xf32>
    %36 = tpu.matmul %35, %34, %cst {dimension_numbers = #tpu.dot_dimension_numbers<[1], [0], [0], [1], [0, 0, 1, 1], [], []>} : vector<8x72xbf16>, vector<72x512xbf16>, vector<8x512xf32> -> vector<8x512xf32>
    %c0_12 = arith.constant 0 : index
    %c0_13 = arith.constant 0 : index
    %37 = vector.load %arg2[%c0_12, %c0_13] : memref<8x1xf32, #tpu.memory_space<vmem>>, vector<8x1xf32>
    %38 = vector.broadcast %37 : vector<8x1xf32> to vector<8x512xf32>
    %39 = arith.addf %36, %38 : vector<8x512xf32>
    %cst_14 = arith.constant 0.000000e+00 : f32
    %40 = vector.broadcast %cst_14 : f32 to vector<8x512xf32>
    %41 = arith.maximumf %39, %40 : vector<8x512xf32>
    %c17_i32_15 = arith.constant 17 : i32
    %42 = tpu.dynamic_rotate %41 by %c17_i32_15 dim 1 : vector<8x512xf32>, i32 -> vector<8x512xf32>
    %c0_16 = arith.constant 0 : index
    %c0_17 = arith.constant 0 : index
    %43 = vector.load %arg29[%c0_16, %c0_17] : memref<9x512xf32, #tpu.memory_space<vmem>>, vector<1x512xf32>
    %44 = vector.broadcast %43 : vector<1x512xf32> to vector<8x512xf32>
    %45 = arith.mulf %42, %44 : vector<8x512xf32>
    %c16_i32_18 = arith.constant 16 : i32
    %46 = tpu.dynamic_rotate %41 by %c16_i32_18 dim 1 : vector<8x512xf32>, i32 -> vector<8x512xf32>
    %c1_19 = arith.constant 1 : index
    %c0_20 = arith.constant 0 : index
    %47 = vector.load %arg29[%c1_19, %c0_20] : memref<9x512xf32, #tpu.memory_space<vmem>>, vector<1x512xf32>
    %48 = vector.broadcast %47 : vector<1x512xf32> to vector<8x512xf32>
    %49 = arith.mulf %46, %48 : vector<8x512xf32>
    %c15_i32_21 = arith.constant 15 : i32
    %50 = tpu.dynamic_rotate %41 by %c15_i32_21 dim 1 : vector<8x512xf32>, i32 -> vector<8x512xf32>
    %c2_22 = arith.constant 2 : index
    %c0_23 = arith.constant 0 : index
    %51 = vector.load %arg29[%c2_22, %c0_23] : memref<9x512xf32, #tpu.memory_space<vmem>>, vector<1x512xf32>
    %52 = vector.broadcast %51 : vector<1x512xf32> to vector<8x512xf32>
    %53 = arith.mulf %50, %52 : vector<8x512xf32>
    %c1_i32_24 = arith.constant 1 : i32
    %54 = tpu.dynamic_rotate %41 by %c1_i32_24 dim 1 : vector<8x512xf32>, i32 -> vector<8x512xf32>
    %c3_25 = arith.constant 3 : index
    %c0_26 = arith.constant 0 : index
    %55 = vector.load %arg29[%c3_25, %c0_26] : memref<9x512xf32, #tpu.memory_space<vmem>>, vector<1x512xf32>
    %56 = vector.broadcast %55 : vector<1x512xf32> to vector<8x512xf32>
    %57 = arith.mulf %54, %56 : vector<8x512xf32>
    %c511_i32_27 = arith.constant 511 : i32
    %58 = tpu.dynamic_rotate %41 by %c511_i32_27 dim 1 : vector<8x512xf32>, i32 -> vector<8x512xf32>
    %c5_28 = arith.constant 5 : index
    %c0_29 = arith.constant 0 : index
    %59 = vector.load %arg29[%c5_28, %c0_29] : memref<9x512xf32, #tpu.memory_space<vmem>>, vector<1x512xf32>
    %60 = vector.broadcast %59 : vector<1x512xf32> to vector<8x512xf32>
    %61 = arith.mulf %58, %60 : vector<8x512xf32>
    %c497_i32_30 = arith.constant 497 : i32
    %62 = tpu.dynamic_rotate %41 by %c497_i32_30 dim 1 : vector<8x512xf32>, i32 -> vector<8x512xf32>
    %c6_31 = arith.constant 6 : index
    %c0_32 = arith.constant 0 : index
    %63 = vector.load %arg29[%c6_31, %c0_32] : memref<9x512xf32, #tpu.memory_space<vmem>>, vector<1x512xf32>
    %64 = vector.broadcast %63 : vector<1x512xf32> to vector<8x512xf32>
    %65 = arith.mulf %62, %64 : vector<8x512xf32>
    %c496_i32_33 = arith.constant 496 : i32
    %66 = tpu.dynamic_rotate %41 by %c496_i32_33 dim 1 : vector<8x512xf32>, i32 -> vector<8x512xf32>
    %c7_34 = arith.constant 7 : index
    %c0_35 = arith.constant 0 : index
    %67 = vector.load %arg29[%c7_34, %c0_35] : memref<9x512xf32, #tpu.memory_space<vmem>>, vector<1x512xf32>
    %68 = vector.broadcast %67 : vector<1x512xf32> to vector<8x512xf32>
    %69 = arith.mulf %66, %68 : vector<8x512xf32>
    %c495_i32_36 = arith.constant 495 : i32
    %70 = tpu.dynamic_rotate %41 by %c495_i32_36 dim 1 : vector<8x512xf32>, i32 -> vector<8x512xf32>
    %c8_37 = arith.constant 8 : index
    %c0_38 = arith.constant 0 : index
    %71 = vector.load %arg29[%c8_37, %c0_38] : memref<9x512xf32, #tpu.memory_space<vmem>>, vector<1x512xf32>
    %72 = vector.broadcast %71 : vector<1x512xf32> to vector<8x512xf32>
    %73 = arith.mulf %70, %72 : vector<8x512xf32>
    %74 = tpu.concatenate %45, %49, %53, %57, %41, %61, %65, %69, %73 in 0 : vector<8x512xf32>, vector<8x512xf32>, vector<8x512xf32>, vector<8x512xf32>, vector<8x512xf32>, vector<8x512xf32>, vector<8x512xf32>, vector<8x512xf32>, vector<8x512xf32> -> vector<72x512xf32>
    %75 = arith.truncf %74 : vector<72x512xf32> to vector<72x512xbf16>
    %c0_39 = arith.constant 0 : index
    %c0_40 = arith.constant 0 : index
    %76 = vector.load %arg3[%c0_39, %c0_40] : memref<8x72xbf16, #tpu.memory_space<vmem>>, vector<8x72xbf16>
    %cst_41 = arith.constant dense<0.000000e+00> : vector<8x512xf32>
    %77 = tpu.matmul %76, %75, %cst_41 {dimension_numbers = #tpu.dot_dimension_numbers<[1], [0], [0], [1], [0, 0, 1, 1], [], []>} : vector<8x72xbf16>, vector<72x512xbf16>, vector<8x512xf32> -> vector<8x512xf32>
    %c0_42 = arith.constant 0 : index
    %c0_43 = arith.constant 0 : index
    %78 = vector.load %arg4[%c0_42, %c0_43] : memref<8x1xf32, #tpu.memory_space<vmem>>, vector<8x1xf32>
    %79 = vector.broadcast %78 : vector<8x1xf32> to vector<8x512xf32>
    %80 = arith.addf %77, %79 : vector<8x512xf32>
    %cst_44 = arith.constant 0.000000e+00 : f32
    %81 = vector.broadcast %cst_44 : f32 to vector<8x512xf32>
    %82 = arith.maximumf %80, %81 : vector<8x512xf32>
    %c511_i32_45 = arith.constant 511 : i32
    %83 = tpu.dynamic_rotate %82 by %c511_i32_45 dim 1 : vector<8x512xf32>, i32 -> vector<8x512xf32>
    %84 = arith.maximumf %82, %83 : vector<8x512xf32>
    %c496_i32_46 = arith.constant 496 : i32
    %85 = tpu.dynamic_rotate %82 by %c496_i32_46 dim 1 : vector<8x512xf32>, i32 -> vector<8x512xf32>
    %86 = arith.maximumf %84, %85 : vector<8x512xf32>
    %c495_i32_47 = arith.constant 495 : i32
    %87 = tpu.dynamic_rotate %82 by %c495_i32_47 dim 1 : vector<8x512xf32>, i32 -> vector<8x512xf32>
    %88 = arith.maximumf %86, %87 : vector<8x512xf32>
    %89 = arith.truncf %88 : vector<8x512xf32> to vector<8x512xbf16>
    %c0_48 = arith.constant 0 : index
    %c0_49 = arith.constant 0 : index
    %90 = vector.load %arg31[%c0_48, %c0_49] : memref<512x128xbf16, #tpu.memory_space<vmem>>, vector<512x128xbf16>
    %cst_50 = arith.constant dense<0.000000e+00> : vector<8x128xf32>
    %91 = tpu.matmul %89, %90, %cst_50 {dimension_numbers = #tpu.dot_dimension_numbers<[1], [0], [0], [1], [0, 0, 1, 1], [], []>} : vector<8x512xbf16>, vector<512x128xbf16>, vector<8x128xf32> -> vector<8x128xf32>
    %c9_i32 = arith.constant 9 : i32
    %92 = tpu.dynamic_rotate %91 by %c9_i32 dim 1 : vector<8x128xf32>, i32 -> vector<8x128xf32>
    %c0_51 = arith.constant 0 : index
    %c0_52 = arith.constant 0 : index
    %93 = vector.load %arg30[%c0_51, %c0_52] : memref<9x128xf32, #tpu.memory_space<vmem>>, vector<1x128xf32>
    %94 = vector.broadcast %93 : vector<1x128xf32> to vector<8x128xf32>
    %95 = arith.mulf %92, %94 : vector<8x128xf32>
    %c8_i32 = arith.constant 8 : i32
    %96 = tpu.dynamic_rotate %91 by %c8_i32 dim 1 : vector<8x128xf32>, i32 -> vector<8x128xf32>
    %c1_53 = arith.constant 1 : index
    %c0_54 = arith.constant 0 : index
    %97 = vector.load %arg30[%c1_53, %c0_54] : memref<9x128xf32, #tpu.memory_space<vmem>>, vector<1x128xf32>
    %98 = vector.broadcast %97 : vector<1x128xf32> to vector<8x128xf32>
    %99 = arith.mulf %96, %98 : vector<8x128xf32>
    %c7_i32 = arith.constant 7 : i32
    %100 = tpu.dynamic_rotate %91 by %c7_i32 dim 1 : vector<8x128xf32>, i32 -> vector<8x128xf32>
    %c2_55 = arith.constant 2 : index
    %c0_56 = arith.constant 0 : index
    %101 = vector.load %arg30[%c2_55, %c0_56] : memref<9x128xf32, #tpu.memory_space<vmem>>, vector<1x128xf32>
    %102 = vector.broadcast %101 : vector<1x128xf32> to vector<8x128xf32>
    %103 = arith.mulf %100, %102 : vector<8x128xf32>
    %c1_i32_57 = arith.constant 1 : i32
    %104 = tpu.dynamic_rotate %91 by %c1_i32_57 dim 1 : vector<8x128xf32>, i32 -> vector<8x128xf32>
    %c3_58 = arith.constant 3 : index
    %c0_59 = arith.constant 0 : index
    %105 = vector.load %arg30[%c3_58, %c0_59] : memref<9x128xf32, #tpu.memory_space<vmem>>, vector<1x128xf32>
    %106 = vector.broadcast %105 : vector<1x128xf32> to vector<8x128xf32>
    %107 = arith.mulf %104, %106 : vector<8x128xf32>
    %c127_i32 = arith.constant 127 : i32
    %108 = tpu.dynamic_rotate %91 by %c127_i32 dim 1 : vector<8x128xf32>, i32 -> vector<8x128xf32>
    %c5_60 = arith.constant 5 : index
    %c0_61 = arith.constant 0 : index
    %109 = vector.load %arg30[%c5_60, %c0_61] : memref<9x128xf32, #tpu.memory_space<vmem>>, vector<1x128xf32>
    %110 = vector.broadcast %109 : vector<1x128xf32> to vector<8x128xf32>
    %111 = arith.mulf %108, %110 : vector<8x128xf32>
    %c121_i32 = arith.constant 121 : i32
    %112 = tpu.dynamic_rotate %91 by %c121_i32 dim 1 : vector<8x128xf32>, i32 -> vector<8x128xf32>
    %c6_62 = arith.constant 6 : index
    %c0_63 = arith.constant 0 : index
    %113 = vector.load %arg30[%c6_62, %c0_63] : memref<9x128xf32, #tpu.memory_space<vmem>>, vector<1x128xf32>
    %114 = vector.broadcast %113 : vector<1x128xf32> to vector<8x128xf32>
    %115 = arith.mulf %112, %114 : vector<8x128xf32>
    %c120_i32 = arith.constant 120 : i32
    %116 = tpu.dynamic_rotate %91 by %c120_i32 dim 1 : vector<8x128xf32>, i32 -> vector<8x128xf32>
    %c7_64 = arith.constant 7 : index
    %c0_65 = arith.constant 0 : index
    %117 = vector.load %arg30[%c7_64, %c0_65] : memref<9x128xf32, #tpu.memory_space<vmem>>, vector<1x128xf32>
    %118 = vector.broadcast %117 : vector<1x128xf32> to vector<8x128xf32>
    %119 = arith.mulf %116, %118 : vector<8x128xf32>
    %c119_i32 = arith.constant 119 : i32
    %120 = tpu.dynamic_rotate %91 by %c119_i32 dim 1 : vector<8x128xf32>, i32 -> vector<8x128xf32>
    %c8_66 = arith.constant 8 : index
    %c0_67 = arith.constant 0 : index
    %121 = vector.load %arg30[%c8_66, %c0_67] : memref<9x128xf32, #tpu.memory_space<vmem>>, vector<1x128xf32>
    %122 = vector.broadcast %121 : vector<1x128xf32> to vector<8x128xf32>
    %123 = arith.mulf %120, %122 : vector<8x128xf32>
    %124 = tpu.concatenate %95, %99, %103, %107, %91, %111, %115, %119, %123 in 0 : vector<8x128xf32>, vector<8x128xf32>, vector<8x128xf32>, vector<8x128xf32>, vector<8x128xf32>, vector<8x128xf32>, vector<8x128xf32>, vector<8x128xf32>, vector<8x128xf32> -> vector<72x128xf32>
    %125 = arith.truncf %124 : vector<72x128xf32> to vector<72x128xbf16>
    %c0_68 = arith.constant 0 : index
    %c0_69 = arith.constant 0 : index
    %126 = vector.load %arg5[%c0_68, %c0_69] : memref<16x72xbf16, #tpu.memory_space<vmem>>, vector<16x72xbf16>
    %cst_70 = arith.constant dense<0.000000e+00> : vector<16x128xf32>
    %127 = tpu.matmul %126, %125, %cst_70 {dimension_numbers = #tpu.dot_dimension_numbers<[1], [0], [0], [1], [0, 0, 1, 1], [], []>} : vector<16x72xbf16>, vector<72x128xbf16>, vector<16x128xf32> -> vector<16x128xf32>
    %c0_71 = arith.constant 0 : index
    %c0_72 = arith.constant 0 : index
    %128 = vector.load %arg6[%c0_71, %c0_72] : memref<16x1xf32, #tpu.memory_space<vmem>>, vector<16x1xf32>
    %129 = vector.broadcast %128 : vector<16x1xf32> to vector<16x128xf32>
    %130 = arith.addf %127, %129 : vector<16x128xf32>
    %cst_73 = arith.constant 0.000000e+00 : f32
    %131 = vector.broadcast %cst_73 : f32 to vector<16x128xf32>
    %132 = arith.maximumf %130, %131 : vector<16x128xf32>
    %c9_i32_74 = arith.constant 9 : i32
    %133 = tpu.dynamic_rotate %132 by %c9_i32_74 dim 1 : vector<16x128xf32>, i32 -> vector<16x128xf32>
    %c0_75 = arith.constant 0 : index
    %c0_76 = arith.constant 0 : index
    %134 = vector.load %arg30[%c0_75, %c0_76] : memref<9x128xf32, #tpu.memory_space<vmem>>, vector<1x128xf32>
    %135 = vector.broadcast %134 : vector<1x128xf32> to vector<16x128xf32>
    %136 = arith.mulf %133, %135 : vector<16x128xf32>
    %c8_i32_77 = arith.constant 8 : i32
    %137 = tpu.dynamic_rotate %132 by %c8_i32_77 dim 1 : vector<16x128xf32>, i32 -> vector<16x128xf32>
    %c1_78 = arith.constant 1 : index
    %c0_79 = arith.constant 0 : index
    %138 = vector.load %arg30[%c1_78, %c0_79] : memref<9x128xf32, #tpu.memory_space<vmem>>, vector<1x128xf32>
    %139 = vector.broadcast %138 : vector<1x128xf32> to vector<16x128xf32>
    %140 = arith.mulf %137, %139 : vector<16x128xf32>
    %c7_i32_80 = arith.constant 7 : i32
    %141 = tpu.dynamic_rotate %132 by %c7_i32_80 dim 1 : vector<16x128xf32>, i32 -> vector<16x128xf32>
    %c2_81 = arith.constant 2 : index
    %c0_82 = arith.constant 0 : index
    %142 = vector.load %arg30[%c2_81, %c0_82] : memref<9x128xf32, #tpu.memory_space<vmem>>, vector<1x128xf32>
    %143 = vector.broadcast %142 : vector<1x128xf32> to vector<16x128xf32>
    %144 = arith.mulf %141, %143 : vector<16x128xf32>
    %c1_i32_83 = arith.constant 1 : i32
    %145 = tpu.dynamic_rotate %132 by %c1_i32_83 dim 1 : vector<16x128xf32>, i32 -> vector<16x128xf32>
    %c3_84 = arith.constant 3 : index
    %c0_85 = arith.constant 0 : index
    %146 = vector.load %arg30[%c3_84, %c0_85] : memref<9x128xf32, #tpu.memory_space<vmem>>, vector<1x128xf32>
    %147 = vector.broadcast %146 : vector<1x128xf32> to vector<16x128xf32>
    %148 = arith.mulf %145, %147 : vector<16x128xf32>
    %c127_i32_86 = arith.constant 127 : i32
    %149 = tpu.dynamic_rotate %132 by %c127_i32_86 dim 1 : vector<16x128xf32>, i32 -> vector<16x128xf32>
    %c5_87 = arith.constant 5 : index
    %c0_88 = arith.constant 0 : index
    %150 = vector.load %arg30[%c5_87, %c0_88] : memref<9x128xf32, #tpu.memory_space<vmem>>, vector<1x128xf32>
    %151 = vector.broadcast %150 : vector<1x128xf32> to vector<16x128xf32>
    %152 = arith.mulf %149, %151 : vector<16x128xf32>
    %c121_i32_89 = arith.constant 121 : i32
    %153 = tpu.dynamic_rotate %132 by %c121_i32_89 dim 1 : vector<16x128xf32>, i32 -> vector<16x128xf32>
    %c6_90 = arith.constant 6 : index
    %c0_91 = arith.constant 0 : index
    %154 = vector.load %arg30[%c6_90, %c0_91] : memref<9x128xf32, #tpu.memory_space<vmem>>, vector<1x128xf32>
    %155 = vector.broadcast %154 : vector<1x128xf32> to vector<16x128xf32>
    %156 = arith.mulf %153, %155 : vector<16x128xf32>
    %c120_i32_92 = arith.constant 120 : i32
    %157 = tpu.dynamic_rotate %132 by %c120_i32_92 dim 1 : vector<16x128xf32>, i32 -> vector<16x128xf32>
    %c7_93 = arith.constant 7 : index
    %c0_94 = arith.constant 0 : index
    %158 = vector.load %arg30[%c7_93, %c0_94] : memref<9x128xf32, #tpu.memory_space<vmem>>, vector<1x128xf32>
    %159 = vector.broadcast %158 : vector<1x128xf32> to vector<16x128xf32>
    %160 = arith.mulf %157, %159 : vector<16x128xf32>
    %c119_i32_95 = arith.constant 119 : i32
    %161 = tpu.dynamic_rotate %132 by %c119_i32_95 dim 1 : vector<16x128xf32>, i32 -> vector<16x128xf32>
    %c8_96 = arith.constant 8 : index
    %c0_97 = arith.constant 0 : index
    %162 = vector.load %arg30[%c8_96, %c0_97] : memref<9x128xf32, #tpu.memory_space<vmem>>, vector<1x128xf32>
    %163 = vector.broadcast %162 : vector<1x128xf32> to vector<16x128xf32>
    %164 = arith.mulf %161, %163 : vector<16x128xf32>
    %165 = tpu.concatenate %136, %140, %144, %148, %132, %152, %156, %160, %164 in 0 : vector<16x128xf32>, vector<16x128xf32>, vector<16x128xf32>, vector<16x128xf32>, vector<16x128xf32>, vector<16x128xf32>, vector<16x128xf32>, vector<16x128xf32>, vector<16x128xf32> -> vector<144x128xf32>
    %166 = arith.truncf %165 : vector<144x128xf32> to vector<144x128xbf16>
    %c0_98 = arith.constant 0 : index
    %c0_99 = arith.constant 0 : index
    %167 = vector.load %arg7[%c0_98, %c0_99] : memref<16x144xbf16, #tpu.memory_space<vmem>>, vector<16x144xbf16>
    %cst_100 = arith.constant dense<0.000000e+00> : vector<16x128xf32>
    %168 = tpu.matmul %167, %166, %cst_100 {dimension_numbers = #tpu.dot_dimension_numbers<[1], [0], [0], [1], [0, 0, 1, 1], [], []>} : vector<16x144xbf16>, vector<144x128xbf16>, vector<16x128xf32> -> vector<16x128xf32>
    %c0_101 = arith.constant 0 : index
    %c0_102 = arith.constant 0 : index
    %169 = vector.load %arg8[%c0_101, %c0_102] : memref<16x1xf32, #tpu.memory_space<vmem>>, vector<16x1xf32>
    %170 = vector.broadcast %169 : vector<16x1xf32> to vector<16x128xf32>
    %171 = arith.addf %168, %170 : vector<16x128xf32>
    %cst_103 = arith.constant 0.000000e+00 : f32
    %172 = vector.broadcast %cst_103 : f32 to vector<16x128xf32>
    %173 = arith.maximumf %171, %172 : vector<16x128xf32>
    %174 = arith.truncf %173 : vector<16x128xf32> to vector<16x128xbf16>
    %c0_104 = arith.constant 0 : index
    %c0_105 = arith.constant 0 : index
    %175 = vector.load %arg32[%c0_104, %c0_105] : memref<128x512xbf16, #tpu.memory_space<vmem>>, vector<128x512xbf16>
    %cst_106 = arith.constant dense<0.000000e+00> : vector<16x512xf32>
    %176 = tpu.matmul %174, %175, %cst_106 {dimension_numbers = #tpu.dot_dimension_numbers<[1], [0], [0], [1], [0, 0, 1, 1], [], []>} : vector<16x128xbf16>, vector<128x512xbf16>, vector<16x512xf32> -> vector<16x512xf32>
    %177 = tpu.concatenate %176, %82 in 0 : vector<16x512xf32>, vector<8x512xf32> -> vector<24x512xf32>
    %c17_i32_107 = arith.constant 17 : i32
    %178 = tpu.dynamic_rotate %177 by %c17_i32_107 dim 1 : vector<24x512xf32>, i32 -> vector<24x512xf32>
    %c0_108 = arith.constant 0 : index
    %c0_109 = arith.constant 0 : index
    %179 = vector.load %arg29[%c0_108, %c0_109] : memref<9x512xf32, #tpu.memory_space<vmem>>, vector<1x512xf32>
    %180 = vector.broadcast %179 : vector<1x512xf32> to vector<24x512xf32>
    %181 = arith.mulf %178, %180 : vector<24x512xf32>
    %c16_i32_110 = arith.constant 16 : i32
    %182 = tpu.dynamic_rotate %177 by %c16_i32_110 dim 1 : vector<24x512xf32>, i32 -> vector<24x512xf32>
    %c1_111 = arith.constant 1 : index
    %c0_112 = arith.constant 0 : index
    %183 = vector.load %arg29[%c1_111, %c0_112] : memref<9x512xf32, #tpu.memory_space<vmem>>, vector<1x512xf32>
    %184 = vector.broadcast %183 : vector<1x512xf32> to vector<24x512xf32>
    %185 = arith.mulf %182, %184 : vector<24x512xf32>
    %c15_i32_113 = arith.constant 15 : i32
    %186 = tpu.dynamic_rotate %177 by %c15_i32_113 dim 1 : vector<24x512xf32>, i32 -> vector<24x512xf32>
    %c2_114 = arith.constant 2 : index
    %c0_115 = arith.constant 0 : index
    %187 = vector.load %arg29[%c2_114, %c0_115] : memref<9x512xf32, #tpu.memory_space<vmem>>, vector<1x512xf32>
    %188 = vector.broadcast %187 : vector<1x512xf32> to vector<24x512xf32>
    %189 = arith.mulf %186, %188 : vector<24x512xf32>
    %c1_i32_116 = arith.constant 1 : i32
    %190 = tpu.dynamic_rotate %177 by %c1_i32_116 dim 1 : vector<24x512xf32>, i32 -> vector<24x512xf32>
    %c3_117 = arith.constant 3 : index
    %c0_118 = arith.constant 0 : index
    %191 = vector.load %arg29[%c3_117, %c0_118] : memref<9x512xf32, #tpu.memory_space<vmem>>, vector<1x512xf32>
    %192 = vector.broadcast %191 : vector<1x512xf32> to vector<24x512xf32>
    %193 = arith.mulf %190, %192 : vector<24x512xf32>
    %c511_i32_119 = arith.constant 511 : i32
    %194 = tpu.dynamic_rotate %177 by %c511_i32_119 dim 1 : vector<24x512xf32>, i32 -> vector<24x512xf32>
    %c5_120 = arith.constant 5 : index
    %c0_121 = arith.constant 0 : index
    %195 = vector.load %arg29[%c5_120, %c0_121] : memref<9x512xf32, #tpu.memory_space<vmem>>, vector<1x512xf32>
    %196 = vector.broadcast %195 : vector<1x512xf32> to vector<24x512xf32>
    %197 = arith.mulf %194, %196 : vector<24x512xf32>
    %c497_i32_122 = arith.constant 497 : i32
    %198 = tpu.dynamic_rotate %177 by %c497_i32_122 dim 1 : vector<24x512xf32>, i32 -> vector<24x512xf32>
    %c6_123 = arith.constant 6 : index
    %c0_124 = arith.constant 0 : index
    %199 = vector.load %arg29[%c6_123, %c0_124] : memref<9x512xf32, #tpu.memory_space<vmem>>, vector<1x512xf32>
    %200 = vector.broadcast %199 : vector<1x512xf32> to vector<24x512xf32>
    %201 = arith.mulf %198, %200 : vector<24x512xf32>
    %c496_i32_125 = arith.constant 496 : i32
    %202 = tpu.dynamic_rotate %177 by %c496_i32_125 dim 1 : vector<24x512xf32>, i32 -> vector<24x512xf32>
    %c7_126 = arith.constant 7 : index
    %c0_127 = arith.constant 0 : index
    %203 = vector.load %arg29[%c7_126, %c0_127] : memref<9x512xf32, #tpu.memory_space<vmem>>, vector<1x512xf32>
    %204 = vector.broadcast %203 : vector<1x512xf32> to vector<24x512xf32>
    %205 = arith.mulf %202, %204 : vector<24x512xf32>
    %c495_i32_128 = arith.constant 495 : i32
    %206 = tpu.dynamic_rotate %177 by %c495_i32_128 dim 1 : vector<24x512xf32>, i32 -> vector<24x512xf32>
    %c8_129 = arith.constant 8 : index
    %c0_130 = arith.constant 0 : index
    %207 = vector.load %arg29[%c8_129, %c0_130] : memref<9x512xf32, #tpu.memory_space<vmem>>, vector<1x512xf32>
    %208 = vector.broadcast %207 : vector<1x512xf32> to vector<24x512xf32>
    %209 = arith.mulf %206, %208 : vector<24x512xf32>
    %210 = tpu.concatenate %181, %185, %189, %193, %177, %197, %201, %205, %209 in 0 : vector<24x512xf32>, vector<24x512xf32>, vector<24x512xf32>, vector<24x512xf32>, vector<24x512xf32>, vector<24x512xf32>, vector<24x512xf32>, vector<24x512xf32>, vector<24x512xf32> -> vector<216x512xf32>
    %211 = arith.truncf %210 : vector<216x512xf32> to vector<216x512xbf16>
    %c0_131 = arith.constant 0 : index
    %c0_132 = arith.constant 0 : index
    %212 = vector.load %arg9[%c0_131, %c0_132] : memref<8x216xbf16, #tpu.memory_space<vmem>>, vector<8x216xbf16>
    %cst_133 = arith.constant dense<0.000000e+00> : vector<8x512xf32>
    %213 = tpu.matmul %212, %211, %cst_133 {dimension_numbers = #tpu.dot_dimension_numbers<[1], [0], [0], [1], [0, 0, 1, 1], [], []>} : vector<8x216xbf16>, vector<216x512xbf16>, vector<8x512xf32> -> vector<8x512xf32>
    %c0_134 = arith.constant 0 : index
    %c0_135 = arith.constant 0 : index
    %214 = vector.load %arg10[%c0_134, %c0_135] : memref<8x1xf32, #tpu.memory_space<vmem>>, vector<8x1xf32>
    %215 = vector.broadcast %214 : vector<8x1xf32> to vector<8x512xf32>
    %216 = arith.addf %213, %215 : vector<8x512xf32>
    %cst_136 = arith.constant 0.000000e+00 : f32
    %217 = vector.broadcast %cst_136 : f32 to vector<8x512xf32>
    %218 = arith.maximumf %216, %217 : vector<8x512xf32>
    %c17_i32_137 = arith.constant 17 : i32
    %219 = tpu.dynamic_rotate %218 by %c17_i32_137 dim 1 : vector<8x512xf32>, i32 -> vector<8x512xf32>
    %c0_138 = arith.constant 0 : index
    %c0_139 = arith.constant 0 : index
    %220 = vector.load %arg29[%c0_138, %c0_139] : memref<9x512xf32, #tpu.memory_space<vmem>>, vector<1x512xf32>
    %221 = vector.broadcast %220 : vector<1x512xf32> to vector<8x512xf32>
    %222 = arith.mulf %219, %221 : vector<8x512xf32>
    %c16_i32_140 = arith.constant 16 : i32
    %223 = tpu.dynamic_rotate %218 by %c16_i32_140 dim 1 : vector<8x512xf32>, i32 -> vector<8x512xf32>
    %c1_141 = arith.constant 1 : index
    %c0_142 = arith.constant 0 : index
    %224 = vector.load %arg29[%c1_141, %c0_142] : memref<9x512xf32, #tpu.memory_space<vmem>>, vector<1x512xf32>
    %225 = vector.broadcast %224 : vector<1x512xf32> to vector<8x512xf32>
    %226 = arith.mulf %223, %225 : vector<8x512xf32>
    %c15_i32_143 = arith.constant 15 : i32
    %227 = tpu.dynamic_rotate %218 by %c15_i32_143 dim 1 : vector<8x512xf32>, i32 -> vector<8x512xf32>
    %c2_144 = arith.constant 2 : index
    %c0_145 = arith.constant 0 : index
    %228 = vector.load %arg29[%c2_144, %c0_145] : memref<9x512xf32, #tpu.memory_space<vmem>>, vector<1x512xf32>
    %229 = vector.broadcast %228 : vector<1x512xf32> to vector<8x512xf32>
    %230 = arith.mulf %227, %229 : vector<8x512xf32>
    %c1_i32_146 = arith.constant 1 : i32
    %231 = tpu.dynamic_rotate %218 by %c1_i32_146 dim 1 : vector<8x512xf32>, i32 -> vector<8x512xf32>
    %c3_147 = arith.constant 3 : index
    %c0_148 = arith.constant 0 : index
    %232 = vector.load %arg29[%c3_147, %c0_148] : memref<9x512xf32, #tpu.memory_space<vmem>>, vector<1x512xf32>
    %233 = vector.broadcast %232 : vector<1x512xf32> to vector<8x512xf32>
    %234 = arith.mulf %231, %233 : vector<8x512xf32>
    %c511_i32_149 = arith.constant 511 : i32
    %235 = tpu.dynamic_rotate %218 by %c511_i32_149 dim 1 : vector<8x512xf32>, i32 -> vector<8x512xf32>
    %c5_150 = arith.constant 5 : index
    %c0_151 = arith.constant 0 : index
    %236 = vector.load %arg29[%c5_150, %c0_151] : memref<9x512xf32, #tpu.memory_space<vmem>>, vector<1x512xf32>
    %237 = vector.broadcast %236 : vector<1x512xf32> to vector<8x512xf32>
    %238 = arith.mulf %235, %237 : vector<8x512xf32>
    %c497_i32_152 = arith.constant 497 : i32
    %239 = tpu.dynamic_rotate %218 by %c497_i32_152 dim 1 : vector<8x512xf32>, i32 -> vector<8x512xf32>
    %c6_153 = arith.constant 6 : index
    %c0_154 = arith.constant 0 : index
    %240 = vector.load %arg29[%c6_153, %c0_154] : memref<9x512xf32, #tpu.memory_space<vmem>>, vector<1x512xf32>
    %241 = vector.broadcast %240 : vector<1x512xf32> to vector<8x512xf32>
    %242 = arith.mulf %239, %241 : vector<8x512xf32>
    %c496_i32_155 = arith.constant 496 : i32
    %243 = tpu.dynamic_rotate %218 by %c496_i32_155 dim 1 : vector<8x512xf32>, i32 -> vector<8x512xf32>
    %c7_156 = arith.constant 7 : index
    %c0_157 = arith.constant 0 : index
    %244 = vector.load %arg29[%c7_156, %c0_157] : memref<9x512xf32, #tpu.memory_space<vmem>>, vector<1x512xf32>
    %245 = vector.broadcast %244 : vector<1x512xf32> to vector<8x512xf32>
    %246 = arith.mulf %243, %245 : vector<8x512xf32>
    %c495_i32_158 = arith.constant 495 : i32
    %247 = tpu.dynamic_rotate %218 by %c495_i32_158 dim 1 : vector<8x512xf32>, i32 -> vector<8x512xf32>
    %c8_159 = arith.constant 8 : index
    %c0_160 = arith.constant 0 : index
    %248 = vector.load %arg29[%c8_159, %c0_160] : memref<9x512xf32, #tpu.memory_space<vmem>>, vector<1x512xf32>
    %249 = vector.broadcast %248 : vector<1x512xf32> to vector<8x512xf32>
    %250 = arith.mulf %247, %249 : vector<8x512xf32>
    %251 = tpu.concatenate %222, %226, %230, %234, %218, %238, %242, %246, %250 in 0 : vector<8x512xf32>, vector<8x512xf32>, vector<8x512xf32>, vector<8x512xf32>, vector<8x512xf32>, vector<8x512xf32>, vector<8x512xf32>, vector<8x512xf32>, vector<8x512xf32> -> vector<72x512xf32>
    %252 = arith.truncf %251 : vector<72x512xf32> to vector<72x512xbf16>
    %c0_161 = arith.constant 0 : index
    %c0_162 = arith.constant 0 : index
    %253 = vector.load %arg11[%c0_161, %c0_162] : memref<8x72xbf16, #tpu.memory_space<vmem>>, vector<8x72xbf16>
    %cst_163 = arith.constant dense<0.000000e+00> : vector<8x512xf32>
    %254 = tpu.matmul %253, %252, %cst_163 {dimension_numbers = #tpu.dot_dimension_numbers<[1], [0], [0], [1], [0, 0, 1, 1], [], []>} : vector<8x72xbf16>, vector<72x512xbf16>, vector<8x512xf32> -> vector<8x512xf32>
    %c0_164 = arith.constant 0 : index
    %c0_165 = arith.constant 0 : index
    %255 = vector.load %arg12[%c0_164, %c0_165] : memref<8x1xf32, #tpu.memory_space<vmem>>, vector<8x1xf32>
    %256 = vector.broadcast %255 : vector<8x1xf32> to vector<8x512xf32>
    %257 = arith.addf %254, %256 : vector<8x512xf32>
    %cst_166 = arith.constant 0.000000e+00 : f32
    %258 = vector.broadcast %cst_166 : f32 to vector<8x512xf32>
    %259 = arith.maximumf %257, %258 : vector<8x512xf32>
    %c0_167 = arith.constant 0 : index
    %c0_168 = arith.constant 0 : index
    %260 = vector.load %arg13[%c0_167, %c0_168] : memref<8x8xbf16, #tpu.memory_space<vmem>>, vector<8x8xbf16>
    %261 = arith.truncf %259 : vector<8x512xf32> to vector<8x512xbf16>
    %cst_169 = arith.constant dense<0.000000e+00> : vector<8x512xf32>
    %262 = tpu.matmul %260, %261, %cst_169 {dimension_numbers = #tpu.dot_dimension_numbers<[1], [0], [0], [1], [0, 0, 1, 1], [], []>} : vector<8x8xbf16>, vector<8x512xbf16>, vector<8x512xf32> -> vector<8x512xf32>
    %c0_170 = arith.constant 0 : index
    %c0_171 = arith.constant 0 : index
    %263 = vector.load %arg14[%c0_170, %c0_171] : memref<8x1xf32, #tpu.memory_space<vmem>>, vector<8x1xf32>
    %264 = vector.broadcast %263 : vector<8x1xf32> to vector<8x512xf32>
    %265 = arith.addf %262, %264 : vector<8x512xf32>
    %266 = vector.extract_strided_slice %265 {offsets = [0, 0], sizes = [3, 512], strides = [1, 1]} : vector<8x512xf32> to vector<3x512xf32>
    %c0_172 = arith.constant 0 : index
    %c0_173 = arith.constant 0 : index
    %267 = vector.load %arg33[%c0_172, %c0_173] : memref<3x512xf32, #tpu.memory_space<vmem>>, vector<3x512xf32>
    tpu.vector_store %arg33[%c0_172, %c0_173], %266 {strides = array<i32>} : memref<3x512xf32, #tpu.memory_space<vmem>>, vector<3x512xf32>,
    %268 = vector.extract_strided_slice %265 {offsets = [2, 0], sizes = [1, 512], strides = [1, 1]} : vector<8x512xf32> to vector<1x512xf32>
    %cst_174 = arith.constant 0.000000e+00 : f32
    %269 = vector.broadcast %cst_174 : f32 to vector<8x512xf32>
    %270 = arith.subf %269, %265 : vector<8x512xf32>
    %271 = math.exp %270 : vector<8x512xf32>
    %cst_175 = arith.constant 1.000000e+00 : f32
    %272 = vector.broadcast %cst_175 : f32 to vector<8x512xf32>
    %273 = arith.addf %272, %271 : vector<8x512xf32>
    %cst_176 = arith.constant 1.000000e+00 : f32
    %274 = vector.broadcast %cst_176 : f32 to vector<8x512xf32>
    %275 = arith.divf %274, %273 : vector<8x512xf32>
    %276 = vector.extract_strided_slice %275 {offsets = [2, 0], sizes = [1, 512], strides = [1, 1]} : vector<8x512xf32> to vector<1x512xf32>
    %c17_i32_177 = arith.constant 17 : i32
    %277 = tpu.dynamic_rotate %275 by %c17_i32_177 dim 1 : vector<8x512xf32>, i32 -> vector<8x512xf32>
    %c0_178 = arith.constant 0 : index
    %c0_179 = arith.constant 0 : index
    %278 = vector.load %arg29[%c0_178, %c0_179] : memref<9x512xf32, #tpu.memory_space<vmem>>, vector<1x512xf32>
    %279 = vector.broadcast %278 : vector<1x512xf32> to vector<8x512xf32>
    %280 = arith.mulf %277, %279 : vector<8x512xf32>
    %c16_i32_180 = arith.constant 16 : i32
    %281 = tpu.dynamic_rotate %275 by %c16_i32_180 dim 1 : vector<8x512xf32>, i32 -> vector<8x512xf32>
    %c1_181 = arith.constant 1 : index
    %c0_182 = arith.constant 0 : index
    %282 = vector.load %arg29[%c1_181, %c0_182] : memref<9x512xf32, #tpu.memory_space<vmem>>, vector<1x512xf32>
    %283 = vector.broadcast %282 : vector<1x512xf32> to vector<8x512xf32>
    %284 = arith.mulf %281, %283 : vector<8x512xf32>
    %c15_i32_183 = arith.constant 15 : i32
    %285 = tpu.dynamic_rotate %275 by %c15_i32_183 dim 1 : vector<8x512xf32>, i32 -> vector<8x512xf32>
    %c2_184 = arith.constant 2 : index
    %c0_185 = arith.constant 0 : index
    %286 = vector.load %arg29[%c2_184, %c0_185] : memref<9x512xf32, #tpu.memory_space<vmem>>, vector<1x512xf32>
    %287 = vector.broadcast %286 : vector<1x512xf32> to vector<8x512xf32>
    %288 = arith.mulf %285, %287 : vector<8x512xf32>
    %c1_i32_186 = arith.constant 1 : i32
    %289 = tpu.dynamic_rotate %275 by %c1_i32_186 dim 1 : vector<8x512xf32>, i32 -> vector<8x512xf32>
    %c3_187 = arith.constant 3 : index
    %c0_188 = arith.constant 0 : index
    %290 = vector.load %arg29[%c3_187, %c0_188] : memref<9x512xf32, #tpu.memory_space<vmem>>, vector<1x512xf32>
    %291 = vector.broadcast %290 : vector<1x512xf32> to vector<8x512xf32>
    %292 = arith.mulf %289, %291 : vector<8x512xf32>
    %c511_i32_189 = arith.constant 511 : i32
    %293 = tpu.dynamic_rotate %275 by %c511_i32_189 dim 1 : vector<8x512xf32>, i32 -> vector<8x512xf32>
    %c5_190 = arith.constant 5 : index
    %c0_191 = arith.constant 0 : index
    %294 = vector.load %arg29[%c5_190, %c0_191] : memref<9x512xf32, #tpu.memory_space<vmem>>, vector<1x512xf32>
    %295 = vector.broadcast %294 : vector<1x512xf32> to vector<8x512xf32>
    %296 = arith.mulf %293, %295 : vector<8x512xf32>
    %c497_i32_192 = arith.constant 497 : i32
    %297 = tpu.dynamic_rotate %275 by %c497_i32_192 dim 1 : vector<8x512xf32>, i32 -> vector<8x512xf32>
    %c6_193 = arith.constant 6 : index
    %c0_194 = arith.constant 0 : index
    %298 = vector.load %arg29[%c6_193, %c0_194] : memref<9x512xf32, #tpu.memory_space<vmem>>, vector<1x512xf32>
    %299 = vector.broadcast %298 : vector<1x512xf32> to vector<8x512xf32>
    %300 = arith.mulf %297, %299 : vector<8x512xf32>
    %c496_i32_195 = arith.constant 496 : i32
    %301 = tpu.dynamic_rotate %275 by %c496_i32_195 dim 1 : vector<8x512xf32>, i32 -> vector<8x512xf32>
    %c7_196 = arith.constant 7 : index
    %c0_197 = arith.constant 0 : index
    %302 = vector.load %arg29[%c7_196, %c0_197] : memref<9x512xf32, #tpu.memory_space<vmem>>, vector<1x512xf32>
    %303 = vector.broadcast %302 : vector<1x512xf32> to vector<8x512xf32>
    %304 = arith.mulf %301, %303 : vector<8x512xf32>
    %c495_i32_198 = arith.constant 495 : i32
    %305 = tpu.dynamic_rotate %275 by %c495_i32_198 dim 1 : vector<8x512xf32>, i32 -> vector<8x512xf32>
    %c8_199 = arith.constant 8 : index
    %c0_200 = arith.constant 0 : index
    %306 = vector.load %arg29[%c8_199, %c0_200] : memref<9x512xf32, #tpu.memory_space<vmem>>, vector<1x512xf32>
    %307 = vector.broadcast %306 : vector<1x512xf32> to vector<8x512xf32>
    %308 = arith.mulf %305, %307 : vector<8x512xf32>
    %309 = tpu.concatenate %280, %284, %288, %292, %275, %296, %300, %304, %308 in 0 : vector<8x512xf32>, vector<8x512xf32>, vector<8x512xf32>, vector<8x512xf32>, vector<8x512xf32>, vector<8x512xf32>, vector<8x512xf32>, vector<8x512xf32>, vector<8x512xf32> -> vector<72x512xf32>
    %310 = arith.truncf %309 : vector<72x512xf32> to vector<72x512xbf16>
    %c0_201 = arith.constant 0 : index
    %c0_202 = arith.constant 0 : index
    %311 = vector.load %arg15[%c0_201, %c0_202] : memref<8x72xbf16, #tpu.memory_space<vmem>>, vector<8x72xbf16>
    %cst_203 = arith.constant dense<0.000000e+00> : vector<8x512xf32>
    %312 = tpu.matmul %311, %310, %cst_203 {dimension_numbers = #tpu.dot_dimension_numbers<[1], [0], [0], [1], [0, 0, 1, 1], [], []>} : vector<8x72xbf16>, vector<72x512xbf16>, vector<8x512xf32> -> vector<8x512xf32>
    %c0_204 = arith.constant 0 : index
    %c0_205 = arith.constant 0 : index
    %313 = vector.load %arg16[%c0_204, %c0_205] : memref<8x1xf32, #tpu.memory_space<vmem>>, vector<8x1xf32>
    %314 = vector.broadcast %313 : vector<8x1xf32> to vector<8x512xf32>
    %315 = arith.addf %312, %314 : vector<8x512xf32>
    %cst_206 = arith.constant 0.000000e+00 : f32
    %316 = vector.broadcast %cst_206 : f32 to vector<8x512xf32>
    %317 = arith.maximumf %315, %316 : vector<8x512xf32>
    %c17_i32_207 = arith.constant 17 : i32
    %318 = tpu.dynamic_rotate %317 by %c17_i32_207 dim 1 : vector<8x512xf32>, i32 -> vector<8x512xf32>
    %c0_208 = arith.constant 0 : index
    %c0_209 = arith.constant 0 : index
    %319 = vector.load %arg29[%c0_208, %c0_209] : memref<9x512xf32, #tpu.memory_space<vmem>>, vector<1x512xf32>
    %320 = vector.broadcast %319 : vector<1x512xf32> to vector<8x512xf32>
    %321 = arith.mulf %318, %320 : vector<8x512xf32>
    %c16_i32_210 = arith.constant 16 : i32
    %322 = tpu.dynamic_rotate %317 by %c16_i32_210 dim 1 : vector<8x512xf32>, i32 -> vector<8x512xf32>
    %c1_211 = arith.constant 1 : index
    %c0_212 = arith.constant 0 : index
    %323 = vector.load %arg29[%c1_211, %c0_212] : memref<9x512xf32, #tpu.memory_space<vmem>>, vector<1x512xf32>
    %324 = vector.broadcast %323 : vector<1x512xf32> to vector<8x512xf32>
    %325 = arith.mulf %322, %324 : vector<8x512xf32>
    %c15_i32_213 = arith.constant 15 : i32
    %326 = tpu.dynamic_rotate %317 by %c15_i32_213 dim 1 : vector<8x512xf32>, i32 -> vector<8x512xf32>
    %c2_214 = arith.constant 2 : index
    %c0_215 = arith.constant 0 : index
    %327 = vector.load %arg29[%c2_214, %c0_215] : memref<9x512xf32, #tpu.memory_space<vmem>>, vector<1x512xf32>
    %328 = vector.broadcast %327 : vector<1x512xf32> to vector<8x512xf32>
    %329 = arith.mulf %326, %328 : vector<8x512xf32>
    %c1_i32_216 = arith.constant 1 : i32
    %330 = tpu.dynamic_rotate %317 by %c1_i32_216 dim 1 : vector<8x512xf32>, i32 -> vector<8x512xf32>
    %c3_217 = arith.constant 3 : index
    %c0_218 = arith.constant 0 : index
    %331 = vector.load %arg29[%c3_217, %c0_218] : memref<9x512xf32, #tpu.memory_space<vmem>>, vector<1x512xf32>
    %332 = vector.broadcast %331 : vector<1x512xf32> to vector<8x512xf32>
    %333 = arith.mulf %330, %332 : vector<8x512xf32>
    %c511_i32_219 = arith.constant 511 : i32
    %334 = tpu.dynamic_rotate %317 by %c511_i32_219 dim 1 : vector<8x512xf32>, i32 -> vector<8x512xf32>
    %c5_220 = arith.constant 5 : index
    %c0_221 = arith.constant 0 : index
    %335 = vector.load %arg29[%c5_220, %c0_221] : memref<9x512xf32, #tpu.memory_space<vmem>>, vector<1x512xf32>
    %336 = vector.broadcast %335 : vector<1x512xf32> to vector<8x512xf32>
    %337 = arith.mulf %334, %336 : vector<8x512xf32>
    %c497_i32_222 = arith.constant 497 : i32
    %338 = tpu.dynamic_rotate %317 by %c497_i32_222 dim 1 : vector<8x512xf32>, i32 -> vector<8x512xf32>
    %c6_223 = arith.constant 6 : index
    %c0_224 = arith.constant 0 : index
    %339 = vector.load %arg29[%c6_223, %c0_224] : memref<9x512xf32, #tpu.memory_space<vmem>>, vector<1x512xf32>
    %340 = vector.broadcast %339 : vector<1x512xf32> to vector<8x512xf32>
    %341 = arith.mulf %338, %340 : vector<8x512xf32>
    %c496_i32_225 = arith.constant 496 : i32
    %342 = tpu.dynamic_rotate %317 by %c496_i32_225 dim 1 : vector<8x512xf32>, i32 -> vector<8x512xf32>
    %c7_226 = arith.constant 7 : index
    %c0_227 = arith.constant 0 : index
    %343 = vector.load %arg29[%c7_226, %c0_227] : memref<9x512xf32, #tpu.memory_space<vmem>>, vector<1x512xf32>
    %344 = vector.broadcast %343 : vector<1x512xf32> to vector<8x512xf32>
    %345 = arith.mulf %342, %344 : vector<8x512xf32>
    %c495_i32_228 = arith.constant 495 : i32
    %346 = tpu.dynamic_rotate %317 by %c495_i32_228 dim 1 : vector<8x512xf32>, i32 -> vector<8x512xf32>
    %c8_229 = arith.constant 8 : index
    %c0_230 = arith.constant 0 : index
    %347 = vector.load %arg29[%c8_229, %c0_230] : memref<9x512xf32, #tpu.memory_space<vmem>>, vector<1x512xf32>
    %348 = vector.broadcast %347 : vector<1x512xf32> to vector<8x512xf32>
    %349 = arith.mulf %346, %348 : vector<8x512xf32>
    %350 = tpu.concatenate %321, %325, %329, %333, %317, %337, %341, %345, %349 in 0 : vector<8x512xf32>, vector<8x512xf32>, vector<8x512xf32>, vector<8x512xf32>, vector<8x512xf32>, vector<8x512xf32>, vector<8x512xf32>, vector<8x512xf32>, vector<8x512xf32> -> vector<72x512xf32>
    %351 = arith.truncf %350 : vector<72x512xf32> to vector<72x512xbf16>
    %c0_231 = arith.constant 0 : index
    %c0_232 = arith.constant 0 : index
    %352 = vector.load %arg17[%c0_231, %c0_232] : memref<8x72xbf16, #tpu.memory_space<vmem>>, vector<8x72xbf16>
    %cst_233 = arith.constant dense<0.000000e+00> : vector<8x512xf32>
    %353 = tpu.matmul %352, %351, %cst_233 {dimension_numbers = #tpu.dot_dimension_numbers<[1], [0], [0], [1], [0, 0, 1, 1], [], []>} : vector<8x72xbf16>, vector<72x512xbf16>, vector<8x512xf32> -> vector<8x512xf32>
    %c0_234 = arith.constant 0 : index
    %c0_235 = arith.constant 0 : index
    %354 = vector.load %arg18[%c0_234, %c0_235] : memref<8x1xf32, #tpu.memory_space<vmem>>, vector<8x1xf32>
    %355 = vector.broadcast %354 : vector<8x1xf32> to vector<8x512xf32>
    %356 = arith.addf %353, %355 : vector<8x512xf32>
    %cst_236 = arith.constant 0.000000e+00 : f32
    %357 = vector.broadcast %cst_236 : f32 to vector<8x512xf32>
    %358 = arith.maximumf %356, %357 : vector<8x512xf32>
    %c511_i32_237 = arith.constant 511 : i32
    %359 = tpu.dynamic_rotate %358 by %c511_i32_237 dim 1 : vector<8x512xf32>, i32 -> vector<8x512xf32>
    %360 = arith.maximumf %358, %359 : vector<8x512xf32>
    %c496_i32_238 = arith.constant 496 : i32
    %361 = tpu.dynamic_rotate %358 by %c496_i32_238 dim 1 : vector<8x512xf32>, i32 -> vector<8x512xf32>
    %362 = arith.maximumf %360, %361 : vector<8x512xf32>
    %c495_i32_239 = arith.constant 495 : i32
    %363 = tpu.dynamic_rotate %358 by %c495_i32_239 dim 1 : vector<8x512xf32>, i32 -> vector<8x512xf32>
    %364 = arith.maximumf %362, %363 : vector<8x512xf32>
    %365 = arith.truncf %364 : vector<8x512xf32> to vector<8x512xbf16>
    %c0_240 = arith.constant 0 : index
    %c0_241 = arith.constant 0 : index
    %366 = vector.load %arg31[%c0_240, %c0_241] : memref<512x128xbf16, #tpu.memory_space<vmem>>, vector<512x128xbf16>
    %cst_242 = arith.constant dense<0.000000e+00> : vector<8x128xf32>
    %367 = tpu.matmul %365, %366, %cst_242 {dimension_numbers = #tpu.dot_dimension_numbers<[1], [0], [0], [1], [0, 0, 1, 1], [], []>} : vector<8x512xbf16>, vector<512x128xbf16>, vector<8x128xf32> -> vector<8x128xf32>
    %c9_i32_243 = arith.constant 9 : i32
    %368 = tpu.dynamic_rotate %367 by %c9_i32_243 dim 1 : vector<8x128xf32>, i32 -> vector<8x128xf32>
    %c0_244 = arith.constant 0 : index
    %c0_245 = arith.constant 0 : index
    %369 = vector.load %arg30[%c0_244, %c0_245] : memref<9x128xf32, #tpu.memory_space<vmem>>, vector<1x128xf32>
    %370 = vector.broadcast %369 : vector<1x128xf32> to vector<8x128xf32>
    %371 = arith.mulf %368, %370 : vector<8x128xf32>
    %c8_i32_246 = arith.constant 8 : i32
    %372 = tpu.dynamic_rotate %367 by %c8_i32_246 dim 1 : vector<8x128xf32>, i32 -> vector<8x128xf32>
    %c1_247 = arith.constant 1 : index
    %c0_248 = arith.constant 0 : index
    %373 = vector.load %arg30[%c1_247, %c0_248] : memref<9x128xf32, #tpu.memory_space<vmem>>, vector<1x128xf32>
    %374 = vector.broadcast %373 : vector<1x128xf32> to vector<8x128xf32>
    %375 = arith.mulf %372, %374 : vector<8x128xf32>
    %c7_i32_249 = arith.constant 7 : i32
    %376 = tpu.dynamic_rotate %367 by %c7_i32_249 dim 1 : vector<8x128xf32>, i32 -> vector<8x128xf32>
    %c2_250 = arith.constant 2 : index
    %c0_251 = arith.constant 0 : index
    %377 = vector.load %arg30[%c2_250, %c0_251] : memref<9x128xf32, #tpu.memory_space<vmem>>, vector<1x128xf32>
    %378 = vector.broadcast %377 : vector<1x128xf32> to vector<8x128xf32>
    %379 = arith.mulf %376, %378 : vector<8x128xf32>
    %c1_i32_252 = arith.constant 1 : i32
    %380 = tpu.dynamic_rotate %367 by %c1_i32_252 dim 1 : vector<8x128xf32>, i32 -> vector<8x128xf32>
    %c3_253 = arith.constant 3 : index
    %c0_254 = arith.constant 0 : index
    %381 = vector.load %arg30[%c3_253, %c0_254] : memref<9x128xf32, #tpu.memory_space<vmem>>, vector<1x128xf32>
    %382 = vector.broadcast %381 : vector<1x128xf32> to vector<8x128xf32>
    %383 = arith.mulf %380, %382 : vector<8x128xf32>
    %c127_i32_255 = arith.constant 127 : i32
    %384 = tpu.dynamic_rotate %367 by %c127_i32_255 dim 1 : vector<8x128xf32>, i32 -> vector<8x128xf32>
    %c5_256 = arith.constant 5 : index
    %c0_257 = arith.constant 0 : index
    %385 = vector.load %arg30[%c5_256, %c0_257] : memref<9x128xf32, #tpu.memory_space<vmem>>, vector<1x128xf32>
    %386 = vector.broadcast %385 : vector<1x128xf32> to vector<8x128xf32>
    %387 = arith.mulf %384, %386 : vector<8x128xf32>
    %c121_i32_258 = arith.constant 121 : i32
    %388 = tpu.dynamic_rotate %367 by %c121_i32_258 dim 1 : vector<8x128xf32>, i32 -> vector<8x128xf32>
    %c6_259 = arith.constant 6 : index
    %c0_260 = arith.constant 0 : index
    %389 = vector.load %arg30[%c6_259, %c0_260] : memref<9x128xf32, #tpu.memory_space<vmem>>, vector<1x128xf32>
    %390 = vector.broadcast %389 : vector<1x128xf32> to vector<8x128xf32>
    %391 = arith.mulf %388, %390 : vector<8x128xf32>
    %c120_i32_261 = arith.constant 120 : i32
    %392 = tpu.dynamic_rotate %367 by %c120_i32_261 dim 1 : vector<8x128xf32>, i32 -> vector<8x128xf32>
    %c7_262 = arith.constant 7 : index
    %c0_263 = arith.constant 0 : index
    %393 = vector.load %arg30[%c7_262, %c0_263] : memref<9x128xf32, #tpu.memory_space<vmem>>, vector<1x128xf32>
    %394 = vector.broadcast %393 : vector<1x128xf32> to vector<8x128xf32>
    %395 = arith.mulf %392, %394 : vector<8x128xf32>
    %c119_i32_264 = arith.constant 119 : i32
    %396 = tpu.dynamic_rotate %367 by %c119_i32_264 dim 1 : vector<8x128xf32>, i32 -> vector<8x128xf32>
    %c8_265 = arith.constant 8 : index
    %c0_266 = arith.constant 0 : index
    %397 = vector.load %arg30[%c8_265, %c0_266] : memref<9x128xf32, #tpu.memory_space<vmem>>, vector<1x128xf32>
    %398 = vector.broadcast %397 : vector<1x128xf32> to vector<8x128xf32>
    %399 = arith.mulf %396, %398 : vector<8x128xf32>
    %400 = tpu.concatenate %371, %375, %379, %383, %367, %387, %391, %395, %399 in 0 : vector<8x128xf32>, vector<8x128xf32>, vector<8x128xf32>, vector<8x128xf32>, vector<8x128xf32>, vector<8x128xf32>, vector<8x128xf32>, vector<8x128xf32>, vector<8x128xf32> -> vector<72x128xf32>
    %401 = arith.truncf %400 : vector<72x128xf32> to vector<72x128xbf16>
    %c0_267 = arith.constant 0 : index
    %c0_268 = arith.constant 0 : index
    %402 = vector.load %arg19[%c0_267, %c0_268] : memref<16x72xbf16, #tpu.memory_space<vmem>>, vector<16x72xbf16>
    %cst_269 = arith.constant dense<0.000000e+00> : vector<16x128xf32>
    %403 = tpu.matmul %402, %401, %cst_269 {dimension_numbers = #tpu.dot_dimension_numbers<[1], [0], [0], [1], [0, 0, 1, 1], [], []>} : vector<16x72xbf16>, vector<72x128xbf16>, vector<16x128xf32> -> vector<16x128xf32>
    %c0_270 = arith.constant 0 : index
    %c0_271 = arith.constant 0 : index
    %404 = vector.load %arg20[%c0_270, %c0_271] : memref<16x1xf32, #tpu.memory_space<vmem>>, vector<16x1xf32>
    %405 = vector.broadcast %404 : vector<16x1xf32> to vector<16x128xf32>
    %406 = arith.addf %403, %405 : vector<16x128xf32>
    %cst_272 = arith.constant 0.000000e+00 : f32
    %407 = vector.broadcast %cst_272 : f32 to vector<16x128xf32>
    %408 = arith.maximumf %406, %407 : vector<16x128xf32>
    %c9_i32_273 = arith.constant 9 : i32
    %409 = tpu.dynamic_rotate %408 by %c9_i32_273 dim 1 : vector<16x128xf32>, i32 -> vector<16x128xf32>
    %c0_274 = arith.constant 0 : index
    %c0_275 = arith.constant 0 : index
    %410 = vector.load %arg30[%c0_274, %c0_275] : memref<9x128xf32, #tpu.memory_space<vmem>>, vector<1x128xf32>
    %411 = vector.broadcast %410 : vector<1x128xf32> to vector<16x128xf32>
    %412 = arith.mulf %409, %411 : vector<16x128xf32>
    %c8_i32_276 = arith.constant 8 : i32
    %413 = tpu.dynamic_rotate %408 by %c8_i32_276 dim 1 : vector<16x128xf32>, i32 -> vector<16x128xf32>
    %c1_277 = arith.constant 1 : index
    %c0_278 = arith.constant 0 : index
    %414 = vector.load %arg30[%c1_277, %c0_278] : memref<9x128xf32, #tpu.memory_space<vmem>>, vector<1x128xf32>
    %415 = vector.broadcast %414 : vector<1x128xf32> to vector<16x128xf32>
    %416 = arith.mulf %413, %415 : vector<16x128xf32>
    %c7_i32_279 = arith.constant 7 : i32
    %417 = tpu.dynamic_rotate %408 by %c7_i32_279 dim 1 : vector<16x128xf32>, i32 -> vector<16x128xf32>
    %c2_280 = arith.constant 2 : index
    %c0_281 = arith.constant 0 : index
    %418 = vector.load %arg30[%c2_280, %c0_281] : memref<9x128xf32, #tpu.memory_space<vmem>>, vector<1x128xf32>
    %419 = vector.broadcast %418 : vector<1x128xf32> to vector<16x128xf32>
    %420 = arith.mulf %417, %419 : vector<16x128xf32>
    %c1_i32_282 = arith.constant 1 : i32
    %421 = tpu.dynamic_rotate %408 by %c1_i32_282 dim 1 : vector<16x128xf32>, i32 -> vector<16x128xf32>
    %c3_283 = arith.constant 3 : index
    %c0_284 = arith.constant 0 : index
    %422 = vector.load %arg30[%c3_283, %c0_284] : memref<9x128xf32, #tpu.memory_space<vmem>>, vector<1x128xf32>
    %423 = vector.broadcast %422 : vector<1x128xf32> to vector<16x128xf32>
    %424 = arith.mulf %421, %423 : vector<16x128xf32>
    %c127_i32_285 = arith.constant 127 : i32
    %425 = tpu.dynamic_rotate %408 by %c127_i32_285 dim 1 : vector<16x128xf32>, i32 -> vector<16x128xf32>
    %c5_286 = arith.constant 5 : index
    %c0_287 = arith.constant 0 : index
    %426 = vector.load %arg30[%c5_286, %c0_287] : memref<9x128xf32, #tpu.memory_space<vmem>>, vector<1x128xf32>
    %427 = vector.broadcast %426 : vector<1x128xf32> to vector<16x128xf32>
    %428 = arith.mulf %425, %427 : vector<16x128xf32>
    %c121_i32_288 = arith.constant 121 : i32
    %429 = tpu.dynamic_rotate %408 by %c121_i32_288 dim 1 : vector<16x128xf32>, i32 -> vector<16x128xf32>
    %c6_289 = arith.constant 6 : index
    %c0_290 = arith.constant 0 : index
    %430 = vector.load %arg30[%c6_289, %c0_290] : memref<9x128xf32, #tpu.memory_space<vmem>>, vector<1x128xf32>
    %431 = vector.broadcast %430 : vector<1x128xf32> to vector<16x128xf32>
    %432 = arith.mulf %429, %431 : vector<16x128xf32>
    %c120_i32_291 = arith.constant 120 : i32
    %433 = tpu.dynamic_rotate %408 by %c120_i32_291 dim 1 : vector<16x128xf32>, i32 -> vector<16x128xf32>
    %c7_292 = arith.constant 7 : index
    %c0_293 = arith.constant 0 : index
    %434 = vector.load %arg30[%c7_292, %c0_293] : memref<9x128xf32, #tpu.memory_space<vmem>>, vector<1x128xf32>
    %435 = vector.broadcast %434 : vector<1x128xf32> to vector<16x128xf32>
    %436 = arith.mulf %433, %435 : vector<16x128xf32>
    %c119_i32_294 = arith.constant 119 : i32
    %437 = tpu.dynamic_rotate %408 by %c119_i32_294 dim 1 : vector<16x128xf32>, i32 -> vector<16x128xf32>
    %c8_295 = arith.constant 8 : index
    %c0_296 = arith.constant 0 : index
    %438 = vector.load %arg30[%c8_295, %c0_296] : memref<9x128xf32, #tpu.memory_space<vmem>>, vector<1x128xf32>
    %439 = vector.broadcast %438 : vector<1x128xf32> to vector<16x128xf32>
    %440 = arith.mulf %437, %439 : vector<16x128xf32>
    %441 = tpu.concatenate %412, %416, %420, %424, %408, %428, %432, %436, %440 in 0 : vector<16x128xf32>, vector<16x128xf32>, vector<16x128xf32>, vector<16x128xf32>, vector<16x128xf32>, vector<16x128xf32>, vector<16x128xf32>, vector<16x128xf32>, vector<16x128xf32> -> vector<144x128xf32>
    %442 = arith.truncf %441 : vector<144x128xf32> to vector<144x128xbf16>
    %c0_297 = arith.constant 0 : index
    %c0_298 = arith.constant 0 : index
    %443 = vector.load %arg21[%c0_297, %c0_298] : memref<16x144xbf16, #tpu.memory_space<vmem>>, vector<16x144xbf16>
    %cst_299 = arith.constant dense<0.000000e+00> : vector<16x128xf32>
    %444 = tpu.matmul %443, %442, %cst_299 {dimension_numbers = #tpu.dot_dimension_numbers<[1], [0], [0], [1], [0, 0, 1, 1], [], []>} : vector<16x144xbf16>, vector<144x128xbf16>, vector<16x128xf32> -> vector<16x128xf32>
    %c0_300 = arith.constant 0 : index
    %c0_301 = arith.constant 0 : index
    %445 = vector.load %arg22[%c0_300, %c0_301] : memref<16x1xf32, #tpu.memory_space<vmem>>, vector<16x1xf32>
    %446 = vector.broadcast %445 : vector<16x1xf32> to vector<16x128xf32>
    %447 = arith.addf %444, %446 : vector<16x128xf32>
    %cst_302 = arith.constant 0.000000e+00 : f32
    %448 = vector.broadcast %cst_302 : f32 to vector<16x128xf32>
    %449 = arith.maximumf %447, %448 : vector<16x128xf32>
    %450 = arith.truncf %449 : vector<16x128xf32> to vector<16x128xbf16>
    %c0_303 = arith.constant 0 : index
    %c0_304 = arith.constant 0 : index
    %451 = vector.load %arg32[%c0_303, %c0_304] : memref<128x512xbf16, #tpu.memory_space<vmem>>, vector<128x512xbf16>
    %cst_305 = arith.constant dense<0.000000e+00> : vector<16x512xf32>
    %452 = tpu.matmul %450, %451, %cst_305 {dimension_numbers = #tpu.dot_dimension_numbers<[1], [0], [0], [1], [0, 0, 1, 1], [], []>} : vector<16x128xbf16>, vector<128x512xbf16>, vector<16x512xf32> -> vector<16x512xf32>
    %453 = tpu.concatenate %452, %358 in 0 : vector<16x512xf32>, vector<8x512xf32> -> vector<24x512xf32>
    %c17_i32_306 = arith.constant 17 : i32
    %454 = tpu.dynamic_rotate %453 by %c17_i32_306 dim 1 : vector<24x512xf32>, i32 -> vector<24x512xf32>
    %c0_307 = arith.constant 0 : index
    %c0_308 = arith.constant 0 : index
    %455 = vector.load %arg29[%c0_307, %c0_308] : memref<9x512xf32, #tpu.memory_space<vmem>>, vector<1x512xf32>
    %456 = vector.broadcast %455 : vector<1x512xf32> to vector<24x512xf32>
    %457 = arith.mulf %454, %456 : vector<24x512xf32>
    %c16_i32_309 = arith.constant 16 : i32
    %458 = tpu.dynamic_rotate %453 by %c16_i32_309 dim 1 : vector<24x512xf32>, i32 -> vector<24x512xf32>
    %c1_310 = arith.constant 1 : index
    %c0_311 = arith.constant 0 : index
    %459 = vector.load %arg29[%c1_310, %c0_311] : memref<9x512xf32, #tpu.memory_space<vmem>>, vector<1x512xf32>
    %460 = vector.broadcast %459 : vector<1x512xf32> to vector<24x512xf32>
    %461 = arith.mulf %458, %460 : vector<24x512xf32>
    %c15_i32_312 = arith.constant 15 : i32
    %462 = tpu.dynamic_rotate %453 by %c15_i32_312 dim 1 : vector<24x512xf32>, i32 -> vector<24x512xf32>
    %c2_313 = arith.constant 2 : index
    %c0_314 = arith.constant 0 : index
    %463 = vector.load %arg29[%c2_313, %c0_314] : memref<9x512xf32, #tpu.memory_space<vmem>>, vector<1x512xf32>
    %464 = vector.broadcast %463 : vector<1x512xf32> to vector<24x512xf32>
    %465 = arith.mulf %462, %464 : vector<24x512xf32>
    %c1_i32_315 = arith.constant 1 : i32
    %466 = tpu.dynamic_rotate %453 by %c1_i32_315 dim 1 : vector<24x512xf32>, i32 -> vector<24x512xf32>
    %c3_316 = arith.constant 3 : index
    %c0_317 = arith.constant 0 : index
    %467 = vector.load %arg29[%c3_316, %c0_317] : memref<9x512xf32, #tpu.memory_space<vmem>>, vector<1x512xf32>
    %468 = vector.broadcast %467 : vector<1x512xf32> to vector<24x512xf32>
    %469 = arith.mulf %466, %468 : vector<24x512xf32>
    %c511_i32_318 = arith.constant 511 : i32
    %470 = tpu.dynamic_rotate %453 by %c511_i32_318 dim 1 : vector<24x512xf32>, i32 -> vector<24x512xf32>
    %c5_319 = arith.constant 5 : index
    %c0_320 = arith.constant 0 : index
    %471 = vector.load %arg29[%c5_319, %c0_320] : memref<9x512xf32, #tpu.memory_space<vmem>>, vector<1x512xf32>
    %472 = vector.broadcast %471 : vector<1x512xf32> to vector<24x512xf32>
    %473 = arith.mulf %470, %472 : vector<24x512xf32>
    %c497_i32_321 = arith.constant 497 : i32
    %474 = tpu.dynamic_rotate %453 by %c497_i32_321 dim 1 : vector<24x512xf32>, i32 -> vector<24x512xf32>
    %c6_322 = arith.constant 6 : index
    %c0_323 = arith.constant 0 : index
    %475 = vector.load %arg29[%c6_322, %c0_323] : memref<9x512xf32, #tpu.memory_space<vmem>>, vector<1x512xf32>
    %476 = vector.broadcast %475 : vector<1x512xf32> to vector<24x512xf32>
    %477 = arith.mulf %474, %476 : vector<24x512xf32>
    %c496_i32_324 = arith.constant 496 : i32
    %478 = tpu.dynamic_rotate %453 by %c496_i32_324 dim 1 : vector<24x512xf32>, i32 -> vector<24x512xf32>
    %c7_325 = arith.constant 7 : index
    %c0_326 = arith.constant 0 : index
    %479 = vector.load %arg29[%c7_325, %c0_326] : memref<9x512xf32, #tpu.memory_space<vmem>>, vector<1x512xf32>
    %480 = vector.broadcast %479 : vector<1x512xf32> to vector<24x512xf32>
    %481 = arith.mulf %478, %480 : vector<24x512xf32>
    %c495_i32_327 = arith.constant 495 : i32
    %482 = tpu.dynamic_rotate %453 by %c495_i32_327 dim 1 : vector<24x512xf32>, i32 -> vector<24x512xf32>
    %c8_328 = arith.constant 8 : index
    %c0_329 = arith.constant 0 : index
    %483 = vector.load %arg29[%c8_328, %c0_329] : memref<9x512xf32, #tpu.memory_space<vmem>>, vector<1x512xf32>
    %484 = vector.broadcast %483 : vector<1x512xf32> to vector<24x512xf32>
    %485 = arith.mulf %482, %484 : vector<24x512xf32>
    %486 = tpu.concatenate %457, %461, %465, %469, %453, %473, %477, %481, %485 in 0 : vector<24x512xf32>, vector<24x512xf32>, vector<24x512xf32>, vector<24x512xf32>, vector<24x512xf32>, vector<24x512xf32>, vector<24x512xf32>, vector<24x512xf32>, vector<24x512xf32> -> vector<216x512xf32>
    %487 = arith.truncf %486 : vector<216x512xf32> to vector<216x512xbf16>
    %c0_330 = arith.constant 0 : index
    %c0_331 = arith.constant 0 : index
    %488 = vector.load %arg23[%c0_330, %c0_331] : memref<8x216xbf16, #tpu.memory_space<vmem>>, vector<8x216xbf16>
    %cst_332 = arith.constant dense<0.000000e+00> : vector<8x512xf32>
    %489 = tpu.matmul %488, %487, %cst_332 {dimension_numbers = #tpu.dot_dimension_numbers<[1], [0], [0], [1], [0, 0, 1, 1], [], []>} : vector<8x216xbf16>, vector<216x512xbf16>, vector<8x512xf32> -> vector<8x512xf32>
    %c0_333 = arith.constant 0 : index
    %c0_334 = arith.constant 0 : index
    %490 = vector.load %arg24[%c0_333, %c0_334] : memref<8x1xf32, #tpu.memory_space<vmem>>, vector<8x1xf32>
    %491 = vector.broadcast %490 : vector<8x1xf32> to vector<8x512xf32>
    %492 = arith.addf %489, %491 : vector<8x512xf32>
    %cst_335 = arith.constant 0.000000e+00 : f32
    %493 = vector.broadcast %cst_335 : f32 to vector<8x512xf32>
    %494 = arith.maximumf %492, %493 : vector<8x512xf32>
    %c17_i32_336 = arith.constant 17 : i32
    %495 = tpu.dynamic_rotate %494 by %c17_i32_336 dim 1 : vector<8x512xf32>, i32 -> vector<8x512xf32>
    %c0_337 = arith.constant 0 : index
    %c0_338 = arith.constant 0 : index
    %496 = vector.load %arg29[%c0_337, %c0_338] : memref<9x512xf32, #tpu.memory_space<vmem>>, vector<1x512xf32>
    %497 = vector.broadcast %496 : vector<1x512xf32> to vector<8x512xf32>
    %498 = arith.mulf %495, %497 : vector<8x512xf32>
    %c16_i32_339 = arith.constant 16 : i32
    %499 = tpu.dynamic_rotate %494 by %c16_i32_339 dim 1 : vector<8x512xf32>, i32 -> vector<8x512xf32>
    %c1_340 = arith.constant 1 : index
    %c0_341 = arith.constant 0 : index
    %500 = vector.load %arg29[%c1_340, %c0_341] : memref<9x512xf32, #tpu.memory_space<vmem>>, vector<1x512xf32>
    %501 = vector.broadcast %500 : vector<1x512xf32> to vector<8x512xf32>
    %502 = arith.mulf %499, %501 : vector<8x512xf32>
    %c15_i32_342 = arith.constant 15 : i32
    %503 = tpu.dynamic_rotate %494 by %c15_i32_342 dim 1 : vector<8x512xf32>, i32 -> vector<8x512xf32>
    %c2_343 = arith.constant 2 : index
    %c0_344 = arith.constant 0 : index
    %504 = vector.load %arg29[%c2_343, %c0_344] : memref<9x512xf32, #tpu.memory_space<vmem>>, vector<1x512xf32>
    %505 = vector.broadcast %504 : vector<1x512xf32> to vector<8x512xf32>
    %506 = arith.mulf %503, %505 : vector<8x512xf32>
    %c1_i32_345 = arith.constant 1 : i32
    %507 = tpu.dynamic_rotate %494 by %c1_i32_345 dim 1 : vector<8x512xf32>, i32 -> vector<8x512xf32>
    %c3_346 = arith.constant 3 : index
    %c0_347 = arith.constant 0 : index
    %508 = vector.load %arg29[%c3_346, %c0_347] : memref<9x512xf32, #tpu.memory_space<vmem>>, vector<1x512xf32>
    %509 = vector.broadcast %508 : vector<1x512xf32> to vector<8x512xf32>
    %510 = arith.mulf %507, %509 : vector<8x512xf32>
    %c511_i32_348 = arith.constant 511 : i32
    %511 = tpu.dynamic_rotate %494 by %c511_i32_348 dim 1 : vector<8x512xf32>, i32 -> vector<8x512xf32>
    %c5_349 = arith.constant 5 : index
    %c0_350 = arith.constant 0 : index
    %512 = vector.load %arg29[%c5_349, %c0_350] : memref<9x512xf32, #tpu.memory_space<vmem>>, vector<1x512xf32>
    %513 = vector.broadcast %512 : vector<1x512xf32> to vector<8x512xf32>
    %514 = arith.mulf %511, %513 : vector<8x512xf32>
    %c497_i32_351 = arith.constant 497 : i32
    %515 = tpu.dynamic_rotate %494 by %c497_i32_351 dim 1 : vector<8x512xf32>, i32 -> vector<8x512xf32>
    %c6_352 = arith.constant 6 : index
    %c0_353 = arith.constant 0 : index
    %516 = vector.load %arg29[%c6_352, %c0_353] : memref<9x512xf32, #tpu.memory_space<vmem>>, vector<1x512xf32>
    %517 = vector.broadcast %516 : vector<1x512xf32> to vector<8x512xf32>
    %518 = arith.mulf %515, %517 : vector<8x512xf32>
    %c496_i32_354 = arith.constant 496 : i32
    %519 = tpu.dynamic_rotate %494 by %c496_i32_354 dim 1 : vector<8x512xf32>, i32 -> vector<8x512xf32>
    %c7_355 = arith.constant 7 : index
    %c0_356 = arith.constant 0 : index
    %520 = vector.load %arg29[%c7_355, %c0_356] : memref<9x512xf32, #tpu.memory_space<vmem>>, vector<1x512xf32>
    %521 = vector.broadcast %520 : vector<1x512xf32> to vector<8x512xf32>
    %522 = arith.mulf %519, %521 : vector<8x512xf32>
    %c495_i32_357 = arith.constant 495 : i32
    %523 = tpu.dynamic_rotate %494 by %c495_i32_357 dim 1 : vector<8x512xf32>, i32 -> vector<8x512xf32>
    %c8_358 = arith.constant 8 : index
    %c0_359 = arith.constant 0 : index
    %524 = vector.load %arg29[%c8_358, %c0_359] : memref<9x512xf32, #tpu.memory_space<vmem>>, vector<1x512xf32>
    %525 = vector.broadcast %524 : vector<1x512xf32> to vector<8x512xf32>
    %526 = arith.mulf %523, %525 : vector<8x512xf32>
    %527 = tpu.concatenate %498, %502, %506, %510, %494, %514, %518, %522, %526 in 0 : vector<8x512xf32>, vector<8x512xf32>, vector<8x512xf32>, vector<8x512xf32>, vector<8x512xf32>, vector<8x512xf32>, vector<8x512xf32>, vector<8x512xf32>, vector<8x512xf32> -> vector<72x512xf32>
    %528 = arith.truncf %527 : vector<72x512xf32> to vector<72x512xbf16>
    %c0_360 = arith.constant 0 : index
    %c0_361 = arith.constant 0 : index
    %529 = vector.load %arg25[%c0_360, %c0_361] : memref<8x72xbf16, #tpu.memory_space<vmem>>, vector<8x72xbf16>
    %cst_362 = arith.constant dense<0.000000e+00> : vector<8x512xf32>
    %530 = tpu.matmul %529, %528, %cst_362 {dimension_numbers = #tpu.dot_dimension_numbers<[1], [0], [0], [1], [0, 0, 1, 1], [], []>} : vector<8x72xbf16>, vector<72x512xbf16>, vector<8x512xf32> -> vector<8x512xf32>
    %c0_363 = arith.constant 0 : index
    %c0_364 = arith.constant 0 : index
    %531 = vector.load %arg26[%c0_363, %c0_364] : memref<8x1xf32, #tpu.memory_space<vmem>>, vector<8x1xf32>
    %532 = vector.broadcast %531 : vector<8x1xf32> to vector<8x512xf32>
    %533 = arith.addf %530, %532 : vector<8x512xf32>
    %cst_365 = arith.constant 0.000000e+00 : f32
    %534 = vector.broadcast %cst_365 : f32 to vector<8x512xf32>
    %535 = arith.maximumf %533, %534 : vector<8x512xf32>
    %c0_366 = arith.constant 0 : index
    %c0_367 = arith.constant 0 : index
    %536 = vector.load %arg27[%c0_366, %c0_367] : memref<8x8xbf16, #tpu.memory_space<vmem>>, vector<8x8xbf16>
    %537 = arith.truncf %535 : vector<8x512xf32> to vector<8x512xbf16>
    %cst_368 = arith.constant dense<0.000000e+00> : vector<8x512xf32>
    %538 = tpu.matmul %536, %537, %cst_368 {dimension_numbers = #tpu.dot_dimension_numbers<[1], [0], [0], [1], [0, 0, 1, 1], [], []>} : vector<8x8xbf16>, vector<8x512xbf16>, vector<8x512xf32> -> vector<8x512xf32>
    %c0_369 = arith.constant 0 : index
    %c0_370 = arith.constant 0 : index
    %539 = vector.load %arg28[%c0_369, %c0_370] : memref<8x1xf32, #tpu.memory_space<vmem>>, vector<8x1xf32>
    %540 = vector.broadcast %539 : vector<8x1xf32> to vector<8x512xf32>
    %541 = arith.addf %538, %540 : vector<8x512xf32>
    %542 = vector.extract_strided_slice %541 {offsets = [0, 0], sizes = [2, 512], strides = [1, 1]} : vector<8x512xf32> to vector<2x512xf32>
    %c0_371 = arith.constant 0 : index
    %c0_372 = arith.constant 0 : index
    %c0_373 = arith.constant 0 : index
    %543 = vector.load %arg34[%c0_371, %c0_372, %c0_373] : memref<6x3x512xf32, #tpu.memory_space<vmem>>, vector<1x2x512xf32>
    %544 = vector.shape_cast %543 : vector<1x2x512xf32> to vector<2x512xf32>
    %545 = vector.shape_cast %542 : vector<2x512xf32> to vector<1x2x512xf32>
    tpu.vector_store %arg34[%c0_371, %c0_372, %c0_373], %545 {strides = array<i32>} : memref<6x3x512xf32, #tpu.memory_space<vmem>>, vector<1x2x512xf32>,
    %c0_374 = arith.constant 0 : index
    %c2_375 = arith.constant 2 : index
    %c0_376 = arith.constant 0 : index
    %546 = vector.load %arg34[%c0_374, %c2_375, %c0_376] : memref<6x3x512xf32, #tpu.memory_space<vmem>>, vector<1x1x512xf32>
    %547 = vector.shape_cast %546 : vector<1x1x512xf32> to vector<1x512xf32>
    %548 = vector.shape_cast %268 : vector<1x512xf32> to vector<1x1x512xf32>
    tpu.vector_store %arg34[%c0_374, %c2_375, %c0_376], %548 {strides = array<i32>} : memref<6x3x512xf32, #tpu.memory_space<vmem>>, vector<1x1x512xf32>,
    %549 = tpu.iota {dimensions = array<i32: 0>} : vector<8x512xi32>
    %c2_i32 = arith.constant 2 : i32
    %550 = vector.broadcast %c2_i32 : i32 to vector<8x512xi32>
    %551 = arith.cmpi eq, %549, %550 : vector<8x512xi32>
    %c1_i32_377 = arith.constant 1 : i32
    %c5_i32 = arith.constant 5 : i32
    %552 = arith.addi %c1_i32_377, %c5_i32 : i32
    %c1_i32_378 = arith.constant 1 : i32
    %553 = scf.for %arg35 = %c1_i32_377 to %552 step %c1_i32_378 iter_args(%arg36 = %541) -> (vector<8x512xf32>)  : i32 {
      %cst_380 = arith.constant 0.000000e+00 : f32
      %554 = vector.broadcast %cst_380 : f32 to vector<8x512xf32>
      %555 = arith.subf %554, %arg36 : vector<8x512xf32>
      %556 = math.exp %555 : vector<8x512xf32>
      %cst_381 = arith.constant 1.000000e+00 : f32
      %557 = vector.broadcast %cst_381 : f32 to vector<8x512xf32>
      %558 = arith.addf %557, %556 : vector<8x512xf32>
      %cst_382 = arith.constant 1.000000e+00 : f32
      %559 = vector.broadcast %cst_382 : f32 to vector<8x512xf32>
      %560 = arith.divf %559, %558 : vector<8x512xf32>
      %561 = vector.shape_cast %276 : vector<1x512xf32> to vector<1x512xf32>
      %562 = vector.broadcast %561 : vector<1x512xf32> to vector<8x512xf32>
      %563 = arith.select %551, %562, %560 : vector<8x512xi1>, vector<8x512xf32>
      %c17_i32_383 = arith.constant 17 : i32
      %564 = tpu.dynamic_rotate %563 by %c17_i32_383 dim 1 : vector<8x512xf32>, i32 -> vector<8x512xf32>
      %c0_384 = arith.constant 0 : index
      %c0_385 = arith.constant 0 : index
      %565 = vector.load %arg29[%c0_384, %c0_385] : memref<9x512xf32, #tpu.memory_space<vmem>>, vector<1x512xf32>
      %566 = vector.broadcast %565 : vector<1x512xf32> to vector<8x512xf32>
      %567 = arith.mulf %564, %566 : vector<8x512xf32>
      %c16_i32_386 = arith.constant 16 : i32
      %568 = tpu.dynamic_rotate %563 by %c16_i32_386 dim 1 : vector<8x512xf32>, i32 -> vector<8x512xf32>
      %c1_387 = arith.constant 1 : index
      %c0_388 = arith.constant 0 : index
      %569 = vector.load %arg29[%c1_387, %c0_388] : memref<9x512xf32, #tpu.memory_space<vmem>>, vector<1x512xf32>
      %570 = vector.broadcast %569 : vector<1x512xf32> to vector<8x512xf32>
      %571 = arith.mulf %568, %570 : vector<8x512xf32>
      %c15_i32_389 = arith.constant 15 : i32
      %572 = tpu.dynamic_rotate %563 by %c15_i32_389 dim 1 : vector<8x512xf32>, i32 -> vector<8x512xf32>
      %c2_390 = arith.constant 2 : index
      %c0_391 = arith.constant 0 : index
      %573 = vector.load %arg29[%c2_390, %c0_391] : memref<9x512xf32, #tpu.memory_space<vmem>>, vector<1x512xf32>
      %574 = vector.broadcast %573 : vector<1x512xf32> to vector<8x512xf32>
      %575 = arith.mulf %572, %574 : vector<8x512xf32>
      %c1_i32_392 = arith.constant 1 : i32
      %576 = tpu.dynamic_rotate %563 by %c1_i32_392 dim 1 : vector<8x512xf32>, i32 -> vector<8x512xf32>
      %c3_393 = arith.constant 3 : index
      %c0_394 = arith.constant 0 : index
      %577 = vector.load %arg29[%c3_393, %c0_394] : memref<9x512xf32, #tpu.memory_space<vmem>>, vector<1x512xf32>
      %578 = vector.broadcast %577 : vector<1x512xf32> to vector<8x512xf32>
      %579 = arith.mulf %576, %578 : vector<8x512xf32>
      %c511_i32_395 = arith.constant 511 : i32
      %580 = tpu.dynamic_rotate %563 by %c511_i32_395 dim 1 : vector<8x512xf32>, i32 -> vector<8x512xf32>
      %c5_396 = arith.constant 5 : index
      %c0_397 = arith.constant 0 : index
      %581 = vector.load %arg29[%c5_396, %c0_397] : memref<9x512xf32, #tpu.memory_space<vmem>>, vector<1x512xf32>
      %582 = vector.broadcast %581 : vector<1x512xf32> to vector<8x512xf32>
      %583 = arith.mulf %580, %582 : vector<8x512xf32>
      %c497_i32_398 = arith.constant 497 : i32
      %584 = tpu.dynamic_rotate %563 by %c497_i32_398 dim 1 : vector<8x512xf32>, i32 -> vector<8x512xf32>
      %c6_399 = arith.constant 6 : index
      %c0_400 = arith.constant 0 : index
      %585 = vector.load %arg29[%c6_399, %c0_400] : memref<9x512xf32, #tpu.memory_space<vmem>>, vector<1x512xf32>
      %586 = vector.broadcast %585 : vector<1x512xf32> to vector<8x512xf32>
      %587 = arith.mulf %584, %586 : vector<8x512xf32>
      %c496_i32_401 = arith.constant 496 : i32
      %588 = tpu.dynamic_rotate %563 by %c496_i32_401 dim 1 : vector<8x512xf32>, i32 -> vector<8x512xf32>
      %c7_402 = arith.constant 7 : index
      %c0_403 = arith.constant 0 : index
      %589 = vector.load %arg29[%c7_402, %c0_403] : memref<9x512xf32, #tpu.memory_space<vmem>>, vector<1x512xf32>
      %590 = vector.broadcast %589 : vector<1x512xf32> to vector<8x512xf32>
      %591 = arith.mulf %588, %590 : vector<8x512xf32>
      %c495_i32_404 = arith.constant 495 : i32
      %592 = tpu.dynamic_rotate %563 by %c495_i32_404 dim 1 : vector<8x512xf32>, i32 -> vector<8x512xf32>
      %c8_405 = arith.constant 8 : index
      %c0_406 = arith.constant 0 : index
      %593 = vector.load %arg29[%c8_405, %c0_406] : memref<9x512xf32, #tpu.memory_space<vmem>>, vector<1x512xf32>
      %594 = vector.broadcast %593 : vector<1x512xf32> to vector<8x512xf32>
      %595 = arith.mulf %592, %594 : vector<8x512xf32>
      %596 = tpu.concatenate %567, %571, %575, %579, %563, %583, %587, %591, %595 in 0 : vector<8x512xf32>, vector<8x512xf32>, vector<8x512xf32>, vector<8x512xf32>, vector<8x512xf32>, vector<8x512xf32>, vector<8x512xf32>, vector<8x512xf32>, vector<8x512xf32> -> vector<72x512xf32>
      %597 = arith.truncf %596 : vector<72x512xf32> to vector<72x512xbf16>
      %c0_407 = arith.constant 0 : index
      %c0_408 = arith.constant 0 : index
      %598 = vector.load %arg15[%c0_407, %c0_408] : memref<8x72xbf16, #tpu.memory_space<vmem>>, vector<8x72xbf16>
      %cst_409 = arith.constant dense<0.000000e+00> : vector<8x512xf32>
      %599 = tpu.matmul %598, %597, %cst_409 {dimension_numbers = #tpu.dot_dimension_numbers<[1], [0], [0], [1], [0, 0, 1, 1], [], []>} : vector<8x72xbf16>, vector<72x512xbf16>, vector<8x512xf32> -> vector<8x512xf32>
      %c0_410 = arith.constant 0 : index
      %c0_411 = arith.constant 0 : index
      %600 = vector.load %arg16[%c0_410, %c0_411] : memref<8x1xf32, #tpu.memory_space<vmem>>, vector<8x1xf32>
      %601 = vector.broadcast %600 : vector<8x1xf32> to vector<8x512xf32>
      %602 = arith.addf %599, %601 : vector<8x512xf32>
      %cst_412 = arith.constant 0.000000e+00 : f32
      %603 = vector.broadcast %cst_412 : f32 to vector<8x512xf32>
      %604 = arith.maximumf %602, %603 : vector<8x512xf32>
      %c17_i32_413 = arith.constant 17 : i32
      %605 = tpu.dynamic_rotate %604 by %c17_i32_413 dim 1 : vector<8x512xf32>, i32 -> vector<8x512xf32>
      %c0_414 = arith.constant 0 : index
      %c0_415 = arith.constant 0 : index
      %606 = vector.load %arg29[%c0_414, %c0_415] : memref<9x512xf32, #tpu.memory_space<vmem>>, vector<1x512xf32>
      %607 = vector.broadcast %606 : vector<1x512xf32> to vector<8x512xf32>
      %608 = arith.mulf %605, %607 : vector<8x512xf32>
      %c16_i32_416 = arith.constant 16 : i32
      %609 = tpu.dynamic_rotate %604 by %c16_i32_416 dim 1 : vector<8x512xf32>, i32 -> vector<8x512xf32>
      %c1_417 = arith.constant 1 : index
      %c0_418 = arith.constant 0 : index
      %610 = vector.load %arg29[%c1_417, %c0_418] : memref<9x512xf32, #tpu.memory_space<vmem>>, vector<1x512xf32>
      %611 = vector.broadcast %610 : vector<1x512xf32> to vector<8x512xf32>
      %612 = arith.mulf %609, %611 : vector<8x512xf32>
      %c15_i32_419 = arith.constant 15 : i32
      %613 = tpu.dynamic_rotate %604 by %c15_i32_419 dim 1 : vector<8x512xf32>, i32 -> vector<8x512xf32>
      %c2_420 = arith.constant 2 : index
      %c0_421 = arith.constant 0 : index
      %614 = vector.load %arg29[%c2_420, %c0_421] : memref<9x512xf32, #tpu.memory_space<vmem>>, vector<1x512xf32>
      %615 = vector.broadcast %614 : vector<1x512xf32> to vector<8x512xf32>
      %616 = arith.mulf %613, %615 : vector<8x512xf32>
      %c1_i32_422 = arith.constant 1 : i32
      %617 = tpu.dynamic_rotate %604 by %c1_i32_422 dim 1 : vector<8x512xf32>, i32 -> vector<8x512xf32>
      %c3_423 = arith.constant 3 : index
      %c0_424 = arith.constant 0 : index
      %618 = vector.load %arg29[%c3_423, %c0_424] : memref<9x512xf32, #tpu.memory_space<vmem>>, vector<1x512xf32>
      %619 = vector.broadcast %618 : vector<1x512xf32> to vector<8x512xf32>
      %620 = arith.mulf %617, %619 : vector<8x512xf32>
      %c511_i32_425 = arith.constant 511 : i32
      %621 = tpu.dynamic_rotate %604 by %c511_i32_425 dim 1 : vector<8x512xf32>, i32 -> vector<8x512xf32>
      %c5_426 = arith.constant 5 : index
      %c0_427 = arith.constant 0 : index
      %622 = vector.load %arg29[%c5_426, %c0_427] : memref<9x512xf32, #tpu.memory_space<vmem>>, vector<1x512xf32>
      %623 = vector.broadcast %622 : vector<1x512xf32> to vector<8x512xf32>
      %624 = arith.mulf %621, %623 : vector<8x512xf32>
      %c497_i32_428 = arith.constant 497 : i32
      %625 = tpu.dynamic_rotate %604 by %c497_i32_428 dim 1 : vector<8x512xf32>, i32 -> vector<8x512xf32>
      %c6_429 = arith.constant 6 : index
      %c0_430 = arith.constant 0 : index
      %626 = vector.load %arg29[%c6_429, %c0_430] : memref<9x512xf32, #tpu.memory_space<vmem>>, vector<1x512xf32>
      %627 = vector.broadcast %626 : vector<1x512xf32> to vector<8x512xf32>
      %628 = arith.mulf %625, %627 : vector<8x512xf32>
      %c496_i32_431 = arith.constant 496 : i32
      %629 = tpu.dynamic_rotate %604 by %c496_i32_431 dim 1 : vector<8x512xf32>, i32 -> vector<8x512xf32>
      %c7_432 = arith.constant 7 : index
      %c0_433 = arith.constant 0 : index
      %630 = vector.load %arg29[%c7_432, %c0_433] : memref<9x512xf32, #tpu.memory_space<vmem>>, vector<1x512xf32>
      %631 = vector.broadcast %630 : vector<1x512xf32> to vector<8x512xf32>
      %632 = arith.mulf %629, %631 : vector<8x512xf32>
      %c495_i32_434 = arith.constant 495 : i32
      %633 = tpu.dynamic_rotate %604 by %c495_i32_434 dim 1 : vector<8x512xf32>, i32 -> vector<8x512xf32>
      %c8_435 = arith.constant 8 : index
      %c0_436 = arith.constant 0 : index
      %634 = vector.load %arg29[%c8_435, %c0_436] : memref<9x512xf32, #tpu.memory_space<vmem>>, vector<1x512xf32>
      %635 = vector.broadcast %634 : vector<1x512xf32> to vector<8x512xf32>
      %636 = arith.mulf %633, %635 : vector<8x512xf32>
      %637 = tpu.concatenate %608, %612, %616, %620, %604, %624, %628, %632, %636 in 0 : vector<8x512xf32>, vector<8x512xf32>, vector<8x512xf32>, vector<8x512xf32>, vector<8x512xf32>, vector<8x512xf32>, vector<8x512xf32>, vector<8x512xf32>, vector<8x512xf32> -> vector<72x512xf32>
      %638 = arith.truncf %637 : vector<72x512xf32> to vector<72x512xbf16>
      %c0_437 = arith.constant 0 : index
      %c0_438 = arith.constant 0 : index
      %639 = vector.load %arg17[%c0_437, %c0_438] : memref<8x72xbf16, #tpu.memory_space<vmem>>, vector<8x72xbf16>
      %cst_439 = arith.constant dense<0.000000e+00> : vector<8x512xf32>
      %640 = tpu.matmul %639, %638, %cst_439 {dimension_numbers = #tpu.dot_dimension_numbers<[1], [0], [0], [1], [0, 0, 1, 1], [], []>} : vector<8x72xbf16>, vector<72x512xbf16>, vector<8x512xf32> -> vector<8x512xf32>
      %c0_440 = arith.constant 0 : index
      %c0_441 = arith.constant 0 : index
      %641 = vector.load %arg18[%c0_440, %c0_441] : memref<8x1xf32, #tpu.memory_space<vmem>>, vector<8x1xf32>
      %642 = vector.broadcast %641 : vector<8x1xf32> to vector<8x512xf32>
      %643 = arith.addf %640, %642 : vector<8x512xf32>
      %cst_442 = arith.constant 0.000000e+00 : f32
      %644 = vector.broadcast %cst_442 : f32 to vector<8x512xf32>
      %645 = arith.maximumf %643, %644 : vector<8x512xf32>
      %c511_i32_443 = arith.constant 511 : i32
      %646 = tpu.dynamic_rotate %645 by %c511_i32_443 dim 1 : vector<8x512xf32>, i32 -> vector<8x512xf32>
      %647 = arith.maximumf %645, %646 : vector<8x512xf32>
      %c496_i32_444 = arith.constant 496 : i32
      %648 = tpu.dynamic_rotate %645 by %c496_i32_444 dim 1 : vector<8x512xf32>, i32 -> vector<8x512xf32>
      %649 = arith.maximumf %647, %648 : vector<8x512xf32>
      %c495_i32_445 = arith.constant 495 : i32
      %650 = tpu.dynamic_rotate %645 by %c495_i32_445 dim 1 : vector<8x512xf32>, i32 -> vector<8x512xf32>
      %651 = arith.maximumf %649, %650 : vector<8x512xf32>
      %652 = arith.truncf %651 : vector<8x512xf32> to vector<8x512xbf16>
      %c0_446 = arith.constant 0 : index
      %c0_447 = arith.constant 0 : index
      %653 = vector.load %arg31[%c0_446, %c0_447] : memref<512x128xbf16, #tpu.memory_space<vmem>>, vector<512x128xbf16>
      %cst_448 = arith.constant dense<0.000000e+00> : vector<8x128xf32>
      %654 = tpu.matmul %652, %653, %cst_448 {dimension_numbers = #tpu.dot_dimension_numbers<[1], [0], [0], [1], [0, 0, 1, 1], [], []>} : vector<8x512xbf16>, vector<512x128xbf16>, vector<8x128xf32> -> vector<8x128xf32>
      %c9_i32_449 = arith.constant 9 : i32
      %655 = tpu.dynamic_rotate %654 by %c9_i32_449 dim 1 : vector<8x128xf32>, i32 -> vector<8x128xf32>
      %c0_450 = arith.constant 0 : index
      %c0_451 = arith.constant 0 : index
      %656 = vector.load %arg30[%c0_450, %c0_451] : memref<9x128xf32, #tpu.memory_space<vmem>>, vector<1x128xf32>
      %657 = vector.broadcast %656 : vector<1x128xf32> to vector<8x128xf32>
      %658 = arith.mulf %655, %657 : vector<8x128xf32>
      %c8_i32_452 = arith.constant 8 : i32
      %659 = tpu.dynamic_rotate %654 by %c8_i32_452 dim 1 : vector<8x128xf32>, i32 -> vector<8x128xf32>
      %c1_453 = arith.constant 1 : index
      %c0_454 = arith.constant 0 : index
      %660 = vector.load %arg30[%c1_453, %c0_454] : memref<9x128xf32, #tpu.memory_space<vmem>>, vector<1x128xf32>
      %661 = vector.broadcast %660 : vector<1x128xf32> to vector<8x128xf32>
      %662 = arith.mulf %659, %661 : vector<8x128xf32>
      %c7_i32_455 = arith.constant 7 : i32
      %663 = tpu.dynamic_rotate %654 by %c7_i32_455 dim 1 : vector<8x128xf32>, i32 -> vector<8x128xf32>
      %c2_456 = arith.constant 2 : index
      %c0_457 = arith.constant 0 : index
      %664 = vector.load %arg30[%c2_456, %c0_457] : memref<9x128xf32, #tpu.memory_space<vmem>>, vector<1x128xf32>
      %665 = vector.broadcast %664 : vector<1x128xf32> to vector<8x128xf32>
      %666 = arith.mulf %663, %665 : vector<8x128xf32>
      %c1_i32_458 = arith.constant 1 : i32
      %667 = tpu.dynamic_rotate %654 by %c1_i32_458 dim 1 : vector<8x128xf32>, i32 -> vector<8x128xf32>
      %c3_459 = arith.constant 3 : index
      %c0_460 = arith.constant 0 : index
      %668 = vector.load %arg30[%c3_459, %c0_460] : memref<9x128xf32, #tpu.memory_space<vmem>>, vector<1x128xf32>
      %669 = vector.broadcast %668 : vector<1x128xf32> to vector<8x128xf32>
      %670 = arith.mulf %667, %669 : vector<8x128xf32>
      %c127_i32_461 = arith.constant 127 : i32
      %671 = tpu.dynamic_rotate %654 by %c127_i32_461 dim 1 : vector<8x128xf32>, i32 -> vector<8x128xf32>
      %c5_462 = arith.constant 5 : index
      %c0_463 = arith.constant 0 : index
      %672 = vector.load %arg30[%c5_462, %c0_463] : memref<9x128xf32, #tpu.memory_space<vmem>>, vector<1x128xf32>
      %673 = vector.broadcast %672 : vector<1x128xf32> to vector<8x128xf32>
      %674 = arith.mulf %671, %673 : vector<8x128xf32>
      %c121_i32_464 = arith.constant 121 : i32
      %675 = tpu.dynamic_rotate %654 by %c121_i32_464 dim 1 : vector<8x128xf32>, i32 -> vector<8x128xf32>
      %c6_465 = arith.constant 6 : index
      %c0_466 = arith.constant 0 : index
      %676 = vector.load %arg30[%c6_465, %c0_466] : memref<9x128xf32, #tpu.memory_space<vmem>>, vector<1x128xf32>
      %677 = vector.broadcast %676 : vector<1x128xf32> to vector<8x128xf32>
      %678 = arith.mulf %675, %677 : vector<8x128xf32>
      %c120_i32_467 = arith.constant 120 : i32
      %679 = tpu.dynamic_rotate %654 by %c120_i32_467 dim 1 : vector<8x128xf32>, i32 -> vector<8x128xf32>
      %c7_468 = arith.constant 7 : index
      %c0_469 = arith.constant 0 : index
      %680 = vector.load %arg30[%c7_468, %c0_469] : memref<9x128xf32, #tpu.memory_space<vmem>>, vector<1x128xf32>
      %681 = vector.broadcast %680 : vector<1x128xf32> to vector<8x128xf32>
      %682 = arith.mulf %679, %681 : vector<8x128xf32>
      %c119_i32_470 = arith.constant 119 : i32
      %683 = tpu.dynamic_rotate %654 by %c119_i32_470 dim 1 : vector<8x128xf32>, i32 -> vector<8x128xf32>
      %c8_471 = arith.constant 8 : index
      %c0_472 = arith.constant 0 : index
      %684 = vector.load %arg30[%c8_471, %c0_472] : memref<9x128xf32, #tpu.memory_space<vmem>>, vector<1x128xf32>
      %685 = vector.broadcast %684 : vector<1x128xf32> to vector<8x128xf32>
      %686 = arith.mulf %683, %685 : vector<8x128xf32>
      %687 = tpu.concatenate %658, %662, %666, %670, %654, %674, %678, %682, %686 in 0 : vector<8x128xf32>, vector<8x128xf32>, vector<8x128xf32>, vector<8x128xf32>, vector<8x128xf32>, vector<8x128xf32>, vector<8x128xf32>, vector<8x128xf32>, vector<8x128xf32> -> vector<72x128xf32>
      %688 = arith.truncf %687 : vector<72x128xf32> to vector<72x128xbf16>
      %c0_473 = arith.constant 0 : index
      %c0_474 = arith.constant 0 : index
      %689 = vector.load %arg19[%c0_473, %c0_474] : memref<16x72xbf16, #tpu.memory_space<vmem>>, vector<16x72xbf16>
      %cst_475 = arith.constant dense<0.000000e+00> : vector<16x128xf32>
      %690 = tpu.matmul %689, %688, %cst_475 {dimension_numbers = #tpu.dot_dimension_numbers<[1], [0], [0], [1], [0, 0, 1, 1], [], []>} : vector<16x72xbf16>, vector<72x128xbf16>, vector<16x128xf32> -> vector<16x128xf32>
      %c0_476 = arith.constant 0 : index
      %c0_477 = arith.constant 0 : index
      %691 = vector.load %arg20[%c0_476, %c0_477] : memref<16x1xf32, #tpu.memory_space<vmem>>, vector<16x1xf32>
      %692 = vector.broadcast %691 : vector<16x1xf32> to vector<16x128xf32>
      %693 = arith.addf %690, %692 : vector<16x128xf32>
      %cst_478 = arith.constant 0.000000e+00 : f32
      %694 = vector.broadcast %cst_478 : f32 to vector<16x128xf32>
      %695 = arith.maximumf %693, %694 : vector<16x128xf32>
      %c9_i32_479 = arith.constant 9 : i32
      %696 = tpu.dynamic_rotate %695 by %c9_i32_479 dim 1 : vector<16x128xf32>, i32 -> vector<16x128xf32>
      %c0_480 = arith.constant 0 : index
      %c0_481 = arith.constant 0 : index
      %697 = vector.load %arg30[%c0_480, %c0_481] : memref<9x128xf32, #tpu.memory_space<vmem>>, vector<1x128xf32>
      %698 = vector.broadcast %697 : vector<1x128xf32> to vector<16x128xf32>
      %699 = arith.mulf %696, %698 : vector<16x128xf32>
      %c8_i32_482 = arith.constant 8 : i32
      %700 = tpu.dynamic_rotate %695 by %c8_i32_482 dim 1 : vector<16x128xf32>, i32 -> vector<16x128xf32>
      %c1_483 = arith.constant 1 : index
      %c0_484 = arith.constant 0 : index
      %701 = vector.load %arg30[%c1_483, %c0_484] : memref<9x128xf32, #tpu.memory_space<vmem>>, vector<1x128xf32>
      %702 = vector.broadcast %701 : vector<1x128xf32> to vector<16x128xf32>
      %703 = arith.mulf %700, %702 : vector<16x128xf32>
      %c7_i32_485 = arith.constant 7 : i32
      %704 = tpu.dynamic_rotate %695 by %c7_i32_485 dim 1 : vector<16x128xf32>, i32 -> vector<16x128xf32>
      %c2_486 = arith.constant 2 : index
      %c0_487 = arith.constant 0 : index
      %705 = vector.load %arg30[%c2_486, %c0_487] : memref<9x128xf32, #tpu.memory_space<vmem>>, vector<1x128xf32>
      %706 = vector.broadcast %705 : vector<1x128xf32> to vector<16x128xf32>
      %707 = arith.mulf %704, %706 : vector<16x128xf32>
      %c1_i32_488 = arith.constant 1 : i32
      %708 = tpu.dynamic_rotate %695 by %c1_i32_488 dim 1 : vector<16x128xf32>, i32 -> vector<16x128xf32>
      %c3_489 = arith.constant 3 : index
      %c0_490 = arith.constant 0 : index
      %709 = vector.load %arg30[%c3_489, %c0_490] : memref<9x128xf32, #tpu.memory_space<vmem>>, vector<1x128xf32>
      %710 = vector.broadcast %709 : vector<1x128xf32> to vector<16x128xf32>
      %711 = arith.mulf %708, %710 : vector<16x128xf32>
      %c127_i32_491 = arith.constant 127 : i32
      %712 = tpu.dynamic_rotate %695 by %c127_i32_491 dim 1 : vector<16x128xf32>, i32 -> vector<16x128xf32>
      %c5_492 = arith.constant 5 : index
      %c0_493 = arith.constant 0 : index
      %713 = vector.load %arg30[%c5_492, %c0_493] : memref<9x128xf32, #tpu.memory_space<vmem>>, vector<1x128xf32>
      %714 = vector.broadcast %713 : vector<1x128xf32> to vector<16x128xf32>
      %715 = arith.mulf %712, %714 : vector<16x128xf32>
      %c121_i32_494 = arith.constant 121 : i32
      %716 = tpu.dynamic_rotate %695 by %c121_i32_494 dim 1 : vector<16x128xf32>, i32 -> vector<16x128xf32>
      %c6_495 = arith.constant 6 : index
      %c0_496 = arith.constant 0 : index
      %717 = vector.load %arg30[%c6_495, %c0_496] : memref<9x128xf32, #tpu.memory_space<vmem>>, vector<1x128xf32>
      %718 = vector.broadcast %717 : vector<1x128xf32> to vector<16x128xf32>
      %719 = arith.mulf %716, %718 : vector<16x128xf32>
      %c120_i32_497 = arith.constant 120 : i32
      %720 = tpu.dynamic_rotate %695 by %c120_i32_497 dim 1 : vector<16x128xf32>, i32 -> vector<16x128xf32>
      %c7_498 = arith.constant 7 : index
      %c0_499 = arith.constant 0 : index
      %721 = vector.load %arg30[%c7_498, %c0_499] : memref<9x128xf32, #tpu.memory_space<vmem>>, vector<1x128xf32>
      %722 = vector.broadcast %721 : vector<1x128xf32> to vector<16x128xf32>
      %723 = arith.mulf %720, %722 : vector<16x128xf32>
      %c119_i32_500 = arith.constant 119 : i32
      %724 = tpu.dynamic_rotate %695 by %c119_i32_500 dim 1 : vector<16x128xf32>, i32 -> vector<16x128xf32>
      %c8_501 = arith.constant 8 : index
      %c0_502 = arith.constant 0 : index
      %725 = vector.load %arg30[%c8_501, %c0_502] : memref<9x128xf32, #tpu.memory_space<vmem>>, vector<1x128xf32>
      %726 = vector.broadcast %725 : vector<1x128xf32> to vector<16x128xf32>
      %727 = arith.mulf %724, %726 : vector<16x128xf32>
      %728 = tpu.concatenate %699, %703, %707, %711, %695, %715, %719, %723, %727 in 0 : vector<16x128xf32>, vector<16x128xf32>, vector<16x128xf32>, vector<16x128xf32>, vector<16x128xf32>, vector<16x128xf32>, vector<16x128xf32>, vector<16x128xf32>, vector<16x128xf32> -> vector<144x128xf32>
      %729 = arith.truncf %728 : vector<144x128xf32> to vector<144x128xbf16>
      %c0_503 = arith.constant 0 : index
      %c0_504 = arith.constant 0 : index
      %730 = vector.load %arg21[%c0_503, %c0_504] : memref<16x144xbf16, #tpu.memory_space<vmem>>, vector<16x144xbf16>
      %cst_505 = arith.constant dense<0.000000e+00> : vector<16x128xf32>
      %731 = tpu.matmul %730, %729, %cst_505 {dimension_numbers = #tpu.dot_dimension_numbers<[1], [0], [0], [1], [0, 0, 1, 1], [], []>} : vector<16x144xbf16>, vector<144x128xbf16>, vector<16x128xf32> -> vector<16x128xf32>
      %c0_506 = arith.constant 0 : index
      %c0_507 = arith.constant 0 : index
      %732 = vector.load %arg22[%c0_506, %c0_507] : memref<16x1xf32, #tpu.memory_space<vmem>>, vector<16x1xf32>
      %733 = vector.broadcast %732 : vector<16x1xf32> to vector<16x128xf32>
      %734 = arith.addf %731, %733 : vector<16x128xf32>
      %cst_508 = arith.constant 0.000000e+00 : f32
      %735 = vector.broadcast %cst_508 : f32 to vector<16x128xf32>
      %736 = arith.maximumf %734, %735 : vector<16x128xf32>
      %737 = arith.truncf %736 : vector<16x128xf32> to vector<16x128xbf16>
      %c0_509 = arith.constant 0 : index
      %c0_510 = arith.constant 0 : index
      %738 = vector.load %arg32[%c0_509, %c0_510] : memref<128x512xbf16, #tpu.memory_space<vmem>>, vector<128x512xbf16>
      %cst_511 = arith.constant dense<0.000000e+00> : vector<16x512xf32>
      %739 = tpu.matmul %737, %738, %cst_511 {dimension_numbers = #tpu.dot_dimension_numbers<[1], [0], [0], [1], [0, 0, 1, 1], [], []>} : vector<16x128xbf16>, vector<128x512xbf16>, vector<16x512xf32> -> vector<16x512xf32>
      %740 = tpu.concatenate %739, %645 in 0 : vector<16x512xf32>, vector<8x512xf32> -> vector<24x512xf32>
      %c17_i32_512 = arith.constant 17 : i32
      %741 = tpu.dynamic_rotate %740 by %c17_i32_512 dim 1 : vector<24x512xf32>, i32 -> vector<24x512xf32>
      %c0_513 = arith.constant 0 : index
      %c0_514 = arith.constant 0 : index
      %742 = vector.load %arg29[%c0_513, %c0_514] : memref<9x512xf32, #tpu.memory_space<vmem>>, vector<1x512xf32>
      %743 = vector.broadcast %742 : vector<1x512xf32> to vector<24x512xf32>
      %744 = arith.mulf %741, %743 : vector<24x512xf32>
      %c16_i32_515 = arith.constant 16 : i32
      %745 = tpu.dynamic_rotate %740 by %c16_i32_515 dim 1 : vector<24x512xf32>, i32 -> vector<24x512xf32>
      %c1_516 = arith.constant 1 : index
      %c0_517 = arith.constant 0 : index
      %746 = vector.load %arg29[%c1_516, %c0_517] : memref<9x512xf32, #tpu.memory_space<vmem>>, vector<1x512xf32>
      %747 = vector.broadcast %746 : vector<1x512xf32> to vector<24x512xf32>
      %748 = arith.mulf %745, %747 : vector<24x512xf32>
      %c15_i32_518 = arith.constant 15 : i32
      %749 = tpu.dynamic_rotate %740 by %c15_i32_518 dim 1 : vector<24x512xf32>, i32 -> vector<24x512xf32>
      %c2_519 = arith.constant 2 : index
      %c0_520 = arith.constant 0 : index
      %750 = vector.load %arg29[%c2_519, %c0_520] : memref<9x512xf32, #tpu.memory_space<vmem>>, vector<1x512xf32>
      %751 = vector.broadcast %750 : vector<1x512xf32> to vector<24x512xf32>
      %752 = arith.mulf %749, %751 : vector<24x512xf32>
      %c1_i32_521 = arith.constant 1 : i32
      %753 = tpu.dynamic_rotate %740 by %c1_i32_521 dim 1 : vector<24x512xf32>, i32 -> vector<24x512xf32>
      %c3_522 = arith.constant 3 : index
      %c0_523 = arith.constant 0 : index
      %754 = vector.load %arg29[%c3_522, %c0_523] : memref<9x512xf32, #tpu.memory_space<vmem>>, vector<1x512xf32>
      %755 = vector.broadcast %754 : vector<1x512xf32> to vector<24x512xf32>
      %756 = arith.mulf %753, %755 : vector<24x512xf32>
      %c511_i32_524 = arith.constant 511 : i32
      %757 = tpu.dynamic_rotate %740 by %c511_i32_524 dim 1 : vector<24x512xf32>, i32 -> vector<24x512xf32>
      %c5_525 = arith.constant 5 : index
      %c0_526 = arith.constant 0 : index
      %758 = vector.load %arg29[%c5_525, %c0_526] : memref<9x512xf32, #tpu.memory_space<vmem>>, vector<1x512xf32>
      %759 = vector.broadcast %758 : vector<1x512xf32> to vector<24x512xf32>
      %760 = arith.mulf %757, %759 : vector<24x512xf32>
      %c497_i32_527 = arith.constant 497 : i32
      %761 = tpu.dynamic_rotate %740 by %c497_i32_527 dim 1 : vector<24x512xf32>, i32 -> vector<24x512xf32>
      %c6_528 = arith.constant 6 : index
      %c0_529 = arith.constant 0 : index
      %762 = vector.load %arg29[%c6_528, %c0_529] : memref<9x512xf32, #tpu.memory_space<vmem>>, vector<1x512xf32>
      %763 = vector.broadcast %762 : vector<1x512xf32> to vector<24x512xf32>
      %764 = arith.mulf %761, %763 : vector<24x512xf32>
      %c496_i32_530 = arith.constant 496 : i32
      %765 = tpu.dynamic_rotate %740 by %c496_i32_530 dim 1 : vector<24x512xf32>, i32 -> vector<24x512xf32>
      %c7_531 = arith.constant 7 : index
      %c0_532 = arith.constant 0 : index
      %766 = vector.load %arg29[%c7_531, %c0_532] : memref<9x512xf32, #tpu.memory_space<vmem>>, vector<1x512xf32>
      %767 = vector.broadcast %766 : vector<1x512xf32> to vector<24x512xf32>
      %768 = arith.mulf %765, %767 : vector<24x512xf32>
      %c495_i32_533 = arith.constant 495 : i32
      %769 = tpu.dynamic_rotate %740 by %c495_i32_533 dim 1 : vector<24x512xf32>, i32 -> vector<24x512xf32>
      %c8_534 = arith.constant 8 : index
      %c0_535 = arith.constant 0 : index
      %770 = vector.load %arg29[%c8_534, %c0_535] : memref<9x512xf32, #tpu.memory_space<vmem>>, vector<1x512xf32>
      %771 = vector.broadcast %770 : vector<1x512xf32> to vector<24x512xf32>
      %772 = arith.mulf %769, %771 : vector<24x512xf32>
      %773 = tpu.concatenate %744, %748, %752, %756, %740, %760, %764, %768, %772 in 0 : vector<24x512xf32>, vector<24x512xf32>, vector<24x512xf32>, vector<24x512xf32>, vector<24x512xf32>, vector<24x512xf32>, vector<24x512xf32>, vector<24x512xf32>, vector<24x512xf32> -> vector<216x512xf32>
      %774 = arith.truncf %773 : vector<216x512xf32> to vector<216x512xbf16>
      %c0_536 = arith.constant 0 : index
      %c0_537 = arith.constant 0 : index
      %775 = vector.load %arg23[%c0_536, %c0_537] : memref<8x216xbf16, #tpu.memory_space<vmem>>, vector<8x216xbf16>
      %cst_538 = arith.constant dense<0.000000e+00> : vector<8x512xf32>
      %776 = tpu.matmul %775, %774, %cst_538 {dimension_numbers = #tpu.dot_dimension_numbers<[1], [0], [0], [1], [0, 0, 1, 1], [], []>} : vector<8x216xbf16>, vector<216x512xbf16>, vector<8x512xf32> -> vector<8x512xf32>
      %c0_539 = arith.constant 0 : index
      %c0_540 = arith.constant 0 : index
      %777 = vector.load %arg24[%c0_539, %c0_540] : memref<8x1xf32, #tpu.memory_space<vmem>>, vector<8x1xf32>
      %778 = vector.broadcast %777 : vector<8x1xf32> to vector<8x512xf32>
      %779 = arith.addf %776, %778 : vector<8x512xf32>
      %cst_541 = arith.constant 0.000000e+00 : f32
      %780 = vector.broadcast %cst_541 : f32 to vector<8x512xf32>
      %781 = arith.maximumf %779, %780 : vector<8x512xf32>
      %c17_i32_542 = arith.constant 17 : i32
      %782 = tpu.dynamic_rotate %781 by %c17_i32_542 dim 1 : vector<8x512xf32>, i32 -> vector<8x512xf32>
      %c0_543 = arith.constant 0 : index
      %c0_544 = arith.constant 0 : index
      %783 = vector.load %arg29[%c0_543, %c0_544] : memref<9x512xf32, #tpu.memory_space<vmem>>, vector<1x512xf32>
      %784 = vector.broadcast %783 : vector<1x512xf32> to vector<8x512xf32>
      %785 = arith.mulf %782, %784 : vector<8x512xf32>
      %c16_i32_545 = arith.constant 16 : i32
      %786 = tpu.dynamic_rotate %781 by %c16_i32_545 dim 1 : vector<8x512xf32>, i32 -> vector<8x512xf32>
      %c1_546 = arith.constant 1 : index
      %c0_547 = arith.constant 0 : index
      %787 = vector.load %arg29[%c1_546, %c0_547] : memref<9x512xf32, #tpu.memory_space<vmem>>, vector<1x512xf32>
      %788 = vector.broadcast %787 : vector<1x512xf32> to vector<8x512xf32>
      %789 = arith.mulf %786, %788 : vector<8x512xf32>
      %c15_i32_548 = arith.constant 15 : i32
      %790 = tpu.dynamic_rotate %781 by %c15_i32_548 dim 1 : vector<8x512xf32>, i32 -> vector<8x512xf32>
      %c2_549 = arith.constant 2 : index
      %c0_550 = arith.constant 0 : index
      %791 = vector.load %arg29[%c2_549, %c0_550] : memref<9x512xf32, #tpu.memory_space<vmem>>, vector<1x512xf32>
      %792 = vector.broadcast %791 : vector<1x512xf32> to vector<8x512xf32>
      %793 = arith.mulf %790, %792 : vector<8x512xf32>
      %c1_i32_551 = arith.constant 1 : i32
      %794 = tpu.dynamic_rotate %781 by %c1_i32_551 dim 1 : vector<8x512xf32>, i32 -> vector<8x512xf32>
      %c3_552 = arith.constant 3 : index
      %c0_553 = arith.constant 0 : index
      %795 = vector.load %arg29[%c3_552, %c0_553] : memref<9x512xf32, #tpu.memory_space<vmem>>, vector<1x512xf32>
      %796 = vector.broadcast %795 : vector<1x512xf32> to vector<8x512xf32>
      %797 = arith.mulf %794, %796 : vector<8x512xf32>
      %c511_i32_554 = arith.constant 511 : i32
      %798 = tpu.dynamic_rotate %781 by %c511_i32_554 dim 1 : vector<8x512xf32>, i32 -> vector<8x512xf32>
      %c5_555 = arith.constant 5 : index
      %c0_556 = arith.constant 0 : index
      %799 = vector.load %arg29[%c5_555, %c0_556] : memref<9x512xf32, #tpu.memory_space<vmem>>, vector<1x512xf32>
      %800 = vector.broadcast %799 : vector<1x512xf32> to vector<8x512xf32>
      %801 = arith.mulf %798, %800 : vector<8x512xf32>
      %c497_i32_557 = arith.constant 497 : i32
      %802 = tpu.dynamic_rotate %781 by %c497_i32_557 dim 1 : vector<8x512xf32>, i32 -> vector<8x512xf32>
      %c6_558 = arith.constant 6 : index
      %c0_559 = arith.constant 0 : index
      %803 = vector.load %arg29[%c6_558, %c0_559] : memref<9x512xf32, #tpu.memory_space<vmem>>, vector<1x512xf32>
      %804 = vector.broadcast %803 : vector<1x512xf32> to vector<8x512xf32>
      %805 = arith.mulf %802, %804 : vector<8x512xf32>
      %c496_i32_560 = arith.constant 496 : i32
      %806 = tpu.dynamic_rotate %781 by %c496_i32_560 dim 1 : vector<8x512xf32>, i32 -> vector<8x512xf32>
      %c7_561 = arith.constant 7 : index
      %c0_562 = arith.constant 0 : index
      %807 = vector.load %arg29[%c7_561, %c0_562] : memref<9x512xf32, #tpu.memory_space<vmem>>, vector<1x512xf32>
      %808 = vector.broadcast %807 : vector<1x512xf32> to vector<8x512xf32>
      %809 = arith.mulf %806, %808 : vector<8x512xf32>
      %c495_i32_563 = arith.constant 495 : i32
      %810 = tpu.dynamic_rotate %781 by %c495_i32_563 dim 1 : vector<8x512xf32>, i32 -> vector<8x512xf32>
      %c8_564 = arith.constant 8 : index
      %c0_565 = arith.constant 0 : index
      %811 = vector.load %arg29[%c8_564, %c0_565] : memref<9x512xf32, #tpu.memory_space<vmem>>, vector<1x512xf32>
      %812 = vector.broadcast %811 : vector<1x512xf32> to vector<8x512xf32>
      %813 = arith.mulf %810, %812 : vector<8x512xf32>
      %814 = tpu.concatenate %785, %789, %793, %797, %781, %801, %805, %809, %813 in 0 : vector<8x512xf32>, vector<8x512xf32>, vector<8x512xf32>, vector<8x512xf32>, vector<8x512xf32>, vector<8x512xf32>, vector<8x512xf32>, vector<8x512xf32>, vector<8x512xf32> -> vector<72x512xf32>
      %815 = arith.truncf %814 : vector<72x512xf32> to vector<72x512xbf16>
      %c0_566 = arith.constant 0 : index
      %c0_567 = arith.constant 0 : index
      %816 = vector.load %arg25[%c0_566, %c0_567] : memref<8x72xbf16, #tpu.memory_space<vmem>>, vector<8x72xbf16>
      %cst_568 = arith.constant dense<0.000000e+00> : vector<8x512xf32>
      %817 = tpu.matmul %816, %815, %cst_568 {dimension_numbers = #tpu.dot_dimension_numbers<[1], [0], [0], [1], [0, 0, 1, 1], [], []>} : vector<8x72xbf16>, vector<72x512xbf16>, vector<8x512xf32> -> vector<8x512xf32>
      %c0_569 = arith.constant 0 : index
      %c0_570 = arith.constant 0 : index
      %818 = vector.load %arg26[%c0_569, %c0_570] : memref<8x1xf32, #tpu.memory_space<vmem>>, vector<8x1xf32>
      %819 = vector.broadcast %818 : vector<8x1xf32> to vector<8x512xf32>
      %820 = arith.addf %817, %819 : vector<8x512xf32>
      %cst_571 = arith.constant 0.000000e+00 : f32
      %821 = vector.broadcast %cst_571 : f32 to vector<8x512xf32>
      %822 = arith.maximumf %820, %821 : vector<8x512xf32>
      %c0_572 = arith.constant 0 : index
      %c0_573 = arith.constant 0 : index
      %823 = vector.load %arg27[%c0_572, %c0_573] : memref<8x8xbf16, #tpu.memory_space<vmem>>, vector<8x8xbf16>
      %824 = arith.truncf %822 : vector<8x512xf32> to vector<8x512xbf16>
      %cst_574 = arith.constant dense<0.000000e+00> : vector<8x512xf32>
      %825 = tpu.matmul %823, %824, %cst_574 {dimension_numbers = #tpu.dot_dimension_numbers<[1], [0], [0], [1], [0, 0, 1, 1], [], []>} : vector<8x8xbf16>, vector<8x512xbf16>, vector<8x512xf32> -> vector<8x512xf32>
      %c0_575 = arith.constant 0 : index
      %c0_576 = arith.constant 0 : index
      %826 = vector.load %arg28[%c0_575, %c0_576] : memref<8x1xf32, #tpu.memory_space<vmem>>, vector<8x1xf32>
      %827 = vector.broadcast %826 : vector<8x1xf32> to vector<8x512xf32>
      %828 = arith.addf %825, %827 : vector<8x512xf32>
      %829 = vector.extract_strided_slice %828 {offsets = [0, 0], sizes = [2, 512], strides = [1, 1]} : vector<8x512xf32> to vector<2x512xf32>
      %830 = arith.index_cast %arg35 : i32 to index
      %c0_577 = arith.constant 0 : index
      %c0_578 = arith.constant 0 : index
      %831 = vector.load %arg34[%830, %c0_577, %c0_578] : memref<6x3x512xf32, #tpu.memory_space<vmem>>, vector<1x2x512xf32>
      %832 = vector.shape_cast %831 : vector<1x2x512xf32> to vector<2x512xf32>
      %833 = vector.shape_cast %829 : vector<2x512xf32> to vector<1x2x512xf32>
      tpu.vector_store %arg34[%830, %c0_577, %c0_578], %833 {strides = array<i32>} : memref<6x3x512xf32, #tpu.memory_space<vmem>>, vector<1x2x512xf32>,
      %834 = arith.index_cast %arg35 : i32 to index
      %c2_579 = arith.constant 2 : index
      %c0_580 = arith.constant 0 : index
      %835 = vector.load %arg34[%834, %c2_579, %c0_580] : memref<6x3x512xf32, #tpu.memory_space<vmem>>, vector<1x1x512xf32>
      %836 = vector.shape_cast %835 : vector<1x1x512xf32> to vector<1x512xf32>
      %837 = vector.shape_cast %268 : vector<1x512xf32> to vector<1x1x512xf32>
      tpu.vector_store %arg34[%834, %c2_579, %c0_580], %837 {strides = array<i32>} : memref<6x3x512xf32, #tpu.memory_space<vmem>>, vector<1x1x512xf32>,
      scf.yield %828 : vector<8x512xf32>
    }
    %c5_i32_379 = arith.constant 5 : i32
    return
  }
}

</mosaic_0001>

<bundles_post_ra>
// kernel: rrwnet_forward.1
= control target key start
LH: loop header
LB: loop body
LE: loop exit
PB: predicated region body
PF: predicated region fallthrough
CT: control target
= control target key end

     0   :  { %v14372_v0 = vlaneseq  ;;  %s8826_s6 = smov 17   ;;  %s8827_s7 = smov 16   ;;  %v14373_v6 = vmov 0   ;;  %vm498_vm9 = vcmask 1043456   ;;  %vm494_vm10 = vcmask 588800   ;;  %s14371_s0 = inlined_call_operand.smem [shape: u32[35], index: -1, kind: input, shape index: {}] }
   0x1   :  { %s1_s5 = sld [smem:[%s14371_s0]]   ;;  %s8828_s8 = smov 15   ;;  %543 = vmatprep.mubr.bf16.mxu0 %v14373_v6  ;;  %584 = vmatprep.mubr.bf16.mxu1 %v14373_v6  ;;  %vm8847_vm11 = vmmov 0   ;;  %vm1458_vm12 = vcmask 130048   ;;  %vm2201_vm13 = vcmask 719872   ;;  %vm2570_vm14 = vcmask 64512  }
   0x2   :  { %v8897_v1 = vshrl.u32 %v14372_v0, 7  ;;  %s8829_s9 = smov 1   ;;  %s8830_s10 = smov 127   ;;  %8492 = vset.pattern.permute.xlu0 %v14373_v6  ;;  %8493 = vset.pattern.permute.xlu1 %v14373_v6  ;;  %v8985_v10 = vand.u32 127, %v14372_v0 }
   0x3   :  { %s8831_s11 = smov 113   ;;  %s8832_s12 = smov 112  }
   0x4   :  { %14648 = vst [vmem:[#allocation2_spill] sm:$0xff] %v8897_v1  ;;  %vm5244_vm0 = vcmp.eq.s32.totalorder %v8897_v1, 2  ;;  %s14497_s13 = smov 111   ;;  %s8835_s14 = smov 2   ;;  %v8988_v11 = vsub.s32 1, %v8897_v1  ;;  %vm156_vm1 = vcmp.lt.s32.totalorder %v8985_v10, 17 }
   0x5   :  { %s7842_s17 = sld [smem:[%s14371_s0 + %s8835_s14]]   ;;  %s8836_s18 = smov 29   ;;  %v8994_v16 = vsub.s32 0, %v8897_v1  ;;  %v8997_v17 = vsub.s32 3, %v8897_v1  ;;  %v9000_v18 = vsub.s32 2, %v8897_v1  ;;  %vm195_vm2 = vcmp.lt.s32.totalorder %v8985_v10, 16 }
   0x6   :  { %s8982_s21 = sld [smem:[%s14371_s0 + %s8836_s18]]   ;;  %14649 = vst [vmem:[#allocation3_spill] sm:$0xff] %v8988_v11  ;;  %vm235_vm3 = vcmp.lt.s32.totalorder %v8985_v10, 15  ;;  %vm275_vm4 = vcmp.lt.s32.totalorder %v8985_v10, 1  ;;  %vm315_vm5 = vcmp.lt.s32.totalorder %v8985_v10, 127  ;;  %vm395_vm6 = vcmp.lt.s32.totalorder %v8985_v10, 112  ;;  %s8837_s25 = smov 4  }
   0x7   :  { %v8899_v2 = vld [vmem:[%s1_s5 + $0x10] sm:$0xff]  ;;  %v8901_v3 = vld [vmem:[%s1_s5] sm:$0xff]  ;;  %v8908_v4 = vld [vmem:[%s1_s5 + $0x18] sm:$0xff]  ;;  %14650 = vst [vmem:[#allocation4_spill] sm:$0xff] %v8994_v16  ;;  %vm355_vm7 = vcmp.lt.s32.totalorder %v8985_v10, 113  ;;  %vm435_vm8 = vcmp.lt.s32.totalorder %v8985_v10, 111  ;;  %s7841_s24 = sld [smem:[%s14371_s0 + %s8829_s9]]  }
   0x8   :  { %150 = vrot.lane.b32.xlu1 %v8899_v2, %s8826_s6  ;;  %146 = vrot.lane.b32.xlu0 %v8901_v3, %s8826_s6  ;;  %v8910_v5 = vld [vmem:[%s1_s5 + $0x8] sm:$0xff]  ;;  %14651 = vst [vmem:[#allocation5_spill] sm:$0xff] %v8997_v17  ;;  %14652 = vst [vmem:[#allocation6_spill] sm:$0xff] %v9000_v18  ;;  %s7844_s28 = sld [smem:[%s14371_s0 + %s8837_s25]]   ;;  %s8838_s29 = smov 3  }
   0x9   :  { %s7843_s2 = sld [smem:[%s14371_s0 + %s8838_s29]]   ;;  %s8839_s3 = smov 31  }
   0xa   :  { %s9410_s14 = sld [smem:[%s14371_s0 + %s8839_s3]]   ;;  %s8841_s15 = smov 8  }
   0xb   :  { %v488_v7 = vld [vmem:[%s7842_s17] sm:$0xff]  ;;  %s8842_s16 = smov 9   ;;  %s8843_s17 = smov 5  }
   0xc   :  { %152 = vrot.lane.b32.xlu1 %v8908_v4, %s8826_s6  ;;  %148 = vrot.lane.b32.xlu0 %v8910_v5, %s8826_s6  ;;  %v161_v12 = vld [vmem:[%s8982_s21] ss:$8 sm:$0xf]  ;;  %v7875_v13 = vld [vmem:[%s8982_s21 + $0x1] ss:$8 sm:$0xf]  ;;  %s9547_s20 = sld [smem:[%s14371_s0 + %s8843_s17]]  }
   0xd   :  { %v9004_v19 = vrot.slane %v161_v12, %v8988_v11  ;;  %v9007_v20 = vrot.slane %v7875_v13, %v8988_v11  ;;  %v9012_v24 = vrot.slane %v161_v12, %v8994_v16  ;;  %v9015_v25 = vrot.slane %v7875_v13, %v8994_v16  ;;  %v7876_v53 = vld [vmem:[%s8982_s21 + $0x2] ss:$8 sm:$0xf]  ;;  %v7877_v54 = vld [vmem:[%s8982_s21 + $0x3] ss:$8 sm:$0xf] }
   0xe   :  { %v9018_v26 = vrot.slane %v161_v12, %v8997_v17  ;;  %v9025_v29 = vrot.slane %v7875_v13, %v8997_v17  ;;  %v9028_v30 = vrot.slane %v161_v12, %v9000_v18  ;;  %v9035_v34 = vrot.slane %v7875_v13, %v9000_v18  ;;  %s8844_s22 = smov 7   ;;  %s8845_s23 = smov 6  }
   0xf   :  { %v9056_v57 = vrot.slane %v7876_v53, %v8988_v11  ;;  %v9059_v58 = vrot.slane %v7877_v54, %v8988_v11  ;;  %v9064_v60 = vrot.slane %v7876_v53, %v8994_v16  ;;  %v9067_v61 = vrot.slane %v7876_v53, %v9000_v18  ;;  %s7846_s26 = sld [smem:[%s14371_s0 + %s8845_s23]]   ;;  %s8846_s27 = smov 121  }
  0x10   :  { %189 = vrot.lane.b32.xlu1 %v8910_v5, %s8827_s7  ;;  %187 = vrot.lane.b32.xlu0 %v8901_v3, %s8827_s7  ;;  %v9070_v62 = vrot.slane %v7876_v53, %v8997_v17  ;;  %v9077_v12 = vrot.slane %v7877_v54, %v8994_v16  ;;  %v9080_v13 = vrot.slane %v7877_v54, %v9000_v18  ;;  %s8849_s29 = smov 120   ;;  %s8850_s30 = smov 30  }
  0x11   :  { %14653 = vst [vmem:[#allocation7_spill] sm:$0xff] %v9064_v60  ;;  %14654 = vst [vmem:[#allocation8_spill] sm:$0xff] %v9067_v61  ;;  %s9563_s3 = sld [smem:[%s14371_s0 + %s8850_s30]]   ;;  %s8851_s23 = smov 32  }
  0x12   :  { %14655 = vst [vmem:[#allocation9_spill] sm:$0xff] %v9070_v62  ;;  %14656 = vst [vmem:[#allocation10_spill] sm:$0xff] %v9077_v12  ;;  %s9635_s17 = sld [smem:[%s14371_s0 + %s8844_s22]]   ;;  %s8852_s4 = smov 10  }
  0x13   :  { %14657 = vst [vmem:[#allocation11_spill] sm:$0xff] %v9080_v13  ;;  %s7850_s18 = sld [smem:[%s14371_s0 + %s8852_s4]]   ;;  %s8853_s19 = smov 12  }
  0x14   :  { %193 = vrot.lane.b32.xlu1 %v8908_v4, %s8827_s7  ;;  %191 = vrot.lane.b32.xlu0 %v8899_v2, %s8827_s7  ;;  %s8854_s25 = smov 14   ;;  %s8855_s4 = smov 11  }
  0x15   :  { %s11046_s30 = sld [smem:[%s14371_s0 + %s8828_s8]]   ;;  %s8860_s1 = smov 18  }
  0x16   :  { %s11135_s5 = sld [smem:[%s14371_s0 + %s8860_s1]]  }
  0x18   :  { %229 = vrot.lane.b32.xlu1 %v8910_v5, %s8828_s8  ;;  %227 = vrot.lane.b32.xlu0 %v8901_v3, %s8828_s8 }
  0x1c   :  { %233 = vrot.lane.b32.xlu1 %v8908_v4, %s8828_s8  ;;  %231 = vrot.lane.b32.xlu0 %v8899_v2, %s8828_s8 }
  0x20   :  { %269 = vrot.lane.b32.xlu1 %v8910_v5, %s8829_s9  ;;  %267 = vrot.lane.b32.xlu0 %v8901_v3, %s8829_s9 }
  0x24   :  { %273 = vrot.lane.b32.xlu1 %v8908_v4, %s8829_s9  ;;  %271 = vrot.lane.b32.xlu0 %v8899_v2, %s8829_s9 }
  0x28   :  { %309 = vrot.lane.b32.xlu1 %v8910_v5, %s8830_s10  ;;  %307 = vrot.lane.b32.xlu0 %v8901_v3, %s8830_s10 }
  0x2c   :  { %313 = vrot.lane.b32.xlu1 %v8908_v4, %s8830_s10  ;;  %311 = vrot.lane.b32.xlu0 %v8899_v2, %s8830_s10 }
  0x30   :  { %349 = vrot.lane.b32.xlu1 %v8910_v5, %s8831_s11  ;;  %347 = vrot.lane.b32.xlu0 %v8901_v3, %s8831_s11 }
  0x34   :  { %353 = vrot.lane.b32.xlu1 %v8908_v4, %s8831_s11  ;;  %351 = vrot.lane.b32.xlu0 %v8899_v2, %s8831_s11 }
  0x38   :  { %389 = vrot.lane.b32.xlu1 %v8910_v5, %s8832_s12  ;;  %387 = vrot.lane.b32.xlu0 %v8901_v3, %s8832_s12 }
  0x3c   :  { %393 = vrot.lane.b32.xlu1 %v8908_v4, %s8832_s12  ;;  %391 = vrot.lane.b32.xlu0 %v8899_v2, %s8832_s12 }
  0x40   :  { %429 = vrot.lane.b32.xlu1 %v8910_v5, %s14497_s13  ;;  %427 = vrot.lane.b32.xlu0 %v8901_v3, %s14497_s13 }
  0x44   :  { %433 = vrot.lane.b32.xlu1 %v8908_v4, %s14497_s13  ;;  %431 = vrot.lane.b32.xlu0 %v8899_v2, %s14497_s13 }
  0x48   :  { %491 = vperm.xlu0 %8492, %v488_v7  }
  0x7a   :  { %v151_v8 = vpop.permute.xlu1 %150  ;;  %v147_v9 = vpop.permute.xlu0 %146 }
  0x7e   :  { %v153_v14 = vpop.permute.xlu1 %152  ;;  %v149_v15 = vpop.permute.xlu0 %148 }
  0x7f   :  { %v159_v21 = vsel %vm156_vm1, %v147_v9, %v149_v15  ;;  %v160_v27 = vsel %vm156_vm1, %v153_v14, %v147_v9  ;;  %v157_v33 = vsel %vm156_vm1, %v151_v8, %v153_v14  ;;  %v158_v35 = vsel %vm156_vm1, %v149_v15, %v151_v8 }
  0x80   :  { %v184_v31 = vmul.f32 %v9004_v19, %v159_v21  ;;  %v183_v39 = vmul.f32 %v9012_v24, %v160_v27  ;;  %v186_v42 = vmul.f32 %v9018_v26, %v157_v33  ;;  %v185_v46 = vmul.f32 %v9028_v30, %v158_v35 }
  0x82   :  { %v190_v22 = vpop.permute.xlu1 %189  ;;  %v188_v23 = vpop.permute.xlu0 %187 }
  0x83   :  { %v198_v28 = vsel %vm195_vm2, %v188_v23, %v190_v22 }
  0x84   :  { %v224_v32 = vmul.f32 %v9007_v20, %v198_v28 }
  0x86   :  { %v194_v36 = vpop.permute.xlu1 %193  ;;  %v192_v37 = vpop.permute.xlu0 %191  ;;  %v468_v38 = vpack.c.bf16 %v224_v32, %v184_v31 }
  0x87   :  { %v199_v40 = vsel %vm195_vm2, %v194_v36, %v188_v23  ;;  %v197_v41 = vsel %vm195_vm2, %v190_v22, %v192_v37  ;;  %v196_v43 = vsel %vm195_vm2, %v192_v37, %v194_v36  ;;  %v9087_v22 = vrot.slane %v7877_v54, %v8997_v17 }
  0x88   :  { %511 = vmatprep.subr.bf16.mxu0 %v468_v38  ;;  %v223_v44 = vmul.f32 %v9015_v25, %v199_v40  ;;  %v226_v45 = vmul.f32 %v9025_v29, %v196_v43  ;;  %v225_v47 = vmul.f32 %v9035_v34, %v197_v41 }
  0x89   :  { %14658 = vst [vmem:[#allocation12_spill] sm:$0xff] %v9087_v22 }
  0x8a   :  { %v230_v48 = vpop.permute.xlu1 %229  ;;  %v228_v49 = vpop.permute.xlu0 %227  ;;  %v467_v50 = vpack.c.bf16 %v223_v44, %v183_v39  ;;  %v470_v51 = vpack.c.bf16 %v226_v45, %v186_v42  ;;  %v469_v52 = vpack.c.bf16 %v225_v47, %v185_v46  ;;  %v7878_v42 = vld [vmem:[%s8982_s21 + $0x5] ss:$8 sm:$0xf] }
  0x8b   :  { %v238_v59 = vsel %vm235_vm3, %v228_v49, %v230_v48 }
  0x8c   :  { %512 = vmatpush1.bf16.msra.mxu0 %v467_v50  ;;  %552 = vmatprep.subr.bf16.mxu1 %v470_v51  ;;  %v264_v14 = vmul.f32 %v9056_v57, %v238_v59  ;;  %v9114_v51 = vrot.slane %v7878_v42, %v8988_v11 }
  0x8d   :  { %553 = vmatpush1.bf16.msra.mxu1 %v469_v52  ;;  %v9117_v52 = vrot.slane %v7878_v42, %v9000_v18 }
  0x8e   :  { %v234_v55 = vpop.permute.xlu1 %233  ;;  %v232_v56 = vpop.permute.xlu0 %231  ;;  %14661 = vst [vmem:[#allocation15_spill] sm:$0xff] %v9114_v51 }
  0x8f   :  { %v239_v8 = vsel %vm235_vm3, %v234_v55, %v228_v49  ;;  %v237_v15 = vsel %vm235_vm3, %v230_v48, %v232_v56  ;;  %v236_v23 = vsel %vm235_vm3, %v232_v56, %v234_v55  ;;  %v9106_v48 = vrot.slane %v7878_v42, %v8994_v16  ;;  %14662 = vst [vmem:[#allocation16_spill] sm:$0xff] %v9117_v52 }
  0x90   :  { %v263_v27 = vmul.f32 %v9064_v60, %v239_v8  ;;  %v265_v33 = vmul.f32 %v9067_v61, %v237_v15  ;;  %v266_v38 = vmul.f32 %v9070_v62, %v236_v23  ;;  %v9109_v49 = vrot.slane %v7878_v42, %v8997_v17 }
  0x91   :  { %14659 = vst [vmem:[#allocation13_spill] sm:$0xff] %v9106_v48 }
  0x92   :  { %v270_v63 = vpop.permute.xlu1 %269  ;;  %v268_v7 = vpop.permute.xlu0 %267  ;;  %14660 = vst [vmem:[#allocation14_spill] sm:$0xff] %v9109_v49 }
  0x93   :  { %v278_v9 = vsel %vm275_vm4, %v268_v7, %v270_v63 }
  0x94   :  { %v304_v21 = vmul.f32 %v9059_v58, %v278_v9 }
  0x96   :  { %v274_v28 = vpop.permute.xlu1 %273  ;;  %v272_v31 = vpop.permute.xlu0 %271  ;;  %v472_v32 = vpack.c.bf16 %v304_v21, %v264_v14 }
  0x97   :  { %v279_v35 = vsel %vm275_vm4, %v274_v28, %v268_v7  ;;  %v276_v36 = vsel %vm275_vm4, %v272_v31, %v274_v28  ;;  %v277_v37 = vsel %vm275_vm4, %v270_v63, %v272_v31 }
  0x98   :  { %v303_v39 = vmul.f32 %v9077_v12, %v279_v35  ;;  %v305_v40 = vmul.f32 %v9080_v13, %v277_v37  ;;  %v306_v41 = vmul.f32 %v9087_v22, %v276_v36  ;;  %513 = vmatprep.subr.bf16.mxu0 %v472_v32  ;;  %v7879_v35 = vld [vmem:[%s8982_s21 + $0x6] ss:$8 sm:$0xf] }
  0x99   :  { %v9146_v37 = vrot.slane %v7879_v35, %v9000_v18 }
  0x9a   :  { %v310_v43 = vpop.permute.xlu1 %309  ;;  %v308_v44 = vpop.permute.xlu0 %307  ;;  %v471_v45 = vpack.c.bf16 %v303_v39, %v263_v27  ;;  %v474_v46 = vpack.c.bf16 %v306_v41, %v266_v38  ;;  %v473_v47 = vpack.c.bf16 %v305_v40, %v265_v33  ;;  %v7880_v33 = vld [vmem:[%s8982_s21 + $0x7] ss:$8 sm:$0xf]  ;;  %v7881_v40 = vld [vmem:[%s8982_s21 + $0x20] ss:$8 sm:$0xf] }
  0x9b   :  { %v318_v50 = vsel %vm315_vm5, %v308_v44, %v310_v43  ;;  %14665 = vst [vmem:[#allocation19_spill] sm:$0xff] %v9146_v37  ;;  %v9151_v39 = vrot.slane %v7880_v33, %v8994_v16  ;;  %v9157_v42 = vrot.slane %v7880_v33, %v8997_v17 }
  0x9c   :  { %514 = vmatpush1.bf16.msra.mxu0 %v471_v45  ;;  %554 = vmatprep.subr.bf16.mxu1 %v474_v46  ;;  %v343_v55 = vmul.f32 %v9106_v48, %v318_v50  ;;  %v9167_v45 = vrot.slane %v7879_v35, %v8994_v16 }
  0x9d   :  { %555 = vmatpush1.bf16.msra.mxu1 %v473_v47  ;;  %14666 = vst [vmem:[#allocation20_spill] sm:$0xff] %v9151_v39  ;;  %14667 = vst [vmem:[#allocation21_spill] sm:$0xff] %v9157_v42 }
  0x9e   :  { %v314_v53 = vpop.permute.xlu1 %313  ;;  %v312_v54 = vpop.permute.xlu0 %311  ;;  %v475_v28 = vpack.c.bf16 %v343_v55, %v8901_v3  ;;  %14670 = vst [vmem:[#allocation24_spill] sm:$0xff] %v9167_v45 }
  0x9f   :  { %v319_v56 = vsel %vm315_vm5, %v314_v53, %v308_v44  ;;  %v316_v59 = vsel %vm315_vm5, %v312_v54, %v314_v53  ;;  %v317_v63 = vsel %vm315_vm5, %v310_v43, %v312_v54  ;;  %v9160_v43 = vrot.slane %v7880_v33, %v8988_v11 }
  0xa0   :  { %v346_v7 = vmul.f32 %v9109_v49, %v319_v56  ;;  %v344_v8 = vmul.f32 %v9114_v51, %v317_v63  ;;  %v345_v9 = vmul.f32 %v9117_v52, %v316_v59  ;;  %v9163_v44 = vrot.slane %v7880_v33, %v9000_v18 }
  0xa1   :  { %14668 = vst [vmem:[#allocation22_spill] sm:$0xff] %v9160_v43  ;;  %v9176_v56 = vrot.slane %v7881_v40, %v8994_v16 }
  0xa2   :  { %v350_v14 = vpop.permute.xlu1 %349  ;;  %v348_v15 = vpop.permute.xlu0 %347  ;;  %v476_v21 = vpack.c.bf16 %v344_v8, %v8910_v5  ;;  %v478_v23 = vpack.c.bf16 %v346_v7, %v8908_v4  ;;  %v477_v27 = vpack.c.bf16 %v345_v9, %v8899_v2  ;;  %v9138_v5 = vrot.slane %v7879_v35, %v8997_v17  ;;  %14669 = vst [vmem:[#allocation23_spill] sm:$0xff] %v9163_v44 }
  0xa3   :  { %v9141_v2 = vrot.slane %v7879_v35, %v8988_v11  ;;  %v358_v47 = vsel %vm355_vm7, %v348_v15, %v350_v14  ;;  %14671 = vst [vmem:[#allocation25_spill] sm:$0xff] %v9176_v56 }
  0xa4   :  { %515 = vmatprep.subr.bf16.mxu0 %v476_v21  ;;  %556 = vmatprep.subr.bf16.mxu1 %v478_v23  ;;  %14663 = vst [vmem:[#allocation17_spill] sm:$0xff] %v9138_v5  ;;  %v383_v23 = vmul.f32 %v9167_v45, %v358_v47 }
  0xa5   :  { %516 = vmatpush1.bf16.msra.mxu0 %v475_v28  ;;  %557 = vmatpush1.bf16.msra.mxu1 %v477_v27  ;;  %14664 = vst [vmem:[#allocation18_spill] sm:$0xff] %v9141_v2 }
  0xa6   :  { %v354_v31 = vpop.permute.xlu1 %353  ;;  %v352_v32 = vpop.permute.xlu0 %351 }
  0xa7   :  { %v359_v36 = vsel %vm355_vm7, %v354_v31, %v348_v15  ;;  %v357_v38 = vsel %vm355_vm7, %v350_v14, %v352_v32  ;;  %v356_v46 = vsel %vm355_vm7, %v352_v32, %v354_v31 }
  0xa8   :  { %v386_v50 = vmul.f32 %v9138_v5, %v359_v36  ;;  %v384_v53 = vmul.f32 %v9141_v2, %v357_v38  ;;  %v385_v9 = vmul.f32 %v9146_v37, %v356_v46  ;;  %v9196_v36 = vrot.slane %v7881_v40, %v8988_v11 }
  0xaa   :  { %v390_v3 = vpop.permute.xlu1 %389  ;;  %v388_v4 = vpop.permute.xlu0 %387  ;;  %14673 = vst [vmem:[#allocation27_spill] sm:$0xff] %v9196_v36 }
  0xab   :  { %v398_v41 = vsel %vm395_vm6, %v388_v4, %v390_v3 }
  0xac   :  { %v423_v59 = vmul.f32 %v9151_v39, %v398_v41  ;;  %v9200_v41 = vrot.slane %v7881_v40, %v9000_v18 }
  0xae   :  { %v394_v54 = vpop.permute.xlu1 %393  ;;  %v392_v55 = vpop.permute.xlu0 %391  ;;  %14674 = vst [vmem:[#allocation28_spill] sm:$0xff] %v9200_v41 }
  0xaf   :  { %v399_v63 = vsel %vm395_vm6, %v394_v54, %v388_v4  ;;  %v396_v7 = vsel %vm395_vm6, %v392_v55, %v394_v54  ;;  %v397_v8 = vsel %vm395_vm6, %v390_v3, %v392_v55  ;;  %v479_v4 = vpack.c.bf16 %v423_v59, %v383_v23 }
  0xb0   :  { %v426_v14 = vmul.f32 %v9157_v42, %v399_v63  ;;  %v424_v15 = vmul.f32 %v9160_v43, %v397_v8  ;;  %v425_v21 = vmul.f32 %v9163_v44, %v396_v7  ;;  %v9193_v3 = vrot.slane %v7881_v40, %v8997_v17 }
  0xb2   :  { %v430_v27 = vpop.permute.xlu1 %429  ;;  %v428_v28 = vpop.permute.xlu0 %427  ;;  %v480_v31 = vpack.c.bf16 %v424_v15, %v384_v53  ;;  %v482_v32 = vpack.c.bf16 %v426_v14, %v386_v50  ;;  %v481_v33 = vpack.c.bf16 %v425_v21, %v385_v9  ;;  %14672 = vst [vmem:[#allocation26_spill] sm:$0xff] %v9193_v3  ;;  %v487_v21 = vld [vmem:[%s7841_s24] sm:$0xf]  ;;  %s7852_s24 = sld [smem:[%s14371_s0 + %s8853_s19]]   ;;  %s8856_s19 = smov 13  }
  0xb3   :  { %v438_v35 = vsel %vm435_vm8, %v428_v28, %v430_v27 }
  0xb4   :  { %517 = vmatprep.subr.bf16.mxu0 %v480_v31  ;;  %558 = vmatprep.subr.bf16.mxu1 %v482_v32  ;;  %v463_v38 = vmul.f32 %v9176_v56, %v438_v35 }
  0xb5   :  { %518 = vmatpush1.bf16.msra.mxu0 %v479_v4  ;;  %559 = vmatpush1.bf16.msra.mxu1 %v481_v33 }
  0xb6   :  { %v434_v46 = vpop.permute.xlu1 %433  ;;  %v432_v47 = vpop.permute.xlu0 %431  ;;  %v483_v59 = vpack.c.bf16 %v463_v38, %v463_v38 }
  0xb7   :  { %v439_v50 = vsel %vm435_vm8, %v434_v46, %v428_v28  ;;  %v436_v53 = vsel %vm435_vm8, %v432_v47, %v434_v46  ;;  %v437_v54 = vsel %vm435_vm8, %v430_v27, %v432_v47 }
  0xb8   :  { %v466_v40 = vmul.f32 %v9193_v3, %v439_v50  ;;  %v464_v55 = vmul.f32 %v9196_v36, %v437_v54  ;;  %v465_v63 = vmul.f32 %v9200_v41, %v436_v53  ;;  %v500_v14 = vsel %vm498_vm9, %v483_v59, 0 }
  0xba   :  { %v486_v7 = vpack.c.bf16 %v466_v40, %v466_v40  ;;  %v484_v8 = vpack.c.bf16 %v464_v55, %v464_v55  ;;  %v485_v9 = vpack.c.bf16 %v465_v63, %v465_v63  ;;  %v746_v63 = vld [vmem:[%s7844_s28] sm:$0xff]  ;;  %s8848_s28 = smov 119  }
  0xbc   :  { %7882 = vmatprep.subr.msk.bf16.mxu0 %vm498_vm9, %v484_v8  ;;  %7884 = vmatprep.subr.msk.bf16.mxu1 %vm498_vm9, %v486_v7  ;;  %v506_v15 = vsel %vm498_vm9, %v485_v9, 0 }
  0xbd   :  { %520 = vmatpush1.bf16.msra.mxu0 %v500_v14  ;;  %561 = vmatpush1.bf16.msra.mxu1 %v506_v15 }
  0xc0   :  { %7883 = vmatmul.mubr.msk.bf16.vlgmr.msra.gmra.mrb[0].mxu0 %vm494_vm10, %v487_v21  ;;  %7885 = vmatmul.mubr.msk.bf16.vlgmr.msra.gmra.mrb[0].mxu1 %vm494_vm10, %v487_v21 }
  0xc1   :  { %799 = vmatprep.mubr.bf16.mxu0 %v14373_v6  ;;  %840 = vmatprep.mubr.bf16.mxu1 %v14373_v6 }
  0xc7   :  { %v492_v23 = vpop.permute.xlu0 %491 }
 0x193   :  { %v545_v27 = vpop.f32.mrb[0].mxu0  ;;  %v586_v28 = vpop.f32.mrb[0].mxu1 }
 0x194   :  { %v546_v31 = vadd.f32 %v545_v27, %v492_v23  ;;  %v587_v32 = vadd.f32 %v586_v28, %v492_v23  ;;  %v547_v33 = vpop.f32.mrb[1].mxu0  ;;  %v588_v35 = vpop.f32.mrb[1].mxu1 }
 0x195   :  { %v549_v4 = vpop.f32.mrb[2].mxu0  ;;  %v590_v38 = vpop.f32.mrb[2].mxu1  ;;  %v548_v50 = vadd.f32 %v547_v33, %v492_v23  ;;  %v589_v55 = vadd.f32 %v588_v35, %v492_v23 }
 0x196   :  { %v9223_v46 = vmax.f32 %v546_v31, 0.0  ;;  %v9225_v47 = vmax.f32 %v587_v32, 0.0  ;;  %v550_v53 = vpop.f32.mrb[3].mxu0  ;;  %v591_v54 = vpop.f32.mrb[3].mxu1 }
 0x197   :  { %v9231_v40 = vmax.f32 %v548_v50, 0.0  ;;  %v9237_v59 = vmax.f32 %v589_v55, 0.0 }
 0x198   :  { %601 = vrot.lane.b32.xlu0 %v9225_v47, %s8826_s6  ;;  %597 = vrot.lane.b32.xlu1 %v9223_v46, %s8826_s6 }
 0x19c   :  { %613 = vrot.lane.b32.xlu0 %v9223_v46, %s8827_s7  ;;  %599 = vrot.lane.b32.xlu1 %v9231_v40, %s8826_s6 }
 0x1a0   :  { %617 = vrot.lane.b32.xlu0 %v9225_v47, %s8827_s7  ;;  %603 = vrot.lane.b32.xlu1 %v9237_v59, %s8826_s6 }
 0x1a4   :  { %629 = vrot.lane.b32.xlu0 %v9223_v46, %s8828_s8  ;;  %615 = vrot.lane.b32.xlu1 %v9231_v40, %s8827_s7 }
 0x1a8   :  { %633 = vrot.lane.b32.xlu0 %v9225_v47, %s8828_s8  ;;  %619 = vrot.lane.b32.xlu1 %v9237_v59, %s8827_s7 }
 0x1ac   :  { %645 = vrot.lane.b32.xlu0 %v9223_v46, %s8829_s9  ;;  %631 = vrot.lane.b32.xlu1 %v9231_v40, %s8828_s8 }
 0x1b0   :  { %649 = vrot.lane.b32.xlu0 %v9225_v47, %s8829_s9  ;;  %635 = vrot.lane.b32.xlu1 %v9237_v59, %s8828_s8 }
 0x1b4   :  { %661 = vrot.lane.b32.xlu0 %v9223_v46, %s8830_s10  ;;  %647 = vrot.lane.b32.xlu1 %v9231_v40, %s8829_s9 }
 0x1b8   :  { %665 = vrot.lane.b32.xlu0 %v9225_v47, %s8830_s10  ;;  %651 = vrot.lane.b32.xlu1 %v9237_v59, %s8829_s9 }
 0x1bc   :  { %677 = vrot.lane.b32.xlu0 %v9223_v46, %s8831_s11  ;;  %663 = vrot.lane.b32.xlu1 %v9231_v40, %s8830_s10 }
 0x1c0   :  { %681 = vrot.lane.b32.xlu0 %v9225_v47, %s8831_s11  ;;  %667 = vrot.lane.b32.xlu1 %v9237_v59, %s8830_s10 }
 0x1c4   :  { %693 = vrot.lane.b32.xlu0 %v9223_v46, %s8832_s12  ;;  %679 = vrot.lane.b32.xlu1 %v9231_v40, %s8831_s11 }
 0x1c8   :  { %697 = vrot.lane.b32.xlu0 %v9225_v47, %s8832_s12  ;;  %683 = vrot.lane.b32.xlu1 %v9237_v59, %s8831_s11 }
 0x1cc   :  { %709 = vrot.lane.b32.xlu0 %v9223_v46, %s14497_s13  ;;  %695 = vrot.lane.b32.xlu1 %v9231_v40, %s8832_s12 }
 0x1d0   :  { %713 = vrot.lane.b32.xlu0 %v9225_v47, %s14497_s13  ;;  %699 = vrot.lane.b32.xlu1 %v9237_v59, %s8832_s12 }
 0x1d4   :  { %749 = vperm.xlu0 %8492, %v746_v63   ;;  %711 = vrot.lane.b32.xlu1 %v9231_v40, %s14497_s13 }
 0x1d8   :  { %715 = vrot.lane.b32.xlu1 %v9237_v59, %s14497_s13 }
 0x20a   :  { %v602_v7 = vpop.permute.xlu0 %601  ;;  %v598_v8 = vpop.permute.xlu1 %597 }
 0x20e   :  { %v614_v9 = vpop.permute.xlu0 %613  ;;  %v600_v14 = vpop.permute.xlu1 %599 }
 0x20f   :  { %v607_v23 = vsel %vm156_vm1, %v598_v8, %v600_v14  ;;  %v606_v50 = vsel %vm156_vm1, %v600_v14, %v602_v7 }
 0x210   :  { %v610_v32 = vmul.f32 %v607_v23, %v9004_v19 }
 0x212   :  { %v618_v15 = vpop.permute.xlu0 %617  ;;  %v604_v21 = vpop.permute.xlu1 %603 }
 0x213   :  { %v605_v4 = vsel %vm156_vm1, %v602_v7, %v604_v21  ;;  %v608_v38 = vsel %vm156_vm1, %v604_v21, %v598_v8  ;;  %v611_v7 = vmul.f32 %v606_v50, %v9028_v30 }
 0x214   :  { %v612_v0 = vmul.f32 %v605_v4, %v9018_v26 }
 0x216   :  { %v630_v27 = vpop.permute.xlu0 %629  ;;  %v616_v28 = vpop.permute.xlu1 %615 }
 0x217   :  { %v623_v31 = vsel %vm195_vm2, %v614_v9, %v616_v28  ;;  %v622_v33 = vsel %vm195_vm2, %v616_v28, %v618_v15 }
 0x218   :  { %v626_v35 = vmul.f32 %v623_v31, %v9007_v20  ;;  %v627_v63 = vmul.f32 %v622_v33, %v9035_v34  ;;  %v609_v31 = vmul.f32 %v608_v38, %v9012_v24 }
 0x21a   :  { %v634_v53 = vpop.permute.xlu0 %633  ;;  %v620_v54 = vpop.permute.xlu1 %619  ;;  %v726_v55 = vpack.c.bf16 %v626_v35, %v610_v32  ;;  %v727_v6 = vpack.c.bf16 %v627_v63, %v611_v7 }
 0x21b   :  { %v621_v23 = vsel %vm195_vm2, %v618_v15, %v620_v54  ;;  %v624_v28 = vsel %vm195_vm2, %v620_v54, %v614_v9 }
 0x21c   :  { %v625_v8 = vmul.f32 %v624_v28, %v9015_v25  ;;  %v628_v21 = vmul.f32 %v621_v23, %v9025_v29  ;;  %767 = vmatprep.subr.bf16.mxu0 %v726_v55 }
 0x21e   :  { %v725_v14 = vpack.c.bf16 %v625_v8, %v609_v31  ;;  %v646_v32 = vpop.permute.xlu0 %645  ;;  %v632_v33 = vpop.permute.xlu1 %631  ;;  %v728_v35 = vpack.c.bf16 %v628_v21, %v612_v0 }
 0x21f   :  { %v639_v4 = vsel %vm235_vm3, %v630_v27, %v632_v33  ;;  %v638_v28 = vsel %vm235_vm3, %v632_v33, %v634_v53 }
 0x220   :  { %768 = vmatpush1.bf16.msra.mxu0 %v725_v14  ;;  %808 = vmatprep.subr.bf16.mxu1 %v728_v35  ;;  %v642_v50 = vmul.f32 %v639_v4, %v9056_v57 }
 0x221   :  { %809 = vmatpush1.bf16.msra.mxu1 %v727_v6 }
 0x222   :  { %v650_v9 = vpop.permute.xlu0 %649  ;;  %v636_v15 = vpop.permute.xlu1 %635 }
 0x223   :  { %v637_v6 = vsel %vm235_vm3, %v634_v53, %v636_v15  ;;  %v640_v63 = vsel %vm235_vm3, %v636_v15, %v630_v27  ;;  %v643_v53 = vmul.f32 %v638_v28, %v9067_v61 }
 0x224   :  { %v641_v4 = vmul.f32 %v640_v63, %v9064_v60 }
 0x226   :  { %v662_v38 = vpop.permute.xlu0 %661  ;;  %v648_v54 = vpop.permute.xlu1 %647 }
 0x227   :  { %v655_v55 = vsel %vm275_vm4, %v646_v32, %v648_v54  ;;  %v654_v23 = vsel %vm275_vm4, %v648_v54, %v650_v9  ;;  %v644_v54 = vmul.f32 %v637_v6, %v9070_v62 }
 0x228   :  { %v658_v0 = vmul.f32 %v655_v55, %v9059_v58  ;;  %v659_v7 = vmul.f32 %v654_v23, %v9080_v13 }
 0x22a   :  { %v666_v31 = vpop.permute.xlu0 %665  ;;  %v652_v8 = vpop.permute.xlu1 %651  ;;  %v730_v21 = vpack.c.bf16 %v658_v0, %v642_v50  ;;  %v731_v0 = vpack.c.bf16 %v659_v7, %v643_v53 }
 0x22b   :  { %v653_v14 = vsel %vm275_vm4, %v650_v9, %v652_v8  ;;  %v656_v35 = vsel %vm275_vm4, %v652_v8, %v646_v32 }
 0x22c   :  { %v657_v27 = vmul.f32 %v656_v35, %v9077_v12  ;;  %v660_v15 = vmul.f32 %v653_v14, %v9087_v22  ;;  %769 = vmatprep.subr.bf16.mxu0 %v730_v21 }
 0x22e   :  { %v729_v33 = vpack.c.bf16 %v657_v27, %v641_v4  ;;  %v678_v55 = vpop.permute.xlu0 %677  ;;  %v664_v50 = vpop.permute.xlu1 %663  ;;  %v732_v23 = vpack.c.bf16 %v660_v15, %v644_v54 }
 0x22f   :  { %v670_v9 = vsel %vm315_vm5, %v664_v50, %v666_v31  ;;  %v671_v32 = vsel %vm315_vm5, %v662_v38, %v664_v50 }
 0x230   :  { %v673_v6 = vmul.f32 %v671_v32, %v9106_v48  ;;  %v674_v63 = vmul.f32 %v670_v9, %v9114_v51  ;;  %770 = vmatpush1.bf16.msra.mxu0 %v729_v33  ;;  %810 = vmatprep.subr.bf16.mxu1 %v732_v23 }
 0x231   :  { %811 = vmatpush1.bf16.msra.mxu1 %v731_v0 }
 0x232   :  { %v733_v28 = vpack.c.bf16 %v673_v6, %v9223_v46  ;;  %v682_v8 = vpop.permute.xlu0 %681  ;;  %v668_v21 = vpop.permute.xlu1 %667  ;;  %v734_v14 = vpack.c.bf16 %v674_v63, %v9231_v40 }
 0x233   :  { %v669_v7 = vsel %vm315_vm5, %v666_v31, %v668_v21  ;;  %v672_v35 = vsel %vm315_vm5, %v668_v21, %v662_v38 }
 0x234   :  { %v675_v4 = vmul.f32 %v669_v7, %v9117_v52  ;;  %v676_v54 = vmul.f32 %v672_v35, %v9109_v49  ;;  %771 = vmatprep.subr.bf16.mxu0 %v734_v14 }
 0x235   :  { %772 = vmatpush1.bf16.msra.mxu0 %v733_v28 }
 0x236   :  { %v735_v27 = vpack.c.bf16 %v675_v4, %v9225_v47  ;;  %v694_v15 = vpop.permute.xlu0 %693  ;;  %v680_v46 = vpop.permute.xlu1 %679  ;;  %v736_v53 = vpack.c.bf16 %v676_v54, %v9237_v59 }
 0x237   :  { %v686_v31 = vsel %vm355_vm7, %v680_v46, %v682_v8  ;;  %v687_v38 = vsel %vm355_vm7, %v678_v55, %v680_v46 }
 0x238   :  { %812 = vmatprep.subr.bf16.mxu1 %v736_v53  ;;  %v689_v0 = vmul.f32 %v687_v38, %v9167_v45  ;;  %v690_v59 = vmul.f32 %v686_v31, %v9141_v2 }
 0x239   :  { %813 = vmatpush1.bf16.msra.mxu1 %v735_v27 }
 0x23a   :  { %v698_v40 = vpop.permute.xlu0 %697  ;;  %v684_v33 = vpop.permute.xlu1 %683 }
 0x23b   :  { %v685_v63 = vsel %vm355_vm7, %v682_v8, %v684_v33  ;;  %v688_v28 = vsel %vm355_vm7, %v684_v33, %v678_v55 }
 0x23c   :  { %v691_v54 = vmul.f32 %v685_v63, %v9146_v37  ;;  %v692_v27 = vmul.f32 %v688_v28, %v9138_v5 }
 0x23e   :  { %v696_v50 = vpop.permute.xlu1 %695  ;;  %v710_v9 = vpop.permute.xlu0 %709 }
 0x23f   :  { %v702_v23 = vsel %vm395_vm6, %v696_v50, %v698_v40  ;;  %v703_v47 = vsel %vm395_vm6, %v694_v15, %v696_v50 }
 0x240   :  { %v705_v32 = vmul.f32 %v703_v47, %v9151_v39  ;;  %v706_v6 = vmul.f32 %v702_v23, %v9160_v43  ;;  %v2189_v43 = vld [vmem:[%s7850_s18] sm:$0xff]  ;;  %s7851_s18 = sld [smem:[%s14371_s0 + %s8855_s4]]   ;;  %s8859_s4 = smov 34  }
 0x242   :  { %v737_v21 = vpack.c.bf16 %v705_v32, %v689_v0  ;;  %v700_v14 = vpop.permute.xlu1 %699  ;;  %v738_v7 = vpack.c.bf16 %v706_v6, %v690_v59  ;;  %v714_v55 = vpop.permute.xlu0 %713 }
 0x243   :  { %v701_v35 = vsel %vm395_vm6, %v698_v40, %v700_v14  ;;  %v704_v4 = vsel %vm395_vm6, %v700_v14, %v694_v15 }
 0x244   :  { %v707_v46 = vmul.f32 %v701_v35, %v9163_v44  ;;  %v708_v8 = vmul.f32 %v704_v4, %v9157_v42  ;;  %773 = vmatprep.subr.bf16.mxu0 %v738_v7  ;;  %v8495_v4 = vld [vmem:[%s9410_s14] sm:$0xff]  }
 0x245   :  { %774 = vmatpush1.bf16.msra.mxu0 %v737_v21  ;;  %v745_v21 = vld [vmem:[%s7843_s2] sm:$0xf]  ;;  %s7849_s2 = sld [smem:[%s14371_s0 + %s8842_s16]]  }
 0x246   :  { %v739_v53 = vpack.c.bf16 %v707_v46, %v691_v54  ;;  %v712_v40 = vpop.permute.xlu1 %711  ;;  %v740_v33 = vpack.c.bf16 %v708_v8, %v692_v27  ;;  %v8496_v54 = vld [vmem:[%s9410_s14 + $0xc0] sm:$0xff]   ;;  %v8498_v46 = vld [vmem:[%s9410_s14 + $0x48] sm:$0xff]  }
 0x247   :  { %v718_v15 = vsel %vm435_vm8, %v712_v40, %v714_v55  ;;  %v719_v31 = vsel %vm435_vm8, %v710_v9, %v712_v40  ;;  %v8497_v27 = vld [vmem:[%s9410_s14 + $0x80] sm:$0xff]   ;;  %v8499_v8 = vld [vmem:[%s9410_s14 + $0x8] sm:$0xff]   ;;  %v8502_v40 = vld [vmem:[%s9410_s14 + $0x50] sm:$0xff]  }
 0x248   :  { %v721_v38 = vmul.f32 %v719_v31, %v9176_v56  ;;  %v722_v50 = vmul.f32 %v718_v15, %v9196_v36  ;;  %814 = vmatprep.subr.bf16.mxu1 %v740_v33  ;;  %v8503_v33 = vld [vmem:[%s9410_s14 + $0x10] sm:$0xff]  }
 0x249   :  { %815 = vmatpush1.bf16.msra.mxu1 %v739_v53  ;;  %v8501_v53 = vld [vmem:[%s9410_s14 + $0x88] sm:$0xff]   ;;  %v8504_v15 = vld [vmem:[%s9410_s14 + $0xd0] sm:$0xff]  }
 0x24a   :  { %v741_v23 = vpack.c.bf16 %v721_v38, %v721_v38  ;;  %v742_v47 = vpack.c.bf16 %v722_v50, %v722_v50  ;;  %v716_v0 = vpop.permute.xlu1 %715  ;;  %v8505_v31 = vld [vmem:[%s9410_s14 + $0x90] sm:$0xff]   ;;  %v8506_v38 = vld [vmem:[%s9410_s14 + $0x58] sm:$0xff]  }
 0x24b   :  { %v717_v59 = vsel %vm435_vm8, %v714_v55, %v716_v0  ;;  %v720_v32 = vsel %vm435_vm8, %v716_v0, %v710_v9  ;;  %v8494_v9 = vld [vmem:[%s9410_s14 + $0x40] sm:$0xff]   ;;  %v8500_v55 = vld [vmem:[%s9410_s14 + $0xc8] sm:$0xff]   ;;  %v8507_v50 = vld [vmem:[%s9410_s14 + $0x18] sm:$0xff]  }
 0x24c   :  { %v723_v6 = vmul.f32 %v717_v59, %v9200_v41  ;;  %v724_v63 = vmul.f32 %v720_v32, %v9193_v3  ;;  %7886 = vmatprep.subr.msk.bf16.mxu0 %vm498_vm9, %v742_v47  ;;  %v756_v28 = vsel %vm498_vm9, %v741_v23, 0  ;;  %v8508_v23 = vld [vmem:[%s9410_s14 + $0xd8] sm:$0xff]   ;;  %v8510_v32 = vld [vmem:[%s9410_s14 + $0x60] sm:$0xff]  }
 0x24d   :  { %776 = vmatpush1.bf16.msra.mxu0 %v756_v28  ;;  %v8509_v47 = vld [vmem:[%s9410_s14 + $0x98] sm:$0xff]   ;;  %v8511_v28 = vld [vmem:[%s9410_s14 + $0x20] sm:$0xff]  }
 0x24e   :  { %v743_v14 = vpack.c.bf16 %v723_v6, %v723_v6  ;;  %v744_v7 = vpack.c.bf16 %v724_v63, %v724_v63  ;;  %8198 = vmatprep.subr.bf16.mxu0 %v8494_v9 }
 0x250   :  { %7887 = vmatmul.mubr.msk.bf16.vlgmr.msra.gmra.mrb[4].mxu0 %vm494_vm10, %v745_v21  ;;  %7888 = vmatprep.subr.msk.bf16.mxu1 %vm498_vm9, %v744_v7  ;;  %v762_v35 = vsel %vm498_vm9, %v743_v14, 0 }
 0x251   :  { %817 = vmatpush1.bf16.msra.mxu1 %v762_v35  ;;  %8199 = vmatpush3.bf16.msra.mxu0 %v8495_v4  ;;  %v8513_v35 = vld [vmem:[%s9410_s14 + $0xa0] sm:$0xff]  }
 0x252   :  { %8220 = vmatprep.subr.bf16.mxu1 %v8496_v54  ;;  %8200 = vmatprep.subr.bf16.mxu0 %v8498_v46  ;;  %v8514_v46 = vld [vmem:[%s9410_s14 + $0x68] sm:$0xff]  }
 0x253   :  { %v750_v0 = vpop.permute.xlu0 %749 }
 0x254   :  { %7889 = vmatmul.mubr.msk.bf16.vlgmr.msra.gmra.mrb[4].mxu1 %vm494_vm10, %v745_v21  ;;  %v8512_v21 = vld [vmem:[%s9410_s14 + $0xe0] sm:$0xff]  }
 0x255   :  { %8221 = vmatpush3.bf16.msra.mxu1 %v8497_v27  ;;  %8201 = vmatpush3.bf16.msra.mxu0 %v8499_v8 }
 0x256   :  { %8222 = vmatprep.subr.bf16.mxu1 %v8500_v55  ;;  %8202 = vmatprep.subr.bf16.mxu0 %v8502_v40  ;;  %v8516_v40 = vld [vmem:[%s9410_s14 + $0xe8] sm:$0xff]  }
 0x259   :  { %8223 = vmatpush3.bf16.msra.mxu1 %v8501_v53  ;;  %8203 = vmatpush3.bf16.msra.mxu0 %v8503_v33  ;;  %v8515_v53 = vld [vmem:[%s9410_s14 + $0x28] sm:$0xff]  }
 0x25a   :  { %8224 = vmatprep.subr.bf16.mxu1 %v8504_v15  ;;  %8204 = vmatprep.subr.bf16.mxu0 %v8506_v38 }
 0x25d   :  { %8225 = vmatpush3.bf16.msra.mxu1 %v8505_v31  ;;  %8205 = vmatpush3.bf16.msra.mxu0 %v8507_v50  ;;  %v8517_v31 = vld [vmem:[%s9410_s14 + $0xa8] sm:$0xff]  }
 0x25e   :  { %8226 = vmatprep.subr.bf16.mxu1 %v8508_v23  ;;  %8206 = vmatprep.subr.bf16.mxu0 %v8510_v32  ;;  %v8521_v32 = vld [vmem:[%s9410_s14 + $0xb0] sm:$0xff]  }
 0x261   :  { %8227 = vmatpush3.bf16.msra.mxu1 %v8509_v47  ;;  %8207 = vmatpush3.bf16.msra.mxu0 %v8511_v28  ;;  %v8518_v47 = vld [vmem:[%s9410_s14 + $0x70] sm:$0xff]   ;;  %v8524_v28 = vld [vmem:[%s9410_s14 + $0xf8] sm:$0xff]  }
 0x262   :  { %8228 = vmatprep.subr.bf16.mxu1 %v8512_v21  ;;  %8208 = vmatprep.subr.bf16.mxu0 %v8514_v46  ;;  %v8525_v21 = vld [vmem:[%s9410_s14 + $0xb8] sm:$0xff]  }
 0x265   :  { %8229 = vmatpush3.bf16.msra.mxu1 %v8513_v35  ;;  %8209 = vmatpush3.bf16.msra.mxu0 %v8515_v53 }
 0x266   :  { %8230 = vmatprep.subr.bf16.mxu1 %v8516_v40  ;;  %8210 = vmatprep.subr.bf16.mxu0 %v8518_v47 }
 0x269   :  { %8231 = vmatpush3.bf16.msra.mxu1 %v8517_v31 }
 0x323   :  { %v801_v59 = vpop.f32.mrb[4].mxu0 }
 0x324   :  { %v802_v6 = vadd.f32 %v801_v59, %v750_v0  ;;  %v803_v63 = vpop.f32.mrb[5].mxu0  ;;  %v8520_v59 = vld [vmem:[%s9410_s14 + $0xf0] sm:$0xff]  }
 0x325   :  { %v804_v14 = vadd.f32 %v803_v63, %v750_v0  ;;  %v805_v7 = vpop.f32.mrb[6].mxu0  ;;  %8232 = vmatprep.subr.bf16.mxu1 %v8520_v59  ;;  %v8523_v63 = vld [vmem:[%s9410_s14 + $0x38] sm:$0xff]  }
 0x326   :  { %v9432_v9 = vmax.f32 %v802_v6, 0.0  ;;  %v806_v4 = vpop.f32.mrb[7].mxu0  ;;  %8233 = vmatpush3.bf16.msra.mxu1 %v8521_v32  ;;  %v8522_v6 = vld [vmem:[%s9410_s14 + $0x78] sm:$0xff]  }
 0x327   :  { %v9434_v54 = vmax.f32 %v804_v14, 0.0  ;;  %v842_v27 = vpop.f32.mrb[4].mxu1  ;;  %8234 = vmatprep.subr.bf16.mxu1 %v8524_v28  ;;  %v14679_v14 = vmov 0  }
 0x328   :  { %14675 = vst [vmem:[#allocation29_spill] sm:$0xff] %v9432_v9  ;;  %v843_v8 = vadd.f32 %v842_v27, %v750_v0  ;;  %853 = vrot.lane.b32.xlu1 %v9432_v9, %s8830_s10  ;;  %v844_v55 = vpop.f32.mrb[5].mxu1 }
 0x329   :  { %14676 = vst [vmem:[#allocation30_spill] sm:$0xff] %v9434_v54  ;;  %v845_v33 = vadd.f32 %v844_v55, %v750_v0  ;;  %855 = vrot.lane.b32.xlu0 %v9434_v54, %s8830_s10  ;;  %v846_v15 = vpop.f32.mrb[6].mxu1  ;;  %v8519_v0 = vld [vmem:[%s9410_s14 + $0x30] sm:$0xff]  }
 0x32a   :  { %v9444_v38 = vmax.f32 %v843_v8, 0.0  ;;  %v847_v50 = vpop.f32.mrb[7].mxu1  ;;  %8211 = vmatpush3.bf16.msra.mxu0 %v8519_v0  ;;  %8235 = vmatpush3.bf16.msra.mxu1 %v8525_v21 }
 0x32b   :  { %v9446_v23 = vmax.f32 %v845_v33, 0.0  ;;  %8212 = vmatprep.subr.bf16.mxu0 %v8522_v6  ;;  %1462 = vmatprep.subr.bf16.mxu1 %v14679_v14 }
 0x32c   :  { %14677 = vst [vmem:[#allocation31_spill] sm:$0xff] %v9444_v38  ;;  %857 = vrot.lane.b32.xlu1 %v9444_v38, %s8830_s10 }
 0x32d   :  { %14678 = vst [vmem:[#allocation32_spill] sm:$0xff] %v9446_v23  ;;  %859 = vrot.lane.b32.xlu0 %v9446_v23, %s8830_s10 }
 0x32e   :  { %8213 = vmatpush3.bf16.msra.mxu0 %v8523_v63 }
 0x330   :  { %869 = vrot.lane.b32.xlu1 %v9432_v9, %s8832_s12 }
 0x331   :  { %871 = vrot.lane.b32.xlu0 %v9434_v54, %s8832_s12 }
 0x334   :  { %873 = vrot.lane.b32.xlu1 %v9444_v38, %s8832_s12 }
 0x335   :  { %875 = vrot.lane.b32.xlu0 %v9446_v23, %s8832_s12 }
 0x338   :  { %885 = vrot.lane.b32.xlu1 %v9432_v9, %s14497_s13 }
 0x339   :  { %887 = vrot.lane.b32.xlu0 %v9434_v54, %s14497_s13 }
 0x33c   :  { %889 = vrot.lane.b32.xlu1 %v9444_v38, %s14497_s13 }
 0x33d   :  { %891 = vrot.lane.b32.xlu0 %v9446_v23, %s14497_s13 }
 0x39a   :  { %v854_v7 = vpop.permute.xlu1 %853 }
 0x39b   :  { %v856_v35 = vpop.permute.xlu0 %855 }
 0x39c   :  { %v9479_v40 = vsel %vm315_vm5, %v854_v7, %v856_v35 }
 0x39d   :  { %14680 = vst [vmem:[#allocation33_spill] sm:$0xff] %v9479_v40  ;;  %v865_v0 = vmax.f32 %v9432_v9, %v9479_v40 }
 0x39e   :  { %v858_v4 = vpop.permute.xlu1 %857 }
 0x39f   :  { %v860_v27 = vpop.permute.xlu0 %859  ;;  %v9483_v33 = vsel %vm315_vm5, %v856_v35, %v858_v4 }
 0x3a0   :  { %14681 = vst [vmem:[#allocation34_spill] sm:$0xff] %v9483_v33  ;;  %v9487_v15 = vsel %vm315_vm5, %v858_v4, %v860_v27  ;;  %v9491_v31 = vsel %vm315_vm5, %v860_v27, %v854_v7  ;;  %v866_v6 = vmax.f32 %v9434_v54, %v9483_v33 }
 0x3a1   :  { %14682 = vst [vmem:[#allocation35_spill] sm:$0xff] %v9487_v15  ;;  %14683 = vst [vmem:[#allocation36_spill] sm:$0xff] %v9491_v31  ;;  %v867_v7 = vmax.f32 %v9444_v38, %v9487_v15  ;;  %v868_v35 = vmax.f32 %v9446_v23, %v9491_v31 }
 0x3a2   :  { %v870_v46 = vpop.permute.xlu1 %869 }
 0x3a3   :  { %v872_v8 = vpop.permute.xlu0 %871 }
 0x3a4   :  { %v9495_v50 = vsel %vm395_vm6, %v870_v46, %v872_v8 }
 0x3a5   :  { %14684 = vst [vmem:[#allocation37_spill] sm:$0xff] %v9495_v50  ;;  %v881_v4 = vmax.f32 %v865_v0, %v9495_v50 }
 0x3a6   :  { %v874_v55 = vpop.permute.xlu1 %873 }
 0x3a7   :  { %v876_v53 = vpop.permute.xlu0 %875  ;;  %v9501_v59 = vsel %vm395_vm6, %v872_v8, %v874_v55 }
 0x3a8   :  { %14685 = vst [vmem:[#allocation38_spill] sm:$0xff] %v9501_v59  ;;  %v9507_v63 = vsel %vm395_vm6, %v874_v55, %v876_v53  ;;  %v9511_v28 = vsel %vm395_vm6, %v876_v53, %v870_v46  ;;  %v882_v27 = vmax.f32 %v866_v6, %v9501_v59 }
 0x3a9   :  { %14686 = vst [vmem:[#allocation39_spill] sm:$0xff] %v9507_v63  ;;  %14687 = vst [vmem:[#allocation40_spill] sm:$0xff] %v9511_v28  ;;  %v883_v55 = vmax.f32 %v867_v7, %v9507_v63  ;;  %v884_v46 = vmax.f32 %v868_v35, %v9511_v28  ;;  %v8526_v63 = vld [vmem:[%s9547_s20] sm:$0xff]   ;;  %s7848_s20 = sld [smem:[%s14371_s0 + %s8841_s15]]  }
 0x3aa   :  { %v886_v47 = vpop.permute.xlu1 %885 }
 0x3ab   :  { %v888_v32 = vpop.permute.xlu0 %887 }
 0x3ac   :  { %v9515_v21 = vsel %vm435_vm8, %v886_v47, %v888_v32 }
 0x3ad   :  { %14688 = vst [vmem:[#allocation41_spill] sm:$0xff] %v9515_v21  ;;  %v897_v53 = vmax.f32 %v881_v4, %v9515_v21 }
 0x3ae   :  { %v890_v8 = vpop.permute.xlu1 %889 }
 0x3af   :  { %v9528_v17 = vsel %vm435_vm8, %v888_v32, %v890_v8  ;;  %v892_v18 = vpop.permute.xlu0 %891  ;;  %v901_v11 = vpack.c.bf16 %v897_v53, %v897_v53 }
 0x3b0   :  { %14689 = vst [vmem:[#allocation42_spill] sm:$0xff] %v9528_v17  ;;  %v9532_v16 = vsel %vm435_vm8, %v890_v8, %v892_v18  ;;  %v9536_v0 = vsel %vm435_vm8, %v892_v18, %v886_v47  ;;  %v898_v6 = vmax.f32 %v882_v27, %v9528_v17  ;;  %v14402_v8 = vmov 0.0  }
 0x3b1   :  { %14690 = vst [vmem:[#allocation43_spill] sm:$0xff] %v9532_v16  ;;  %14691 = vst [vmem:[#allocation44_spill] sm:$0xff] %v9536_v0  ;;  %v899_v7 = vmax.f32 %v883_v55, %v9532_v16  ;;  %v900_v35 = vmax.f32 %v884_v46, %v9536_v0  ;;  %8348 = vmatprep.subr.bf16.mxu0 %v14402_v8  ;;  %v9587_v0 = vld [vmem:[%s9563_s3 + $0x6] ss:$0 sm:$0xff] }
 0x3b2   :  { %v902_v4 = vpack.c.bf16 %v898_v6, %v898_v6 }
 0x3b3   :  { %v903_v1 = vpack.c.bf16 %v899_v7, %v899_v7  ;;  %v904_v32 = vpack.c.bf16 %v900_v35, %v900_v35 }
 0x3b4   :  { %1193 = vmatprep.mubr.bf16.mxu0 %v902_v4  ;;  %v9574_v4 = vld [vmem:[%s9563_s3 + $0x3] ss:$0 sm:$0xff] }
 0x3b5   :  { %1194 = vmatmul.mubr.bf16.vlgmr.msra.gmra.mrb[8].mxu0 %v901_v11  ;;  %1233 = vmatprep.mubr.bf16.mxu1 %v904_v32  ;;  %v1312_v11 = vld [vmem:[%s7846_s26] sm:$0xff] }
 0x3b6   :  { %1234 = vmatmul.mubr.bf16.vlgmr.msra.gmra.mrb[8].mxu1 %v903_v1  ;;  %8358 = vmatprep.mubr.msk.bf16.mxu0 %vm8847_vm11, %v14402_v8  ;;  %v1313_v1 = vld [vmem:[%s7846_s26 + $0x8] sm:$0xff]  ;;  %v9577_v32 = vld [vmem:[%s9563_s3 + $0x2] ss:$0 sm:$0xff]  ;;  %s9698_s26 = sld [smem:[%s14371_s0 + %s8851_s23]]  }
 0x3b7   :  { %s10794_s23 = sld [smem:[%s14371_s0 + %s8827_s7]]  }
 0x488   :  { %v8214_v3 = vpop.f32.mrb[8].mxu0 }
 0x489   :  { %v8215_v18 = vpop.f32.mrb[9].mxu0  ;;  %v8236_v47 = vpop.f32.mrb[8].mxu1 }
 0x48a   :  { %v8216_v41 = vadd.f32 %v8215_v18, %v8214_v3  ;;  %v8217_v27 = vpop.f32.mrb[10].mxu0  ;;  %v8237_v17 = vpop.f32.mrb[9].mxu1 }
 0x48b   :  { %v8238_v55 = vadd.f32 %v8237_v17, %v8236_v47  ;;  %v8218_v16 = vpop.f32.mrb[11].mxu0  ;;  %v8239_v46 = vpop.f32.mrb[10].mxu1  ;;  %v9569_v17 = vld [vmem:[%s9563_s3] ss:$0 sm:$0xff] }
 0x48c   :  { %v8240_v6 = vpop.f32.mrb[11].mxu1  ;;  %v9566_v16 = vld [vmem:[%s9563_s3 + $0x1] ss:$0 sm:$0xff] }
 0x48d   :  { %v1236_v53 = vadd.f32 %v8238_v55, %v8216_v41  ;;  %v9583_v6 = vld [vmem:[%s9563_s3 + $0x5] ss:$0 sm:$0xff] }
 0x48f   :  { %1249 = vrot.lane.b32.xlu0 %v1236_v53, %s8841_s15  ;;  %1241 = vrot.lane.b32.xlu1 %v1236_v53, %s8842_s16 }
 0x493   :  { %1265 = vrot.lane.b32.xlu0 %v1236_v53, %s8829_s9  ;;  %1257 = vrot.lane.b32.xlu1 %v1236_v53, %s8844_s22 }
 0x497   :  { %1281 = vrot.lane.b32.xlu0 %v1236_v53, %s8846_s27  ;;  %1273 = vrot.lane.b32.xlu1 %v1236_v53, %s8830_s10 }
 0x49b   :  { %1297 = vrot.lane.b32.xlu0 %v1236_v53, %s8848_s28  ;;  %1289 = vrot.lane.b32.xlu1 %v1236_v53, %s8849_s29 }
 0x49f   :  { %1321 = vperm.xlu0 %8492, %v1313_v1   ;;  %1316 = vperm.xlu1 %8493, %v1312_v11  }
 0x501   :  { %v1250_v3 = vpop.permute.xlu0 %1249  ;;  %v1242_v41 = vpop.permute.xlu1 %1241 }
 0x502   :  { %v1256_v7 = vmul.f32 %v9566_v16, %v1250_v3  ;;  %v1248_v35 = vmul.f32 %v9569_v17, %v1242_v41 }
 0x504   :  { %v1305_v18 = vpack.c.bf16 %v1256_v7, %v1248_v35  ;;  %v9590_v7 = vld [vmem:[%s9563_s3 + $0x8] ss:$0 sm:$0xff]  ;;  %v9594_v35 = vld [vmem:[%s9563_s3 + $0x7] ss:$0 sm:$0xff] }
 0x505   :  { %v1266_v47 = vpop.permute.xlu0 %1265  ;;  %v1258_v27 = vpop.permute.xlu1 %1257 }
 0x506   :  { %v1272_v55 = vmul.f32 %v9574_v4, %v1266_v47  ;;  %v1264_v46 = vmul.f32 %v9577_v32, %v1258_v27  ;;  %8349 = vmatpush3.bf16.msra.mxu0 %v1305_v18 }
 0x507   :  { %8350 = vmatprep.subr.bf16.mxu0 %v14402_v8 }
 0x508   :  { %v1306_v1 = vpack.c.bf16 %v1272_v55, %v1264_v46 }
 0x509   :  { %v1282_v11 = vpop.permute.xlu0 %1281  ;;  %v1274_v3 = vpop.permute.xlu1 %1273 }
 0x50a   :  { %v1280_v41 = vmul.f32 %v9583_v6, %v1274_v3  ;;  %8351 = vmatpush3.bf16.msra.mxu0 %v1306_v1  ;;  %v1288_v21 = vmul.f32 %v9587_v0, %v1282_v11 }
 0x50b   :  { %8352 = vmatprep.subr.bf16.mxu0 %v14402_v8 }
 0x50c   :  { %v1307_v18 = vpack.c.bf16 %v1280_v41, %v1236_v53 }
 0x50d   :  { %v1298_v47 = vpop.permute.xlu0 %1297  ;;  %v1290_v27 = vpop.permute.xlu1 %1289 }
 0x50e   :  { %v1304_v55 = vmul.f32 %v9590_v7, %v1298_v47  ;;  %v1296_v46 = vmul.f32 %v9594_v35, %v1290_v27  ;;  %8353 = vmatpush3.bf16.msra.mxu0 %v1307_v18 }
 0x50f   :  { %8354 = vmatprep.subr.bf16.mxu0 %v14402_v8 }
 0x510   :  { %v1308_v1 = vpack.c.bf16 %v1296_v46, %v1288_v21  ;;  %v1309_v3 = vpack.c.bf16 %v1304_v55, %v1304_v55 }
 0x512   :  { %8355 = vmatpush3.bf16.msra.mxu0 %v1308_v1  ;;  %v1333_v56 = vsel %vm498_vm9, %v1309_v3, 0  ;;  %v1437_v1 = vld [vmem:[%s7848_s20] sm:$0xff]  ;;  %v1438_v3 = vld [vmem:[%s7848_s20 + $0x8] sm:$0xff]  ;;  %s11267_s20 = sld [smem:[%s14371_s0 + %s8826_s6]]  }
 0x513   :  { %8356 = vmatprep.subr.bf16.mxu0 %v14402_v8 }
 0x516   :  { %8357 = vmatpush3.bf16.msra.mxu0 %v1333_v56  ;;  %v8560_v56 = vld [vmem:[%s9698_s26 + $0xa0] ss:$16 sps:$4 sm:$0xff]  }
 0x519   :  { %8359 = vmatmul.mubr.msk.bf16.vlgmr.msra.gmra.mrb[12].mxu0 %vm494_vm10, %v8526_v63  ;;  %v8527_v63 = vld [vmem:[%s9635_s17 + $0x4] ss:$8 sps:$4 sm:$0xff]  }
 0x51a   :  { %1730 = vmatprep.mubr.bf16.mxu0 %v14679_v14  ;;  %7934 = vmatprep.mubr.msk.bf16.mxu1 %vm1458_vm12, %v8527_v63  ;;  %v8556_v63 = vld [vmem:[%s9698_s26 + $0x84] ss:$16 sps:$4 sm:$0xff]  }
 0x51e   :  { %v1317_v53 = vpop.permute.xlu1 %1316  ;;  %v1322_v18 = vpop.permute.xlu0 %1321 }
 0x5ec   :  { %v1369_v11 = vpop.f32.mrb[12].mxu0 }
 0x5ed   :  { %v1370_v41 = vadd.f32 %v1369_v11, %v1317_v53  ;;  %v8360_v47 = vpop.f32.mrb[13].mxu0  ;;  %v8530_v53 = vld [vmem:[%s9698_s26] ss:$16 sps:$4 sm:$0xff]   ;;  %v8532_v11 = vld [vmem:[%s9698_s26 + $0x4] ss:$16 sps:$4 sm:$0xff]  }
 0x5ee   :  { %v1372_v27 = vpop.f32.mrb[14].mxu0  ;;  %1698 = vmatprep.subr.bf16.mxu0 %v8532_v11  ;;  %v8536_v47 = vld [vmem:[%s9698_s26 + $0x20] ss:$16 sps:$4 sm:$0xff]  }
 0x5ef   :  { %v9605_v36 = vmax.f32 %v1370_v41, 0.0  ;;  %v1373_v21 = vadd.f32 %v1372_v27, %v1322_v18  ;;  %v8361_v55 = vpop.f32.mrb[15].mxu0  ;;  %v8538_v41 = vld [vmem:[%s9698_s26 + $0x24] ss:$16 sps:$4 sm:$0xff]   ;;  %1699 = vmatpush1.bf16.msra.mxu0 %v8530_v53  ;;  %v8542_v27 = vld [vmem:[%s9698_s26 + $0x40] ss:$16 sps:$4 sm:$0xff]  }
 0x5f0   :  { %1700 = vmatprep.subr.bf16.mxu0 %v8538_v41  ;;  %v8544_v18 = vld [vmem:[%s9698_s26 + $0x44] ss:$16 sps:$4 sm:$0xff]   ;;  %v8548_v55 = vld [vmem:[%s9698_s26 + $0x60] ss:$16 sps:$4 sm:$0xff]  }
 0x5f1   :  { %v9607_v46 = vmax.f32 %v1373_v21, 0.0  ;;  %1378 = vrot.lane.b32.xlu1 %v9605_v36, %s8842_s16  ;;  %v8550_v21 = vld [vmem:[%s9698_s26 + $0x64] ss:$16 sps:$4 sm:$0xff]  }
 0x5f3   :  { %1380 = vrot.lane.b32.xlu0 %v9607_v46, %s8842_s16  ;;  %1701 = vmatpush1.bf16.msra.mxu0 %v8536_v47 }
 0x5f4   :  { %1702 = vmatprep.subr.bf16.mxu0 %v8544_v18 }
 0x5f5   :  { %1384 = vrot.lane.b32.xlu1 %v9605_v36, %s8841_s15 }
 0x5f7   :  { %1386 = vrot.lane.b32.xlu0 %v9607_v46, %s8841_s15  ;;  %1703 = vmatpush1.bf16.msra.mxu0 %v8542_v27 }
 0x5f8   :  { %1704 = vmatprep.subr.bf16.mxu0 %v8550_v21 }
 0x5f9   :  { %1390 = vrot.lane.b32.xlu1 %v9605_v36, %s8844_s22 }
 0x5fb   :  { %1392 = vrot.lane.b32.xlu0 %v9607_v46, %s8844_s22  ;;  %1705 = vmatpush1.bf16.msra.mxu0 %v8548_v55 }
 0x5fc   :  { %1706 = vmatprep.subr.bf16.mxu0 %v8556_v63 }
 0x5fd   :  { %1396 = vrot.lane.b32.xlu1 %v9605_v36, %s8829_s9 }
 0x5ff   :  { %1398 = vrot.lane.b32.xlu0 %v9607_v46, %s8829_s9 }
 0x601   :  { %1402 = vrot.lane.b32.xlu1 %v9605_v36, %s8830_s10 }
 0x603   :  { %1404 = vrot.lane.b32.xlu0 %v9607_v46, %s8830_s10 }
 0x605   :  { %1408 = vrot.lane.b32.xlu1 %v9605_v36, %s8846_s27 }
 0x607   :  { %1410 = vrot.lane.b32.xlu0 %v9607_v46, %s8846_s27 }
 0x609   :  { %1414 = vrot.lane.b32.xlu1 %v9605_v36, %s8849_s29 }
 0x60b   :  { %1416 = vrot.lane.b32.xlu0 %v9607_v46, %s8849_s29 }
 0x60d   :  { %1420 = vrot.lane.b32.xlu1 %v9605_v36, %s8848_s28 }
 0x60f   :  { %1422 = vrot.lane.b32.xlu0 %v9607_v46, %s8848_s28 }
 0x611   :  { %1441 = vperm.xlu1 %8493, %v1437_v1   ;;  %v8554_v1 = vld [vmem:[%s9698_s26 + $0x80] ss:$16 sps:$4 sm:$0xff]  }
 0x612   :  { %1707 = vmatpush1.bf16.msra.mxu0 %v8554_v1 }
 0x613   :  { %1446 = vperm.xlu0 %8492, %v1438_v3   ;;  %v8562_v3 = vld [vmem:[%s9698_s26 + $0xa4] ss:$16 sps:$4 sm:$0xff]  }
 0x614   :  { %1708 = vmatprep.subr.bf16.mxu0 %v8562_v3 }
 0x615   :  { %1788 = vrot.lane.b32.xlu1 %v9432_v9, %s8826_s6 }
 0x616   :  { %1709 = vmatpush1.bf16.msra.mxu0 %v8560_v56 }
 0x617   :  { %1794 = vrot.lane.b32.xlu0 %v9434_v54, %s8826_s6 }
 0x619   :  { %1800 = vrot.lane.b32.xlu1 %v9444_v38, %s8826_s6 }
 0x61b   :  { %1806 = vrot.lane.b32.xlu0 %v9446_v23, %s8826_s6 }
 0x61d   :  { %1884 = vrot.lane.b32.xlu1 %v9432_v9, %s8828_s8 }
 0x61f   :  { %1836 = vrot.lane.b32.xlu0 %v9432_v9, %s8827_s7 }
 0x621   :  { %1896 = vrot.lane.b32.xlu1 %v9444_v38, %s8828_s8 }
 0x623   :  { %1842 = vrot.lane.b32.xlu0 %v9434_v54, %s8827_s7 }
 0x625   :  { %2022 = vrot.lane.b32.xlu1 %v9434_v54, %s8831_s11 }
 0x627   :  { %1848 = vrot.lane.b32.xlu0 %v9444_v38, %s8827_s7 }
 0x629   :  { %2016 = vrot.lane.b32.xlu1 %v9432_v9, %s8831_s11 }
 0x62b   :  { %1854 = vrot.lane.b32.xlu0 %v9446_v23, %s8827_s7 }
 0x62f   :  { %1890 = vrot.lane.b32.xlu0 %v9434_v54, %s8828_s8 }
 0x633   :  { %1902 = vrot.lane.b32.xlu0 %v9446_v23, %s8828_s8 }
 0x637   :  { %1932 = vrot.lane.b32.xlu0 %v9432_v9, %s8829_s9 }
 0x63b   :  { %1938 = vrot.lane.b32.xlu0 %v9434_v54, %s8829_s9 }
 0x63f   :  { %1944 = vrot.lane.b32.xlu0 %v9444_v38, %s8829_s9 }
 0x643   :  { %1950 = vrot.lane.b32.xlu0 %v9446_v23, %s8829_s9 }
 0x647   :  { %2028 = vrot.lane.b32.xlu0 %v9444_v38, %s8831_s11 }
 0x64b   :  { %2034 = vrot.lane.b32.xlu0 %v9446_v23, %s8831_s11 }
 0x663   :  { %v1379_v8 = vpop.permute.xlu1 %1378 }
 0x664   :  { %v1382_v53 = vmul.f32 %v9569_v17, %v1379_v8 }
 0x665   :  { %v1381_v11 = vpop.permute.xlu0 %1380 }
 0x666   :  { %v1383_v41 = vmul.f32 %v9569_v17, %v1381_v11 }
 0x667   :  { %v1385_v28 = vpop.permute.xlu1 %1384 }
 0x668   :  { %v1426_v47 = vpack.c.bf16 %v1383_v41, %v1382_v53  ;;  %v1388_v27 = vmul.f32 %v9566_v16, %v1385_v28 }
 0x669   :  { %v1387_v18 = vpop.permute.xlu0 %1386 }
 0x66a   :  { %v1389_v21 = vmul.f32 %v9566_v16, %v1387_v18  ;;  %1463 = vmatpush1.bf16.msra.mxu1 %v1426_v47 }
 0x66b   :  { %v1391_v50 = vpop.permute.xlu1 %1390  ;;  %1464 = vmatprep.subr.bf16.mxu1 %v14679_v14 }
 0x66c   :  { %v1427_v55 = vpack.c.bf16 %v1389_v21, %v1388_v27  ;;  %v1394_v8 = vmul.f32 %v9577_v32, %v1391_v50  ;;  %v14692_v27 = vpack.c.bf16 %v9607_v46, %v9605_v36 }
 0x66d   :  { %v1393_v63 = vpop.permute.xlu0 %1392 }
 0x66e   :  { %v1395_v17 = vmul.f32 %v9577_v32, %v1393_v63  ;;  %1465 = vmatpush1.bf16.msra.mxu1 %v1427_v55 }
 0x66f   :  { %v1397_v1 = vpop.permute.xlu1 %1396  ;;  %1466 = vmatprep.subr.bf16.mxu1 %v14679_v14 }
 0x670   :  { %v1428_v3 = vpack.c.bf16 %v1395_v17, %v1394_v8  ;;  %v1400_v28 = vmul.f32 %v9574_v4, %v1397_v1 }
 0x671   :  { %v1399_v11 = vpop.permute.xlu0 %1398 }
 0x672   :  { %v1401_v16 = vmul.f32 %v9574_v4, %v1399_v11  ;;  %1467 = vmatpush1.bf16.msra.mxu1 %v1428_v3 }
 0x673   :  { %v1403_v53 = vpop.permute.xlu1 %1402  ;;  %1468 = vmatprep.subr.bf16.mxu1 %v14679_v14 }
 0x674   :  { %v1429_v56 = vpack.c.bf16 %v1401_v16, %v1400_v28  ;;  %v1406_v18 = vmul.f32 %v9583_v6, %v1403_v53  ;;  %v8535_v28 = vld [vmem:[%s9698_s26 + $0xc] ss:$16 sps:$4 sm:$0xff]   ;;  %v8529_v53 = vld [vmem:[%s9635_s17] ss:$8 sps:$4 sm:$0xff]  }
 0x675   :  { %v1405_v41 = vpop.permute.xlu0 %1404 }
 0x676   :  { %1469 = vmatpush1.bf16.msra.mxu1 %v1429_v56  ;;  %v1407_v32 = vmul.f32 %v9583_v6, %v1405_v41  ;;  %v8541_v56 = vld [vmem:[%s9698_s26 + $0x2c] ss:$16 sps:$4 sm:$0xff]   ;;  %v8539_v41 = vld [vmem:[%s9698_s26 + $0x28] ss:$16 sps:$4 sm:$0xff]  }
 0x677   :  { %v1409_v50 = vpop.permute.xlu1 %1408  ;;  %1470 = vmatprep.subr.bf16.mxu1 %v14679_v14 }
 0x678   :  { %v1431_v4 = vpack.c.bf16 %v1407_v32, %v1406_v18  ;;  %v1412_v8 = vmul.f32 %v9587_v0, %v1409_v50  ;;  %v8545_v50 = vld [vmem:[%s9698_s26 + $0x48] ss:$16 sps:$4 sm:$0xff]   ;;  %v8553_v32 = vld [vmem:[%s9698_s26 + $0x6c] ss:$16 sps:$4 sm:$0xff]  }
 0x679   :  { %v1411_v47 = vpop.permute.xlu0 %1410  ;;  %v8559_v18 = vld [vmem:[%s9698_s26 + $0x8c] ss:$16 sps:$4 sm:$0xff]  }
 0x67a   :  { %1471 = vmatpush1.bf16.msra.mxu1 %v14692_v27  ;;  %v1413_v21 = vmul.f32 %v9587_v0, %v1411_v47  ;;  %v8551_v47 = vld [vmem:[%s9698_s26 + $0x68] ss:$16 sps:$4 sm:$0xff]  }
 0x67b   :  { %1472 = vmatprep.subr.bf16.mxu1 %v14679_v14  ;;  %v1415_v55 = vpop.permute.xlu1 %1414  ;;  %v8557_v27 = vld [vmem:[%s9698_s26 + $0x88] ss:$16 sps:$4 sm:$0xff]  }
 0x67c   :  { %v1432_v17 = vpack.c.bf16 %v1413_v21, %v1412_v8  ;;  %v1418_v46 = vmul.f32 %v9594_v35, %v1415_v55  ;;  %v8563_v21 = vld [vmem:[%s9698_s26 + $0xa8] ss:$16 sps:$4 sm:$0xff]   ;;  %v8568_v55 = vld [vmem:[%s9698_s26 + $0xc4] ss:$16 sps:$4 sm:$0xff]   ;;  %v8566_v8 = vld [vmem:[%s9698_s26 + $0xc0] ss:$16 sps:$4 sm:$0xff]  }
 0x67d   :  { %v1417_v63 = vpop.permute.xlu0 %1416  ;;  %1710 = vmatprep.subr.bf16.mxu0 %v8568_v55 }
 0x67e   :  { %1473 = vmatpush1.bf16.msra.mxu1 %v1431_v4  ;;  %v1419_v6 = vmul.f32 %v9594_v35, %v1417_v63  ;;  %v8533_v35 = vld [vmem:[%s9698_s26 + $0x8] ss:$16 sps:$4 sm:$0xff]   ;;  %v8565_v4 = vld [vmem:[%s9698_s26 + $0xac] ss:$16 sps:$4 sm:$0xff]   ;;  %1711 = vmatpush1.bf16.msra.mxu0 %v8566_v8 }
 0x67f   :  { %1474 = vmatprep.subr.bf16.mxu1 %v14679_v14  ;;  %v1421_v1 = vpop.permute.xlu1 %1420  ;;  %v8571_v63 = vld [vmem:[%s9698_s26 + $0xcc] ss:$16 sps:$4 sm:$0xff]  }
 0x680   :  { %v1433_v3 = vpack.c.bf16 %v1419_v6, %v1418_v46  ;;  %v1424_v11 = vmul.f32 %v9590_v7, %v1421_v1  ;;  %v8574_v6 = vld [vmem:[%s9698_s26 + $0xe4] ss:$16 sps:$4 sm:$0xff]   ;;  %v8572_v46 = vld [vmem:[%s9698_s26 + $0xe0] ss:$16 sps:$4 sm:$0xff]   ;;  %v8575_v1 = vld [vmem:[%s9698_s26 + $0xe8] ss:$16 sps:$4 sm:$0xff]  }
 0x681   :  { %v1423_v36 = vpop.permute.xlu0 %1422  ;;  %1712 = vmatprep.subr.bf16.mxu0 %v8574_v6 }
 0x682   :  { %1475 = vmatpush1.bf16.msra.mxu1 %v1432_v17  ;;  %v1425_v0 = vmul.f32 %v9590_v7, %v1423_v36  ;;  %v8547_v7 = vld [vmem:[%s9698_s26 + $0x4c] ss:$16 sps:$4 sm:$0xff]   ;;  %v8569_v17 = vld [vmem:[%s9698_s26 + $0xc8] ss:$16 sps:$4 sm:$0xff]   ;;  %1713 = vmatpush1.bf16.msra.mxu0 %v8572_v46 }
 0x683   :  { %1476 = vmatprep.subr.bf16.mxu1 %v14679_v14  ;;  %v8577_v36 = vld [vmem:[%s9698_s26 + $0xec] ss:$16 sps:$4 sm:$0xff]  }
 0x684   :  { %v1434_v16 = vpack.c.bf16 %v1425_v0, %v1424_v11 }
 0x686   :  { %1477 = vmatpush1.bf16.msra.mxu1 %v1433_v3 }
 0x687   :  { %1478 = vmatprep.subr.bf16.mxu1 %v14679_v14 }
 0x68a   :  { %1479 = vmatpush1.bf16.msra.mxu1 %v1434_v16 }
 0x68b   :  { %1741 = vmatprep.subr.bf16.mxu1 %v8535_v28 }
 0x68d   :  { %1495 = vmatmul.mubr.bf16.vlgmr.msra.gmra.mrb[12].mxu1 %v8529_v53 }
 0x68e   :  { %1742 = vmatpush1.bf16.msra.mxu1 %v8533_v35  ;;  %1773 = vmatprep.mubr.bf16.mxu1 %v14679_v14 }
 0x68f   :  { %1743 = vmatprep.subr.bf16.mxu1 %v8541_v56 }
 0x690   :  { %v1442_v3 = vpop.permute.xlu1 %1441 }
 0x692   :  { %1744 = vmatpush1.bf16.msra.mxu1 %v8539_v41  ;;  %v1447_v16 = vpop.permute.xlu0 %1446 }
 0x693   :  { %1745 = vmatprep.subr.bf16.mxu1 %v8547_v7 }
 0x696   :  { %1746 = vmatpush1.bf16.msra.mxu1 %v8545_v50  ;;  %v9817_v46 = vpop.permute.xlu0 %1794 }
 0x697   :  { %1747 = vmatprep.subr.bf16.mxu1 %v8553_v32 }
 0x69a   :  { %1748 = vmatpush1.bf16.msra.mxu1 %v8551_v47 }
 0x69b   :  { %1749 = vmatprep.subr.bf16.mxu1 %v8559_v18 }
 0x69e   :  { %1750 = vmatpush1.bf16.msra.mxu1 %v8557_v27 }
 0x69f   :  { %1751 = vmatprep.subr.bf16.mxu1 %v8565_v4 }
 0x6a2   :  { %1752 = vmatpush1.bf16.msra.mxu1 %v8563_v21 }
 0x6a3   :  { %1753 = vmatprep.subr.bf16.mxu1 %v8571_v63 }
 0x6a6   :  { %1754 = vmatpush1.bf16.msra.mxu1 %v8569_v17 }
 0x6a7   :  { %1755 = vmatprep.subr.bf16.mxu1 %v8577_v36 }
 0x6aa   :  { %1756 = vmatpush1.bf16.msra.mxu1 %v8575_v1  ;;  %v9827_v1 = vpop.permute.xlu0 %1806 }
 0x760   :  { %v1496_v0 = vpop.f32.mrb[12].mxu1 }
 0x761   :  { %v1497_v11 = vadd.f32 %v1496_v0, %v1442_v3  ;;  %v1498_v28 = vpop.f32.mrb[13].mxu1  ;;  %v9833_v3 = vpop.permute.xlu0 %1836 }
 0x762   :  { %v1499_v53 = vpop.f32.mrb[14].mxu1 }
 0x763   :  { %v1500_v35 = vadd.f32 %v1499_v53, %v1447_v16  ;;  %v1501_v56 = vpop.f32.mrb[15].mxu1  ;;  %v1503_v41 = vmax.f32 %v1497_v11, 0.0 }
 0x765   :  { %v1504_v7 = vmax.f32 %v1500_v35, 0.0  ;;  %v9843_v0 = vpop.permute.xlu0 %1842  ;;  %v9881_v35 = vpop.permute.xlu1 %1788 }
 0x767   :  { %v1505_v50 = vpack.c.bf16 %v1504_v7, %v1503_v41 }
 0x769   :  { %1731 = vmatmul.mubr.bf16.vlgmr.msra.gmra.mrb[16].mxu0 %v1505_v50  ;;  %1774 = vmatmul.mubr.bf16.vlgmr.msra.gmra.mrb[16].mxu1 %v1505_v50  ;;  %v9849_v11 = vpop.permute.xlu0 %1848  ;;  %v9893_v41 = vpop.permute.xlu1 %1800 }
 0x76d   :  { %v9859_v28 = vpop.permute.xlu0 %1854  ;;  %v9901_v50 = vpop.permute.xlu1 %1884 }
 0x771   :  { %v9865_v16 = vpop.permute.xlu0 %1890  ;;  %v9913_v8 = vpop.permute.xlu1 %1896 }
 0x775   :  { %v9875_v53 = vpop.permute.xlu0 %1902  ;;  %v9921_v6 = vpop.permute.xlu1 %2022 }
 0x776   :  { %14704 = vst [vmem:[#allocation56_spill] sm:$0xff] %v9921_v6 }
 0x779   :  { %v9883_v56 = vpop.permute.xlu0 %1932  ;;  %v9933_v44 = vpop.permute.xlu1 %2016 }
 0x77a   :  { %14701 = vst [vmem:[#allocation53_spill] sm:$0xff] %v9883_v56  ;;  %14706 = vst [vmem:[#allocation58_spill] sm:$0xff] %v9933_v44 }
 0x77d   :  { %v9895_v7 = vpop.permute.xlu0 %1938 }
 0x781   :  { %v9903_v17 = vpop.permute.xlu0 %1944 }
 0x782   :  { %14702 = vst [vmem:[#allocation54_spill] sm:$0xff] %v9903_v17 }
 0x785   :  { %v9915_v36 = vpop.permute.xlu0 %1950 }
 0x786   :  { %14703 = vst [vmem:[#allocation55_spill] sm:$0xff] %v9915_v36 }
 0x789   :  { %v9923_v14 = vpop.permute.xlu0 %2028 }
 0x78a   :  { %14705 = vst [vmem:[#allocation57_spill] sm:$0xff] %v9923_v14 }
 0x78d   :  { %v9935_v39 = vpop.permute.xlu0 %2034 }
 0x78e   :  { %14707 = vst [vmem:[#allocation59_spill] sm:$0xff] %v9935_v39 }
 0x83c   :  { %v9761_v32 = vpop.f32.mrb[16].mxu0  ;;  %v9763_v47 = vpop.f32.mrb[16].mxu1 }
 0x83d   :  { %14693 = vst [vmem:[#allocation45_spill] sm:$0xff] %v9761_v32  ;;  %14694 = vst [vmem:[#allocation46_spill] sm:$0xff] %v9763_v47  ;;  %1984 = vrot.lane.b32.xlu0 %v9763_v47, %s8830_s10  ;;  %v9767_v18 = vpop.f32.mrb[17].mxu1  ;;  %1784 = vrot.lane.b32.xlu1 %v9761_v32, %s8826_s6  ;;  %v9771_v27 = vpop.f32.mrb[17].mxu0 }
 0x83e   :  { %14695 = vst [vmem:[#allocation47_spill] sm:$0xff] %v9767_v18  ;;  %14696 = vst [vmem:[#allocation48_spill] sm:$0xff] %v9771_v27  ;;  %v9773_v4 = vpop.f32.mrb[18].mxu0  ;;  %v9775_v21 = vpop.f32.mrb[18].mxu1 }
 0x83f   :  { %14697 = vst [vmem:[#allocation49_spill] sm:$0xff] %v9773_v4  ;;  %14698 = vst [vmem:[#allocation50_spill] sm:$0xff] %v9775_v21  ;;  %v9777_v55 = vpop.f32.mrb[19].mxu0  ;;  %v9779_v63 = vpop.f32.mrb[19].mxu1 }
 0x840   :  { %14699 = vst [vmem:[#allocation51_spill] sm:$0xff] %v9777_v55  ;;  %14700 = vst [vmem:[#allocation52_spill] sm:$0xff] %v9779_v63 }
 0x841   :  { %2068 = vrot.lane.b32.xlu0 %v9763_v47, %s8832_s12  ;;  %1796 = vrot.lane.b32.xlu1 %v9763_v47, %s8826_s6 }
 0x845   :  { %1832 = vrot.lane.b32.xlu1 %v9761_v32, %s8827_s7  ;;  %1838 = vrot.lane.b32.xlu0 %v9771_v27, %s8827_s7 }
 0x849   :  { %1844 = vrot.lane.b32.xlu1 %v9763_v47, %s8827_s7  ;;  %1850 = vrot.lane.b32.xlu0 %v9767_v18, %s8827_s7 }
 0x84d   :  { %1880 = vrot.lane.b32.xlu1 %v9761_v32, %s8828_s8  ;;  %1934 = vrot.lane.b32.xlu0 %v9771_v27, %s8829_s9 }
 0x851   :  { %1892 = vrot.lane.b32.xlu1 %v9763_v47, %s8828_s8  ;;  %1946 = vrot.lane.b32.xlu0 %v9767_v18, %s8829_s9 }
 0x855   :  { %1928 = vrot.lane.b32.xlu1 %v9761_v32, %s8829_s9  ;;  %1988 = vrot.lane.b32.xlu0 %v9767_v18, %s8830_s10 }
 0x859   :  { %1940 = vrot.lane.b32.xlu1 %v9763_v47, %s8829_s9  ;;  %1786 = vrot.lane.b32.xlu0 %v9773_v4, %s8826_s6 }
 0x85d   :  { %1976 = vrot.lane.b32.xlu1 %v9761_v32, %s8830_s10  ;;  %1798 = vrot.lane.b32.xlu0 %v9775_v21, %s8826_s6 }
 0x861   :  { %2024 = vrot.lane.b32.xlu1 %v9763_v47, %s8831_s11  ;;  %1882 = vrot.lane.b32.xlu0 %v9773_v4, %s8828_s8 }
 0x865   :  { %2012 = vrot.lane.b32.xlu1 %v9761_v32, %s8831_s11  ;;  %1894 = vrot.lane.b32.xlu0 %v9775_v21, %s8828_s8 }
 0x869   :  { %1790 = vrot.lane.b32.xlu1 %v9771_v27, %s8826_s6  ;;  %1986 = vrot.lane.b32.xlu0 %v9775_v21, %s8830_s10 }
 0x86d   :  { %1802 = vrot.lane.b32.xlu1 %v9767_v18, %s8826_s6  ;;  %2026 = vrot.lane.b32.xlu0 %v9775_v21, %s8831_s11 }
 0x871   :  { %1886 = vrot.lane.b32.xlu1 %v9771_v27, %s8828_s8  ;;  %2014 = vrot.lane.b32.xlu0 %v9773_v4, %s8831_s11 }
 0x875   :  { %1898 = vrot.lane.b32.xlu1 %v9767_v18, %s8828_s8  ;;  %1792 = vrot.lane.b32.xlu0 %v9777_v55, %s8826_s6 }
 0x879   :  { %1980 = vrot.lane.b32.xlu1 %v9771_v27, %s8830_s10  ;;  %1804 = vrot.lane.b32.xlu0 %v9779_v63, %s8826_s6 }
 0x87d   :  { %2018 = vrot.lane.b32.xlu1 %v9771_v27, %s8831_s11  ;;  %2072 = vrot.lane.b32.xlu0 %v9767_v18, %s8832_s12 }
 0x881   :  { %2030 = vrot.lane.b32.xlu1 %v9767_v18, %s8831_s11  ;;  %1888 = vrot.lane.b32.xlu0 %v9777_v55, %s8828_s8 }
 0x885   :  { %2064 = vrot.lane.b32.xlu1 %v9771_v27, %s8832_s12  ;;  %1900 = vrot.lane.b32.xlu0 %v9779_v63, %s8828_s8 }
 0x889   :  { %1834 = vrot.lane.b32.xlu1 %v9773_v4, %s8827_s7  ;;  %2070 = vrot.lane.b32.xlu0 %v9775_v21, %s8832_s12 }
 0x88d   :  { %1846 = vrot.lane.b32.xlu1 %v9775_v21, %s8827_s7  ;;  %2106 = vrot.lane.b32.xlu0 %v9775_v21, %s14497_s13 }
 0x891   :  { %1930 = vrot.lane.b32.xlu1 %v9773_v4, %s8829_s9  ;;  %1990 = vrot.lane.b32.xlu0 %v9779_v63, %s8830_s10 }
 0x895   :  { %1942 = vrot.lane.b32.xlu1 %v9775_v21, %s8829_s9  ;;  %2020 = vrot.lane.b32.xlu0 %v9777_v55, %s8831_s11 }
 0x899   :  { %1978 = vrot.lane.b32.xlu1 %v9773_v4, %s8830_s10  ;;  %2032 = vrot.lane.b32.xlu0 %v9779_v63, %s8831_s11 }
 0x89d   :  { %1840 = vrot.lane.b32.xlu1 %v9777_v55, %s8827_s7  ;;  %2098 = vrot.lane.b32.xlu0 %v9773_v4, %s14497_s13 }
 0x8a1   :  { %1852 = vrot.lane.b32.xlu1 %v9779_v63, %s8827_s7  ;;  %2074 = vrot.lane.b32.xlu0 %v9779_v63, %s8832_s12 }
 0x8a5   :  { %2060 = vrot.lane.b32.xlu1 %v9761_v32, %s8832_s12  ;;  %2102 = vrot.lane.b32.xlu0 %v9777_v55, %s14497_s13 }
 0x8a9   :  { %1936 = vrot.lane.b32.xlu1 %v9777_v55, %s8829_s9  ;;  %2110 = vrot.lane.b32.xlu0 %v9779_v63, %s14497_s13 }
 0x8ad   :  { %1948 = vrot.lane.b32.xlu1 %v9779_v63, %s8829_s9 }
 0x8af   :  { %v9939_v42 = vpop.permute.xlu0 %1984  ;;  %v1785_v37 = vpop.permute.xlu1 %1784 }
 0x8b0   :  { %14708 = vst [vmem:[#allocation60_spill] sm:$0xff] %v9939_v42 }
 0x8b1   :  { %2062 = vrot.lane.b32.xlu1 %v9773_v4, %s8832_s12  ;;  %v9970_v4 = vld [vmem:[%s7849_s2] sm:$0xff]  ;;  %s7854_s2 = sld [smem:[%s14371_s0 + %s8854_s25]]   ;;  %s8857_s25 = smov 33  }
 0x8b2   :  { %14710 = vst [vmem:[#allocation62_spill] sm:$0xff] %v9970_v4  ;;  %v7968_v54 = vcombine.high %v9970_v4, %v9970_v4 }
 0x8b3   :  { %v9943_v5 = vpop.permute.xlu0 %2068  ;;  %v1797_v38 = vpop.permute.xlu1 %1796 }
 0x8b4   :  { %14709 = vst [vmem:[#allocation61_spill] sm:$0xff] %v9943_v5  ;;  %7970 = vmatprep.mubr.msk.bf16.mxu0 %vm2201_vm13, %v7968_v54  ;;  %7972 = vmatprep.mubr.msk.bf16.mxu1 %vm2201_vm13, %v7968_v54 }
 0x8b5   :  { %1982 = vrot.lane.b32.xlu1 %v9777_v55, %s8830_s10 }
 0x8b7   :  { %v1833_v21 = vpop.permute.xlu1 %1832  ;;  %v1839_v23 = vpop.permute.xlu0 %1838 }
 0x8b9   :  { %2100 = vrot.lane.b32.xlu1 %v9771_v27, %s14497_s13 }
 0x8bb   :  { %v1845_v39 = vpop.permute.xlu1 %1844  ;;  %v1851_v9 = vpop.permute.xlu0 %1850 }
 0x8bd   :  { %2104 = vrot.lane.b32.xlu1 %v9763_v47, %s14497_s13 }
 0x8bf   :  { %v9951_v2 = vpop.permute.xlu1 %1880  ;;  %v9953_v45 = vpop.permute.xlu0 %1934 }
 0x8c1   :  { %2066 = vrot.lane.b32.xlu1 %v9777_v55, %s8832_s12 }
 0x8c3   :  { %v9964_v5 = vpop.permute.xlu1 %1892  ;;  %v9966_v47 = vpop.permute.xlu0 %1946 }
 0x8c5   :  { %2096 = vrot.lane.b32.xlu1 %v9761_v32, %s14497_s13 }
 0x8c7   :  { %v9974_v63 = vpop.permute.xlu1 %1928  ;;  %v9976_v59 = vpop.permute.xlu0 %1988 }
 0x8c8   :  { %14711 = vst [vmem:[#allocation63_spill] sm:$0xff] %v9976_v59 }
 0x8c9   :  { %2108 = vrot.lane.b32.xlu1 %v9767_v18, %s14497_s13 }
 0x8cb   :  { %v9982_v31 = vpop.permute.xlu1 %1940  ;;  %v1787_v32 = vpop.permute.xlu0 %1786 }
 0x8cd   :  { %2192 = vperm.xlu1 %8493, %v2189_v43  }
 0x8cf   :  { %v9984_v15 = vpop.permute.xlu1 %1976  ;;  %v1799_v4 = vpop.permute.xlu0 %1798 }
 0x8d0   :  { %14712 = vst [vmem:[#allocation64_spill] sm:$0xff] %v9984_v15  ;;  %v1810_v15 = vsel %vm156_vm1, %v9893_v41, %v9827_v1 }
 0x8d3   :  { %v9986_v52 = vpop.permute.xlu1 %2024  ;;  %v9988_v27 = vpop.permute.xlu0 %1882 }
 0x8d4   :  { %14713 = vst [vmem:[#allocation65_spill] sm:$0xff] %v9986_v52  ;;  %v1862_v52 = vsel %vm195_vm2, %v1833_v21, %v1839_v23 }
 0x8d5   :  { %v1869_v42 = vmul.f32 %v1862_v52, %v9007_v20 }
 0x8d7   :  { %v9990_v55 = vpop.permute.xlu1 %2012  ;;  %v9992_v49 = vpop.permute.xlu0 %1894 }
 0x8d8   :  { %14714 = vst [vmem:[#allocation66_spill] sm:$0xff] %v9990_v55 }
 0x8db   :  { %v1791_v54 = vpop.permute.xlu1 %1790  ;;  %v9994_v14 = vpop.permute.xlu0 %1986 }
 0x8dc   :  { %14715 = vst [vmem:[#allocation67_spill] sm:$0xff] %v9994_v14  ;;  %v1814_v33 = vsel %vm156_vm1, %v1785_v37, %v1791_v54  ;;  %v1816_v14 = vsel %vm156_vm1, %v9881_v35, %v9817_v46 }
 0x8dd   :  { %v1821_v40 = vmul.f32 %v1814_v33, %v9004_v19  ;;  %v1859_v33 = vsel %vm195_vm2, %v1839_v23, %v1845_v39 }
 0x8df   :  { %v1803_v18 = vpop.permute.xlu1 %1802  ;;  %v9996_v44 = vpop.permute.xlu0 %2026 }
 0x8e0   :  { %14716 = vst [vmem:[#allocation68_spill] sm:$0xff] %v9996_v44  ;;  %v1808_v17 = vsel %vm156_vm1, %v1797_v38, %v1803_v18  ;;  %v1817_v13 = vsel %vm156_vm1, %v1803_v18, %v1785_v37 }
 0x8e1   :  { %v1820_v23 = vmul.f32 %v1817_v13, %v9012_v24 }
 0x8e3   :  { %v9998_v6 = vpop.permute.xlu1 %1886  ;;  %v10000_v43 = vpop.permute.xlu0 %2014 }
 0x8e4   :  { %14717 = vst [vmem:[#allocation69_spill] sm:$0xff] %v10000_v43  ;;  %v1856_v43 = vsel %vm195_vm2, %v1845_v39, %v1851_v9 }
 0x8e5   :  { %v1871_v52 = vmul.f32 %v1856_v43, %v9025_v29 }
 0x8e7   :  { %v10006_v51 = vpop.permute.xlu1 %1898  ;;  %v1793_v55 = vpop.permute.xlu0 %1792 }
 0x8e8   :  { %v1815_v44 = vsel %vm156_vm1, %v1787_v32, %v1793_v55  ;;  %v1812_v48 = vsel %vm156_vm1, %v1793_v55, %v1799_v4  ;;  %v1865_v55 = vsel %vm195_vm2, %v1851_v9, %v1833_v21  ;;  %v1823_v9 = vmul.f32 %v1808_v17, %v9018_v26 }
 0x8e9   :  { %v1825_v59 = vmul.f32 %v1815_v44, %v9004_v19  ;;  %v1811_v44 = vsel %vm156_vm1, %v1791_v54, %v1797_v38  ;;  %v1826_v56 = vmul.f32 %v1812_v48, %v9028_v30  ;;  %v1813_v48 = vsel %vm156_vm1, %v9817_v46, %v9893_v41 }
 0x8ea   :  { %v1822_v13 = vmul.f32 %v1811_v44, %v9028_v30  ;;  %v1870_v21 = vmul.f32 %v1859_v33, %v9035_v34 }
 0x8eb   :  { %v10035_v36 = vpop.permute.xlu1 %1980  ;;  %v1805_v12 = vpop.permute.xlu0 %1804  ;;  %v2133_v22 = vpack.c.bf16 %v1825_v59, %v1821_v40  ;;  %v1829_v40 = vmul.f32 %v1816_v14, %v9004_v19  ;;  %v1831_v59 = vmul.f32 %v1810_v15, %v9018_v26 }
 0x8ec   :  { %v1809_v37 = vsel %vm156_vm1, %v1799_v4, %v1805_v12  ;;  %v1818_v39 = vsel %vm156_vm1, %v1805_v12, %v1787_v32  ;;  %v1819_v12 = vsel %vm156_vm1, %v9827_v1, %v9881_v35  ;;  %v1868_v32 = vmul.f32 %v1865_v55, %v9015_v25 }
 0x8ed   :  { %v1824_v38 = vmul.f32 %v1818_v39, %v9012_v24  ;;  %v1827_v18 = vmul.f32 %v1809_v37, %v9018_v26  ;;  %2217 = vmatprep.subr.bf16.mxu0 %v2133_v22  ;;  %v2134_v17 = vpack.c.bf16 %v1826_v56, %v1822_v13  ;;  %v2137_v54 = vpack.c.bf16 %v1869_v42, %v1829_v40 }
 0x8ee   :  { %v1828_v46 = vmul.f32 %v1819_v12, %v9012_v24  ;;  %v2139_v41 = vpack.c.bf16 %v1871_v52, %v1831_v59  ;;  %v1830_v1 = vmul.f32 %v1813_v48, %v9028_v30  ;;  %v1858_v40 = vsel %vm195_vm2, %v9849_v11, %v9859_v28 }
 0x8ef   :  { %v2132_v4 = vpack.c.bf16 %v1824_v38, %v1820_v23  ;;  %v10059_v22 = vpop.permute.xlu1 %2018  ;;  %v2135_v14 = vpack.c.bf16 %v1827_v18, %v1823_v9  ;;  %v10066_v55 = vpop.permute.xlu0 %2072  ;;  %v1864_v38 = vsel %vm195_vm2, %v9833_v3, %v9843_v0  ;;  %v1861_v18 = vsel %vm195_vm2, %v9843_v0, %v9849_v11 }
 0x8f0   :  { %v2136_v15 = vpack.c.bf16 %v1868_v32, %v1828_v46  ;;  %v2138_v43 = vpack.c.bf16 %v1870_v21, %v1830_v1  ;;  %v1867_v48 = vsel %vm195_vm2, %v9859_v28, %v9833_v3  ;;  %v1912_v13 = vsel %vm235_vm3, %v9901_v50, %v9865_v16 }
 0x8f1   :  { %2218 = vmatpush1.bf16.msra.mxu0 %v2132_v4  ;;  %2258 = vmatprep.subr.bf16.mxu1 %v2135_v14  ;;  %v1877_v59 = vmul.f32 %v1864_v38, %v9007_v20  ;;  %v1915_v0 = vsel %vm235_vm3, %v9875_v53, %v9901_v50  ;;  %v1878_v32 = vmul.f32 %v1861_v18, %v9035_v34 }
 0x8f2   :  { %2219 = vmatprep.subr.bf16.mxu0 %v2137_v54  ;;  %2259 = vmatpush1.bf16.msra.mxu1 %v2134_v17  ;;  %v1876_v4 = vmul.f32 %v1867_v48, %v9015_v25  ;;  %v1879_v3 = vmul.f32 %v1858_v40, %v9025_v29  ;;  %v10114_v14 = vsel %vm235_vm3, %v9865_v16, %v9913_v8 }
 0x8f3   :  { %v10064_v35 = vpop.permute.xlu1 %2030  ;;  %2260 = vmatprep.subr.bf16.mxu1 %v2139_v41  ;;  %v1889_v42 = vpop.permute.xlu0 %1888  ;;  %v10117_v21 = vmul.f32 %v1912_v13, %v9056_v57  ;;  %v1906_v54 = vsel %vm235_vm3, %v9913_v8, %v9875_v53  ;;  %v10128_v46 = vmul.f32 %v1915_v0, %v9064_v60  ;;  %v1958_v16 = vsel %vm275_vm4, %v9974_v63, %v9953_v45 }
 0x8f4   :  { %v1911_v50 = vsel %vm235_vm3, %v9988_v27, %v1889_v42  ;;  %v1961_v1 = vsel %vm275_vm4, %v9966_v47, %v9974_v63  ;;  %v1910_v8 = vsel %vm235_vm3, %v9951_v2, %v9998_v6  ;;  %v1904_v13 = vsel %vm235_vm3, %v9964_v5, %v10006_v51 }
 0x8f5   :  { %2220 = vmatpush1.bf16.msra.mxu0 %v2136_v15  ;;  %v1921_v18 = vmul.f32 %v1911_v50, %v9056_v57 }
 0x8f6   :  { %2261 = vmatpush1.bf16.msra.mxu1 %v2138_v43 }
 0x8f7   :  { %v10068_v56 = vpop.permute.xlu1 %2064  ;;  %v1901_v37 = vpop.permute.xlu0 %1900 }
 0x8f8   :  { %v1905_v53 = vsel %vm235_vm3, %v9992_v49, %v1901_v37  ;;  %v1914_v40 = vsel %vm235_vm3, %v1901_v37, %v9988_v27  ;;  %v1917_v27 = vmul.f32 %v1910_v8, %v9056_v57 }
 0x8f9   :  { %v1923_v37 = vmul.f32 %v1905_v53, %v9070_v62  ;;  %v1920_v50 = vmul.f32 %v1914_v40, %v9064_v60  ;;  %v14718_v53 = vld [vmem:[#allocation53_spill] sm:$0xff] }
 0x8fb   :  { %v1835_v33 = vpop.permute.xlu1 %1834  ;;  %v10072_v39 = vpop.permute.xlu0 %2070 }
 0x8ff   :  { %v1847_v44 = vpop.permute.xlu1 %1846  ;;  %v10094_v12 = vpop.permute.xlu0 %2106 }
 0x903   :  { %v10070_v52 = vpop.permute.xlu1 %1930  ;;  %v10147_v15 = vpop.permute.xlu0 %1990 }
 0x907   :  { %v10074_v23 = vpop.permute.xlu1 %1942 }
 0x90b   :  { %v10076_v9 = vpop.permute.xlu1 %1978 }
 0x90f   :  { %v1841_v11 = vpop.permute.xlu1 %1840 }
 0x910   :  { %v1863_v28 = vsel %vm195_vm2, %v1835_v33, %v1841_v11  ;;  %v1860_v41 = vsel %vm195_vm2, %v1841_v11, %v1847_v44 }
 0x911   :  { %v1873_v17 = vmul.f32 %v1863_v28, %v9007_v20  ;;  %v1874_v0 = vmul.f32 %v1860_v41, %v9035_v34  ;;  %v1952_v28 = vsel %vm275_vm4, %v9982_v31, %v9966_v47  ;;  %v1955_v47 = vsel %vm275_vm4, %v9953_v45, %v9982_v31  ;;  %v14720_v31 = vld [vmem:[#allocation10_spill] sm:$0xff] }
 0x912   :  { %v1927_v45 = vmul.f32 %v1906_v54, %v9070_v62  ;;  %v1964_v40 = vmul.f32 %v1961_v1, %v14720_v31 }
 0x913   :  { %v1853_v43 = vpop.permute.xlu1 %1852  ;;  %v2141_v38 = vpack.c.bf16 %v1877_v59, %v1873_v17 }
 0x914   :  { %v1857_v63 = vsel %vm195_vm2, %v1847_v44, %v1853_v43  ;;  %v1866_v48 = vsel %vm195_vm2, %v1853_v43, %v1835_v33  ;;  %v1913_v44 = vsel %vm235_vm3, %v10006_v51, %v9951_v2  ;;  %v1908_v33 = vsel %vm235_vm3, %v1889_v42, %v9992_v49 }
 0x915   :  { %v1872_v59 = vmul.f32 %v1866_v48, %v9015_v25  ;;  %v1875_v11 = vmul.f32 %v1857_v63, %v9025_v29  ;;  %2221 = vmatprep.subr.bf16.mxu0 %v2141_v38  ;;  %v1965_v43 = vmul.f32 %v1958_v16, %v9059_v58  ;;  %v1907_v49 = vsel %vm235_vm3, %v9998_v6, %v9964_v5  ;;  %v14719_v6 = vld [vmem:[#allocation12_spill] sm:$0xff] }
 0x916   :  { %v1919_v51 = vmul.f32 %v1904_v13, %v9070_v62  ;;  %v2145_v2 = vpack.c.bf16 %v1921_v18, %v1917_v27  ;;  %v1916_v42 = vmul.f32 %v1913_v44, %v9064_v60  ;;  %v2142_v16 = vpack.c.bf16 %v1878_v32, %v1874_v0  ;;  %v14721_v13 = vld [vmem:[#allocation55_spill] sm:$0xff]  ;;  %v14723_v44 = vld [vmem:[#allocation54_spill] sm:$0xff] }
 0x917   :  { %v2140_v17 = vpack.c.bf16 %v1876_v4, %v1872_v59  ;;  %v10178_v41 = vpop.permute.xlu1 %2060  ;;  %v2143_v8 = vpack.c.bf16 %v1879_v3, %v1875_v11  ;;  %v1922_v4 = vmul.f32 %v1908_v33, %v9067_v61  ;;  %v10192_v3 = vpop.permute.xlu0 %2020  ;;  %v1960_v5 = vsel %vm275_vm4, %v14718_v53, %v9895_v7  ;;  %v14722_v59 = vld [vmem:[#allocation11_spill] sm:$0xff] }
 0x918   :  { %v1967_v38 = vmul.f32 %v1952_v28, %v14719_v6  ;;  %v2147_v18 = vpack.c.bf16 %v1923_v37, %v1919_v51  ;;  %v1918_v63 = vmul.f32 %v1907_v49, %v9067_v61  ;;  %v2144_v48 = vpack.c.bf16 %v1920_v50, %v1916_v42 }
 0x919   :  { %2222 = vmatpush1.bf16.msra.mxu0 %v2140_v17  ;;  %2262 = vmatprep.subr.bf16.mxu1 %v2143_v8  ;;  %v1963_v0 = vsel %vm275_vm4, %v14721_v13, %v14718_v53  ;;  %v1966_v11 = vmul.f32 %v1955_v47, %v14722_v59  ;;  %v2149_v54 = vpack.c.bf16 %v1965_v43, %v10117_v21 }
 0x91a   :  { %2223 = vmatprep.subr.bf16.mxu0 %v2145_v2  ;;  %2263 = vmatpush1.bf16.msra.mxu1 %v2142_v16  ;;  %v1973_v1 = vmul.f32 %v1960_v5, %v9059_v58  ;;  %v1954_v33 = vsel %vm275_vm4, %v14723_v44, %v14721_v13  ;;  %v2146_v37 = vpack.c.bf16 %v1922_v4, %v1918_v63  ;;  %v14724_v16 = vld [vmem:[#allocation60_spill] sm:$0xff]  ;;  %v14727_v13 = vld [vmem:[#allocation13_spill] sm:$0xff] }
 0x91b   :  { %v1937_v32 = vpop.permute.xlu1 %1936  ;;  %2264 = vmatprep.subr.bf16.mxu1 %v2147_v18  ;;  %v1926_v50 = vmul.f32 %v10114_v14, %v9067_v61  ;;  %v2151_v21 = vpack.c.bf16 %v1967_v38, %v1927_v45  ;;  %v1957_v8 = vsel %vm275_vm4, %v9895_v7, %v14723_v44  ;;  %v1972_v43 = vmul.f32 %v1963_v0, %v14720_v31  ;;  %v10228_v51 = vpop.permute.xlu0 %2032  ;;  %v14726_v45 = vld [vmem:[#allocation63_spill] sm:$0xff]  ;;  %v14728_v0 = vld [vmem:[#allocation33_spill] sm:$0xff] }
 0x91c   :  { %v1959_v27 = vsel %vm275_vm4, %v10070_v52, %v1937_v32  ;;  %v1956_v17 = vsel %vm275_vm4, %v1937_v32, %v10074_v23  ;;  %v2148_v49 = vpack.c.bf16 %v1964_v40, %v10128_v46  ;;  %v1975_v47 = vmul.f32 %v1954_v33, %v14719_v6 }
 0x91d   :  { %v1969_v28 = vmul.f32 %v1959_v27, %v9059_v58  ;;  %2224 = vmatpush1.bf16.msra.mxu0 %v2144_v48  ;;  %v2150_v42 = vpack.c.bf16 %v1966_v11, %v1926_v50  ;;  %v1994_v46 = vsel %vm315_vm5, %v10035_v36, %v14724_v16  ;;  %v1970_v53 = vmul.f32 %v1956_v17, %v14722_v59  ;;  %v14729_v27 = vld [vmem:[#allocation15_spill] sm:$0xff]  ;;  %v14732_v50 = vld [vmem:[#allocation58_spill] sm:$0xff] }
 0x91e   :  { %2225 = vmatprep.subr.bf16.mxu0 %v2149_v54  ;;  %2265 = vmatpush1.bf16.msra.mxu1 %v2146_v37  ;;  %v1974_v18 = vmul.f32 %v1957_v8, %v14722_v59  ;;  %v10257_v11 = vmul.f32 %v14728_v0, %v14727_v13  ;;  %v2001_v54 = vmul.f32 %v1994_v46, %v14729_v27  ;;  %v14740_v46 = vld [vmem:[#allocation36_spill] sm:$0xff] }
 0x91f   :  { %v1949_v2 = vpop.permute.xlu1 %1948  ;;  %v2153_v14 = vpack.c.bf16 %v1973_v1, %v1969_v28  ;;  %2266 = vmatprep.subr.bf16.mxu1 %v2151_v21  ;;  %v14730_v1 = vld [vmem:[#allocation34_spill] sm:$0xff]  ;;  %v1992_v33 = vsel %vm315_vm5, %v14724_v16, %v14726_v45  ;;  %v14731_v28 = vld [vmem:[#allocation56_spill] sm:$0xff]  ;;  %v14733_v21 = vld [vmem:[#allocation57_spill] sm:$0xff] }
 0x920   :  { %v1953_v4 = vsel %vm275_vm4, %v10074_v23, %v1949_v2  ;;  %v1962_v7 = vsel %vm275_vm4, %v1949_v2, %v10070_v52  ;;  %v14725_v23 = vld [vmem:[#allocation64_spill] sm:$0xff]  ;;  %v2009_v44 = vmul.f32 %v14730_v1, %v14729_v27  ;;  %v2154_v37 = vpack.c.bf16 %v1974_v18, %v1970_v53  ;;  %v14745_v1 = vld [vmem:[#allocation47_spill] sm:$0xff] }
 0x921   :  { %v1968_v5 = vmul.f32 %v1962_v7, %v14720_v31  ;;  %v1971_v38 = vmul.f32 %v1953_v4, %v14719_v6  ;;  %2226 = vmatpush1.bf16.msra.mxu0 %v2148_v49  ;;  %v1998_v52 = vsel %vm315_vm5, %v14726_v45, %v14725_v23  ;;  %v1996_v40 = vsel %vm315_vm5, %v14725_v23, %v10035_v36  ;;  %v10266_v36 = vpop.permute.xlu0 %2098  ;;  %v14738_v4 = vld [vmem:[#allocation16_spill] sm:$0xff]  ;;  %v14739_v7 = vld [vmem:[#allocation35_spill] sm:$0xff] }
 0x922   :  { %2227 = vmatprep.subr.bf16.mxu0 %v2153_v14  ;;  %2267 = vmatpush1.bf16.msra.mxu1 %v2150_v42  ;;  %v2044_v17 = vsel %vm355_vm7, %v14732_v50, %v14731_v28  ;;  %v2041_v8 = vsel %vm355_vm7, %v14731_v28, %v14733_v21  ;;  %v2000_v2 = vmul.f32 %v1996_v40, %v14727_v13  ;;  %v14735_v14 = vld [vmem:[#allocation51_spill] sm:$0xff]  ;;  %v14744_v0 = vld [vmem:[#allocation52_spill] sm:$0xff] }
 0x923   :  { %v2152_v63 = vpack.c.bf16 %v1972_v43, %v1968_v5  ;;  %v10253_v48 = vpop.permute.xlu1 %2062  ;;  %v2155_v32 = vpack.c.bf16 %v1975_v47, %v1971_v38  ;;  %v14734_v43 = vld [vmem:[#allocation14_spill] sm:$0xff]  ;;  %v14736_v47 = vld [vmem:[#allocation48_spill] sm:$0xff]  ;;  %v10283_v16 = vmul.f32 %v14739_v7, %v14738_v4  ;;  %v1999_v23 = vsel %vm315_vm5, %v10147_v15, %v10076_v9  ;;  %v14743_v40 = vld [vmem:[#allocation67_spill] sm:$0xff] }
 0x924   :  { %v2003_v49 = vmul.f32 %v1998_v52, %v14734_v43  ;;  %v14737_v42 = vpack.c.bf16 %v14735_v14, %v14736_v47  ;;  %v2011_v53 = vmul.f32 %v14740_v46, %v14734_v43  ;;  %v14741_v5 = vld [vmem:[#allocation22_spill] sm:$0xff]  ;;  %v2002_v52 = vmul.f32 %v1992_v33, %v14738_v4  ;;  %v14750_v33 = vld [vmem:[#allocation68_spill] sm:$0xff] }
 0x925   :  { %2228 = vmatpush1.bf16.msra.mxu0 %v2152_v63  ;;  %2268 = vmatprep.subr.bf16.mxu1 %v2155_v32  ;;  %v14742_v38 = vld [vmem:[#allocation38_spill] sm:$0xff]  ;;  %v14746_v28 = vpack.c.bf16 %v14744_v0, %v14745_v1  ;;  %v14754_v0 = vld [vmem:[#allocation29_spill] sm:$0xff] }
 0x926   :  { %2229 = vmatprep.subr.bf16.mxu0 %v14737_v42  ;;  %v10289_v18 = vmul.f32 %v14742_v38, %v14741_v5  ;;  %2269 = vmatpush1.bf16.msra.mxu1 %v2154_v37  ;;  %v14747_v14 = vld [vmem:[#allocation30_spill] sm:$0xff]  ;;  %v14748_v42 = vld [vmem:[#allocation24_spill] sm:$0xff]  ;;  %v2040_v38 = vsel %vm355_vm7, %v10192_v3, %v14750_v33  ;;  %v2160_v1 = vpack.c.bf16 %v2000_v2, %v14754_v0  ;;  %v2075_v2 = vpop.permute.xlu0 %2074 }
 0x927   :  { %v1983_v45 = vpop.permute.xlu1 %1982  ;;  %2270 = vmatprep.subr.bf16.mxu1 %v14746_v28  ;;  %v2161_v47 = vpack.c.bf16 %v2001_v54, %v14747_v14  ;;  %v10307_v7 = vmul.f32 %v2044_v17, %v14748_v42  ;;  %v14749_v37 = vld [vmem:[#allocation18_spill] sm:$0xff]  ;;  %v1993_v54 = vsel %vm315_vm5, %v14743_v40, %v10147_v15  ;;  %v2007_v17 = vmul.f32 %v1999_v23, %v14734_v43  ;;  %v14756_v14 = vld [vmem:[#allocation65_spill] sm:$0xff] }
 0x928   :  { %v1995_v63 = vsel %vm315_vm5, %v1983_v45, %v14743_v40  ;;  %v1997_v32 = vsel %vm315_vm5, %v10076_v9, %v1983_v45  ;;  %v10310_v46 = vmul.f32 %v2041_v8, %v14749_v37  ;;  %v14751_v9 = vld [vmem:[#allocation49_spill] sm:$0xff]  ;;  %v14755_v8 = vld [vmem:[#allocation32_spill] sm:$0xff]  ;;  %v14759_v15 = vld [vmem:[#allocation46_spill] sm:$0xff] }
 0x929   :  { %v2005_v61 = vmul.f32 %v1995_v63, %v14729_v27  ;;  %v14752_v45 = vld [vmem:[#allocation45_spill] sm:$0xff]  ;;  %v2163_v28 = vpack.c.bf16 %v2003_v49, %v14755_v8  ;;  %v2039_v63 = vsel %vm355_vm7, %v10059_v22, %v14756_v14  ;;  %v14762_v8 = vld [vmem:[#allocation31_spill] sm:$0xff] }
 0x92a   :  { %v14753_v62 = vpack.c.bf16 %v14751_v9, %v14752_v45  ;;  %v14757_v27 = vld [vmem:[#allocation69_spill] sm:$0xff]  ;;  %v2004_v9 = vmul.f32 %v1997_v32, %v14727_v13  ;;  %v14758_v45 = vld [vmem:[#allocation50_spill] sm:$0xff]  ;;  %v2162_v43 = vpack.c.bf16 %v2002_v52, %v14762_v8  ;;  %v2053_v32 = vmul.f32 %v2040_v38, %v14749_v37 }
 0x92b   :  { %v14760_v40 = vpack.c.bf16 %v14758_v45, %v14759_v15  ;;  %v10339_v23 = vpop.permute.xlu1 %2100  ;;  %v2165_v49 = vpack.c.bf16 %v2009_v44, %v2005_v61  ;;  %v2043_v60 = vsel %vm355_vm7, %v14757_v27, %v10192_v3  ;;  %v14763_v45 = vld [vmem:[#allocation66_spill] sm:$0xff]  ;;  %v2006_v3 = vmul.f32 %v1993_v54, %v14738_v4  ;;  %v14765_v38 = vld [vmem:[#allocation17_spill] sm:$0xff] }
 0x92c   :  { %2230 = vmatpush1.bf16.msra.mxu0 %v14753_v62  ;;  %v2046_v62 = vsel %vm355_vm7, %v10228_v51, %v14757_v27  ;;  %v2042_v61 = vsel %vm355_vm7, %v14763_v45, %v10059_v22  ;;  %v2045_v44 = vsel %vm355_vm7, %v10064_v35, %v14763_v45  ;;  %v2049_v27 = vmul.f32 %v2039_v63, %v14749_v37 }
 0x92d   :  { %2231 = vmatprep.subr.bf16.mxu0 %v2161_v47  ;;  %2271 = vmatpush1.bf16.msra.mxu1 %v14760_v40  ;;  %v14761_v47 = vld [vmem:[#allocation59_spill] sm:$0xff]  ;;  %v2037_v22 = vsel %vm355_vm7, %v14750_v33, %v10228_v51  ;;  %v2167_v15 = vpack.c.bf16 %v2011_v53, %v2007_v17  ;;  %v2036_v40 = vsel %vm355_vm7, %v14756_v14, %v10064_v35 }
 0x92e   :  { %v2038_v0 = vsel %vm355_vm7, %v14733_v21, %v14761_v47  ;;  %2272 = vmatprep.subr.bf16.mxu1 %v2163_v28  ;;  %v14764_v21 = vld [vmem:[#allocation61_spill] sm:$0xff]  ;;  %v2055_v28 = vmul.f32 %v2046_v62, %v14765_v38  ;;  %v2052_v8 = vmul.f32 %v2043_v60, %v14748_v42  ;;  %v2164_v54 = vpack.c.bf16 %v10257_v11, %v2004_v9  ;;  %v14766_v14 = vld [vmem:[#allocation19_spill] sm:$0xff]  ;;  %v2103_v62 = vpop.permute.xlu0 %2102 }
 0x92f   :  { %v2078_v52 = vsel %vm395_vm6, %v10068_v56, %v14764_v21  ;;  %v10380_v51 = vpop.permute.xlu1 %2104  ;;  %v2051_v33 = vmul.f32 %v2045_v44, %v14765_v38  ;;  %v2080_v35 = vsel %vm395_vm6, %v10178_v41, %v10068_v56  ;;  %v2169_v60 = vpack.c.bf16 %v2053_v32, %v2049_v27  ;;  %v14767_v9 = vld [vmem:[#allocation21_spill] sm:$0xff]  ;;  %v14769_v27 = vld [vmem:[#allocation23_spill] sm:$0xff] }
 0x930   :  { %2232 = vmatpush1.bf16.msra.mxu0 %v2160_v1  ;;  %v2082_v1 = vsel %vm395_vm6, %v10066_v55, %v10178_v41  ;;  %v2085_v53 = vmul.f32 %v2078_v52, %v14741_v5  ;;  %v2047_v17 = vsel %vm355_vm7, %v14761_v47, %v14732_v50  ;;  %v2048_v11 = vmul.f32 %v2042_v61, %v14748_v42  ;;  %v14768_v47 = vld [vmem:[#allocation20_spill] sm:$0xff] }
 0x931   :  { %2233 = vmatprep.subr.bf16.mxu0 %v2165_v49  ;;  %2273 = vmatpush1.bf16.msra.mxu1 %v2162_v43  ;;  %v2166_v43 = vpack.c.bf16 %v10283_v16, %v2006_v3  ;;  %v2054_v63 = vmul.f32 %v2037_v22, %v14766_v14  ;;  %v2076_v56 = vsel %vm395_vm6, %v14764_v21, %v10066_v55 }
 0x932   :  { %2274 = vmatprep.subr.bf16.mxu1 %v2167_v15  ;;  %v2050_v41 = vmul.f32 %v2036_v40, %v14766_v14  ;;  %v2087_v49 = vmul.f32 %v2082_v1, %v14767_v9  ;;  %v2171_v32 = vpack.c.bf16 %v2055_v28, %v2051_v33  ;;  %v2168_v50 = vpack.c.bf16 %v2052_v8, %v2048_v11 }
 0x933   :  { %v2077_v16 = vsel %vm395_vm6, %v10072_v39, %v2075_v2  ;;  %v2084_v45 = vmul.f32 %v2080_v35, %v14768_v47  ;;  %v2083_v61 = vsel %vm395_vm6, %v2075_v2, %v10253_v48  ;;  %v2067_v44 = vpop.permute.xlu1 %2066  ;;  %v2059_v55 = vmul.f32 %v2047_v17, %v14765_v38  ;;  %v14771_v17 = vld [vmem:[#allocation40_spill] sm:$0xff] }
 0x934   :  { %2234 = vmatpush1.bf16.msra.mxu0 %v2164_v54  ;;  %v2079_v21 = vsel %vm395_vm6, %v2067_v44, %v10072_v39  ;;  %v2081_v52 = vsel %vm395_vm6, %v10253_v48, %v2067_v44  ;;  %v2173_v3 = vpack.c.bf16 %v2085_v53, %v10310_v46  ;;  %v2086_v22 = vmul.f32 %v2076_v56, %v14769_v27  ;;  %v2111_v54 = vpop.permute.xlu0 %2110  ;;  %v14773_v56 = vld [vmem:[#allocation39_spill] sm:$0xff] }
 0x935   :  { %2235 = vmatprep.subr.bf16.mxu0 %v2169_v60  ;;  %2275 = vmatpush1.bf16.msra.mxu1 %v2166_v43  ;;  %v2170_v28 = vpack.c.bf16 %v2054_v63, %v2050_v41  ;;  %v2114_v2 = vsel %vm435_vm8, %v10339_v23, %v10380_v51  ;;  %v2089_v15 = vmul.f32 %v2079_v21, %v14741_v5  ;;  %v14772_v43 = vld [vmem:[#allocation27_spill] sm:$0xff] }
 0x936   :  { %2276 = vmatprep.subr.bf16.mxu1 %v2171_v32  ;;  %v2058_v39 = vmul.f32 %v2038_v0, %v14766_v14  ;;  %v2090_v40 = vmul.f32 %v2077_v16, %v14769_v27  ;;  %v2091_v48 = vmul.f32 %v2083_v61, %v14767_v9  ;;  %v2175_v8 = vpack.c.bf16 %v2087_v49, %v2059_v55  ;;  %v14770_v0 = vld [vmem:[#allocation37_spill] sm:$0xff]  ;;  %v14776_v55 = vld [vmem:[#allocation42_spill] sm:$0xff] }
 0x937   :  { %v2172_v46 = vpack.c.bf16 %v2084_v45, %v10307_v7  ;;  %v2115_v1 = vsel %vm435_vm8, %v2103_v62, %v10094_v12  ;;  %v2088_v33 = vmul.f32 %v2081_v52, %v14768_v47  ;;  %v2097_v53 = vpop.permute.xlu1 %2096  ;;  %v2177_v35 = vpack.c.bf16 %v10289_v18, %v2089_v15  ;;  %v14774_v49 = vld [vmem:[#allocation25_spill] sm:$0xff]  ;;  %v14777_v15 = vld [vmem:[#allocation28_spill] sm:$0xff] }
 0x938   :  { %2236 = vmatpush1.bf16.msra.mxu0 %v2168_v50  ;;  %v2092_v60 = vmul.f32 %v14770_v0, %v14768_v47  ;;  %v2095_v11 = vmul.f32 %v14771_v17, %v14767_v9  ;;  %v2121_v63 = vmul.f32 %v2114_v2, %v14772_v43  ;;  %v2116_v7 = vsel %vm435_vm8, %v2097_v53, %v10339_v23  ;;  %v14775_v32 = vld [vmem:[#allocation41_spill] sm:$0xff] }
 0x939   :  { %2237 = vmatprep.subr.bf16.mxu0 %v2173_v3  ;;  %2277 = vmatpush1.bf16.msra.mxu1 %v2170_v28  ;;  %v2094_v41 = vmul.f32 %v14773_v56, %v14769_v27  ;;  %v2128_v50 = vmul.f32 %v14775_v32, %v14774_v49  ;;  %v2174_v18 = vpack.c.bf16 %v2086_v22, %v2058_v39  ;;  %v14781_v56 = vld [vmem:[#allocation62_spill] sm:$0xff] }
 0x93a   :  { %2278 = vmatprep.subr.bf16.mxu1 %v2175_v8  ;;  %v2117_v16 = vsel %vm435_vm8, %v10266_v36, %v2103_v62  ;;  %v2125_v45 = vmul.f32 %v2115_v1, %v14772_v43  ;;  %v2113_v61 = vsel %vm435_vm8, %v10094_v12, %v2111_v54  ;;  %v2119_v23 = vsel %vm435_vm8, %v2111_v54, %v10266_v36  ;;  %v14779_v1 = vld [vmem:[#allocation43_spill] sm:$0xff] }
 0x93b   :  { %v2179_v44 = vpack.c.bf16 %v2095_v11, %v2091_v48  ;;  %v2129_v21 = vmul.f32 %v14776_v55, %v14772_v43  ;;  %v2178_v52 = vpack.c.bf16 %v2094_v41, %v2090_v40  ;;  %v2176_v3 = vpack.c.bf16 %v2092_v60, %v2088_v33  ;;  %v2109_v22 = vpop.permute.xlu1 %2108  ;;  %v14778_v48 = vld [vmem:[#allocation26_spill] sm:$0xff]  ;;  %v14780_v33 = vld [vmem:[#allocation44_spill] sm:$0xff] }
 0x93c   :  { %2238 = vmatpush1.bf16.msra.mxu0 %v2172_v46  ;;  %v2120_v62 = vmul.f32 %v2116_v7, %v14774_v49  ;;  %v2124_v28 = vmul.f32 %v2117_v16, %v14774_v49  ;;  %v2112_v12 = vsel %vm435_vm8, %v10380_v51, %v2109_v22  ;;  %v2118_v36 = vsel %vm435_vm8, %v2109_v22, %v2097_v53 }
 0x93d   :  { %2239 = vmatprep.subr.bf16.mxu0 %v2177_v35  ;;  %2279 = vmatpush1.bf16.msra.mxu1 %v2174_v18  ;;  %v2181_v2 = vpack.c.bf16 %v2125_v45, %v2121_v63  ;;  %v2126_v39 = vmul.f32 %v2113_v61, %v14777_v15  ;;  %v2127_v40 = vmul.f32 %v2119_v23, %v14778_v48 }
 0x93e   :  { %2280 = vmatprep.subr.bf16.mxu1 %v2179_v44  ;;  %v2122_v8 = vmul.f32 %v2112_v12, %v14777_v15  ;;  %v2123_v46 = vmul.f32 %v2118_v36, %v14778_v48  ;;  %v2130_v54 = vmul.f32 %v14779_v1, %v14777_v15  ;;  %v2131_v51 = vmul.f32 %v14780_v33, %v14778_v48 }
 0x93f   :  { %v2180_v35 = vpack.c.bf16 %v2124_v28, %v2120_v62  ;;  %v2184_v60 = vpack.c.bf16 %v2128_v50, %v2128_v50  ;;  %v2185_v17 = vpack.c.bf16 %v2129_v21, %v2129_v21  ;;  %v7967_v41 = vcombine.low %v14781_v56, %v14781_v56 }
 0x940   :  { %2240 = vmatpush1.bf16.msra.mxu0 %v2176_v3  ;;  %v2182_v53 = vpack.c.bf16 %v2126_v39, %v2122_v8  ;;  %v2183_v0 = vpack.c.bf16 %v2127_v40, %v2123_v46  ;;  %v2186_v11 = vpack.c.bf16 %v2130_v54, %v2130_v54  ;;  %v2187_v63 = vpack.c.bf16 %v2131_v51, %v2131_v51  ;;  %v2452_v40 = vld [vmem:[%s7852_s24] sm:$0xff]  ;;  %s7853_s24 = sld [smem:[%s14371_s0 + %s8856_s19]]  }
 0x941   :  { %2241 = vmatprep.subr.bf16.mxu0 %v2181_v2  ;;  %2281 = vmatpush1.bf16.msra.mxu1 %v2178_v52  ;;  %v2206_v7 = vsel %vm498_vm9, %v2184_v60, 0  ;;  %v14782_v50 = vmov 0   ;;  %v2564_v8 = vld [vmem:[%s7854_s2] sm:$0xff]  ;;  %s10705_s2 = sld [smem:[%s14371_s0 + %s8857_s25]]   ;;  %s8864_s25 = smov 21  }
 0x942   :  { %2282 = vmatprep.subr.bf16.mxu1 %v2183_v0  ;;  %v2212_v32 = vsel %vm498_vm9, %v2186_v11, 0  ;;  %s11515_s17 = sld [smem:[%s14371_s0 + %s8864_s25]]  }
 0x944   :  { %2242 = vmatpush1.bf16.msra.mxu0 %v2180_v35 }
 0x945   :  { %7969 = vmatprep.subr.msk.bf16.mxu0 %vm498_vm9, %v2185_v17  ;;  %2283 = vmatpush1.bf16.msra.mxu1 %v2182_v53 }
 0x946   :  { %7971 = vmatprep.subr.msk.bf16.mxu1 %vm498_vm9, %v2187_v63 }
 0x948   :  { %2244 = vmatpush1.bf16.msra.mxu0 %v2206_v7 }
 0x949   :  { %2285 = vmatpush1.bf16.msra.mxu1 %v2212_v32 }
 0x94b   :  { %2250 = vmatmul.mubr.bf16.vlgmr.msra.gmra.mrb[20].mxu0 %v7967_v41 }
 0x94c   :  { %2505 = vmatprep.mubr.bf16.mxu0 %v14782_v50  ;;  %2291 = vmatmul.mubr.bf16.vlgmr.msra.gmra.mrb[20].mxu1 %v7967_v41  ;;  %v2193_v18 = vpop.permute.xlu1 %2192 }
 0x94d   :  { %2546 = vmatprep.mubr.bf16.mxu1 %v14782_v50 }
 0xa1e   :  { %v2251_v16 = vpop.f32.mrb[20].mxu0 }
 0xa1f   :  { %v2252_v45 = vadd.f32 %v2251_v16, %v2193_v18  ;;  %v2253_v61 = vpop.f32.mrb[21].mxu0  ;;  %v2292_v23 = vpop.f32.mrb[20].mxu1 }
 0xa20   :  { %v2255_v44 = vpop.f32.mrb[22].mxu0  ;;  %v2293_v21 = vadd.f32 %v2292_v23, %v2193_v18  ;;  %v2294_v52 = vpop.f32.mrb[21].mxu1  ;;  %v2254_v12 = vadd.f32 %v2253_v61, %v2193_v18 }
 0xa21   :  { %v10478_v55 = vmax.f32 %v2252_v45, 0.0  ;;  %v2256_v3 = vpop.f32.mrb[23].mxu0  ;;  %v2296_v62 = vpop.f32.mrb[22].mxu1  ;;  %v2295_v2 = vadd.f32 %v2294_v52, %v2193_v18 }
 0xa22   :  { %v10480_v22 = vmax.f32 %v2293_v21, 0.0  ;;  %v2297_v28 = vpop.f32.mrb[23].mxu1  ;;  %v10498_v36 = vmax.f32 %v2254_v12, 0.0 }
 0xa23   :  { %2303 = vrot.lane.b32.xlu0 %v10478_v55, %s8826_s6  ;;  %v10508_v39 = vmax.f32 %v2295_v2, 0.0 }
 0xa24   :  { %2323 = vrot.lane.b32.xlu1 %v10480_v22, %s8827_s7 }
 0xa27   :  { %2319 = vrot.lane.b32.xlu0 %v10478_v55, %s8827_s7 }
 0xa28   :  { %2371 = vrot.lane.b32.xlu1 %v10480_v22, %s8830_s10 }
 0xa2b   :  { %2335 = vrot.lane.b32.xlu0 %v10478_v55, %s8828_s8 }
 0xa2c   :  { %2339 = vrot.lane.b32.xlu1 %v10480_v22, %s8828_s8 }
 0xa2f   :  { %2351 = vrot.lane.b32.xlu0 %v10478_v55, %s8829_s9 }
 0xa30   :  { %2383 = vrot.lane.b32.xlu1 %v10478_v55, %s8831_s11 }
 0xa33   :  { %2307 = vrot.lane.b32.xlu0 %v10480_v22, %s8826_s6 }
 0xa34   :  { %2305 = vrot.lane.b32.xlu1 %v10498_v36, %s8826_s6 }
 0xa37   :  { %2367 = vrot.lane.b32.xlu0 %v10478_v55, %s8830_s10 }
 0xa38   :  { %2321 = vrot.lane.b32.xlu1 %v10498_v36, %s8827_s7 }
 0xa3b   :  { %2355 = vrot.lane.b32.xlu0 %v10480_v22, %s8829_s9 }
 0xa3c   :  { %2325 = vrot.lane.b32.xlu1 %v10508_v39, %s8827_s7 }
 0xa3f   :  { %2387 = vrot.lane.b32.xlu0 %v10480_v22, %s8831_s11 }
 0xa40   :  { %2337 = vrot.lane.b32.xlu1 %v10498_v36, %s8828_s8 }
 0xa43   :  { %2403 = vrot.lane.b32.xlu0 %v10480_v22, %s8832_s12 }
 0xa44   :  { %2353 = vrot.lane.b32.xlu1 %v10498_v36, %s8829_s9 }
 0xa47   :  { %2399 = vrot.lane.b32.xlu0 %v10478_v55, %s8832_s12 }
 0xa48   :  { %2357 = vrot.lane.b32.xlu1 %v10508_v39, %s8829_s9 }
 0xa4b   :  { %2309 = vrot.lane.b32.xlu0 %v10508_v39, %s8826_s6 }
 0xa4c   :  { %2385 = vrot.lane.b32.xlu1 %v10498_v36, %s8831_s11 }
 0xa4f   :  { %2341 = vrot.lane.b32.xlu0 %v10508_v39, %s8828_s8 }
 0xa50   :  { %2401 = vrot.lane.b32.xlu1 %v10498_v36, %s8832_s12 }
 0xa53   :  { %2369 = vrot.lane.b32.xlu0 %v10498_v36, %s8830_s10 }
 0xa54   :  { %2373 = vrot.lane.b32.xlu1 %v10508_v39, %s8830_s10 }
 0xa57   :  { %2415 = vrot.lane.b32.xlu0 %v10478_v55, %s14497_s13 }
 0xa58   :  { %2417 = vrot.lane.b32.xlu1 %v10498_v36, %s14497_s13 }
 0xa5b   :  { %2419 = vrot.lane.b32.xlu0 %v10480_v22, %s14497_s13 }
 0xa5c   :  { %2389 = vrot.lane.b32.xlu1 %v10508_v39, %s8831_s11 }
 0xa5f   :  { %2405 = vrot.lane.b32.xlu0 %v10508_v39, %s8832_s12 }
 0xa60   :  { %2421 = vrot.lane.b32.xlu1 %v10508_v39, %s14497_s13 }
 0xa63   :  { %2455 = vperm.xlu0 %8492, %v2452_v40  }
 0xa64   :  { %2567 = vperm.xlu1 %8493, %v2564_v8  }
 0xa95   :  { %v2304_v46 = vpop.permute.xlu0 %2303 }
 0xa96   :  { %v2324_v1 = vpop.permute.xlu1 %2323 }
 0xa99   :  { %v2320_v54 = vpop.permute.xlu0 %2319 }
 0xa9a   :  { %v10556_v33 = vpop.permute.xlu1 %2371 }
 0xa9d   :  { %v2336_v51 = vpop.permute.xlu0 %2335 }
 0xa9e   :  { %v2340_v35 = vpop.permute.xlu1 %2339 }
 0xaa1   :  { %v2352_v53 = vpop.permute.xlu0 %2351 }
 0xaa2   :  { %v10558_v0 = vpop.permute.xlu1 %2383 }
 0xaa5   :  { %v2308_v60 = vpop.permute.xlu0 %2307 }
 0xaa6   :  { %v2306_v17 = vpop.permute.xlu1 %2305 }
 0xaa7   :  { %v2313_v63 = vsel %vm156_vm1, %v2304_v46, %v2306_v17 }
 0xaa8   :  { %v2316_v41 = vmul.f32 %v2313_v63, %v9004_v19  ;;  %v2312_v19 = vsel %vm156_vm1, %v2306_v17, %v2308_v60 }
 0xaa9   :  { %v10560_v11 = vpop.permute.xlu0 %2367  ;;  %v2317_v40 = vmul.f32 %v2312_v19, %v9028_v30 }
 0xaaa   :  { %v2322_v7 = vpop.permute.xlu1 %2321 }
 0xaab   :  { %v2329_v56 = vsel %vm195_vm2, %v2320_v54, %v2322_v7  ;;  %v2328_v52 = vsel %vm195_vm2, %v2322_v7, %v2324_v1 }
 0xaac   :  { %v2332_v32 = vmul.f32 %v2329_v56, %v9007_v20  ;;  %v2333_v12 = vmul.f32 %v2328_v52, %v9035_v34 }
 0xaad   :  { %v2356_v18 = vpop.permute.xlu0 %2355 }
 0xaae   :  { %v2326_v16 = vpop.permute.xlu1 %2325  ;;  %v2432_v45 = vpack.c.bf16 %v2332_v32, %v2316_v41 }
 0xaaf   :  { %v2330_v20 = vsel %vm195_vm2, %v2326_v16, %v2320_v54  ;;  %v2327_v2 = vsel %vm195_vm2, %v2324_v1, %v2326_v16  ;;  %v2433_v16 = vpack.c.bf16 %v2333_v12, %v2317_v40 }
 0xab0   :  { %2473 = vmatprep.subr.bf16.mxu0 %v2432_v45  ;;  %v2331_v8 = vmul.f32 %v2330_v20, %v9015_v25  ;;  %v2334_v1 = vmul.f32 %v2327_v2, %v9025_v29 }
 0xab1   :  { %v10568_v61 = vpop.permute.xlu0 %2387 }
 0xab2   :  { %v2338_v23 = vpop.permute.xlu1 %2337 }
 0xab3   :  { %v2345_v63 = vsel %vm235_vm3, %v2336_v51, %v2338_v23 }
 0xab4   :  { %v2348_v45 = vmul.f32 %v2345_v63, %v9056_v57 }
 0xab5   :  { %v10570_v44 = vpop.permute.xlu0 %2403 }
 0xab6   :  { %v2354_v21 = vpop.permute.xlu1 %2353 }
 0xab7   :  { %v2361_v62 = vsel %vm275_vm4, %v2352_v53, %v2354_v21  ;;  %v2360_v54 = vsel %vm275_vm4, %v2354_v21, %v2356_v18 }
 0xab8   :  { %v2364_v7 = vmul.f32 %v2361_v62, %v9059_v58  ;;  %v14784_v62 = vld [vmem:[#allocation9_spill] sm:$0xff] }
 0xab9   :  { %v10574_v3 = vpop.permute.xlu0 %2399 }
 0xaba   :  { %v2358_v28 = vpop.permute.xlu1 %2357  ;;  %v2436_v57 = vpack.c.bf16 %v2364_v7, %v2348_v45  ;;  %v14787_v45 = vld [vmem:[#allocation14_spill] sm:$0xff] }
 0xabb   :  { %v2362_v25 = vsel %vm275_vm4, %v2358_v28, %v2352_v53  ;;  %v2359_v58 = vsel %vm275_vm4, %v2356_v18, %v2358_v28  ;;  %v14783_v18 = vld [vmem:[#allocation7_spill] sm:$0xff] }
 0xabc   :  { %v2363_v53 = vmul.f32 %v2362_v25, %v14720_v31  ;;  %v2366_v19 = vmul.f32 %v2359_v58, %v14719_v6 }
 0xabd   :  { %v2310_v17 = vpop.permute.xlu0 %2309 }
 0xabe   :  { %v2311_v56 = vsel %vm156_vm1, %v2308_v60, %v2310_v17  ;;  %v2314_v34 = vsel %vm156_vm1, %v2310_v17, %v2304_v46  ;;  %v2386_v32 = vpop.permute.xlu1 %2385  ;;  %v2344_v60 = vsel %vm235_vm3, %v2338_v23, %v2340_v35  ;;  %v2365_v46 = vmul.f32 %v2360_v54, %v14722_v59  ;;  %v14785_v59 = vld [vmem:[#allocation8_spill] sm:$0xff] }
 0xabf   :  { %v2315_v30 = vmul.f32 %v2314_v34, %v9012_v24  ;;  %v2318_v41 = vmul.f32 %v2311_v56, %v9018_v26  ;;  %v2349_v12 = vmul.f32 %v2344_v60, %v14785_v59  ;;  %v14786_v56 = vld [vmem:[#allocation15_spill] sm:$0xff]  ;;  %v2393_v25 = vsel %vm355_vm7, %v10558_v0, %v2386_v32 }
 0xac1   :  { %v2431_v29 = vpack.c.bf16 %v2331_v8, %v2315_v30  ;;  %v2342_v21 = vpop.permute.xlu0 %2341  ;;  %v2434_v52 = vpack.c.bf16 %v2334_v1, %v2318_v41  ;;  %v2437_v40 = vpack.c.bf16 %v2365_v46, %v2349_v12 }
 0xac2   :  { %v2343_v24 = vsel %vm235_vm3, %v2340_v35, %v2342_v21  ;;  %v2346_v26 = vsel %vm235_vm3, %v2342_v21, %v2336_v51  ;;  %v2402_v28 = vpop.permute.xlu1 %2401  ;;  %v2392_v51 = vsel %vm355_vm7, %v2386_v32, %v10568_v61 }
 0xac3   :  { %v2347_v20 = vmul.f32 %v2346_v26, %v14783_v18  ;;  %v2350_v23 = vmul.f32 %v2343_v24, %v14784_v62  ;;  %2474 = vmatpush1.bf16.msra.mxu0 %v2431_v29  ;;  %2514 = vmatprep.subr.bf16.mxu1 %v2434_v52  ;;  %v2408_v31 = vsel %vm395_vm6, %v2402_v28, %v10570_v44 }
 0xac4   :  { %2475 = vmatprep.subr.bf16.mxu0 %v2436_v57  ;;  %2515 = vmatpush1.bf16.msra.mxu1 %v2433_v16  ;;  %v2409_v8 = vsel %vm395_vm6, %v10574_v3, %v2402_v28  ;;  %v2412_v54 = vmul.f32 %v2408_v31, %v14741_v5  ;;  %v2396_v30 = vmul.f32 %v2392_v51, %v14749_v37 }
 0xac5   :  { %v2435_v6 = vpack.c.bf16 %v2363_v53, %v2347_v20  ;;  %v2370_v35 = vpop.permute.xlu0 %2369  ;;  %v2438_v2 = vpack.c.bf16 %v2366_v19, %v2350_v23  ;;  %v2411_v37 = vmul.f32 %v2409_v8, %v14768_v47  ;;  %v2451_v23 = vld [vmem:[%s7851_s18] sm:$0xf]  ;;  %s10712_s18 = sld [smem:[%s14371_s0 + %s8859_s4]]   ;;  %s8862_s4 = smov 20  }
 0xac6   :  { %v2376_v63 = vsel %vm315_vm5, %v2370_v35, %v10556_v33  ;;  %v2377_v17 = vsel %vm315_vm5, %v10560_v11, %v2370_v35  ;;  %v2374_v1 = vpop.permute.xlu1 %2373  ;;  %v2444_v21 = vpack.c.bf16 %v2412_v54, %v2396_v30 }
 0xac7   :  { %v2379_v7 = vmul.f32 %v2377_v17, %v14727_v13  ;;  %v2380_v34 = vmul.f32 %v2376_v63, %v14786_v56  ;;  %2476 = vmatpush1.bf16.msra.mxu0 %v2435_v6  ;;  %2516 = vmatprep.subr.bf16.mxu1 %v2438_v2  ;;  %v2375_v41 = vsel %vm315_vm5, %v10556_v33, %v2374_v1 }
 0xac8   :  { %v2378_v5 = vsel %vm315_vm5, %v2374_v1, %v10560_v11  ;;  %2517 = vmatpush1.bf16.msra.mxu1 %v2437_v40  ;;  %v2381_v16 = vmul.f32 %v2375_v41, %v14738_v4  ;;  %v2395_v11 = vmul.f32 %v2393_v25, %v14748_v42  ;;  %v2559_v1 = vld [vmem:[%s7853_s24] sm:$0xf]  ;;  %s8861_s24 = smov 19  }
 0xac9   :  { %v2439_v13 = vpack.c.bf16 %v2379_v7, %v10478_v55  ;;  %v2382_v58 = vmul.f32 %v2378_v5, %v14787_v45  ;;  %v2416_v60 = vpop.permute.xlu0 %2415  ;;  %v2440_v32 = vpack.c.bf16 %v2380_v34, %v10498_v36 }
 0xaca   :  { %v2441_v46 = vpack.c.bf16 %v2381_v16, %v10480_v22  ;;  %v2418_v29 = vpop.permute.xlu1 %2417  ;;  %v2443_v22 = vpack.c.bf16 %v2411_v37, %v2395_v11 }
 0xacb   :  { %2477 = vmatprep.subr.bf16.mxu0 %v2440_v32  ;;  %v2442_v33 = vpack.c.bf16 %v2382_v58, %v10508_v39  ;;  %v2425_v55 = vsel %vm435_vm8, %v2416_v60, %v2418_v29 }
 0xacc   :  { %2478 = vmatpush1.bf16.msra.mxu0 %v2439_v13  ;;  %v2427_v4 = vmul.f32 %v2425_v55, %v14774_v49 }
 0xacd   :  { %2518 = vmatprep.subr.bf16.mxu1 %v2442_v33  ;;  %2479 = vmatprep.subr.bf16.mxu0 %v2444_v21  ;;  %v2420_v47 = vpop.permute.xlu0 %2419  ;;  %v8858_v33 = vmov 1966171168  }
 0xace   :  { %2519 = vmatpush1.bf16.msra.mxu1 %v2441_v46  ;;  %v2424_v36 = vsel %vm435_vm8, %v2418_v29, %v2420_v47  ;;  %v2447_v42 = vpack.c.bf16 %v2427_v4, %v2427_v4  ;;  %v2390_v52 = vpop.permute.xlu1 %2389  ;;  %v5213_v21 = vunpack.c.l.s4 %v8858_v33 }
 0xacf   :  { %v2428_v39 = vmul.f32 %v2424_v36, %v14772_v43  ;;  %v2391_v53 = vsel %vm355_vm7, %v10568_v61, %v2390_v52  ;;  %v2394_v49 = vsel %vm355_vm7, %v2390_v52, %v10558_v0 }
 0xad0   :  { %2480 = vmatpush1.bf16.msra.mxu0 %v2443_v22  ;;  %v2397_v57 = vmul.f32 %v2391_v53, %v14766_v14  ;;  %v2398_v18 = vmul.f32 %v2394_v49, %v14765_v38  ;;  %v2462_v62 = vsel %vm498_vm9, %v2447_v42, 0 }
 0xad1   :  { %v2448_v24 = vpack.c.bf16 %v2428_v39, %v2428_v39  ;;  %v2406_v26 = vpop.permute.xlu0 %2405  ;;  %v5214_v39 = vunpack.c.0.s8 %v5213_v21 }
 0xad2   :  { %v2407_v19 = vsel %vm395_vm6, %v10570_v44, %v2406_v26  ;;  %v2410_v43 = vsel %vm395_vm6, %v2406_v26, %v10574_v3  ;;  %v2422_v0 = vpop.permute.xlu1 %2421 }
 0xad3   :  { %v2413_v61 = vmul.f32 %v2407_v19, %v14769_v27  ;;  %v2414_v20 = vmul.f32 %v2410_v43, %v14767_v9  ;;  %7973 = vmatprep.subr.msk.bf16.mxu0 %vm498_vm9, %v2448_v24  ;;  %v2423_v14 = vsel %vm435_vm8, %v2420_v47, %v2422_v0  ;;  %v2426_v44 = vsel %vm435_vm8, %v2422_v0, %v2416_v60  ;;  %v14788_v24 = vld [vmem:[#allocation2_spill] sm:$0xff] }
 0xad4   :  { %2482 = vmatpush1.bf16.msra.mxu0 %v2462_v62  ;;  %v2429_v38 = vmul.f32 %v2423_v14, %v14777_v15  ;;  %v2430_v27 = vmul.f32 %v2426_v44, %v14778_v48  ;;  %v5217_v26 = vsub.s32 %v5214_v39, %v14788_v24  ;;  %v7982_v39 = vld [vmem:[%s8982_s21 + $0x2] ss:$8 sm:$0xf] }
 0xad5   :  { %v2445_v3 = vpack.c.bf16 %v2413_v61, %v2397_v57  ;;  %v2446_v28 = vpack.c.bf16 %v2414_v20, %v2398_v18 }
 0xad6   :  { %v2449_v9 = vpack.c.bf16 %v2429_v38, %v2429_v38  ;;  %v2450_v59 = vpack.c.bf16 %v2430_v27, %v2430_v27  ;;  %v14789_v38 = vlaneseq  ;;  %v14790_v27 = vmov 0 }
 0xad7   :  { %7974 = vmatmul.mubr.msk.bf16.vlgmr.msra.gmra.mrb[24].mxu0 %vm494_vm10, %v2451_v23  ;;  %2520 = vmatprep.subr.bf16.mxu1 %v2446_v28 }
 0xad8   :  { %2521 = vmatpush1.bf16.msra.mxu1 %v2445_v3  ;;  %2618 = vmatprep.mubr.bf16.mxu0 %v14782_v50  ;;  %v2468_v12 = vsel %vm498_vm9, %v2449_v9, 0  ;;  %vm10716_vm15 = vcmp.lt.s32.totalorder %v14789_v38, 512 }
 0xad9   :  { %7975 = vmatprep.subr.msk.bf16.mxu1 %vm498_vm9, %v2450_v59  ;;  %v14791_v27 = vsel %vm10716_vm15, 4294967295, %v14790_v27 }
 0xada   :  { %14792 = vst [vmem:[#allocation53_spill] sm:$0xff] %v14791_v27 }
 0xadc   :  { %2523 = vmatpush1.bf16.msra.mxu1 %v2468_v12 }
 0xadf   :  { %7976 = vmatmul.mubr.msk.bf16.vlgmr.msra.gmra.mrb[24].mxu1 %vm494_vm10, %v2451_v23 }
 0xae0   :  { %3121 = vmatprep.mubr.bf16.mxu1 %v14782_v50 }
 0xae2   :  { %v2456_v15 = vpop.permute.xlu0 %2455 }
 0xae3   :  { %v2568_v60 = vpop.permute.xlu1 %2567 }
 0xbaa   :  { %v2507_v48 = vpop.f32.mrb[24].mxu0 }
 0xbab   :  { %v2508_v31 = vadd.f32 %v2507_v48, %v2456_v15  ;;  %v2509_v51 = vpop.f32.mrb[25].mxu0 }
 0xbac   :  { %v2510_v6 = vadd.f32 %v2509_v51, %v2456_v15  ;;  %v2511_v35 = vpop.f32.mrb[26].mxu0 }
 0xbad   :  { %v2555_v2 = vmax.f32 %v2508_v31, 0.0  ;;  %v2512_v40 = vpop.f32.mrb[27].mxu0 }
 0xbae   :  { %v2556_v8 = vmax.f32 %v2510_v6, 0.0 }
 0xbaf   :  { %v2560_v63 = vpack.c.bf16 %v2555_v2, %v2555_v2 }
 0xbb0   :  { %v2561_v17 = vpack.c.bf16 %v2556_v8, %v2556_v8 }
 0xbb1   :  { %v2575_v54 = vsel %vm498_vm9, %v2560_v63, 0  ;;  %v3027_v63 = vld [vmem:[%s10794_s23] sm:$0xff] }
 0xbb2   :  { %v2548_v7 = vpop.f32.mrb[24].mxu1  ;;  %7977 = vmatprep.subr.msk.bf16.mxu0 %vm498_vm9, %v2561_v17 }
 0xbb3   :  { %v2549_v56 = vadd.f32 %v2548_v7, %v2456_v15  ;;  %v2550_v34 = vpop.f32.mrb[25].mxu1  ;;  %2587 = vmatpush1.bf16.msra.mxu0 %v2575_v54  ;;  %v2714_v54 = vld [vmem:[%s8982_s21] ss:$8 sm:$0xf] }
 0xbb4   :  { %v2551_v25 = vadd.f32 %v2550_v34, %v2456_v15  ;;  %v2552_v30 = vpop.f32.mrb[26].mxu1  ;;  %v7981_v7 = vld [vmem:[%s8982_s21 + $0x1] ss:$8 sm:$0xf] }
 0xbb5   :  { %v2557_v41 = vmax.f32 %v2549_v56, 0.0  ;;  %v2553_v5 = vpop.f32.mrb[27].mxu1  ;;  %v14798_v34 = vld [vmem:[#allocation3_spill] sm:$0xff] }
 0xbb6   :  { %v2558_v13 = vmax.f32 %v2551_v25, 0.0  ;;  %7978 = vmatmul.mubr.msk.bf16.vlgmr.msra.gmra.mrb[28].mxu0 %vm2570_vm14, %v2559_v1  ;;  %v10811_v25 = vrot.slane %v7981_v7, %v14798_v34 }
 0xbb7   :  { %v2562_v16 = vpack.c.bf16 %v2557_v41, %v2557_v41  ;;  %2659 = vmatprep.mubr.bf16.mxu0 %v14782_v50 }
 0xbb8   :  { %v2563_v45 = vpack.c.bf16 %v2558_v13, %v2558_v13  ;;  %14800 = vst [vmem:[#allocation64_spill] sm:$0xff] %v10811_v25 }
 0xbb9   :  { %v2581_v58 = vsel %vm498_vm9, %v2562_v16, 0 }
 0xbba   :  { %7979 = vmatprep.subr.msk.bf16.mxu0 %vm498_vm9, %v2563_v45 }
 0xbbb   :  { %2628 = vmatpush1.bf16.msra.mxu0 %v2581_v58 }
 0xbbe   :  { %7980 = vmatmul.mubr.msk.bf16.vlgmr.msra.gmra.mrb[32].mxu0 %vm2570_vm14, %v2559_v1  ;;  %v10808_v1 = vrot.slane %v2714_v54, %v14798_v34 }
 0xbbf   :  { %3080 = vmatprep.mubr.bf16.mxu0 %v14782_v50 }
 0xbc0   :  { %14799 = vst [vmem:[#allocation60_spill] sm:$0xff] %v10808_v1 }
 0xc89   :  { %v2620_v32 = vpop.f32.mrb[28].mxu0 }
 0xc8a   :  { %v2621_v37 = vadd.f32 %v2620_v32, %v2568_v60  ;;  %v2622_v46 = vpop.f32.mrb[29].mxu0 }
 0xc8b   :  { %v2623_v29 = vadd.f32 %v2622_v46, %v2568_v60  ;;  %v2624_v11 = vpop.f32.mrb[30].mxu0 }
 0xc8c   :  { %v2678_v55 = vsub.f32 0.0, %v2621_v37  ;;  %v2625_v4 = vpop.f32.mrb[31].mxu0 }
 0xc8d   :  { %v2672_v47 = vcombine.low %v2621_v37, %v2623_v29  ;;  %v2679_v22 = vsub.f32 0.0, %v2623_v29 }
 0xc8e   :  { %v2682_v36 = vmul.f32 1.442695, %v2678_v55 }
 0xc8f   :  { %2676 = vst [vmem:[%s10705_s2] sm:$0x77] %v2672_v47  ;;  %v2684_v42 = vmul.f32 1.442695, %v2679_v22  ;;  %v5218_v61 = vrot.slane %v2672_v47, %v5217_v26 }
 0xc90   :  { %8666 = vpow2.f32 %v2682_v36  ;;  %v7983_v36 = vld [vmem:[%s8982_s21 + $0x3] ss:$8 sm:$0xf] }
 0xc91   :  { %8668 = vpow2.f32 %v2684_v42  ;;  %v2661_v52 = vpop.f32.mrb[32].mxu0 }
 0xc92   :  { %v2662_v53 = vadd.f32 %v2661_v52, %v2568_v60  ;;  %v2663_v49 = vpop.f32.mrb[33].mxu0 }
 0xc93   :  { %v2664_v57 = vadd.f32 %v2663_v49, %v2568_v60  ;;  %v2665_v19 = vpop.f32.mrb[34].mxu0  ;;  %v14802_v49 = vld [vmem:[#allocation4_spill] sm:$0xff] }
 0xc94   :  { %v2666_v43 = vpop.f32.mrb[35].mxu0  ;;  %v2680_v9 = vsub.f32 0.0, %v2662_v53  ;;  %v10847_v24 = vrot.slane %v2714_v54, %v14802_v49 }
 0xc95   :  { %v2673_v18 = vcombine.low %v2662_v53, %v2664_v57  ;;  %v2681_v59 = vsub.f32 0.0, %v2664_v57  ;;  %v10844_v53 = vrot.slane %v7983_v36, %v14798_v34  ;;  %v14806_v43 = vld [vmem:[#allocation5_spill] sm:$0xff] }
 0xc96   :  { %v2686_v48 = vmul.f32 1.442695, %v2680_v9  ;;  %14803 = vst [vmem:[#allocation13_spill] sm:$0xff] %v10847_v24 }
 0xc97   :  { %2677 = vst [vmem:[%s10705_s2 + $0x8] sm:$0x77] %v2673_v18  ;;  %v5225_v20 = vrot.slane %v2673_v18, %v5217_v26  ;;  %v2688_v31 = vmul.f32 1.442695, %v2681_v59  ;;  %14801 = vst [vmem:[#allocation63_spill] sm:$0xff] %v10844_v53  ;;  %v10857_v18 = vrot.slane %v2714_v54, %v14806_v43  ;;  %s11426_s2 = sld [smem:[%s14371_s0 + %s8861_s24]]  }
 0xc99   :  { %v5226_v0 = vcombine.low %v5218_v61, %v5225_v20  ;;  %14807 = vst [vmem:[#allocation34_spill] sm:$0xff] %v10857_v18  ;;  %v10860_v61 = vrot.slane %v7981_v7, %v14802_v49  ;;  %v10863_v20 = vrot.slane %v7981_v7, %v14806_v43 }
 0xc9a   :  { %v8667_v62 = vpop.eup %8666 }
 0xc9b   :  { %v8669_v14 = vpop.eup %8668  ;;  %v2690_v44 = vadd.f32 1.0, %v8667_v62  ;;  %v5233_v23 = vrot.slane %v5226_v0, %v5217_v26  ;;  %v14804_v26 = vld [vmem:[#allocation6_spill] sm:$0xff]  ;;  %v10866_v0 = vrot.slane %v7982_v39, %v14798_v34 }
 0xc9c   :  { %v2691_v3 = vadd.f32 1.0, %v8669_v14  ;;  %v10850_v57 = vrot.slane %v7981_v7, %v14804_v26  ;;  %v10869_v62 = vrot.slane %v2714_v54, %v14804_v26 }
 0xc9d   :  { %8670 = vrcp.f32 %v2690_v44  ;;  %v10720_v28 = vcombine.high %v5233_v23, %v5233_v23 }
 0xc9e   :  { %8672 = vrcp.f32 %v2691_v3  ;;  %14805 = vst [vmem:[#allocation33_spill] sm:$0xff] %v10850_v57 }
 0xc9f   :  { %14793 = vst [vmem:[#allocation12_spill] sm:$0xff] %v10720_v28  ;;  %8087 = vst.msk [vmem:[%s10712_s18 + $0x2] ss:$4 sm:$0xf] %vm10716_vm15, %v10720_v28  ;;  %8674 = vpow2.f32 %v2686_v48 }
 0xca0   :  { %8676 = vpow2.f32 %v2688_v31  ;;  %v7984_v31 = vld [vmem:[%s8982_s21 + $0x5] ss:$8 sm:$0xf] }
 0xca7   :  { %v10726_v12 = vpop.eup %8670 }
 0xca8   :  { %14794 = vst [vmem:[#allocation10_spill] sm:$0xff] %v10726_v12  ;;  %v10728_v15 = vpop.eup %8672  ;;  %2702 = vrot.lane.b32.xlu0 %v10726_v12, %s8826_s6 }
 0xca9   :  { %14795 = vst [vmem:[#allocation55_spill] sm:$0xff] %v10728_v15  ;;  %2704 = vrot.lane.b32.xlu1 %v10728_v15, %s8826_s6  ;;  %v8675_v51 = vpop.eup %8674 }
 0xcaa   :  { %v8677_v6 = vpop.eup %8676  ;;  %v2692_v35 = vadd.f32 1.0, %v8675_v51 }
 0xcab   :  { %v2693_v2 = vadd.f32 1.0, %v8677_v6 }
 0xcac   :  { %2740 = vrot.lane.b32.xlu0 %v10726_v12, %s8827_s7  ;;  %8678 = vrcp.f32 %v2692_v35 }
 0xcad   :  { %2742 = vrot.lane.b32.xlu1 %v10728_v15, %s8827_s7  ;;  %8680 = vrcp.f32 %v2693_v2 }
 0xcb0   :  { %2778 = vrot.lane.b32.xlu0 %v10726_v12, %s8828_s8 }
 0xcb1   :  { %2780 = vrot.lane.b32.xlu1 %v10728_v15, %s8828_s8 }
 0xcb4   :  { %2816 = vrot.lane.b32.xlu0 %v10726_v12, %s8829_s9 }
 0xcb5   :  { %2818 = vrot.lane.b32.xlu1 %v10728_v15, %s8829_s9 }
 0xcb6   :  { %v10762_v40 = vpop.eup %8678 }
 0xcb7   :  { %14796 = vst [vmem:[#allocation11_spill] sm:$0xff] %v10762_v40  ;;  %v10764_v8 = vpop.eup %8680 }
 0xcb8   :  { %2854 = vrot.lane.b32.xlu0 %v10726_v12, %s8830_s10  ;;  %14797 = vst [vmem:[#allocation54_spill] sm:$0xff] %v10764_v8 }
 0xcb9   :  { %2856 = vrot.lane.b32.xlu1 %v10728_v15, %s8830_s10 }
 0xcbc   :  { %2892 = vrot.lane.b32.xlu0 %v10726_v12, %s8831_s11 }
 0xcbd   :  { %2894 = vrot.lane.b32.xlu1 %v10728_v15, %s8831_s11 }
 0xcc0   :  { %2930 = vrot.lane.b32.xlu0 %v10726_v12, %s8832_s12 }
 0xcc1   :  { %2932 = vrot.lane.b32.xlu1 %v10728_v15, %s8832_s12 }
 0xcc4   :  { %2968 = vrot.lane.b32.xlu0 %v10726_v12, %s14497_s13 }
 0xcc5   :  { %2970 = vrot.lane.b32.xlu1 %v10728_v15, %s14497_s13 }
 0xcc8   :  { %2706 = vrot.lane.b32.xlu0 %v10762_v40, %s8826_s6 }
 0xcc9   :  { %2708 = vrot.lane.b32.xlu1 %v10764_v8, %s8826_s6 }
 0xccc   :  { %2744 = vrot.lane.b32.xlu0 %v10762_v40, %s8827_s7 }
 0xccd   :  { %2746 = vrot.lane.b32.xlu1 %v10764_v8, %s8827_s7 }
 0xcd0   :  { %2782 = vrot.lane.b32.xlu0 %v10762_v40, %s8828_s8 }
 0xcd1   :  { %2784 = vrot.lane.b32.xlu1 %v10764_v8, %s8828_s8 }
 0xcd4   :  { %2820 = vrot.lane.b32.xlu0 %v10762_v40, %s8829_s9 }
 0xcd5   :  { %2822 = vrot.lane.b32.xlu1 %v10764_v8, %s8829_s9 }
 0xcd8   :  { %2858 = vrot.lane.b32.xlu0 %v10762_v40, %s8830_s10 }
 0xcd9   :  { %2860 = vrot.lane.b32.xlu1 %v10764_v8, %s8830_s10 }
 0xcdc   :  { %2896 = vrot.lane.b32.xlu0 %v10762_v40, %s8831_s11 }
 0xcdd   :  { %2898 = vrot.lane.b32.xlu1 %v10764_v8, %s8831_s11 }
 0xce0   :  { %2934 = vrot.lane.b32.xlu0 %v10762_v40, %s8832_s12 }
 0xce1   :  { %2936 = vrot.lane.b32.xlu1 %v10764_v8, %s8832_s12 }
 0xce4   :  { %2972 = vrot.lane.b32.xlu0 %v10762_v40, %s14497_s13 }
 0xce5   :  { %2974 = vrot.lane.b32.xlu1 %v10764_v8, %s14497_s13 }
 0xce8   :  { %3030 = vperm.xlu0 %8492, %v3027_v63  }
 0xd1a   :  { %v2703_v17 = vpop.permute.xlu0 %2702 }
 0xd1b   :  { %v2705_v56 = vpop.permute.xlu1 %2704 }
 0xd1c   :  { %v2712_v30 = vsel %vm156_vm1, %v2703_v17, %v2705_v56 }
 0xd1d   :  { %v2737_v16 = vmul.f32 %v10808_v1, %v2712_v30 }
 0xd1e   :  { %v2741_v41 = vpop.permute.xlu0 %2740 }
 0xd1f   :  { %v2743_v5 = vpop.permute.xlu1 %2742 }
 0xd20   :  { %v2750_v13 = vsel %vm195_vm2, %v2741_v41, %v2743_v5 }
 0xd21   :  { %v2775_v45 = vmul.f32 %v10811_v25, %v2750_v13 }
 0xd22   :  { %v2779_v58 = vpop.permute.xlu0 %2778 }
 0xd23   :  { %v10819_v60 = vpop.permute.xlu1 %2780  ;;  %v3007_v32 = vpack.c.bf16 %v2775_v45, %v2737_v16  ;;  %v10899_v16 = vrot.slane %v7982_v39, %v14804_v26 }
 0xd24   :  { %v2788_v3 = vsel %vm235_vm3, %v2779_v58, %v10819_v60 }
 0xd25   :  { %3048 = vmatprep.subr.bf16.mxu0 %v3007_v32  ;;  %v2813_v7 = vmul.f32 %v10866_v0, %v2788_v3 }
 0xd26   :  { %v10821_v37 = vpop.permute.xlu0 %2816 }
 0xd27   :  { %v10823_v46 = vpop.permute.xlu1 %2818 }
 0xd28   :  { %v2826_v19 = vsel %vm275_vm4, %v10821_v37, %v10823_v46 }
 0xd29   :  { %v2851_v48 = vmul.f32 %v10844_v53, %v2826_v19  ;;  %v10905_v19 = vrot.slane %v7983_v36, %v14804_v26 }
 0xd2a   :  { %v10825_v29 = vpop.permute.xlu0 %2854 }
 0xd2b   :  { %v10827_v33 = vpop.permute.xlu1 %2856  ;;  %14809 = vst [vmem:[#allocation58_spill] sm:$0xff] %v10905_v19 }
 0xd2e   :  { %v10829_v21 = vpop.permute.xlu0 %2892 }
 0xd2f   :  { %v10831_v11 = vpop.permute.xlu1 %2894 }
 0xd32   :  { %v10833_v55 = vpop.permute.xlu0 %2930 }
 0xd33   :  { %v10835_v4 = vpop.permute.xlu1 %2932 }
 0xd36   :  { %v10837_v47 = vpop.permute.xlu0 %2968 }
 0xd37   :  { %v10839_v22 = vpop.permute.xlu1 %2970 }
 0xd3a   :  { %v2707_v42 = vpop.permute.xlu0 %2706 }
 0xd3b   :  { %v2709_v52 = vpop.permute.xlu1 %2708  ;;  %v2711_v38 = vsel %vm156_vm1, %v2705_v56, %v2707_v42 }
 0xd3c   :  { %v2710_v14 = vsel %vm156_vm1, %v2707_v42, %v2709_v52  ;;  %v2713_v44 = vsel %vm156_vm1, %v2709_v52, %v2703_v17  ;;  %v2738_v56 = vmul.f32 %v10869_v62, %v2711_v38  ;;  %v10902_v42 = vrot.slane %v7982_v39, %v14802_v49 }
 0xd3d   :  { %v2736_v2 = vmul.f32 %v10847_v24, %v2713_v44  ;;  %v2739_v63 = vmul.f32 %v10857_v18, %v2710_v14  ;;  %v3011_v52 = vpack.c.bf16 %v2851_v48, %v2813_v7  ;;  %v10908_v14 = vrot.slane %v7982_v39, %v14806_v43  ;;  %v7986_v48 = vld [vmem:[%s8982_s21 + $0x7] ss:$8 sm:$0xf] }
 0xd3e   :  { %v2745_v23 = vpop.permute.xlu0 %2744  ;;  %v10911_v44 = vrot.slane %v7983_v36, %v14802_v49  ;;  %v10921_v39 = vrot.slane %v7984_v31, %v14798_v34 }
 0xd3f   :  { %v2749_v9 = vsel %vm195_vm2, %v2743_v5, %v2745_v23  ;;  %v2747_v59 = vpop.permute.xlu1 %2746  ;;  %v10896_v5 = vrot.slane %v7984_v31, %v14802_v49 }
 0xd40   :  { %v2776_v51 = vmul.f32 %v10850_v57, %v2749_v9  ;;  %v2748_v6 = vsel %vm195_vm2, %v2745_v23, %v2747_v59  ;;  %v2751_v35 = vsel %vm195_vm2, %v2747_v59, %v2741_v41  ;;  %14810 = vst [vmem:[#allocation57_spill] sm:$0xff] %v10911_v44  ;;  %v10914_v23 = vrot.slane %v7983_v36, %v14806_v43  ;;  %v7985_v59 = vld [vmem:[%s8982_s21 + $0x6] ss:$8 sm:$0xf] }
 0xd41   :  { %v2774_v17 = vmul.f32 %v10860_v61, %v2751_v35  ;;  %v2777_v54 = vmul.f32 %v10863_v20, %v2748_v6  ;;  %14808 = vst [vmem:[#allocation56_spill] sm:$0xff] %v10896_v5  ;;  %14812 = vst [vmem:[#allocation48_spill] sm:$0xff] %v10921_v39  ;;  %v10935_v35 = vrot.slane %v7984_v31, %v14806_v43 }
 0xd42   :  { %v2783_v30 = vpop.permute.xlu0 %2782  ;;  %v3008_v32 = vpack.c.bf16 %v2776_v51, %v2738_v56  ;;  %14811 = vst [vmem:[#allocation51_spill] sm:$0xff] %v10914_v23  ;;  %v10952_v56 = vrot.slane %v7985_v59, %v14802_v49 }
 0xd43   :  { %v3006_v13 = vpack.c.bf16 %v2774_v17, %v2736_v2  ;;  %v2785_v41 = vpop.permute.xlu1 %2784  ;;  %v3009_v45 = vpack.c.bf16 %v2777_v54, %v2739_v63  ;;  %v2787_v36 = vsel %vm235_vm3, %v10819_v60, %v2783_v30  ;;  %14814 = vst [vmem:[#allocation35_spill] sm:$0xff] %v10935_v35  ;;  %v2864_v2 = vsel %vm315_vm5, %v10825_v29, %v10827_v33 }
 0xd44   :  { %v2786_v3 = vsel %vm235_vm3, %v2783_v30, %v2785_v41  ;;  %v2789_v38 = vsel %vm235_vm3, %v2785_v41, %v2779_v58  ;;  %v10932_v58 = vrot.slane %v7984_v31, %v14804_v26  ;;  %v10955_v30 = vrot.slane %v7986_v48, %v14802_v49 }
 0xd45   :  { %3049 = vmatpush1.bf16.msra.mxu0 %v3006_v13  ;;  %3089 = vmatprep.subr.bf16.mxu1 %v3009_v45  ;;  %v2812_v17 = vmul.f32 %v10902_v42, %v2789_v38  ;;  %v2815_v54 = vmul.f32 %v10908_v14, %v2786_v3  ;;  %v7987_v13 = vld [vmem:[%s8982_s21 + $0x20] ss:$8 sm:$0xf]  ;;  %v2814_v41 = vmul.f32 %v10899_v16, %v2787_v36 }
 0xd46   :  { %3050 = vmatprep.subr.bf16.mxu0 %v3011_v52  ;;  %3090 = vmatpush1.bf16.msra.mxu1 %v3008_v32  ;;  %v2821_v9 = vpop.permute.xlu0 %2820  ;;  %14813 = vst [vmem:[#allocation16_spill] sm:$0xff] %v10932_v58  ;;  %14815 = vst [vmem:[#allocation36_spill] sm:$0xff] %v10955_v30 }
 0xd47   :  { %v2825_v51 = vsel %vm275_vm4, %v10823_v46, %v2821_v9  ;;  %v2823_v6 = vpop.permute.xlu1 %2822 }
 0xd48   :  { %v2852_v63 = vmul.f32 %v10905_v19, %v2825_v51  ;;  %v2824_v60 = vsel %vm275_vm4, %v2821_v9, %v2823_v6  ;;  %v2827_v46 = vsel %vm275_vm4, %v2823_v6, %v10821_v37  ;;  %v2888_v37 = vmul.f32 %v10896_v5, %v2864_v2 }
 0xd49   :  { %v2850_v31 = vmul.f32 %v10911_v44, %v2827_v46  ;;  %v2853_v7 = vmul.f32 %v10914_v23, %v2824_v60  ;;  %v10970_v60 = vrot.slane %v7987_v13, %v14802_v49 }
 0xd4a   :  { %v2859_v45 = vpop.permute.xlu0 %2858  ;;  %v3012_v9 = vpack.c.bf16 %v2852_v63, %v2814_v41  ;;  %v3014_v49 = vpack.c.bf16 %v2888_v37, %v10726_v12  ;;  %v2978_v37 = vsel %vm435_vm8, %v10837_v47, %v10839_v22 }
 0xd4b   :  { %v3010_v32 = vpack.c.bf16 %v2850_v31, %v2812_v17  ;;  %v2863_v52 = vsel %vm315_vm5, %v10827_v33, %v2859_v45  ;;  %v2861_v3 = vpop.permute.xlu1 %2860  ;;  %v3013_v38 = vpack.c.bf16 %v2853_v7, %v2815_v54  ;;  %14816 = vst [vmem:[#allocation22_spill] sm:$0xff] %v10970_v60  ;;  %v10975_v33 = vrot.slane %v7985_v59, %v14798_v34 }
 0xd4c   :  { %v2889_v51 = vmul.f32 %v10921_v39, %v2863_v52  ;;  %v2862_v6 = vsel %vm315_vm5, %v2859_v45, %v2861_v3  ;;  %v2865_v36 = vsel %vm315_vm5, %v2861_v3, %v10825_v29  ;;  %v10978_v17 = vrot.slane %v7985_v59, %v14804_v26 }
 0xd4d   :  { %v2890_v2 = vmul.f32 %v10932_v58, %v2862_v6  ;;  %v2891_v46 = vmul.f32 %v10935_v35, %v2865_v36  ;;  %3051 = vmatpush1.bf16.msra.mxu0 %v3010_v32  ;;  %3091 = vmatprep.subr.bf16.mxu1 %v3013_v38  ;;  %v10981_v54 = vrot.slane %v7985_v59, %v14806_v43 }
 0xd4e   :  { %3092 = vmatpush1.bf16.msra.mxu1 %v3012_v9  ;;  %v2897_v63 = vpop.permute.xlu0 %2896  ;;  %v3015_v29 = vpack.c.bf16 %v2889_v51, %v10728_v15  ;;  %v10988_v45 = vrot.slane %v7986_v48, %v14798_v34  ;;  %v2902_v32 = vsel %vm355_vm7, %v10829_v21, %v10831_v11  ;;  %v2940_v59 = vsel %vm395_vm6, %v10833_v55, %v10835_v4 }
 0xd4f   :  { %v3016_v31 = vpack.c.bf16 %v2890_v2, %v10762_v40  ;;  %v2899_v7 = vpop.permute.xlu1 %2898  ;;  %v3017_v41 = vpack.c.bf16 %v2891_v46, %v10764_v8  ;;  %v11003_v52 = vrot.slane %v7986_v48, %v14804_v26  ;;  %v2901_v3 = vsel %vm355_vm7, %v10831_v11, %v2897_v63 }
 0xd50   :  { %14817 = vst [vmem:[#allocation38_spill] sm:$0xff] %v10988_v45  ;;  %3052 = vmatprep.subr.bf16.mxu0 %v3015_v29  ;;  %v11009_v38 = vrot.slane %v7986_v48, %v14806_v43  ;;  %v11012_v9 = vrot.slane %v7987_v13, %v14798_v34  ;;  %v2900_v51 = vsel %vm355_vm7, %v2897_v63, %v2899_v7 }
 0xd51   :  { %14818 = vst [vmem:[#allocation67_spill] sm:$0xff] %v11003_v52  ;;  %3053 = vmatpush1.bf16.msra.mxu0 %v3014_v49  ;;  %3093 = vmatprep.subr.bf16.mxu1 %v3017_v41  ;;  %v2903_v6 = vsel %vm355_vm7, %v2899_v7, %v10829_v21  ;;  %v11020_v2 = vrot.slane %v7987_v13, %v14804_v26 }
 0xd52   :  { %14819 = vst [vmem:[#allocation52_spill] sm:$0xff] %v11009_v38  ;;  %14820 = vst [vmem:[#allocation47_spill] sm:$0xff] %v11012_v9  ;;  %3094 = vmatpush1.bf16.msra.mxu1 %v3016_v31  ;;  %v2935_v36 = vpop.permute.xlu0 %2934  ;;  %v11023_v11 = vrot.slane %v7987_v13, %v14806_v43  ;;  %v2926_v48 = vmul.f32 %v10952_v56, %v2902_v32  ;;  %v2964_v34 = vmul.f32 %v10955_v30, %v2940_v59 }
 0xd53   :  { %14821 = vst [vmem:[#allocation30_spill] sm:$0xff] %v11020_v2  ;;  %v3002_v46 = vmul.f32 %v10970_v60, %v2978_v37  ;;  %v2939_v63 = vsel %vm395_vm6, %v10835_v4, %v2935_v36  ;;  %v2937_v29 = vpop.permute.xlu1 %2936  ;;  %v2927_v21 = vmul.f32 %v10975_v33, %v2901_v3  ;;  %v2928_v13 = vmul.f32 %v10978_v17, %v2900_v51 }
 0xd54   :  { %14822 = vst [vmem:[#allocation24_spill] sm:$0xff] %v11023_v11  ;;  %v2965_v49 = vmul.f32 %v10988_v45, %v2939_v63  ;;  %v2938_v26 = vsel %vm395_vm6, %v2935_v36, %v2937_v29  ;;  %v2941_v43 = vsel %vm395_vm6, %v2937_v29, %v10833_v55  ;;  %v2929_v31 = vmul.f32 %v10981_v54, %v2903_v6 }
 0xd55   :  { %v2966_v7 = vmul.f32 %v11003_v52, %v2938_v26  ;;  %v2967_v4 = vmul.f32 %v11009_v38, %v2941_v43  ;;  %v3018_v59 = vpack.c.bf16 %v2964_v34, %v2926_v48  ;;  %v3022_v6 = vpack.c.bf16 %v3002_v46, %v3002_v46  ;;  %v3026_v26 = vld [vmem:[%s11046_s30] sm:$0xf] }
 0xd56   :  { %v2973_v41 = vpop.permute.xlu0 %2972  ;;  %v3019_v32 = vpack.c.bf16 %v2965_v49, %v2927_v21 }
 0xd57   :  { %v3020_v37 = vpack.c.bf16 %v2966_v7, %v2928_v13  ;;  %v2977_v55 = vsel %vm435_vm8, %v10839_v22, %v2973_v41  ;;  %v2975_v3 = vpop.permute.xlu1 %2974  ;;  %v3021_v51 = vpack.c.bf16 %v2967_v4, %v2929_v31  ;;  %v3037_v49 = vsel %vm498_vm9, %v3022_v6, 0 }
 0xd58   :  { %v3003_v36 = vmul.f32 %v11012_v9, %v2977_v55  ;;  %v2976_v63 = vsel %vm435_vm8, %v2973_v41, %v2975_v3  ;;  %v2979_v29 = vsel %vm435_vm8, %v2975_v3, %v10837_v47  ;;  %3054 = vmatprep.subr.bf16.mxu0 %v3019_v32 }
 0xd59   :  { %v3004_v48 = vmul.f32 %v11020_v2, %v2976_v63  ;;  %v3005_v34 = vmul.f32 %v11023_v11, %v2979_v29  ;;  %3055 = vmatpush1.bf16.msra.mxu0 %v3018_v59  ;;  %3095 = vmatprep.subr.bf16.mxu1 %v3021_v51 }
 0xd5a   :  { %v3023_v22 = vpack.c.bf16 %v3003_v36, %v3003_v36  ;;  %3096 = vmatpush1.bf16.msra.mxu1 %v3020_v37 }
 0xd5b   :  { %v3024_v46 = vpack.c.bf16 %v3004_v48, %v3004_v48  ;;  %v3025_v21 = vpack.c.bf16 %v3005_v34, %v3005_v34  ;;  %v3283_v34 = vld [vmem:[%s11135_s5] sm:$0xff] }
 0xd5c   :  { %7988 = vmatprep.subr.msk.bf16.mxu0 %vm498_vm9, %v3023_v22 }
 0xd5d   :  { %3057 = vmatpush1.bf16.msra.mxu0 %v3037_v49  ;;  %7990 = vmatprep.subr.msk.bf16.mxu1 %vm498_vm9, %v3025_v21  ;;  %v3043_v47 = vsel %vm498_vm9, %v3024_v46, 0 }
 0xd5e   :  { %3098 = vmatpush1.bf16.msra.mxu1 %v3043_v47 }
 0xd60   :  { %7989 = vmatmul.mubr.msk.bf16.vlgmr.msra.gmra.mrb[36].mxu0 %vm494_vm10, %v3026_v26 }
 0xd61   :  { %7991 = vmatmul.mubr.msk.bf16.vlgmr.msra.gmra.mrb[28].mxu1 %vm494_vm10, %v3026_v26  ;;  %3336 = vmatprep.mubr.bf16.mxu0 %v14782_v50 }
 0xd62   :  { %3377 = vmatprep.mubr.bf16.mxu1 %v14782_v50 }
 0xd67   :  { %v3031_v43 = vpop.permute.xlu0 %3030 }
 0xe33   :  { %v3082_v13 = vpop.f32.mrb[36].mxu0 }
 0xe34   :  { %v3083_v31 = vadd.f32 %v3082_v13, %v3031_v43  ;;  %v3084_v7 = vpop.f32.mrb[37].mxu0  ;;  %v3123_v4 = vpop.f32.mrb[28].mxu1 }
 0xe35   :  { %v3085_v41 = vadd.f32 %v3084_v7, %v3031_v43  ;;  %v3086_v32 = vpop.f32.mrb[38].mxu0  ;;  %v3125_v59 = vpop.f32.mrb[29].mxu1  ;;  %v3124_v36 = vadd.f32 %v3123_v4, %v3031_v43 }
 0xe36   :  { %v11068_v37 = vmax.f32 %v3083_v31, 0.0  ;;  %v3087_v55 = vpop.f32.mrb[39].mxu0  ;;  %v3127_v3 = vpop.f32.mrb[30].mxu1  ;;  %v3126_v63 = vadd.f32 %v3125_v59, %v3031_v43 }
 0xe37   :  { %v11070_v51 = vmax.f32 %v3085_v41, 0.0  ;;  %v3128_v6 = vpop.f32.mrb[31].mxu1  ;;  %v11104_v29 = vmax.f32 %v3124_v36, 0.0 }
 0xe38   :  { %3134 = vrot.lane.b32.xlu1 %v11068_v37, %s8826_s6  ;;  %v11106_v48 = vmax.f32 %v3126_v63, 0.0 }
 0xe39   :  { %3136 = vrot.lane.b32.xlu0 %v11070_v51, %s8826_s6 }
 0xe3c   :  { %3150 = vrot.lane.b32.xlu1 %v11068_v37, %s8827_s7 }
 0xe3d   :  { %3152 = vrot.lane.b32.xlu0 %v11070_v51, %s8827_s7 }
 0xe40   :  { %3166 = vrot.lane.b32.xlu1 %v11068_v37, %s8828_s8 }
 0xe41   :  { %3168 = vrot.lane.b32.xlu0 %v11070_v51, %s8828_s8 }
 0xe44   :  { %3182 = vrot.lane.b32.xlu1 %v11068_v37, %s8829_s9 }
 0xe45   :  { %3184 = vrot.lane.b32.xlu0 %v11070_v51, %s8829_s9 }
 0xe48   :  { %3198 = vrot.lane.b32.xlu1 %v11068_v37, %s8830_s10 }
 0xe49   :  { %3200 = vrot.lane.b32.xlu0 %v11070_v51, %s8830_s10 }
 0xe4c   :  { %3214 = vrot.lane.b32.xlu1 %v11068_v37, %s8831_s11 }
 0xe4d   :  { %3216 = vrot.lane.b32.xlu0 %v11070_v51, %s8831_s11 }
 0xe50   :  { %3230 = vrot.lane.b32.xlu1 %v11068_v37, %s8832_s12 }
 0xe51   :  { %3232 = vrot.lane.b32.xlu0 %v11070_v51, %s8832_s12 }
 0xe54   :  { %3246 = vrot.lane.b32.xlu1 %v11068_v37, %s14497_s13 }
 0xe55   :  { %3248 = vrot.lane.b32.xlu0 %v11070_v51, %s14497_s13 }
 0xe58   :  { %3138 = vrot.lane.b32.xlu1 %v11104_v29, %s8826_s6 }
 0xe59   :  { %3140 = vrot.lane.b32.xlu0 %v11106_v48, %s8826_s6 }
 0xe5c   :  { %3154 = vrot.lane.b32.xlu1 %v11104_v29, %s8827_s7 }
 0xe5d   :  { %3156 = vrot.lane.b32.xlu0 %v11106_v48, %s8827_s7 }
 0xe60   :  { %3170 = vrot.lane.b32.xlu1 %v11104_v29, %s8828_s8 }
 0xe61   :  { %3172 = vrot.lane.b32.xlu0 %v11106_v48, %s8828_s8 }
 0xe64   :  { %3186 = vrot.lane.b32.xlu1 %v11104_v29, %s8829_s9 }
 0xe65   :  { %3188 = vrot.lane.b32.xlu0 %v11106_v48, %s8829_s9 }
 0xe68   :  { %3202 = vrot.lane.b32.xlu1 %v11104_v29, %s8830_s10 }
 0xe69   :  { %3204 = vrot.lane.b32.xlu0 %v11106_v48, %s8830_s10 }
 0xe6c   :  { %3218 = vrot.lane.b32.xlu1 %v11104_v29, %s8831_s11 }
 0xe6d   :  { %3220 = vrot.lane.b32.xlu0 %v11106_v48, %s8831_s11 }
 0xe70   :  { %3234 = vrot.lane.b32.xlu1 %v11104_v29, %s8832_s12 }
 0xe71   :  { %3236 = vrot.lane.b32.xlu0 %v11106_v48, %s8832_s12 }
 0xe74   :  { %3250 = vrot.lane.b32.xlu1 %v11104_v29, %s14497_s13 }
 0xe75   :  { %3252 = vrot.lane.b32.xlu0 %v11106_v48, %s14497_s13 }
 0xe78   :  { %3286 = vperm.xlu1 %8493, %v3283_v34  }
 0xeaa   :  { %v3135_v22 = vpop.permute.xlu1 %3134 }
 0xeab   :  { %v3137_v46 = vpop.permute.xlu0 %3136 }
 0xeac   :  { %v3144_v21 = vsel %vm156_vm1, %v3135_v22, %v3137_v46 }
 0xead   :  { %v3147_v43 = vmul.f32 %v3144_v21, %v10808_v1 }
 0xeae   :  { %v3151_v49 = vpop.permute.xlu1 %3150 }
 0xeaf   :  { %v3153_v47 = vpop.permute.xlu0 %3152 }
 0xeb0   :  { %v3160_v26 = vsel %vm195_vm2, %v3151_v49, %v3153_v47 }
 0xeb1   :  { %v3163_v13 = vmul.f32 %v3160_v26, %v10811_v25 }
 0xeb2   :  { %v3167_v31 = vpop.permute.xlu1 %3166 }
 0xeb3   :  { %v3169_v7 = vpop.permute.xlu0 %3168  ;;  %v3263_v4 = vpack.c.bf16 %v3163_v13, %v3147_v43 }
 0xeb4   :  { %v3176_v8 = vsel %vm235_vm3, %v3167_v31, %v3169_v7 }
 0xeb5   :  { %3304 = vmatprep.subr.bf16.mxu0 %v3263_v4 }
 0xeb6   :  { %v3183_v41 = vpop.permute.xlu1 %3182 }
 0xeb7   :  { %v3185_v32 = vpop.permute.xlu0 %3184 }
 0xeb8   :  { %v3192_v13 = vsel %vm275_vm4, %v3183_v41, %v3185_v32 }
 0xeb9   :  { %v3195_v25 = vmul.f32 %v3192_v13, %v10844_v53 }
 0xeba   :  { %v11152_v59 = vpop.permute.xlu1 %3198 }
 0xebb   :  { %v3201_v55 = vpop.permute.xlu0 %3200 }
 0xebe   :  { %v11154_v3 = vpop.permute.xlu1 %3214 }
 0xebf   :  { %v11156_v6 = vpop.permute.xlu0 %3216 }
 0xec2   :  { %v11158_v36 = vpop.permute.xlu1 %3230 }
 0xec3   :  { %v11160_v63 = vpop.permute.xlu0 %3232 }
 0xec6   :  { %v11162_v34 = vpop.permute.xlu1 %3246 }
 0xec7   :  { %v11164_v21 = vpop.permute.xlu0 %3248 }
 0xeca   :  { %v3139_v26 = vpop.permute.xlu1 %3138 }
 0xecb   :  { %v3141_v43 = vpop.permute.xlu0 %3140  ;;  %v3143_v15 = vsel %vm156_vm1, %v3137_v46, %v3139_v26 }
 0xecc   :  { %v3142_v4 = vsel %vm156_vm1, %v3139_v26, %v3141_v43  ;;  %v3145_v27 = vsel %vm156_vm1, %v3141_v43, %v3135_v22  ;;  %v3148_v13 = vmul.f32 %v3143_v15, %v10869_v62 }
 0xecd   :  { %v3146_v43 = vmul.f32 %v3145_v27, %v10847_v24  ;;  %v3149_v11 = vmul.f32 %v3142_v4, %v10857_v18 }
 0xece   :  { %v3155_v28 = vpop.permute.xlu1 %3154 }
 0xecf   :  { %v3159_v40 = vsel %vm195_vm2, %v3153_v47, %v3155_v28  ;;  %v3157_v12 = vpop.permute.xlu0 %3156  ;;  %v3179_v47 = vmul.f32 %v3176_v8, %v10866_v0 }
 0xed0   :  { %v3164_v1 = vmul.f32 %v3159_v40, %v10850_v57  ;;  %v3158_v50 = vsel %vm195_vm2, %v3155_v28, %v3157_v12  ;;  %v3161_v22 = vsel %vm195_vm2, %v3157_v12, %v3151_v49 }
 0xed1   :  { %v3162_v46 = vmul.f32 %v3161_v22, %v10860_v61  ;;  %v3165_v26 = vmul.f32 %v3158_v50, %v10863_v20  ;;  %v3267_v9 = vpack.c.bf16 %v3195_v25, %v3179_v47 }
 0xed2   :  { %v3171_v53 = vpop.permute.xlu1 %3170  ;;  %v3264_v28 = vpack.c.bf16 %v3164_v1, %v3148_v13  ;;  %v3208_v1 = vsel %vm315_vm5, %v11152_v59, %v3201_v55 }
 0xed3   :  { %v3262_v40 = vpack.c.bf16 %v3162_v46, %v3146_v43  ;;  %v3173_v57 = vpop.permute.xlu0 %3172  ;;  %v3265_v2 = vpack.c.bf16 %v3165_v26, %v3149_v11  ;;  %v3175_v15 = vsel %vm235_vm3, %v3169_v7, %v3171_v53  ;;  %v3210_v4 = vmul.f32 %v3208_v1, %v10896_v5 }
 0xed4   :  { %v3174_v27 = vsel %vm235_vm3, %v3171_v53, %v3173_v57  ;;  %v3177_v12 = vsel %vm235_vm3, %v3173_v57, %v3167_v31  ;;  %v3180_v7 = vmul.f32 %v3175_v15, %v10899_v16  ;;  %v3240_v1 = vsel %vm395_vm6, %v11158_v36, %v11160_v63 }
 0xed5   :  { %3305 = vmatpush1.bf16.msra.mxu0 %v3262_v40  ;;  %3345 = vmatprep.subr.bf16.mxu1 %v3265_v2  ;;  %v3181_v53 = vmul.f32 %v3174_v27, %v10908_v14 }
 0xed6   :  { %3306 = vmatprep.subr.bf16.mxu0 %v3267_v9  ;;  %3346 = vmatpush1.bf16.msra.mxu1 %v3264_v28  ;;  %v3187_v50 = vpop.permute.xlu1 %3186  ;;  %v3178_v9 = vmul.f32 %v3177_v12, %v10902_v42 }
 0xed7   :  { %v3191_v8 = vsel %vm275_vm4, %v3185_v32, %v3187_v50  ;;  %v3189_v11 = vpop.permute.xlu0 %3188 }
 0xed8   :  { %v3196_v25 = vmul.f32 %v3191_v8, %v10905_v19  ;;  %v3190_v2 = vsel %vm275_vm4, %v3187_v50, %v3189_v11  ;;  %v3193_v57 = vsel %vm275_vm4, %v3189_v11, %v3183_v41  ;;  %v3270_v50 = vpack.c.bf16 %v3210_v4, %v11068_v37 }
 0xed9   :  { %v3194_v49 = vmul.f32 %v3193_v57, %v10911_v44  ;;  %v3197_v31 = vmul.f32 %v3190_v2, %v10914_v23  ;;  %v3256_v37 = vsel %vm435_vm8, %v11162_v34, %v11164_v21  ;;  %v3242_v57 = vmul.f32 %v3240_v1, %v10955_v30 }
 0xeda   :  { %v3203_v32 = vpop.permute.xlu1 %3202  ;;  %v3268_v41 = vpack.c.bf16 %v3196_v25, %v3180_v7 }
 0xedb   :  { %v3266_v22 = vpack.c.bf16 %v3194_v49, %v3178_v9  ;;  %v3207_v43 = vsel %vm315_vm5, %v3201_v55, %v3203_v32  ;;  %v3205_v46 = vpop.permute.xlu0 %3204  ;;  %v3269_v26 = vpack.c.bf16 %v3197_v31, %v3181_v53  ;;  %v3258_v9 = vmul.f32 %v3256_v37, %v10970_v60 }
 0xedc   :  { %v3211_v47 = vmul.f32 %v3207_v43, %v10921_v39  ;;  %v3206_v13 = vsel %vm315_vm5, %v3203_v32, %v3205_v46  ;;  %v3209_v40 = vsel %vm315_vm5, %v3205_v46, %v11152_v59  ;;  %v3224_v59 = vsel %vm355_vm7, %v11154_v3, %v11156_v6 }
 0xedd   :  { %v3212_v28 = vmul.f32 %v3206_v13, %v10932_v58  ;;  %v3213_v27 = vmul.f32 %v3209_v40, %v10935_v35  ;;  %3307 = vmatpush1.bf16.msra.mxu0 %v3266_v22  ;;  %3347 = vmatprep.subr.bf16.mxu1 %v3269_v26  ;;  %v3226_v2 = vmul.f32 %v3224_v59, %v10952_v56 }
 0xede   :  { %3348 = vmatpush1.bf16.msra.mxu1 %v3268_v41  ;;  %v3219_v55 = vpop.permute.xlu1 %3218  ;;  %v3271_v12 = vpack.c.bf16 %v3211_v47, %v11070_v51  ;;  %v3278_v40 = vpack.c.bf16 %v3258_v9, %v3258_v9  ;;  %v8586_v9 = vld [vmem:[%s9410_s14 + $0xc8] sm:$0xff]  }
 0xedf   :  { %v3272_v15 = vpack.c.bf16 %v3212_v28, %v11104_v29  ;;  %v3221_v8 = vpop.permute.xlu0 %3220  ;;  %v3273_v11 = vpack.c.bf16 %v3213_v27, %v11106_v48  ;;  %v3223_v51 = vsel %vm355_vm7, %v11156_v6, %v3219_v55  ;;  %v3274_v26 = vpack.c.bf16 %v3242_v57, %v3226_v2  ;;  %v14823_v28 = vld [vmem:[#allocation47_spill] sm:$0xff]  ;;  %v8583_v2 = vld [vmem:[%s9410_s14 + $0x80] sm:$0xff]  }
 0xee0   :  { %3308 = vmatprep.subr.bf16.mxu0 %v3271_v12  ;;  %v3222_v29 = vsel %vm355_vm7, %v3219_v55, %v3221_v8  ;;  %v3225_v48 = vsel %vm355_vm7, %v3221_v8, %v11154_v3  ;;  %v3227_v49 = vmul.f32 %v3223_v51, %v10975_v33  ;;  %v14825_v8 = vld [vmem:[#allocation24_spill] sm:$0xff]  ;;  %v3282_v51 = vld [vmem:[%s11267_s20] sm:$0xf]  ;;  %v8584_v57 = vld [vmem:[%s9410_s14 + $0x48] sm:$0xff]  }
 0xee1   :  { %3309 = vmatpush1.bf16.msra.mxu0 %v3270_v50  ;;  %3349 = vmatprep.subr.bf16.mxu1 %v3273_v11  ;;  %v3228_v32 = vmul.f32 %v3222_v29, %v10978_v17  ;;  %v3229_v4 = vmul.f32 %v3225_v48, %v10981_v54  ;;  %v14824_v50 = vld [vmem:[#allocation30_spill] sm:$0xff] }
 0xee2   :  { %3350 = vmatpush1.bf16.msra.mxu1 %v3272_v15  ;;  %v3235_v25 = vpop.permute.xlu1 %3234  ;;  %v8580_v29 = vld [vmem:[%s9410_s14 + $0x40] sm:$0xff]  }
 0xee3   :  { %v3239_v6 = vsel %vm395_vm6, %v11160_v63, %v3235_v25  ;;  %v3237_v53 = vpop.permute.xlu0 %3236  ;;  %v8581_v48 = vld [vmem:[%s9410_s14] sm:$0xff]  }
 0xee4   :  { %v3243_v31 = vmul.f32 %v3239_v6, %v10988_v45  ;;  %v3238_v3 = vsel %vm395_vm6, %v3235_v25, %v3237_v53  ;;  %v3241_v7 = vsel %vm395_vm6, %v3237_v53, %v11158_v36  ;;  %v8582_v25 = vld [vmem:[%s9410_s14 + $0xc0] sm:$0xff]   ;;  %v8585_v6 = vld [vmem:[%s9410_s14 + $0x8] sm:$0xff]  }
 0xee5   :  { %v3244_v22 = vmul.f32 %v3238_v3, %v11003_v52  ;;  %v3245_v63 = vmul.f32 %v3241_v7, %v11009_v38  ;;  %v8587_v53 = vld [vmem:[%s9410_s14 + $0x88] sm:$0xff]   ;;  %v8590_v3 = vld [vmem:[%s9410_s14 + $0xd0] sm:$0xff]  }
 0xee6   :  { %v3251_v43 = vpop.permute.xlu1 %3250  ;;  %v3275_v46 = vpack.c.bf16 %v3243_v31, %v3227_v49  ;;  %v8588_v49 = vld [vmem:[%s9410_s14 + $0x50] sm:$0xff]  }
 0xee7   :  { %v3276_v41 = vpack.c.bf16 %v3244_v22, %v3228_v32  ;;  %v3255_v36 = vsel %vm435_vm8, %v11164_v21, %v3251_v43  ;;  %v3253_v47 = vpop.permute.xlu0 %3252  ;;  %v3277_v13 = vpack.c.bf16 %v3245_v63, %v3229_v4  ;;  %v8589_v31 = vld [vmem:[%s9410_s14 + $0x10] sm:$0xff]   ;;  %v8592_v32 = vld [vmem:[%s9410_s14 + $0x58] sm:$0xff]  }
 0xee8   :  { %v3259_v27 = vmul.f32 %v3255_v36, %v14823_v28  ;;  %v3254_v55 = vsel %vm435_vm8, %v3251_v43, %v3253_v47  ;;  %v3257_v12 = vsel %vm435_vm8, %v3253_v47, %v11162_v34  ;;  %3310 = vmatprep.subr.bf16.mxu0 %v3275_v46  ;;  %v3293_v34 = vsel %vm498_vm9, %v3278_v40, 0  ;;  %v8591_v7 = vld [vmem:[%s9410_s14 + $0x90] sm:$0xff]   ;;  %v8593_v4 = vld [vmem:[%s9410_s14 + $0x18] sm:$0xff]  }
 0xee9   :  { %v3260_v15 = vmul.f32 %v3254_v55, %v14824_v50  ;;  %v3261_v11 = vmul.f32 %v3257_v12, %v14825_v8  ;;  %3311 = vmatpush1.bf16.msra.mxu0 %v3274_v26  ;;  %3351 = vmatprep.subr.bf16.mxu1 %v3277_v13  ;;  %v8594_v22 = vld [vmem:[%s9410_s14 + $0xd8] sm:$0xff]   ;;  %v8612_v50 = vld [vmem:[%s11426_s2] sm:$0xff]  }
 0xeea   :  { %v3279_v21 = vpack.c.bf16 %v3259_v27, %v3259_v27  ;;  %3352 = vmatpush1.bf16.msra.mxu1 %v3276_v41  ;;  %v8595_v63 = vld [vmem:[%s9410_s14 + $0x98] sm:$0xff]   ;;  %v8596_v27 = vld [vmem:[%s9410_s14 + $0x60] sm:$0xff]  }
 0xeeb   :  { %v3280_v59 = vpack.c.bf16 %v3260_v15, %v3260_v15  ;;  %v3281_v1 = vpack.c.bf16 %v3261_v11, %v3261_v11  ;;  %v8597_v11 = vld [vmem:[%s9410_s14 + $0x20] sm:$0xff]  }
 0xeec   :  { %7992 = vmatprep.subr.msk.bf16.mxu0 %vm498_vm9, %v3279_v21  ;;  %v8598_v21 = vld [vmem:[%s9410_s14 + $0xe0] sm:$0xff]  }
 0xeed   :  { %3313 = vmatpush1.bf16.msra.mxu0 %v3293_v34  ;;  %7994 = vmatprep.subr.msk.bf16.mxu1 %vm498_vm9, %v3281_v1  ;;  %v3299_v37 = vsel %vm498_vm9, %v3280_v59, 0  ;;  %v8599_v34 = vld [vmem:[%s9410_s14 + $0xa0] sm:$0xff]  }
 0xeee   :  { %3354 = vmatpush1.bf16.msra.mxu1 %v3299_v37  ;;  %8248 = vmatprep.subr.bf16.mxu0 %v8580_v29  ;;  %v8600_v37 = vld [vmem:[%s9410_s14 + $0x68] sm:$0xff]  }
 0xeef   :  { %8270 = vmatprep.subr.bf16.mxu1 %v8582_v25  ;;  %v8602_v29 = vld [vmem:[%s9410_s14 + $0xe8] sm:$0xff]   ;;  %v8604_v25 = vld [vmem:[%s9410_s14 + $0x70] sm:$0xff]  }
 0xef0   :  { %7993 = vmatmul.mubr.msk.bf16.vlgmr.msra.gmra.mrb[40].mxu0 %vm494_vm10, %v3282_v51 }
 0xef1   :  { %7995 = vmatmul.mubr.msk.bf16.vlgmr.msra.gmra.mrb[32].mxu1 %vm494_vm10, %v3282_v51  ;;  %8249 = vmatpush3.bf16.msra.mxu0 %v8581_v48  ;;  %v8601_v51 = vld [vmem:[%s9410_s14 + $0x28] sm:$0xff]  }
 0xef2   :  { %8271 = vmatpush3.bf16.msra.mxu1 %v8583_v2  ;;  %8250 = vmatprep.subr.bf16.mxu0 %v8584_v57  ;;  %v8603_v48 = vld [vmem:[%s9410_s14 + $0xa8] sm:$0xff]   ;;  %v8605_v2 = vld [vmem:[%s9410_s14 + $0x30] sm:$0xff]  }
 0xef3   :  { %8272 = vmatprep.subr.bf16.mxu1 %v8586_v9  ;;  %v8606_v57 = vld [vmem:[%s9410_s14 + $0xf0] sm:$0xff]  }
 0xef5   :  { %8251 = vmatpush3.bf16.msra.mxu0 %v8585_v6 }
 0xef6   :  { %8273 = vmatpush3.bf16.msra.mxu1 %v8587_v53  ;;  %8252 = vmatprep.subr.bf16.mxu0 %v8588_v49  ;;  %v8607_v53 = vld [vmem:[%s9410_s14 + $0xb0] sm:$0xff]   ;;  %v8608_v49 = vld [vmem:[%s9410_s14 + $0x78] sm:$0xff]  }
 0xef7   :  { %8274 = vmatprep.subr.bf16.mxu1 %v8590_v3  ;;  %v3287_v43 = vpop.permute.xlu1 %3286  ;;  %v8609_v3 = vld [vmem:[%s9410_s14 + $0x38] sm:$0xff]  }
 0xef9   :  { %8253 = vmatpush3.bf16.msra.mxu0 %v8589_v31 }
 0xefa   :  { %8275 = vmatpush3.bf16.msra.mxu1 %v8591_v7  ;;  %8254 = vmatprep.subr.bf16.mxu0 %v8592_v32  ;;  %v8610_v7 = vld [vmem:[%s9410_s14 + $0xf8] sm:$0xff]  }
 0xefb   :  { %8276 = vmatprep.subr.bf16.mxu1 %v8594_v22  ;;  %v14830_v22 = vmov 0.0  }
 0xefd   :  { %8255 = vmatpush3.bf16.msra.mxu0 %v8593_v4  ;;  %v8611_v4 = vld [vmem:[%s9410_s14 + $0xb8] sm:$0xff]  }
 0xefe   :  { %8277 = vmatpush3.bf16.msra.mxu1 %v8595_v63  ;;  %8256 = vmatprep.subr.bf16.mxu0 %v8596_v27  ;;  %v14831_v63 = vmov 0  }
 0xeff   :  { %8278 = vmatprep.subr.bf16.mxu1 %v8598_v21 }
 0xf01   :  { %8257 = vmatpush3.bf16.msra.mxu0 %v8597_v11 }
 0xf02   :  { %8279 = vmatpush3.bf16.msra.mxu1 %v8599_v34  ;;  %8258 = vmatprep.subr.bf16.mxu0 %v8600_v37 }
 0xf03   :  { %8280 = vmatprep.subr.bf16.mxu1 %v8602_v29 }
 0xf05   :  { %8259 = vmatpush3.bf16.msra.mxu0 %v8601_v51 }
 0xf06   :  { %8281 = vmatpush3.bf16.msra.mxu1 %v8603_v48  ;;  %8260 = vmatprep.subr.bf16.mxu0 %v8604_v25 }
 0xf07   :  { %8282 = vmatprep.subr.bf16.mxu1 %v8606_v57 }
 0xf09   :  { %8261 = vmatpush3.bf16.msra.mxu0 %v8605_v2 }
 0xf0a   :  { %8283 = vmatpush3.bf16.msra.mxu1 %v8607_v53  ;;  %8262 = vmatprep.subr.bf16.mxu0 %v8608_v49 }
 0xf0b   :  { %8284 = vmatprep.subr.bf16.mxu1 %v8610_v7 }
 0xf0d   :  { %8263 = vmatpush3.bf16.msra.mxu0 %v8609_v3 }
 0xf0e   :  { %8285 = vmatpush3.bf16.msra.mxu1 %v8611_v4  ;;  %8362 = vmatprep.subr.bf16.mxu0 %v14830_v22 }
 0xf0f   :  { %3998 = vmatprep.subr.bf16.mxu1 %v14831_v63 }
 0xfc3   :  { %v3338_v46 = vpop.f32.mrb[40].mxu0 }
 0xfc4   :  { %v3339_v26 = vadd.f32 %v3338_v46, %v3287_v43  ;;  %v3340_v41 = vpop.f32.mrb[41].mxu0  ;;  %v3379_v36 = vpop.f32.mrb[32].mxu1 }
 0xfc5   :  { %v3341_v47 = vadd.f32 %v3340_v41, %v3287_v43  ;;  %v3342_v13 = vpop.f32.mrb[42].mxu0  ;;  %v3381_v40 = vpop.f32.mrb[33].mxu1  ;;  %v3380_v9 = vadd.f32 %v3379_v36, %v3287_v43 }
 0xfc6   :  { %v11304_v55 = vmax.f32 %v3339_v26, 0.0  ;;  %v3343_v12 = vpop.f32.mrb[43].mxu0  ;;  %v3383_v15 = vpop.f32.mrb[34].mxu1  ;;  %v3382_v6 = vadd.f32 %v3381_v40, %v3287_v43 }
 0xfc7   :  { %v11308_v59 = vmax.f32 %v3341_v47, 0.0  ;;  %v3384_v1 = vpop.f32.mrb[35].mxu1  ;;  %v11332_v31 = vmax.f32 %v3380_v9, 0.0 }
 0xfc8   :  { %14826 = vst [vmem:[#allocation18_spill] sm:$0xff] %v11304_v55  ;;  %3390 = vrot.lane.b32.xlu0 %v11304_v55, %s8830_s10  ;;  %v11336_v32 = vmax.f32 %v3382_v6, 0.0 }
 0xfc9   :  { %14827 = vst [vmem:[#allocation68_spill] sm:$0xff] %v11308_v59  ;;  %3392 = vrot.lane.b32.xlu1 %v11308_v59, %s8830_s10  ;;  %14828 = vst [vmem:[#allocation49_spill] sm:$0xff] %v11332_v31 }
 0xfca   :  { %14829 = vst [vmem:[#allocation45_spill] sm:$0xff] %v11336_v32 }
 0xfcc   :  { %3406 = vrot.lane.b32.xlu0 %v11304_v55, %s8832_s12 }
 0xfcd   :  { %3408 = vrot.lane.b32.xlu1 %v11308_v59, %s8832_s12 }
 0xfd0   :  { %3422 = vrot.lane.b32.xlu0 %v11304_v55, %s14497_s13 }
 0xfd1   :  { %3424 = vrot.lane.b32.xlu1 %v11308_v59, %s14497_s13 }
 0xfd4   :  { %3394 = vrot.lane.b32.xlu0 %v11332_v31, %s8830_s10 }
 0xfd5   :  { %3396 = vrot.lane.b32.xlu1 %v11336_v32, %s8830_s10 }
 0xfd8   :  { %3410 = vrot.lane.b32.xlu0 %v11332_v31, %s8832_s12 }
 0xfd9   :  { %3412 = vrot.lane.b32.xlu1 %v11336_v32, %s8832_s12 }
 0xfdc   :  { %3426 = vrot.lane.b32.xlu0 %v11332_v31, %s14497_s13 }
 0xfdd   :  { %3428 = vrot.lane.b32.xlu1 %v11336_v32, %s14497_s13  ;;  %s11431_s13 = sld [smem:[%s14371_s0 + %s8862_s4]]  }
0x103a   :  { %v3391_v43 = vpop.permute.xlu0 %3390 }
0x103b   :  { %v3393_v46 = vpop.permute.xlu1 %3392 }
0x103c   :  { %v11355_v27 = vsel %vm315_vm5, %v3391_v43, %v3393_v46 }
0x103d   :  { %14832 = vst [vmem:[#allocation29_spill] sm:$0xff] %v11355_v27  ;;  %v3402_v34 = vmax.f32 %v11304_v55, %v11355_v27 }
0x103e   :  { %v3407_v26 = vpop.permute.xlu0 %3406 }
0x103f   :  { %v3409_v41 = vpop.permute.xlu1 %3408 }
0x1040   :  { %v11363_v15 = vsel %vm395_vm6, %v3407_v26, %v3409_v41 }
0x1041   :  { %14834 = vst [vmem:[#allocation65_spill] sm:$0xff] %v11363_v15  ;;  %v3418_v57 = vmax.f32 %v3402_v34, %v11363_v15 }
0x1042   :  { %v3423_v36 = vpop.permute.xlu0 %3422 }
0x1043   :  { %v3425_v47 = vpop.permute.xlu1 %3424 }
0x1044   :  { %v11381_v29 = vsel %vm435_vm8, %v3423_v36, %v3425_v47 }
0x1045   :  { %14838 = vst [vmem:[#allocation59_spill] sm:$0xff] %v11381_v29  ;;  %v3434_v3 = vmax.f32 %v3418_v57, %v11381_v29 }
0x1046   :  { %v3395_v13 = vpop.permute.xlu0 %3394 }
0x1047   :  { %v3397_v40 = vpop.permute.xlu1 %3396  ;;  %v11359_v12 = vsel %vm315_vm5, %v3393_v46, %v3395_v13 }
0x1048   :  { %14833 = vst [vmem:[#allocation32_spill] sm:$0xff] %v11359_v12  ;;  %v11367_v11 = vsel %vm315_vm5, %v3395_v13, %v3397_v40  ;;  %v11371_v21 = vsel %vm315_vm5, %v3397_v40, %v3391_v43  ;;  %v3403_v48 = vmax.f32 %v11308_v59, %v11359_v12 }
0x1049   :  { %14835 = vst [vmem:[#allocation69_spill] sm:$0xff] %v11367_v11  ;;  %14836 = vst [vmem:[#allocation50_spill] sm:$0xff] %v11371_v21  ;;  %v3404_v9 = vmax.f32 %v11332_v31, %v11367_v11  ;;  %v3405_v6 = vmax.f32 %v11336_v32, %v11371_v21 }
0x104a   :  { %v3411_v1 = vpop.permute.xlu0 %3410 }
0x104b   :  { %v11377_v37 = vsel %vm395_vm6, %v3409_v41, %v3411_v1  ;;  %v3413_v51 = vpop.permute.xlu1 %3412 }
0x104c   :  { %14837 = vst [vmem:[#allocation46_spill] sm:$0xff] %v11377_v37  ;;  %v11387_v25 = vsel %vm395_vm6, %v3411_v1, %v3413_v51  ;;  %v11391_v2 = vsel %vm395_vm6, %v3413_v51, %v3407_v26  ;;  %v3419_v53 = vmax.f32 %v3403_v48, %v11377_v37  ;;  %v3438_v51 = vpack.c.bf16 %v3434_v3, %v3434_v3 }
0x104d   :  { %14839 = vst [vmem:[#allocation31_spill] sm:$0xff] %v11387_v25  ;;  %14840 = vst [vmem:[#allocation66_spill] sm:$0xff] %v11391_v2  ;;  %v3420_v7 = vmax.f32 %v3404_v9, %v11387_v25  ;;  %v3421_v4 = vmax.f32 %v3405_v6, %v11391_v2 }
0x104e   :  { %v3427_v49 = vpop.permute.xlu0 %3426 }
0x104f   :  { %v11404_v43 = vsel %vm435_vm8, %v3425_v47, %v3427_v49  ;;  %v3429_v46 = vpop.permute.xlu1 %3428 }
0x1050   :  { %14841 = vst [vmem:[#allocation61_spill] sm:$0xff] %v11404_v43  ;;  %v11408_v26 = vsel %vm435_vm8, %v3427_v49, %v3429_v46  ;;  %v11412_v41 = vsel %vm435_vm8, %v3429_v46, %v3423_v36  ;;  %v3435_v13 = vmax.f32 %v3419_v53, %v11404_v43 }
0x1051   :  { %14842 = vst [vmem:[#allocation17_spill] sm:$0xff] %v11408_v26  ;;  %14843 = vst [vmem:[#allocation19_spill] sm:$0xff] %v11412_v41  ;;  %v3436_v40 = vmax.f32 %v3420_v7, %v11408_v26  ;;  %v3437_v1 = vmax.f32 %v3421_v4, %v11412_v41  ;;  %v11461_v41 = vld [vmem:[%s9563_s3 + $0x6] ss:$0 sm:$0xff] }
0x1052   :  { %v3439_v34 = vpack.c.bf16 %v3435_v13, %v3435_v13 }
0x1053   :  { %v3440_v48 = vpack.c.bf16 %v3436_v40, %v3436_v40  ;;  %v3441_v47 = vpack.c.bf16 %v3437_v1, %v3437_v1  ;;  %v3850_v40 = vld [vmem:[%s11431_s13 + $0x8] sm:$0xff]  ;;  %v3849_v1 = vld [vmem:[%s11431_s13] sm:$0xff] }
0x1054   :  { %3730 = vmatprep.mubr.bf16.mxu0 %v3439_v34  ;;  %v11440_v34 = vld [vmem:[%s9563_s3 + $0x1] ss:$0 sm:$0xff] }
0x1055   :  { %3731 = vmatmul.mubr.bf16.vlgmr.msra.gmra.mrb[44].mxu0 %v3438_v51  ;;  %3770 = vmatprep.mubr.bf16.mxu1 %v3441_v47  ;;  %v11443_v51 = vld [vmem:[%s9563_s3] ss:$0 sm:$0xff] }
0x1056   :  { %3771 = vmatmul.mubr.bf16.vlgmr.msra.gmra.mrb[36].mxu1 %v3440_v48  ;;  %8372 = vmatprep.mubr.msk.bf16.mxu0 %vm8847_vm11, %v14830_v22 }
0x1128   :  { %v8264_v57 = vpop.f32.mrb[44].mxu0 }
0x1129   :  { %v8265_v36 = vpop.f32.mrb[45].mxu0  ;;  %v8286_v9 = vpop.f32.mrb[36].mxu1 }
0x112a   :  { %v8266_v6 = vadd.f32 %v8265_v36, %v8264_v57  ;;  %v8267_v53 = vpop.f32.mrb[46].mxu0  ;;  %v8287_v49 = vpop.f32.mrb[37].mxu1 }
0x112b   :  { %v8288_v7 = vadd.f32 %v8287_v49, %v8286_v9  ;;  %v8268_v46 = vpop.f32.mrb[47].mxu0  ;;  %v8289_v4 = vpop.f32.mrb[38].mxu1  ;;  %v11448_v9 = vld [vmem:[%s9563_s3 + $0x3] ss:$0 sm:$0xff] }
0x112c   :  { %v8290_v13 = vpop.f32.mrb[39].mxu1 }
0x112d   :  { %v3773_v3 = vadd.f32 %v8288_v7, %v8266_v6  ;;  %v11451_v6 = vld [vmem:[%s9563_s3 + $0x2] ss:$0 sm:$0xff]  ;;  %v11457_v13 = vld [vmem:[%s9563_s3 + $0x5] ss:$0 sm:$0xff] }
0x112f   :  { %3786 = vrot.lane.b32.xlu1 %v3773_v3, %s8841_s15  ;;  %3778 = vrot.lane.b32.xlu0 %v3773_v3, %s8842_s16 }
0x1133   :  { %3802 = vrot.lane.b32.xlu1 %v3773_v3, %s8829_s9  ;;  %3794 = vrot.lane.b32.xlu0 %v3773_v3, %s8844_s22 }
0x1137   :  { %3818 = vrot.lane.b32.xlu1 %v3773_v3, %s8846_s27  ;;  %3810 = vrot.lane.b32.xlu0 %v3773_v3, %s8830_s10 }
0x113b   :  { %3834 = vrot.lane.b32.xlu1 %v3773_v3, %s8848_s28  ;;  %3826 = vrot.lane.b32.xlu0 %v3773_v3, %s8849_s29 }
0x113f   :  { %3858 = vperm.xlu1 %8493, %v3850_v40   ;;  %3853 = vperm.xlu0 %8492, %v3849_v1  }
0x11a1   :  { %v3787_v48 = vpop.permute.xlu1 %3786  ;;  %v3779_v47 = vpop.permute.xlu0 %3778 }
0x11a2   :  { %v3793_v57 = vmul.f32 %v11440_v34, %v3787_v48  ;;  %v3785_v36 = vmul.f32 %v11443_v51, %v3779_v47 }
0x11a4   :  { %v3842_v53 = vpack.c.bf16 %v3793_v57, %v3785_v36  ;;  %v11464_v57 = vld [vmem:[%s9563_s3 + $0x8] ss:$0 sm:$0xff]  ;;  %v11468_v36 = vld [vmem:[%s9563_s3 + $0x7] ss:$0 sm:$0xff] }
0x11a5   :  { %v3803_v49 = vpop.permute.xlu1 %3802  ;;  %v3795_v7 = vpop.permute.xlu0 %3794 }
0x11a6   :  { %v3809_v46 = vmul.f32 %v11448_v9, %v3803_v49  ;;  %v3801_v4 = vmul.f32 %v11451_v6, %v3795_v7  ;;  %8363 = vmatpush3.bf16.msra.mxu0 %v3842_v53 }
0x11a7   :  { %8364 = vmatprep.subr.bf16.mxu0 %v14830_v22 }
0x11a8   :  { %v3843_v40 = vpack.c.bf16 %v3809_v46, %v3801_v4 }
0x11a9   :  { %v3819_v1 = vpop.permute.xlu1 %3818  ;;  %v3811_v48 = vpop.permute.xlu0 %3810 }
0x11aa   :  { %v3817_v47 = vmul.f32 %v11457_v13, %v3811_v48  ;;  %8365 = vmatpush3.bf16.msra.mxu0 %v3843_v40  ;;  %v3825_v26 = vmul.f32 %v11461_v41, %v3819_v1 }
0x11ab   :  { %8366 = vmatprep.subr.bf16.mxu0 %v14830_v22 }
0x11ac   :  { %v3844_v53 = vpack.c.bf16 %v3817_v47, %v3773_v3 }
0x11ad   :  { %v3835_v49 = vpop.permute.xlu1 %3834  ;;  %v3827_v7 = vpop.permute.xlu0 %3826 }
0x11ae   :  { %v3841_v46 = vmul.f32 %v11464_v57, %v3835_v49  ;;  %v3833_v4 = vmul.f32 %v11468_v36, %v3827_v7  ;;  %8367 = vmatpush3.bf16.msra.mxu0 %v3844_v53 }
0x11af   :  { %8368 = vmatprep.subr.bf16.mxu0 %v14830_v22 }
0x11b0   :  { %v3845_v40 = vpack.c.bf16 %v3833_v4, %v3825_v26  ;;  %v3846_v48 = vpack.c.bf16 %v3841_v46, %v3841_v46 }
0x11b2   :  { %8369 = vmatpush3.bf16.msra.mxu0 %v3845_v40  ;;  %v3870_v8 = vsel %vm498_vm9, %v3846_v48, 0  ;;  %v8616_v48 = vld [vmem:[%s9698_s26] ss:$16 sps:$4 sm:$0xff]  }
0x11b3   :  { %8370 = vmatprep.subr.bf16.mxu0 %v14830_v22 }
0x11b6   :  { %8371 = vmatpush3.bf16.msra.mxu0 %v3870_v8  ;;  %v8613_v8 = vld [vmem:[%s11515_s17 + $0x4] ss:$8 sps:$4 sm:$0xff]  }
0x11b7   :  { %8040 = vmatprep.mubr.msk.bf16.mxu1 %vm1458_vm12, %v8613_v8  ;;  %v8640_v8 = vld [vmem:[%s9698_s26 + $0x80] ss:$16 sps:$4 sm:$0xff]  }
0x11b9   :  { %8373 = vmatmul.mubr.msk.bf16.vlgmr.msra.gmra.mrb[48].mxu0 %vm494_vm10, %v8612_v50 }
0x11ba   :  { %4266 = vmatprep.mubr.bf16.mxu0 %v14831_v63 }
0x11be   :  { %v3854_v3 = vpop.permute.xlu0 %3853  ;;  %v3859_v53 = vpop.permute.xlu1 %3858 }
0x128c   :  { %v3906_v1 = vpop.f32.mrb[48].mxu0 }
0x128d   :  { %v3907_v47 = vadd.f32 %v3906_v1, %v3854_v3  ;;  %v8374_v49 = vpop.f32.mrb[49].mxu0  ;;  %v8618_v3 = vld [vmem:[%s9698_s26 + $0x4] ss:$16 sps:$4 sm:$0xff]  }
0x128e   :  { %v3909_v7 = vpop.f32.mrb[50].mxu0  ;;  %v8624_v1 = vld [vmem:[%s9698_s26 + $0x24] ss:$16 sps:$4 sm:$0xff]   ;;  %4234 = vmatprep.subr.bf16.mxu0 %v8618_v3 }
0x128f   :  { %v11479_v43 = vmax.f32 %v3907_v47, 0.0  ;;  %v3910_v26 = vadd.f32 %v3909_v7, %v3859_v53  ;;  %v8375_v46 = vpop.f32.mrb[51].mxu0  ;;  %4235 = vmatpush1.bf16.msra.mxu0 %v8616_v48  ;;  %v8622_v47 = vld [vmem:[%s9698_s26 + $0x20] ss:$16 sps:$4 sm:$0xff]   ;;  %v8630_v49 = vld [vmem:[%s9698_s26 + $0x44] ss:$16 sps:$4 sm:$0xff]  }
0x1290   :  { %4236 = vmatprep.subr.bf16.mxu0 %v8624_v1  ;;  %v8628_v53 = vld [vmem:[%s9698_s26 + $0x40] ss:$16 sps:$4 sm:$0xff]   ;;  %v8636_v7 = vld [vmem:[%s9698_s26 + $0x64] ss:$16 sps:$4 sm:$0xff]  }
0x1291   :  { %v11481_v4 = vmax.f32 %v3910_v26, 0.0  ;;  %3915 = vrot.lane.b32.xlu0 %v11479_v43, %s8842_s16  ;;  %v8634_v26 = vld [vmem:[%s9698_s26 + $0x60] ss:$16 sps:$4 sm:$0xff]   ;;  %v8642_v46 = vld [vmem:[%s9698_s26 + $0x84] ss:$16 sps:$4 sm:$0xff]  }
0x1293   :  { %3917 = vrot.lane.b32.xlu1 %v11481_v4, %s8842_s16  ;;  %4237 = vmatpush1.bf16.msra.mxu0 %v8622_v47  ;;  %s8866_s16 = smov 24  }
0x1294   :  { %4238 = vmatprep.subr.bf16.mxu0 %v8630_v49  ;;  %s11844_s1 = sld [smem:[%s14371_s0 + %s8866_s16]]   ;;  %s8870_s16 = smov 27  }
0x1295   :  { %3921 = vrot.lane.b32.xlu0 %v11479_v43, %s8841_s15 }
0x1297   :  { %3923 = vrot.lane.b32.xlu1 %v11481_v4, %s8841_s15  ;;  %s8863_s15 = smov 22   ;;  %4239 = vmatpush1.bf16.msra.mxu0 %v8628_v53 }
0x1298   :  { %4240 = vmatprep.subr.bf16.mxu0 %v8636_v7 }
0x1299   :  { %3927 = vrot.lane.b32.xlu0 %v11479_v43, %s8844_s22 }
0x129b   :  { %3929 = vrot.lane.b32.xlu1 %v11481_v4, %s8844_s22  ;;  %s11510_s22 = sld [smem:[%s14371_s0 + %s8863_s15]]   ;;  %4241 = vmatpush1.bf16.msra.mxu0 %v8634_v26 }
0x129c   :  { %4242 = vmatprep.subr.bf16.mxu0 %v8642_v46 }
0x129d   :  { %3933 = vrot.lane.b32.xlu0 %v11479_v43, %s8829_s9 }
0x129f   :  { %3935 = vrot.lane.b32.xlu1 %v11481_v4, %s8829_s9  ;;  %4243 = vmatpush1.bf16.msra.mxu0 %v8640_v8 }
0x12a1   :  { %3939 = vrot.lane.b32.xlu0 %v11479_v43, %s8830_s10  ;;  %v3974_v22 = vld [vmem:[%s11510_s22] sm:$0xff]  ;;  %v3975_v40 = vld [vmem:[%s11510_s22 + $0x8] sm:$0xff] }
0x12a3   :  { %3941 = vrot.lane.b32.xlu1 %v11481_v4, %s8830_s10 }
0x12a5   :  { %3945 = vrot.lane.b32.xlu0 %v11479_v43, %s8846_s27 }
0x12a7   :  { %3947 = vrot.lane.b32.xlu1 %v11481_v4, %s8846_s27  ;;  %s14858_s27 = smov 111  }
0x12a9   :  { %3951 = vrot.lane.b32.xlu0 %v11479_v43, %s8849_s29 }
0x12ab   :  { %3953 = vrot.lane.b32.xlu1 %v11481_v4, %s8849_s29 }
0x12ad   :  { %3957 = vrot.lane.b32.xlu0 %v11479_v43, %s8848_s28 }
0x12af   :  { %3959 = vrot.lane.b32.xlu1 %v11481_v4, %s8848_s28  ;;  %s8865_s28 = smov 23  }
0x12b0   :  { %s11837_s15 = sld [smem:[%s14371_s0 + %s8865_s28]]  }
0x12b1   :  { %3978 = vperm.xlu0 %8492, %v3974_v22   ;;  %v8648_v22 = vld [vmem:[%s9698_s26 + $0xa4] ss:$16 sps:$4 sm:$0xff]  }
0x12b2   :  { %4244 = vmatprep.subr.bf16.mxu0 %v8648_v22 }
0x12b3   :  { %3983 = vperm.xlu1 %8493, %v3975_v40   ;;  %v8646_v40 = vld [vmem:[%s9698_s26 + $0xa0] ss:$16 sps:$4 sm:$0xff]  }
0x12b4   :  { %4245 = vmatpush1.bf16.msra.mxu0 %v8646_v40 }
0x12b5   :  { %4324 = vrot.lane.b32.xlu0 %v11304_v55, %s8826_s6 }
0x12b7   :  { %4330 = vrot.lane.b32.xlu1 %v11308_v59, %s8826_s6 }
0x12b9   :  { %4336 = vrot.lane.b32.xlu0 %v11332_v31, %s8826_s6 }
0x12bb   :  { %4342 = vrot.lane.b32.xlu1 %v11336_v32, %s8826_s6 }
0x12bd   :  { %4420 = vrot.lane.b32.xlu0 %v11304_v55, %s8828_s8 }
0x12bf   :  { %4372 = vrot.lane.b32.xlu1 %v11304_v55, %s8827_s7 }
0x12c1   :  { %4432 = vrot.lane.b32.xlu0 %v11332_v31, %s8828_s8 }
0x12c3   :  { %4378 = vrot.lane.b32.xlu1 %v11308_v59, %s8827_s7 }
0x12c5   :  { %4558 = vrot.lane.b32.xlu0 %v11308_v59, %s8831_s11 }
0x12c7   :  { %4384 = vrot.lane.b32.xlu1 %v11332_v31, %s8827_s7 }
0x12c9   :  { %4552 = vrot.lane.b32.xlu0 %v11304_v55, %s8831_s11 }
0x12cb   :  { %4390 = vrot.lane.b32.xlu1 %v11336_v32, %s8827_s7 }
0x12cf   :  { %4426 = vrot.lane.b32.xlu1 %v11308_v59, %s8828_s8 }
0x12d3   :  { %4438 = vrot.lane.b32.xlu1 %v11336_v32, %s8828_s8 }
0x12d7   :  { %4468 = vrot.lane.b32.xlu1 %v11304_v55, %s8829_s9 }
0x12db   :  { %4474 = vrot.lane.b32.xlu1 %v11308_v59, %s8829_s9 }
0x12df   :  { %4480 = vrot.lane.b32.xlu1 %v11332_v31, %s8829_s9 }
0x12e3   :  { %4486 = vrot.lane.b32.xlu1 %v11336_v32, %s8829_s9 }
0x12e7   :  { %4564 = vrot.lane.b32.xlu1 %v11332_v31, %s8831_s11  ;;  %v11851_v31 = vld [vmem:[%s11837_s15] sm:$0xff] }
0x12e8   :  { %14866 = vst [vmem:[#allocation70_spill] sm:$0xff] %v11851_v31 }
0x12eb   :  { %4570 = vrot.lane.b32.xlu1 %v11336_v32, %s8831_s11 }
0x1303   :  { %v3916_v48 = vpop.permute.xlu0 %3915 }
0x1304   :  { %v3919_v1 = vmul.f32 %v11443_v51, %v3916_v48 }
0x1305   :  { %v3918_v3 = vpop.permute.xlu1 %3917 }
0x1306   :  { %v3920_v47 = vmul.f32 %v11443_v51, %v3918_v3 }
0x1307   :  { %v3922_v49 = vpop.permute.xlu0 %3921 }
0x1308   :  { %v3963_v50 = vpack.c.bf16 %v3920_v47, %v3919_v1  ;;  %v3925_v7 = vmul.f32 %v11440_v34, %v3922_v49 }
0x1309   :  { %v3924_v53 = vpop.permute.xlu1 %3923 }
0x130a   :  { %v3926_v26 = vmul.f32 %v11440_v34, %v3924_v53  ;;  %3999 = vmatpush1.bf16.msra.mxu1 %v3963_v50 }
0x130b   :  { %v3928_v46 = vpop.permute.xlu0 %3927  ;;  %4000 = vmatprep.subr.bf16.mxu1 %v14831_v63 }
0x130c   :  { %v3964_v8 = vpack.c.bf16 %v3926_v26, %v3925_v7  ;;  %v3931_v40 = vmul.f32 %v11451_v6, %v3928_v46  ;;  %v14844_v26 = vpack.c.bf16 %v11481_v4, %v11479_v43 }
0x130d   :  { %v3930_v22 = vpop.permute.xlu1 %3929 }
0x130e   :  { %v3932_v25 = vmul.f32 %v11451_v6, %v3930_v22  ;;  %4001 = vmatpush1.bf16.msra.mxu1 %v3964_v8 }
0x130f   :  { %v3934_v48 = vpop.permute.xlu0 %3933  ;;  %4002 = vmatprep.subr.bf16.mxu1 %v14831_v63 }
0x1310   :  { %v3965_v51 = vpack.c.bf16 %v3932_v25, %v3931_v40  ;;  %v3937_v1 = vmul.f32 %v11448_v9, %v3934_v48 }
0x1311   :  { %v3936_v3 = vpop.permute.xlu1 %3935 }
0x1312   :  { %v3938_v34 = vmul.f32 %v11448_v9, %v3936_v3  ;;  %4003 = vmatpush1.bf16.msra.mxu1 %v3965_v51 }
0x1313   :  { %v3940_v50 = vpop.permute.xlu0 %3939  ;;  %4004 = vmatprep.subr.bf16.mxu1 %v14831_v63 }
0x1314   :  { %v3966_v47 = vpack.c.bf16 %v3938_v34, %v3937_v1  ;;  %v3943_v25 = vmul.f32 %v11457_v13, %v3940_v50  ;;  %v8621_v34 = vld [vmem:[%s9698_s26 + $0xc] ss:$16 sps:$4 sm:$0xff]  }
0x1315   :  { %v3942_v49 = vpop.permute.xlu1 %3941 }
0x1316   :  { %4005 = vmatpush1.bf16.msra.mxu1 %v3966_v47  ;;  %v3944_v6 = vmul.f32 %v11457_v13, %v3942_v49  ;;  %v8615_v47 = vld [vmem:[%s11515_s17] ss:$8 sps:$4 sm:$0xff]   ;;  %v8627_v49 = vld [vmem:[%s9698_s26 + $0x2c] ss:$16 sps:$4 sm:$0xff]  }
0x1317   :  { %v3946_v53 = vpop.permute.xlu0 %3945  ;;  %4006 = vmatprep.subr.bf16.mxu1 %v14831_v63 }
0x1318   :  { %v3968_v9 = vpack.c.bf16 %v3944_v6, %v3943_v25  ;;  %v3949_v40 = vmul.f32 %v11461_v41, %v3946_v53  ;;  %v8625_v53 = vld [vmem:[%s9698_s26 + $0x28] ss:$16 sps:$4 sm:$0xff]   ;;  %v8639_v25 = vld [vmem:[%s9698_s26 + $0x6c] ss:$16 sps:$4 sm:$0xff]  }
0x1319   :  { %v3948_v7 = vpop.permute.xlu1 %3947 }
0x131a   :  { %4007 = vmatpush1.bf16.msra.mxu1 %v14844_v26  ;;  %v3950_v46 = vmul.f32 %v11461_v41, %v3948_v7  ;;  %v8631_v7 = vld [vmem:[%s9698_s26 + $0x48] ss:$16 sps:$4 sm:$0xff]  }
0x131b   :  { %4008 = vmatprep.subr.bf16.mxu1 %v14831_v63  ;;  %v3952_v8 = vpop.permute.xlu0 %3951 }
0x131c   :  { %v3969_v48 = vpack.c.bf16 %v3950_v46, %v3949_v40  ;;  %v3955_v4 = vmul.f32 %v11468_v36, %v3952_v8  ;;  %v8645_v46 = vld [vmem:[%s9698_s26 + $0x8c] ss:$16 sps:$4 sm:$0xff]  }
0x131d   :  { %v3954_v22 = vpop.permute.xlu1 %3953  ;;  %v8651_v40 = vld [vmem:[%s9698_s26 + $0xac] ss:$16 sps:$4 sm:$0xff]  }
0x131e   :  { %4009 = vmatpush1.bf16.msra.mxu1 %v3968_v9  ;;  %v3956_v13 = vmul.f32 %v11468_v36, %v3954_v22  ;;  %v8619_v36 = vld [vmem:[%s9698_s26 + $0x8] ss:$16 sps:$4 sm:$0xff]  }
0x131f   :  { %4010 = vmatprep.subr.bf16.mxu1 %v14831_v63  ;;  %v3958_v51 = vpop.permute.xlu0 %3957  ;;  %v8637_v9 = vld [vmem:[%s9698_s26 + $0x68] ss:$16 sps:$4 sm:$0xff]  }
0x1320   :  { %v3970_v3 = vpack.c.bf16 %v3956_v13, %v3955_v4  ;;  %v3961_v1 = vmul.f32 %v11464_v57, %v3958_v51  ;;  %v8643_v22 = vld [vmem:[%s9698_s26 + $0x88] ss:$16 sps:$4 sm:$0xff]  }
0x1321   :  { %v3960_v43 = vpop.permute.xlu1 %3959  ;;  %v8649_v13 = vld [vmem:[%s9698_s26 + $0xa8] ss:$16 sps:$4 sm:$0xff]  }
0x1322   :  { %4011 = vmatpush1.bf16.msra.mxu1 %v3969_v48  ;;  %v3962_v41 = vmul.f32 %v11464_v57, %v3960_v43  ;;  %v8633_v57 = vld [vmem:[%s9698_s26 + $0x4c] ss:$16 sps:$4 sm:$0xff]  }
0x1323   :  { %4012 = vmatprep.subr.bf16.mxu1 %v14831_v63 }
0x1324   :  { %v3971_v50 = vpack.c.bf16 %v3962_v41, %v3961_v1 }
0x1326   :  { %4013 = vmatpush1.bf16.msra.mxu1 %v3970_v3 }
0x1327   :  { %4014 = vmatprep.subr.bf16.mxu1 %v14831_v63 }
0x132a   :  { %4015 = vmatpush1.bf16.msra.mxu1 %v3971_v50 }
0x132b   :  { %4277 = vmatprep.subr.bf16.mxu1 %v8621_v34 }
0x132d   :  { %4031 = vmatmul.mubr.bf16.vlgmr.msra.gmra.mrb[40].mxu1 %v8615_v47 }
0x132e   :  { %4278 = vmatpush1.bf16.msra.mxu1 %v8619_v36  ;;  %4309 = vmatprep.mubr.bf16.mxu1 %v14831_v63 }
0x132f   :  { %4279 = vmatprep.subr.bf16.mxu1 %v8627_v49  ;;  %v8654_v49 = vld [vmem:[%s9698_s26 + $0xc4] ss:$16 sps:$4 sm:$0xff]  }
0x1330   :  { %4246 = vmatprep.subr.bf16.mxu0 %v8654_v49 }
0x1332   :  { %v3984_v6 = vpop.permute.xlu1 %3983  ;;  %4280 = vmatpush1.bf16.msra.mxu1 %v8625_v53  ;;  %v8657_v53 = vld [vmem:[%s9698_s26 + $0xcc] ss:$16 sps:$4 sm:$0xff]  }
0x1333   :  { %4281 = vmatprep.subr.bf16.mxu1 %v8633_v57  ;;  %v8652_v57 = vld [vmem:[%s9698_s26 + $0xc0] ss:$16 sps:$4 sm:$0xff]  }
0x1334   :  { %4247 = vmatpush1.bf16.msra.mxu0 %v8652_v57 }
0x1336   :  { %v11619_v26 = vpop.permute.xlu1 %4330  ;;  %4282 = vmatpush1.bf16.msra.mxu1 %v8631_v7  ;;  %v8655_v7 = vld [vmem:[%s9698_s26 + $0xc8] ss:$16 sps:$4 sm:$0xff]  }
0x1337   :  { %4283 = vmatprep.subr.bf16.mxu1 %v8639_v25  ;;  %v8660_v25 = vld [vmem:[%s9698_s26 + $0xe4] ss:$16 sps:$4 sm:$0xff]  }
0x1338   :  { %4248 = vmatprep.subr.bf16.mxu0 %v8660_v25 }
0x133a   :  { %v11623_v8 = vpop.permute.xlu1 %4342  ;;  %4284 = vmatpush1.bf16.msra.mxu1 %v8637_v9  ;;  %v8663_v9 = vld [vmem:[%s9698_s26 + $0xec] ss:$16 sps:$4 sm:$0xff]  }
0x133b   :  { %4285 = vmatprep.subr.bf16.mxu1 %v8645_v46  ;;  %v8658_v46 = vld [vmem:[%s9698_s26 + $0xe0] ss:$16 sps:$4 sm:$0xff]  }
0x133c   :  { %4249 = vmatpush1.bf16.msra.mxu0 %v8658_v46 }
0x133e   :  { %v11627_v48 = vpop.permute.xlu1 %4372  ;;  %4286 = vmatpush1.bf16.msra.mxu1 %v8643_v22  ;;  %v8661_v22 = vld [vmem:[%s9698_s26 + $0xe8] ss:$16 sps:$4 sm:$0xff]  }
0x133f   :  { %4287 = vmatprep.subr.bf16.mxu1 %v8651_v40  ;;  %v3979_v40 = vpop.permute.xlu0 %3978 }
0x1342   :  { %v11630_v43 = vpop.permute.xlu1 %4378  ;;  %4288 = vmatpush1.bf16.msra.mxu1 %v8649_v13 }
0x1343   :  { %4289 = vmatprep.subr.bf16.mxu1 %v8657_v53 }
0x1346   :  { %v11632_v4 = vpop.permute.xlu1 %4384  ;;  %4290 = vmatpush1.bf16.msra.mxu1 %v8655_v7 }
0x1347   :  { %4291 = vmatprep.subr.bf16.mxu1 %v8663_v9 }
0x134a   :  { %v11634_v51 = vpop.permute.xlu1 %4390  ;;  %4292 = vmatpush1.bf16.msra.mxu1 %v8661_v22  ;;  %v11766_v22 = vpop.permute.xlu0 %4324 }
0x134e   :  { %v11636_v3 = vpop.permute.xlu1 %4426 }
0x1352   :  { %v11638_v41 = vpop.permute.xlu1 %4438 }
0x1356   :  { %v11640_v1 = vpop.permute.xlu1 %4468 }
0x1357   :  { %14845 = vst [vmem:[#allocation21_spill] sm:$0xff] %v11640_v1 }
0x135a   :  { %v11642_v34 = vpop.permute.xlu1 %4474 }
0x135b   :  { %14846 = vst [vmem:[#allocation20_spill] sm:$0xff] %v11642_v34 }
0x135e   :  { %v11644_v50 = vpop.permute.xlu1 %4480 }
0x135f   :  { %14847 = vst [vmem:[#allocation23_spill] sm:$0xff] %v11644_v50 }
0x1362   :  { %v11646_v47 = vpop.permute.xlu1 %4486 }
0x1363   :  { %14848 = vst [vmem:[#allocation37_spill] sm:$0xff] %v11646_v47  ;;  %v11652_v36 = vsel %vm275_vm4, %v11644_v50, %v11646_v47 }
0x1364   :  { %14849 = vst [vmem:[#allocation40_spill] sm:$0xff] %v11652_v36  ;;  %v14875_v36 = vld [vmem:[#allocation60_spill] sm:$0xff] }
0x1400   :  { %v4032_v13 = vpop.f32.mrb[40].mxu1 }
0x1401   :  { %v4033_v63 = vadd.f32 %v4032_v13, %v3979_v40  ;;  %v4034_v29 = vpop.f32.mrb[41].mxu1  ;;  %v11776_v40 = vpop.permute.xlu0 %4336 }
0x1402   :  { %v4035_v60 = vpop.f32.mrb[42].mxu1  ;;  %v4346_v47 = vsel %vm156_vm1, %v11776_v40, %v11623_v8 }
0x1403   :  { %v4036_v28 = vadd.f32 %v4035_v60, %v3984_v6  ;;  %v4037_v2 = vpop.f32.mrb[43].mxu1  ;;  %v4039_v15 = vmax.f32 %v4033_v63, 0.0  ;;  %v11800_v6 = vpop.permute.xlu1 %4564 }
0x1404   :  { %14861 = vst [vmem:[#allocation7_spill] sm:$0xff] %v11800_v6 }
0x1405   :  { %v4040_v49 = vmax.f32 %v4036_v28, 0.0  ;;  %v11782_v13 = vpop.permute.xlu0 %4420 }
0x1407   :  { %v4041_v53 = vpack.c.bf16 %v4040_v49, %v4039_v15  ;;  %v11812_v46 = vpop.permute.xlu1 %4570 }
0x1408   :  { %14863 = vst [vmem:[#allocation8_spill] sm:$0xff] %v11812_v46 }
0x1409   :  { %4267 = vmatmul.mubr.bf16.vlgmr.msra.gmra.mrb[52].mxu0 %v4041_v53  ;;  %4310 = vmatmul.mubr.bf16.vlgmr.msra.gmra.mrb[44].mxu1 %v4041_v53  ;;  %v11792_v49 = vpop.permute.xlu0 %4432 }
0x140a   :  { %14859 = vst [vmem:[#allocation44_spill] sm:$0xff] %v11792_v49 }
0x140d   :  { %v11798_v53 = vpop.permute.xlu0 %4558 }
0x140e   :  { %14860 = vst [vmem:[#allocation62_spill] sm:$0xff] %v11798_v53 }
0x1411   :  { %v11810_v2 = vpop.permute.xlu0 %4552 }
0x1412   :  { %14862 = vst [vmem:[#allocation9_spill] sm:$0xff] %v11810_v2 }
0x14dc   :  { %v11662_v57 = vpop.f32.mrb[52].mxu0  ;;  %v11664_v7 = vpop.f32.mrb[44].mxu1 }
0x14dd   :  { %14850 = vst [vmem:[#allocation27_spill] sm:$0xff] %v11662_v57  ;;  %14851 = vst [vmem:[#allocation39_spill] sm:$0xff] %v11664_v7  ;;  %4520 = vrot.lane.b32.xlu1 %v11664_v7, %s8830_s10  ;;  %v11668_v25 = vpop.f32.mrb[45].mxu1  ;;  %4320 = vrot.lane.b32.xlu0 %v11662_v57, %s8826_s6  ;;  %v11672_v29 = vpop.f32.mrb[53].mxu0 }
0x14de   :  { %14852 = vst [vmem:[#allocation25_spill] sm:$0xff] %v11668_v25  ;;  %14853 = vst [vmem:[#allocation41_spill] sm:$0xff] %v11672_v29  ;;  %v11674_v60 = vpop.f32.mrb[54].mxu0  ;;  %v11676_v28 = vpop.f32.mrb[46].mxu1 }
0x14df   :  { %14854 = vst [vmem:[#allocation42_spill] sm:$0xff] %v11674_v60  ;;  %14855 = vst [vmem:[#allocation28_spill] sm:$0xff] %v11676_v28  ;;  %v11678_v63 = vpop.f32.mrb[55].mxu0  ;;  %v11680_v15 = vpop.f32.mrb[47].mxu1 }
0x14e0   :  { %14856 = vst [vmem:[#allocation26_spill] sm:$0xff] %v11678_v63  ;;  %14857 = vst [vmem:[#allocation43_spill] sm:$0xff] %v11680_v15 }
0x14e1   :  { %4604 = vrot.lane.b32.xlu1 %v11664_v7, %s8832_s12  ;;  %4332 = vrot.lane.b32.xlu0 %v11664_v7, %s8826_s6 }
0x14e5   :  { %4368 = vrot.lane.b32.xlu0 %v11662_v57, %s8827_s7  ;;  %4374 = vrot.lane.b32.xlu1 %v11672_v29, %s8827_s7 }
0x14e9   :  { %4380 = vrot.lane.b32.xlu0 %v11664_v7, %s8827_s7  ;;  %4386 = vrot.lane.b32.xlu1 %v11668_v25, %s8827_s7 }
0x14ed   :  { %4416 = vrot.lane.b32.xlu0 %v11662_v57, %s8828_s8  ;;  %4470 = vrot.lane.b32.xlu1 %v11672_v29, %s8829_s9 }
0x14f1   :  { %4428 = vrot.lane.b32.xlu0 %v11664_v7, %s8828_s8  ;;  %4482 = vrot.lane.b32.xlu1 %v11668_v25, %s8829_s9 }
0x14f5   :  { %4464 = vrot.lane.b32.xlu0 %v11662_v57, %s8829_s9  ;;  %4524 = vrot.lane.b32.xlu1 %v11668_v25, %s8830_s10 }
0x14f9   :  { %4476 = vrot.lane.b32.xlu0 %v11664_v7, %s8829_s9  ;;  %4322 = vrot.lane.b32.xlu1 %v11674_v60, %s8826_s6 }
0x14fd   :  { %4512 = vrot.lane.b32.xlu0 %v11662_v57, %s8830_s10  ;;  %4334 = vrot.lane.b32.xlu1 %v11676_v28, %s8826_s6 }
0x1501   :  { %4560 = vrot.lane.b32.xlu0 %v11664_v7, %s8831_s11  ;;  %4418 = vrot.lane.b32.xlu1 %v11674_v60, %s8828_s8 }
0x1505   :  { %4548 = vrot.lane.b32.xlu0 %v11662_v57, %s8831_s11  ;;  %4430 = vrot.lane.b32.xlu1 %v11676_v28, %s8828_s8 }
0x1509   :  { %4326 = vrot.lane.b32.xlu0 %v11672_v29, %s8826_s6  ;;  %4522 = vrot.lane.b32.xlu1 %v11676_v28, %s8830_s10 }
0x150d   :  { %4338 = vrot.lane.b32.xlu0 %v11668_v25, %s8826_s6  ;;  %4562 = vrot.lane.b32.xlu1 %v11676_v28, %s8831_s11 }
0x1511   :  { %4422 = vrot.lane.b32.xlu0 %v11672_v29, %s8828_s8  ;;  %4550 = vrot.lane.b32.xlu1 %v11674_v60, %s8831_s11 }
0x1515   :  { %4434 = vrot.lane.b32.xlu0 %v11668_v25, %s8828_s8  ;;  %4328 = vrot.lane.b32.xlu1 %v11678_v63, %s8826_s6 }
0x1519   :  { %4516 = vrot.lane.b32.xlu0 %v11672_v29, %s8830_s10  ;;  %4340 = vrot.lane.b32.xlu1 %v11680_v15, %s8826_s6 }
0x151d   :  { %4554 = vrot.lane.b32.xlu0 %v11672_v29, %s8831_s11  ;;  %4608 = vrot.lane.b32.xlu1 %v11668_v25, %s8832_s12 }
0x1521   :  { %4566 = vrot.lane.b32.xlu0 %v11668_v25, %s8831_s11  ;;  %4424 = vrot.lane.b32.xlu1 %v11678_v63, %s8828_s8 }
0x1525   :  { %4600 = vrot.lane.b32.xlu0 %v11672_v29, %s8832_s12  ;;  %4436 = vrot.lane.b32.xlu1 %v11680_v15, %s8828_s8 }
0x1529   :  { %4370 = vrot.lane.b32.xlu0 %v11674_v60, %s8827_s7  ;;  %4606 = vrot.lane.b32.xlu1 %v11676_v28, %s8832_s12 }
0x152d   :  { %4382 = vrot.lane.b32.xlu0 %v11676_v28, %s8827_s7  ;;  %4642 = vrot.lane.b32.xlu1 %v11676_v28, %s14858_s27 }
0x1531   :  { %4466 = vrot.lane.b32.xlu0 %v11674_v60, %s8829_s9  ;;  %4526 = vrot.lane.b32.xlu1 %v11680_v15, %s8830_s10 }
0x1535   :  { %4478 = vrot.lane.b32.xlu0 %v11676_v28, %s8829_s9  ;;  %4556 = vrot.lane.b32.xlu1 %v11678_v63, %s8831_s11 }
0x1539   :  { %4514 = vrot.lane.b32.xlu0 %v11674_v60, %s8830_s10  ;;  %4568 = vrot.lane.b32.xlu1 %v11680_v15, %s8831_s11 }
0x153d   :  { %4376 = vrot.lane.b32.xlu0 %v11678_v63, %s8827_s7  ;;  %4634 = vrot.lane.b32.xlu1 %v11674_v60, %s14858_s27 }
0x1541   :  { %4388 = vrot.lane.b32.xlu0 %v11680_v15, %s8827_s7  ;;  %4610 = vrot.lane.b32.xlu1 %v11680_v15, %s8832_s12 }
0x1545   :  { %4596 = vrot.lane.b32.xlu0 %v11662_v57, %s8832_s12  ;;  %4638 = vrot.lane.b32.xlu1 %v11678_v63, %s14858_s27 }
0x1549   :  { %4472 = vrot.lane.b32.xlu0 %v11678_v63, %s8829_s9  ;;  %4646 = vrot.lane.b32.xlu1 %v11680_v15, %s14858_s27 }
0x154d   :  { %4484 = vrot.lane.b32.xlu0 %v11680_v15, %s8829_s9 }
0x154f   :  { %v11816_v9 = vpop.permute.xlu1 %4520  ;;  %v11818_v52 = vpop.permute.xlu0 %4320 }
0x1550   :  { %14864 = vst [vmem:[#allocation15_spill] sm:$0xff] %v11816_v9 }
0x1551   :  { %4598 = vrot.lane.b32.xlu0 %v11674_v60, %s8832_s12 }
0x1553   :  { %v11822_v30 = vpop.permute.xlu1 %4604  ;;  %v11824_v38 = vpop.permute.xlu0 %4332 }
0x1554   :  { %14865 = vst [vmem:[#allocation14_spill] sm:$0xff] %v11822_v30 }
0x1555   :  { %4518 = vrot.lane.b32.xlu0 %v11678_v63, %s8830_s10 }
0x1557   :  { %v4369_v2 = vpop.permute.xlu0 %4368  ;;  %v4375_v37 = vpop.permute.xlu1 %4374 }
0x1559   :  { %4636 = vrot.lane.b32.xlu0 %v11672_v29, %s14858_s27 }
0x155b   :  { %v4381_v46 = vpop.permute.xlu0 %4380  ;;  %v4387_v45 = vpop.permute.xlu1 %4386 }
0x155d   :  { %4640 = vrot.lane.b32.xlu0 %v11664_v7, %s14858_s27  ;;  %v8074_v7 = vcombine.high %v11851_v31, %v11851_v31 }
0x155f   :  { %v11832_v53 = vpop.permute.xlu0 %4416  ;;  %v4471_v6 = vpop.permute.xlu1 %4470  ;;  %8076 = vmatprep.mubr.msk.bf16.mxu0 %vm2201_vm13, %v8074_v7  ;;  %8078 = vmatprep.mubr.msk.bf16.mxu1 %vm2201_vm13, %v8074_v7 }
0x1561   :  { %4602 = vrot.lane.b32.xlu0 %v11678_v63, %s8832_s12 }
0x1563   :  { %v11846_v11 = vpop.permute.xlu0 %4428  ;;  %v4483_v30 = vpop.permute.xlu1 %4482 }
0x1565   :  { %4632 = vrot.lane.b32.xlu0 %v11662_v57, %s14858_s27  ;;  %v4725_v57 = vld [vmem:[%s11844_s1] sm:$0xff] }
0x1567   :  { %v4465_v27 = vpop.permute.xlu0 %4464  ;;  %v4525_v21 = vpop.permute.xlu1 %4524 }
0x1568   :  { %v11857_v28 = vsel %vm275_vm4, %v4465_v27, %v4471_v6  ;;  %v11861_v55 = vsel %vm275_vm4, %v4483_v30, %v4465_v27  ;;  %v11866_v32 = vsel %vm315_vm5, %v11816_v9, %v4525_v21  ;;  %v4392_v9 = vsel %vm195_vm2, %v4381_v46, %v4387_v45 }
0x1569   :  { %14867 = vst [vmem:[#allocation71_spill] sm:$0xff] %v11857_v28  ;;  %14868 = vst [vmem:[#allocation72_spill] sm:$0xff] %v11861_v55  ;;  %4644 = vrot.lane.b32.xlu0 %v11668_v25, %s14858_s27  ;;  %v14876_v55 = vld [vmem:[#allocation64_spill] sm:$0xff]  ;;  %v4407_v28 = vmul.f32 %v4392_v9, %v10863_v20 }
0x156a   :  { %14869 = vst [vmem:[#allocation73_spill] sm:$0xff] %v11866_v32 }
0x156b   :  { %v4477_v31 = vpop.permute.xlu0 %4476  ;;  %v4323_v60 = vpop.permute.xlu1 %4322 }
0x156c   :  { %v11875_v58 = vsel %vm275_vm4, %v4477_v31, %v4483_v30  ;;  %v11879_v27 = vsel %vm275_vm4, %v4471_v6, %v4477_v31 }
0x156d   :  { %14870 = vst [vmem:[#allocation74_spill] sm:$0xff] %v11875_v58  ;;  %14871 = vst [vmem:[#allocation75_spill] sm:$0xff] %v11879_v27  ;;  %4728 = vperm.xlu0 %8492, %v4725_v57  }
0x156f   :  { %v11881_v32 = vpop.permute.xlu0 %4512  ;;  %v4335_v12 = vpop.permute.xlu1 %4334 }
0x1570   :  { %14872 = vst [vmem:[#allocation76_spill] sm:$0xff] %v11881_v32  ;;  %v11886_v59 = vsel %vm315_vm5, %v4525_v21, %v11881_v32 }
0x1571   :  { %14873 = vst [vmem:[#allocation77_spill] sm:$0xff] %v11886_v59  ;;  %v4398_v59 = vsel %vm195_vm2, %v4369_v2, %v4375_v37 }
0x1572   :  { %v4405_v44 = vmul.f32 %v4398_v59, %v14876_v55 }
0x1573   :  { %v11888_v7 = vpop.permute.xlu0 %4560  ;;  %v11890_v25 = vpop.permute.xlu1 %4418 }
0x1577   :  { %v11892_v15 = vpop.permute.xlu0 %4548  ;;  %v11894_v30 = vpop.permute.xlu1 %4430 }
0x157b   :  { %v4327_v5 = vpop.permute.xlu0 %4326  ;;  %v11896_v31 = vpop.permute.xlu1 %4522 }
0x157c   :  { %14874 = vst [vmem:[#allocation78_spill] sm:$0xff] %v11896_v31  ;;  %v4350_v21 = vsel %vm156_vm1, %v11818_v52, %v4327_v5  ;;  %v4352_v31 = vsel %vm156_vm1, %v11766_v22, %v11619_v26  ;;  %v4347_v23 = vsel %vm156_vm1, %v4327_v5, %v11824_v38 }
0x157d   :  { %v4357_v50 = vmul.f32 %v4350_v21, %v14875_v36 }
0x157f   :  { %v4339_v57 = vpop.permute.xlu0 %4338  ;;  %v11898_v6 = vpop.permute.xlu1 %4562 }
0x1580   :  { %v4344_v58 = vsel %vm156_vm1, %v11824_v38, %v4339_v57  ;;  %v4353_v21 = vsel %vm156_vm1, %v4339_v57, %v11818_v52  ;;  %v14877_v57 = vld [vmem:[#allocation33_spill] sm:$0xff] }
0x1583   :  { %v11900_v29 = vpop.permute.xlu0 %4422  ;;  %v11902_v63 = vpop.permute.xlu1 %4550 }
0x1587   :  { %v11909_v35 = vpop.permute.xlu0 %4434  ;;  %v4329_v39 = vpop.permute.xlu1 %4328 }
0x1588   :  { %v4351_v32 = vsel %vm156_vm1, %v4323_v60, %v4329_v39  ;;  %v4348_v27 = vsel %vm156_vm1, %v4329_v39, %v4335_v12  ;;  %v4395_v39 = vsel %vm195_vm2, %v4375_v37, %v4381_v46 }
0x1589   :  { %v4361_v19 = vmul.f32 %v4351_v32, %v14875_v36  ;;  %v4401_v32 = vsel %vm195_vm2, %v4387_v45, %v4369_v2  ;;  %v4362_v49 = vmul.f32 %v4348_v27, %v10869_v62  ;;  %v4356_v45 = vmul.f32 %v4353_v21, %v10847_v24 }
0x158a   :  { %v4359_v2 = vmul.f32 %v4344_v58, %v10857_v18  ;;  %v4367_v58 = vmul.f32 %v4346_v47, %v10857_v18  ;;  %v4404_v9 = vmul.f32 %v4401_v32, %v10860_v61  ;;  %v4406_v21 = vmul.f32 %v4395_v39, %v14877_v57 }
0x158b   :  { %v11941_v1 = vpop.permute.xlu0 %4516  ;;  %v4341_v59 = vpop.permute.xlu1 %4340  ;;  %v4669_v34 = vpack.c.bf16 %v4361_v19, %v4357_v50  ;;  %v4365_v19 = vmul.f32 %v4352_v31, %v14875_v36  ;;  %v4349_v50 = vsel %vm156_vm1, %v11619_v26, %v11776_v40 }
0x158c   :  { %v4345_v52 = vsel %vm156_vm1, %v4335_v12, %v4341_v59  ;;  %v4354_v37 = vsel %vm156_vm1, %v4341_v59, %v4323_v60  ;;  %v4355_v12 = vsel %vm156_vm1, %v11623_v8, %v11766_v22  ;;  %v4358_v60 = vmul.f32 %v4347_v23, %v10869_v62 }
0x158d   :  { %v4360_v5 = vmul.f32 %v4354_v37, %v10847_v24  ;;  %v4363_v38 = vmul.f32 %v4345_v52, %v10857_v18  ;;  %4752 = vmatprep.subr.bf16.mxu0 %v4669_v34  ;;  %v4673_v40 = vpack.c.bf16 %v4405_v44, %v4365_v19  ;;  %v4364_v8 = vmul.f32 %v4355_v12, %v10847_v24  ;;  %v14884_v24 = vld [vmem:[#allocation74_spill] sm:$0xff] }
0x158e   :  { %v4670_v59 = vpack.c.bf16 %v4362_v49, %v4358_v60  ;;  %v4675_v23 = vpack.c.bf16 %v4407_v28, %v4367_v58  ;;  %v4366_v47 = vmul.f32 %v4349_v50, %v10869_v62  ;;  %v4443_v22 = vsel %vm235_vm3, %v11900_v29, %v11846_v11 }
0x158f   :  { %v4668_v46 = vpack.c.bf16 %v4360_v5, %v4356_v45  ;;  %v4555_v34 = vpop.permute.xlu0 %4554  ;;  %v11965_v27 = vpop.permute.xlu1 %4608  ;;  %v4671_v31 = vpack.c.bf16 %v4363_v38, %v4359_v2  ;;  %v4672_v49 = vpack.c.bf16 %v4404_v9, %v4364_v8  ;;  %v11981_v28 = vmul.f32 %v4443_v22, %v10899_v16 }
0x1590   :  { %v4578_v26 = vsel %vm355_vm7, %v11892_v15, %v4555_v34  ;;  %v4674_v52 = vpack.c.bf16 %v4406_v21, %v4366_v47  ;;  %v4575_v9 = vsel %vm355_vm7, %v4555_v34, %v11888_v7 }
0x1591   :  { %4753 = vmatpush1.bf16.msra.mxu0 %v4668_v46  ;;  %4793 = vmatprep.subr.bf16.mxu1 %v4671_v31  ;;  %v12013_v8 = vmul.f32 %v4575_v9, %v10975_v33 }
0x1592   :  { %4754 = vmatprep.subr.bf16.mxu0 %v4673_v40  ;;  %4794 = vmatpush1.bf16.msra.mxu1 %v4670_v59  ;;  %v12010_v40 = vmul.f32 %v4578_v26, %v10952_v56  ;;  %v4397_v26 = vsel %vm195_vm2, %v11630_v43, %v11632_v4 }
0x1593   :  { %v4567_v39 = vpop.permute.xlu0 %4566  ;;  %4795 = vmatprep.subr.bf16.mxu1 %v4675_v23  ;;  %v4425_v32 = vpop.permute.xlu1 %4424 }
0x1594   :  { %v4444_v44 = vsel %vm235_vm3, %v4425_v32, %v11894_v30  ;;  %v4572_v47 = vsel %vm355_vm7, %v11888_v7, %v4567_v39  ;;  %v4581_v22 = vsel %vm355_vm7, %v4567_v39, %v11892_v15 }
0x1595   :  { %v11984_v37 = vmul.f32 %v4444_v44, %v10899_v16  ;;  %4755 = vmatpush1.bf16.msra.mxu0 %v4672_v49  ;;  %v12043_v15 = vmul.f32 %v4581_v22, %v10981_v54 }
0x1596   :  { %4796 = vmatpush1.bf16.msra.mxu1 %v4674_v52 }
0x1597   :  { %v11988_v2 = vpop.permute.xlu0 %4600  ;;  %v4437_v5 = vpop.permute.xlu1 %4436 }
0x159b   :  { %v4371_v38 = vpop.permute.xlu0 %4370  ;;  %v11990_v19 = vpop.permute.xlu1 %4606 }
0x159f   :  { %v4383_v50 = vpop.permute.xlu0 %4382  ;;  %v11992_v12 = vpop.permute.xlu1 %4642 }
0x15a3   :  { %v11994_v60 = vpop.permute.xlu0 %4466  ;;  %v11996_v58 = vpop.permute.xlu1 %4526 }
0x15a7   :  { %v12001_v46 = vpop.permute.xlu0 %4478  ;;  %v4557_v31 = vpop.permute.xlu1 %4556 }
0x15a8   :  { %v4576_v21 = vsel %vm355_vm7, %v4557_v31, %v11898_v6  ;;  %v4579_v59 = vsel %vm355_vm7, %v11902_v63, %v4557_v31  ;;  %v12040_v31 = vmul.f32 %v4572_v47, %v10978_v17 }
0x15a9   :  { %v12016_v23 = vmul.f32 %v4579_v59, %v10952_v56  ;;  %v12019_v34 = vmul.f32 %v4576_v21, %v10975_v33 }
0x15ab   :  { %v12029_v49 = vpop.permute.xlu0 %4514  ;;  %v4569_v52 = vpop.permute.xlu1 %4568 }
0x15ac   :  { %v4573_v9 = vsel %vm355_vm7, %v11898_v6, %v4569_v52  ;;  %v4582_v7 = vsel %vm355_vm7, %v4569_v52, %v11902_v63  ;;  %v4400_v6 = vsel %vm195_vm2, %v11627_v48, %v11630_v43  ;;  %v4403_v63 = vsel %vm195_vm2, %v11634_v51, %v11627_v48 }
0x15ad   :  { %v12046_v39 = vmul.f32 %v4573_v9, %v10978_v17  ;;  %v12049_v21 = vmul.f32 %v4582_v7, %v10981_v54  ;;  %v4394_v52 = vsel %vm195_vm2, %v11632_v4, %v11634_v51  ;;  %v4413_v7 = vmul.f32 %v4400_v6, %v14876_v55 }
0x15ae   :  { %v4447_v48 = vsel %vm235_vm3, %v11890_v25, %v4425_v32  ;;  %v4412_v22 = vmul.f32 %v4403_v63, %v10860_v61  ;;  %v4415_v44 = vmul.f32 %v4394_v52, %v10863_v20  ;;  %v4446_v6 = vsel %vm235_vm3, %v11832_v53, %v11900_v29 }
0x15af   :  { %v4377_v47 = vpop.permute.xlu0 %4376  ;;  %v4441_v32 = vsel %vm235_vm3, %v11894_v30, %v4437_v5  ;;  %v4457_v43 = vmul.f32 %v4447_v48, %v10866_v0  ;;  %v4450_v4 = vsel %vm235_vm3, %v4437_v5, %v11890_v25  ;;  %v4440_v29 = vsel %vm235_vm3, %v11846_v11, %v11909_v35 }
0x15b0   :  { %v4399_v9 = vsel %vm195_vm2, %v4371_v38, %v4377_v47  ;;  %v4396_v51 = vsel %vm195_vm2, %v4377_v47, %v4383_v50  ;;  %v4448_v25 = vsel %vm235_vm3, %v11782_v13, %v11636_v3  ;;  %v4453_v5 = vmul.f32 %v4446_v6, %v10866_v0 }
0x15b1   :  { %v4409_v59 = vmul.f32 %v4399_v9, %v14876_v55  ;;  %v4410_v30 = vmul.f32 %v4396_v51, %v14877_v57  ;;  %v4459_v11 = vmul.f32 %v4441_v32, %v10908_v14  ;;  %v4461_v32 = vmul.f32 %v4448_v25, %v10866_v0  ;;  %v14886_v25 = vld [vmem:[#allocation72_spill] sm:$0xff] }
0x15b3   :  { %v4389_v9 = vpop.permute.xlu0 %4388  ;;  %v4677_v45 = vpack.c.bf16 %v4413_v7, %v4409_v59  ;;  %v4456_v7 = vmul.f32 %v4450_v4, %v10902_v42  ;;  %v14881_v4 = vld [vmem:[#allocation20_spill] sm:$0xff] }
0x15b4   :  { %v4393_v63 = vsel %vm195_vm2, %v4383_v50, %v4389_v9  ;;  %v4402_v47 = vsel %vm195_vm2, %v4389_v9, %v4371_v38  ;;  %v4449_v38 = vsel %vm235_vm3, %v11909_v35, %v11832_v53  ;;  %v4414_v50 = vmul.f32 %v4397_v26, %v14877_v57  ;;  %v14878_v9 = vld [vmem:[#allocation44_spill] sm:$0xff] }
0x15b5   :  { %v4408_v59 = vmul.f32 %v4402_v47, %v10860_v61  ;;  %v4411_v52 = vmul.f32 %v4393_v63, %v10863_v20  ;;  %4756 = vmatprep.subr.bf16.mxu0 %v4677_v45  ;;  %v4442_v6 = vsel %vm235_vm3, %v14878_v9, %v11638_v41  ;;  %v14879_v63 = vld [vmem:[#allocation63_spill] sm:$0xff]  ;;  %v4455_v35 = vmul.f32 %v4440_v29, %v10908_v14 }
0x15b6   :  { %v14880_v47 = vld [vmem:[#allocation71_spill] sm:$0xff]  ;;  %v4681_v53 = vpack.c.bf16 %v4457_v43, %v4453_v5  ;;  %v4451_v26 = vsel %vm235_vm3, %v11638_v41, %v11782_v13  ;;  %v4445_v41 = vsel %vm235_vm3, %v11636_v3, %v14878_v9  ;;  %v4463_v13 = vmul.f32 %v4442_v6, %v10908_v14 }
0x15b7   :  { %v4676_v48 = vpack.c.bf16 %v4412_v22, %v4408_v59  ;;  %v12116_v45 = vpop.permute.xlu0 %4596  ;;  %v4679_v51 = vpack.c.bf16 %v4415_v44, %v4411_v52  ;;  %v4501_v18 = vmul.f32 %v14880_v47, %v14879_v63  ;;  %v4452_v44 = vmul.f32 %v4449_v38, %v10902_v42  ;;  %v14882_v59 = vld [vmem:[#allocation21_spill] sm:$0xff]  ;;  %v14883_v47 = vld [vmem:[#allocation51_spill] sm:$0xff] }
0x15b8   :  { %v4678_v22 = vpack.c.bf16 %v4414_v50, %v4410_v30  ;;  %v4496_v52 = vsel %vm275_vm4, %v14882_v59, %v14881_v4  ;;  %v4503_v29 = vmul.f32 %v14884_v24, %v14883_v47  ;;  %v4683_v43 = vpack.c.bf16 %v4459_v11, %v4455_v35  ;;  %v14885_v30 = vld [vmem:[#allocation57_spill] sm:$0xff]  ;;  %v14889_v11 = vld [vmem:[#allocation75_spill] sm:$0xff] }
0x15b9   :  { %4757 = vmatpush1.bf16.msra.mxu0 %v4676_v48  ;;  %4797 = vmatprep.subr.bf16.mxu1 %v4679_v51  ;;  %v4500_v5 = vmul.f32 %v14886_v25, %v14885_v30  ;;  %v4680_v38 = vpack.c.bf16 %v4456_v7, %v4452_v44  ;;  %v14887_v48 = vld [vmem:[#allocation37_spill] sm:$0xff]  ;;  %v14888_v51 = vld [vmem:[#allocation58_spill] sm:$0xff]  ;;  %v4685_v9 = vpack.c.bf16 %v4501_v18, %v4461_v32  ;;  %v14890_v25 = vld [vmem:[#allocation23_spill] sm:$0xff] }
0x15ba   :  { %4758 = vmatprep.subr.bf16.mxu0 %v4681_v53  ;;  %4798 = vmatpush1.bf16.msra.mxu1 %v4678_v22  ;;  %v4499_v24 = vsel %vm275_vm4, %v14887_v48, %v14882_v59  ;;  %v4502_v35 = vmul.f32 %v14889_v11, %v14888_v51  ;;  %v4460_v6 = vmul.f32 %v4451_v26, %v10902_v42 }
0x15bb   :  { %v4473_v50 = vpop.permute.xlu0 %4472  ;;  %4799 = vmatprep.subr.bf16.mxu1 %v4683_v43  ;;  %v4509_v7 = vmul.f32 %v4496_v52, %v14879_v63  ;;  %v4462_v44 = vmul.f32 %v4445_v41, %v10899_v16  ;;  %v4687_v59 = vpack.c.bf16 %v4503_v29, %v4463_v13  ;;  %v4493_v18 = vsel %vm275_vm4, %v14881_v4, %v14890_v25  ;;  %v14893_v13 = vld [vmem:[#allocation15_spill] sm:$0xff] }
0x15bc   :  { %v4495_v3 = vsel %vm275_vm4, %v11994_v60, %v4473_v50  ;;  %v4492_v22 = vsel %vm275_vm4, %v4473_v50, %v12001_v46  ;;  %v4508_v32 = vmul.f32 %v4499_v24, %v14885_v30  ;;  %v4684_v26 = vpack.c.bf16 %v4500_v5, %v4460_v6  ;;  %v14895_v6 = vld [vmem:[#allocation48_spill] sm:$0xff] }
0x15bd   :  { %v4505_v53 = vmul.f32 %v4495_v3, %v14879_v63  ;;  %4759 = vmatpush1.bf16.msra.mxu0 %v4680_v38  ;;  %v14891_v52 = vpack.c.bf16 %v11984_v37, %v11981_v28  ;;  %v14892_v38 = vld [vmem:[#allocation40_spill] sm:$0xff]  ;;  %v4686_v50 = vpack.c.bf16 %v4502_v35, %v4462_v44  ;;  %v4530_v28 = vsel %vm315_vm5, %v11941_v1, %v14893_v13 }
0x15be   :  { %4760 = vmatprep.subr.bf16.mxu0 %v4685_v9  ;;  %v4511_v48 = vmul.f32 %v14892_v38, %v14883_v47  ;;  %v4506_v37 = vmul.f32 %v4492_v22, %v14888_v51  ;;  %v14894_v3 = vld [vmem:[#allocation76_spill] sm:$0xff]  ;;  %v14896_v22 = vld [vmem:[#allocation35_spill] sm:$0xff]  ;;  %v14902_v38 = vld [vmem:[#allocation78_spill] sm:$0xff] }
0x15bf   :  { %4800 = vmatpush1.bf16.msra.mxu1 %v14891_v52  ;;  %v4485_v43 = vpop.permute.xlu0 %4484  ;;  %v4689_v41 = vpack.c.bf16 %v4509_v7, %v4505_v53  ;;  %v4532_v9 = vsel %vm315_vm5, %v14894_v3, %v11941_v1  ;;  %v4537_v7 = vmul.f32 %v4530_v28, %v14895_v6  ;;  %v12191_v53 = vpop.permute.xlu1 %4634  ;;  %v14901_v52 = vld [vmem:[#allocation56_spill] sm:$0xff]  ;;  %v4535_v1 = vsel %vm315_vm5, %v11996_v58, %v12029_v49 }
0x15c0   :  { %v4489_v29 = vsel %vm275_vm4, %v12001_v46, %v4485_v43  ;;  %v4498_v4 = vsel %vm275_vm4, %v4485_v43, %v11994_v60  ;;  %4801 = vmatprep.subr.bf16.mxu1 %v4687_v59  ;;  %v4510_v46 = vmul.f32 %v4493_v18, %v14888_v51  ;;  %v14897_v59 = vld [vmem:[#allocation77_spill] sm:$0xff]  ;;  %v14898_v18 = vld [vmem:[#allocation26_spill] sm:$0xff]  ;;  %v4536_v43 = vmul.f32 %v4532_v9, %v14901_v52  ;;  %v14906_v28 = vld [vmem:[#allocation68_spill] sm:$0xff] }
0x15c1   :  { %v4504_v5 = vmul.f32 %v4498_v4, %v14885_v30  ;;  %v4507_v24 = vmul.f32 %v4489_v29, %v14883_v47  ;;  %4761 = vmatpush1.bf16.msra.mxu0 %v4684_v26  ;;  %v4539_v25 = vmul.f32 %v14897_v59, %v14896_v22  ;;  %v14903_v29 = vld [vmem:[#allocation43_spill] sm:$0xff]  ;;  %v14904_v4 = vld [vmem:[#allocation25_spill] sm:$0xff]  ;;  %v14910_v9 = vld [vmem:[#allocation42_spill] sm:$0xff] }
0x15c2   :  { %4762 = vmatprep.subr.bf16.mxu0 %v4689_v41  ;;  %v4690_v44 = vpack.c.bf16 %v4510_v46, %v4506_v37  ;;  %v14905_v13 = vpack.c.bf16 %v14903_v29, %v14904_v4  ;;  %v4697_v37 = vpack.c.bf16 %v4537_v7, %v14906_v28  ;;  %v14908_v46 = vld [vmem:[#allocation16_spill] sm:$0xff]  ;;  %v14913_v7 = vld [vmem:[#allocation45_spill] sm:$0xff] }
0x15c3   :  { %v4688_v11 = vpack.c.bf16 %v4508_v32, %v4504_v5  ;;  %4802 = vmatpush1.bf16.msra.mxu1 %v4686_v50  ;;  %v12184_v35 = vpop.permute.xlu0 %4598  ;;  %v4691_v60 = vpack.c.bf16 %v4511_v48, %v4507_v24  ;;  %v14899_v32 = vld [vmem:[#allocation41_spill] sm:$0xff]  ;;  %v14907_v5 = vld [vmem:[#allocation32_spill] sm:$0xff]  ;;  %v4611_v29 = vpop.permute.xlu1 %4610 }
0x15c4   :  { %v14900_v26 = vpack.c.bf16 %v14898_v18, %v14899_v32  ;;  %v4545_v24 = vmul.f32 %v14907_v5, %v14895_v6  ;;  %v4543_v18 = vmul.f32 %v4535_v1, %v14896_v22  ;;  %v4699_v32 = vpack.c.bf16 %v4539_v25, %v14913_v7  ;;  %v14923_v7 = vld [vmem:[#allocation7_spill] sm:$0xff] }
0x15c5   :  { %4763 = vmatpush1.bf16.msra.mxu0 %v4688_v11  ;;  %4803 = vmatprep.subr.bf16.mxu1 %v4691_v60  ;;  %v14909_v11 = vld [vmem:[#allocation73_spill] sm:$0xff] }
0x15c6   :  { %4764 = vmatprep.subr.bf16.mxu0 %v14900_v26  ;;  %v4538_v60 = vmul.f32 %v14909_v11, %v14908_v46  ;;  %v14914_v26 = vld [vmem:[#allocation18_spill] sm:$0xff] }
0x15c7   :  { %4804 = vmatpush1.bf16.msra.mxu1 %v4690_v44  ;;  %v4519_v41 = vpop.permute.xlu0 %4518  ;;  %v14911_v44 = vld [vmem:[#allocation27_spill] sm:$0xff] }
0x15c8   :  { %v4531_v48 = vsel %vm315_vm5, %v4519_v41, %v14902_v38  ;;  %v4533_v50 = vsel %vm315_vm5, %v12029_v49, %v4519_v41  ;;  %4805 = vmatprep.subr.bf16.mxu1 %v14905_v13  ;;  %v14912_v59 = vpack.c.bf16 %v14910_v9, %v14911_v44  ;;  %v4529_v49 = vsel %vm315_vm5, %v14902_v38, %v11996_v58  ;;  %v14916_v13 = vld [vmem:[#allocation39_spill] sm:$0xff]  ;;  %v14918_v9 = vld [vmem:[#allocation50_spill] sm:$0xff]  ;;  %v14919_v58 = vld [vmem:[#allocation29_spill] sm:$0xff] }
0x15c9   :  { %v4541_v3 = vmul.f32 %v4531_v48, %v14895_v6  ;;  %v4696_v41 = vpack.c.bf16 %v4536_v43, %v14914_v26  ;;  %v4540_v4 = vmul.f32 %v4533_v50, %v14901_v52  ;;  %v14915_v48 = vld [vmem:[#allocation28_spill] sm:$0xff]  ;;  %v4547_v44 = vmul.f32 %v14918_v9, %v14896_v22  ;;  %v14920_v38 = vld [vmem:[#allocation49_spill] sm:$0xff] }
0x15ca   :  { %4765 = vmatpush1.bf16.msra.mxu0 %v14912_v59  ;;  %v14917_v28 = vpack.c.bf16 %v14915_v48, %v14916_v13  ;;  %v4544_v1 = vmul.f32 %v14919_v58, %v14901_v52  ;;  %v4698_v25 = vpack.c.bf16 %v4538_v60, %v14920_v38  ;;  %v4542_v50 = vmul.f32 %v4529_v49, %v14908_v46  ;;  %v14925_v49 = vld [vmem:[#allocation38_spill] sm:$0xff]  ;;  %v14927_v9 = vld [vmem:[#allocation9_spill] sm:$0xff] }
0x15cb   :  { %4766 = vmatprep.subr.bf16.mxu0 %v4697_v37  ;;  %v4637_v5 = vpop.permute.xlu0 %4636  ;;  %v4701_v11 = vpack.c.bf16 %v4545_v24, %v4541_v3  ;;  %v14921_v37 = vld [vmem:[#allocation14_spill] sm:$0xff]  ;;  %v4703_v59 = vpack.c.bf16 %v4547_v44, %v4543_v18  ;;  %v14922_v24 = vld [vmem:[#allocation69_spill] sm:$0xff]  ;;  %v4618_v60 = vsel %vm395_vm6, %v11965_v27, %v12116_v45  ;;  %v4616_v18 = vsel %vm395_vm6, %v12116_v45, %v11988_v2  ;;  %v14928_v44 = vld [vmem:[#allocation8_spill] sm:$0xff] }
0x15cc   :  { %4806 = vmatpush1.bf16.msra.mxu1 %v14917_v28  ;;  %v4614_v43 = vsel %vm395_vm6, %v11988_v2, %v14921_v37  ;;  %v4546_v3 = vmul.f32 %v14922_v24, %v14908_v46  ;;  %v4700_v48 = vpack.c.bf16 %v4544_v1, %v4540_v4  ;;  %v14926_v28 = vld [vmem:[#allocation46_spill] sm:$0xff]  ;;  %v4583_v58 = vsel %vm355_vm7, %v14928_v44, %v14927_v9  ;;  %v4639_v1 = vpop.permute.xlu1 %4638  ;;  %v14929_v45 = vld [vmem:[#allocation52_spill] sm:$0xff] }
0x15cd   :  { %4807 = vmatprep.subr.bf16.mxu1 %v4699_v32  ;;  %v14924_v32 = vld [vmem:[#allocation62_spill] sm:$0xff]  ;;  %v4612_v2 = vsel %vm395_vm6, %v14921_v37, %v11965_v27  ;;  %v4613_v24 = vsel %vm395_vm6, %v11990_v19, %v4611_v29  ;;  %v4619_v27 = vsel %vm395_vm6, %v4611_v29, %v12184_v35  ;;  %v14933_v29 = vld [vmem:[#allocation67_spill] sm:$0xff] }
0x15ce   :  { %4767 = vmatpush1.bf16.msra.mxu0 %v4696_v41  ;;  %v4577_v26 = vsel %vm355_vm7, %v14924_v32, %v14923_v7  ;;  %v4621_v41 = vmul.f32 %v4614_v43, %v14925_v49  ;;  %v4702_v4 = vpack.c.bf16 %v4546_v3, %v4542_v50  ;;  %v4580_v38 = vsel %vm355_vm7, %v14927_v9, %v14924_v32  ;;  %v14931_v3 = vld [vmem:[#allocation36_spill] sm:$0xff] }
0x15cf   :  { %4768 = vmatprep.subr.bf16.mxu0 %v4701_v11  ;;  %v12252_v13 = vpop.permute.xlu0 %4640  ;;  %v4629_v11 = vmul.f32 %v14926_v28, %v14925_v49  ;;  %v4623_v43 = vmul.f32 %v4618_v60, %v14929_v45  ;;  %v4574_v50 = vsel %vm355_vm7, %v14923_v7, %v14928_v44  ;;  %v4620_v32 = vmul.f32 %v4616_v18, %v14931_v3 }
0x15d0   :  { %4808 = vmatpush1.bf16.msra.mxu1 %v4698_v25  ;;  %v4593_v25 = vmul.f32 %v4577_v26, %v10975_v33  ;;  %v14932_v26 = vpack.c.bf16 %v12049_v21, %v12043_v15  ;;  %v4622_v18 = vmul.f32 %v4612_v2, %v14933_v29  ;;  %v4650_v28 = vsel %vm435_vm8, %v4637_v5, %v12252_v13  ;;  %v14936_v2 = vld [vmem:[#allocation65_spill] sm:$0xff] }
0x15d1   :  { %4809 = vmatprep.subr.bf16.mxu1 %v4703_v59  ;;  %v14930_v59 = vpack.c.bf16 %v12019_v34, %v12013_v8  ;;  %v4595_v8 = vmul.f32 %v4583_v58, %v10981_v54  ;;  %v4626_v15 = vmul.f32 %v4613_v24, %v14933_v29  ;;  %v4627_v21 = vmul.f32 %v4619_v27, %v14929_v45  ;;  %v14938_v24 = vld [vmem:[#allocation47_spill] sm:$0xff] }
0x15d2   :  { %4769 = vmatpush1.bf16.msra.mxu0 %v4700_v48  ;;  %v4709_v60 = vpack.c.bf16 %v4621_v41, %v4593_v25  ;;  %v4592_v48 = vmul.f32 %v4580_v38, %v10952_v56  ;;  %v4651_v58 = vsel %vm435_vm8, %v4639_v1, %v11992_v12 }
0x15d3   :  { %4770 = vmatprep.subr.bf16.mxu0 %v14930_v59  ;;  %v4603_v37 = vpop.permute.xlu0 %4602  ;;  %v4711_v41 = vpack.c.bf16 %v4623_v43, %v4595_v8  ;;  %v4628_v59 = vmul.f32 %v14936_v2, %v14931_v3  ;;  %v14940_v8 = vld [vmem:[#allocation59_spill] sm:$0xff] }
0x15d4   :  { %4810 = vmatpush1.bf16.msra.mxu1 %v4702_v4  ;;  %v4615_v34 = vsel %vm395_vm6, %v4603_v37, %v11990_v19  ;;  %v4617_v7 = vsel %vm395_vm6, %v12184_v35, %v4603_v37  ;;  %v14934_v19 = vpack.c.bf16 %v12016_v23, %v12010_v40  ;;  %v4594_v35 = vmul.f32 %v4574_v50, %v10978_v17  ;;  %v4647_v4 = vpop.permute.xlu1 %4646  ;;  %v14937_v50 = vld [vmem:[#allocation66_spill] sm:$0xff] }
0x15d5   :  { %4811 = vmatprep.subr.bf16.mxu1 %v14932_v26  ;;  %v4625_v9 = vmul.f32 %v4615_v34, %v14925_v49  ;;  %v4708_v44 = vpack.c.bf16 %v4620_v32, %v4592_v48  ;;  %v4624_v38 = vmul.f32 %v4617_v7, %v14931_v3  ;;  %v14935_v40 = vpack.c.bf16 %v12046_v39, %v12040_v31  ;;  %v14939_v37 = vld [vmem:[#allocation22_spill] sm:$0xff]  ;;  %v14941_v31 = vld [vmem:[#allocation31_spill] sm:$0xff] }
0x15d6   :  { %4771 = vmatpush1.bf16.msra.mxu0 %v14934_v19  ;;  %v4631_v43 = vmul.f32 %v14937_v50, %v14929_v45  ;;  %v4657_v32 = vmul.f32 %v4650_v28, %v14938_v24  ;;  %v4664_v34 = vmul.f32 %v14940_v8, %v14939_v37  ;;  %v4630_v39 = vmul.f32 %v14941_v31, %v14933_v29  ;;  %v14942_v28 = vld [vmem:[#allocation61_spill] sm:$0xff] }
0x15d7   :  { %4772 = vmatprep.subr.bf16.mxu0 %v4709_v60  ;;  %v4633_v23 = vpop.permute.xlu0 %4632  ;;  %v4713_v25 = vpack.c.bf16 %v4629_v11, %v4625_v9  ;;  %v4710_v7 = vpack.c.bf16 %v4622_v18, %v4594_v35  ;;  %v4653_v11 = vsel %vm435_vm8, %v12191_v53, %v4639_v1  ;;  %v4661_v26 = vmul.f32 %v4651_v58, %v14938_v24 }
0x15d8   :  { %4812 = vmatpush1.bf16.msra.mxu1 %v14935_v40  ;;  %v4652_v27 = vsel %vm435_vm8, %v4633_v23, %v4637_v5  ;;  %v4649_v60 = vsel %vm435_vm8, %v11992_v12, %v4647_v4  ;;  %v4655_v5 = vsel %vm435_vm8, %v4647_v4, %v12191_v53  ;;  %v4715_v48 = vpack.c.bf16 %v4631_v43, %v4627_v21  ;;  %v14944_v4 = vld [vmem:[#allocation24_spill] sm:$0xff] }
0x15d9   :  { %4813 = vmatprep.subr.bf16.mxu1 %v4711_v41  ;;  %v4665_v18 = vmul.f32 %v14942_v28, %v14938_v24  ;;  %v4714_v9 = vpack.c.bf16 %v4630_v39, %v4626_v15  ;;  %v4712_v19 = vpack.c.bf16 %v4628_v59, %v4624_v38  ;;  %v4656_v1 = vmul.f32 %v4652_v27, %v14939_v37  ;;  %v14946_v59 = vld [vmem:[#allocation19_spill] sm:$0xff] }
0x15da   :  { %4773 = vmatpush1.bf16.msra.mxu0 %v4708_v44  ;;  %v4660_v41 = vmul.f32 %v4653_v11, %v14939_v37  ;;  %v4717_v21 = vpack.c.bf16 %v4661_v26, %v4657_v32  ;;  %v14943_v44 = vld [vmem:[#allocation30_spill] sm:$0xff]  ;;  %v4663_v15 = vmul.f32 %v4655_v5, %v14944_v4  ;;  %v4720_v32 = vpack.c.bf16 %v4664_v34, %v4664_v34 }
0x15db   :  { %4774 = vmatprep.subr.bf16.mxu0 %v4713_v25  ;;  %v4645_v35 = vpop.permute.xlu0 %4644  ;;  %v4662_v58 = vmul.f32 %v4649_v60, %v14943_v44  ;;  %v14945_v25 = vld [vmem:[#allocation17_spill] sm:$0xff]  ;;  %v4721_v27 = vpack.c.bf16 %v4665_v18, %v4665_v18  ;;  %v14948_v34 = vmov 0  }
0x15dc   :  { %4814 = vmatpush1.bf16.msra.mxu1 %v4710_v7  ;;  %v4648_v12 = vsel %vm435_vm8, %v12252_v13, %v4645_v35  ;;  %v4654_v53 = vsel %vm435_vm8, %v4645_v35, %v4633_v23  ;;  %v4666_v2 = vmul.f32 %v14945_v25, %v14943_v44  ;;  %v4667_v13 = vmul.f32 %v14946_v59, %v14944_v4  ;;  %v14947_v7 = vld [vmem:[#allocation70_spill] sm:$0xff] }
0x15dd   :  { %4815 = vmatprep.subr.bf16.mxu1 %v4715_v48  ;;  %v4658_v38 = vmul.f32 %v4648_v12, %v14943_v44  ;;  %v4659_v40 = vmul.f32 %v4654_v53, %v14944_v4  ;;  %v4716_v50 = vpack.c.bf16 %v4660_v41, %v4656_v1  ;;  %v4741_v39 = vsel %vm498_vm9, %v4720_v32, 0 }
0x15de   :  { %4775 = vmatpush1.bf16.msra.mxu0 %v4712_v19  ;;  %v4722_v8 = vpack.c.bf16 %v4666_v2, %v4666_v2  ;;  %v4723_v31 = vpack.c.bf16 %v4667_v13, %v4667_v13  ;;  %v8073_v11 = vcombine.low %v14947_v7, %v14947_v7 }
0x15df   :  { %4776 = vmatprep.subr.bf16.mxu0 %v4717_v21  ;;  %v4718_v23 = vpack.c.bf16 %v4662_v58, %v4658_v38  ;;  %v4719_v43 = vpack.c.bf16 %v4663_v15, %v4659_v40 }
0x15e0   :  { %4816 = vmatpush1.bf16.msra.mxu1 %v4714_v9  ;;  %v4747_v26 = vsel %vm498_vm9, %v4722_v8, 0 }
0x15e1   :  { %4817 = vmatprep.subr.bf16.mxu1 %v4719_v43 }
0x15e2   :  { %4777 = vmatpush1.bf16.msra.mxu0 %v4716_v50 }
0x15e3   :  { %8075 = vmatprep.subr.msk.bf16.mxu0 %vm498_vm9, %v4721_v27 }
0x15e4   :  { %4818 = vmatpush1.bf16.msra.mxu1 %v4718_v23 }
0x15e5   :  { %8077 = vmatprep.subr.msk.bf16.mxu1 %vm498_vm9, %v4723_v31 }
0x15e6   :  { %4779 = vmatpush1.bf16.msra.mxu0 %v4741_v39 }
0x15e8   :  { %4820 = vmatpush1.bf16.msra.mxu1 %v4747_v26 }
0x15e9   :  { %4785 = vmatmul.mubr.bf16.vlgmr.msra.gmra.mrb[56].mxu0 %v8073_v11 }
0x15ea   :  { %5040 = vmatprep.mubr.bf16.mxu0 %v14948_v34 }
0x15eb   :  { %4826 = vmatmul.mubr.bf16.vlgmr.msra.gmra.mrb[48].mxu1 %v8073_v11 }
0x15ec   :  { %5081 = vmatprep.mubr.bf16.mxu1 %v14948_v34  ;;  %v4729_v60 = vpop.permute.xlu0 %4728 }
0x16bc   :  { %v4786_v5 = vpop.f32.mrb[56].mxu0 }
0x16bd   :  { %v4787_v48 = vadd.f32 %v4786_v5, %v4729_v60  ;;  %v4788_v28 = vpop.f32.mrb[57].mxu0 }
0x16be   :  { %v4827_v18 = vpop.f32.mrb[48].mxu1  ;;  %v4790_v9 = vpop.f32.mrb[58].mxu0  ;;  %v4789_v58 = vadd.f32 %v4788_v28, %v4729_v60 }
0x16bf   :  { %v12364_v19 = vmax.f32 %v4787_v48, 0.0  ;;  %v4828_v1 = vadd.f32 %v4827_v18, %v4729_v60  ;;  %v4829_v35 = vpop.f32.mrb[49].mxu1  ;;  %v4791_v41 = vpop.f32.mrb[59].mxu0 }
0x16c0   :  { %v4831_v12 = vpop.f32.mrb[50].mxu1  ;;  %v12384_v15 = vmax.f32 %v4789_v58, 0.0  ;;  %v4830_v38 = vadd.f32 %v4829_v35, %v4729_v60 }
0x16c1   :  { %v12366_v53 = vmax.f32 %v4828_v1, 0.0  ;;  %v4832_v21 = vpop.f32.mrb[51].mxu1  ;;  %4838 = vrot.lane.b32.xlu1 %v12364_v19, %s8826_s6 }
0x16c2   :  { %v12394_v40 = vmax.f32 %v4830_v38, 0.0 }
0x16c3   :  { %4858 = vrot.lane.b32.xlu0 %v12366_v53, %s8827_s7 }
0x16c5   :  { %4854 = vrot.lane.b32.xlu1 %v12364_v19, %s8827_s7 }
0x16c7   :  { %4906 = vrot.lane.b32.xlu0 %v12366_v53, %s8830_s10 }
0x16c9   :  { %4870 = vrot.lane.b32.xlu1 %v12364_v19, %s8828_s8 }
0x16cb   :  { %4874 = vrot.lane.b32.xlu0 %v12366_v53, %s8828_s8 }
0x16cd   :  { %4886 = vrot.lane.b32.xlu1 %v12364_v19, %s8829_s9 }
0x16cf   :  { %4918 = vrot.lane.b32.xlu0 %v12364_v19, %s8831_s11 }
0x16d1   :  { %4842 = vrot.lane.b32.xlu1 %v12366_v53, %s8826_s6 }
0x16d3   :  { %4840 = vrot.lane.b32.xlu0 %v12384_v15, %s8826_s6 }
0x16d5   :  { %4902 = vrot.lane.b32.xlu1 %v12364_v19, %s8830_s10 }
0x16d7   :  { %4856 = vrot.lane.b32.xlu0 %v12384_v15, %s8827_s7 }
0x16d9   :  { %4890 = vrot.lane.b32.xlu1 %v12366_v53, %s8829_s9 }
0x16db   :  { %4860 = vrot.lane.b32.xlu0 %v12394_v40, %s8827_s7  ;;  %s8867_s7 = smov 26  }
0x16dc   :  { %s12429_s4 = sld [smem:[%s14371_s0 + %s8867_s7]]  }
0x16dd   :  { %4922 = vrot.lane.b32.xlu1 %v12366_v53, %s8831_s11  ;;  %s12588_s7 = sld [smem:[%s14371_s0 + %s8870_s16]]  }
0x16df   :  { %4872 = vrot.lane.b32.xlu0 %v12384_v15, %s8828_s8 }
0x16e1   :  { %4938 = vrot.lane.b32.xlu1 %v12366_v53, %s8832_s12 }
0x16e2   :  { %v4987_v25 = vld [vmem:[%s12429_s4] sm:$0xff] }
0x16e3   :  { %4888 = vrot.lane.b32.xlu0 %v12384_v15, %s8829_s9 }
0x16e5   :  { %4934 = vrot.lane.b32.xlu1 %v12364_v19, %s8832_s12 }
0x16e7   :  { %4892 = vrot.lane.b32.xlu0 %v12394_v40, %s8829_s9 }
0x16e9   :  { %4844 = vrot.lane.b32.xlu1 %v12394_v40, %s8826_s6 }
0x16eb   :  { %4920 = vrot.lane.b32.xlu0 %v12384_v15, %s8831_s11 }
0x16ed   :  { %4876 = vrot.lane.b32.xlu1 %v12394_v40, %s8828_s8  ;;  %s8868_s8 = smov 28  }
0x16ee   :  { %s12436_s19 = sld [smem:[%s14371_s0 + %s8868_s8]]  }
0x16ef   :  { %4936 = vrot.lane.b32.xlu0 %v12384_v15, %s8832_s12 }
0x16f1   :  { %4904 = vrot.lane.b32.xlu1 %v12384_v15, %s8830_s10 }
0x16f3   :  { %4908 = vrot.lane.b32.xlu0 %v12394_v40, %s8830_s10  ;;  %s8869_s10 = smov 25  }
0x16f4   :  { %v5099_v2 = vld [vmem:[%s12436_s19] sm:$0xff] }
0x16f5   :  { %4950 = vrot.lane.b32.xlu1 %v12364_v19, %s14858_s27 }
0x16f7   :  { %4952 = vrot.lane.b32.xlu0 %v12384_v15, %s14858_s27 }
0x16f9   :  { %4954 = vrot.lane.b32.xlu1 %v12366_v53, %s14858_s27 }
0x16fb   :  { %4924 = vrot.lane.b32.xlu0 %v12394_v40, %s8831_s11 }
0x16fd   :  { %4940 = vrot.lane.b32.xlu1 %v12394_v40, %s8832_s12 }
0x16ff   :  { %4956 = vrot.lane.b32.xlu0 %v12394_v40, %s14858_s27  ;;  %s12549_s27 = sld [smem:[%s14371_s0 + %s8869_s10]]   ;;  %s12608_s0 = smov 1  }
0x1701   :  { %4990 = vperm.xlu1 %8493, %v4987_v25  }
0x1703   :  { %5102 = vperm.xlu0 %8492, %v5099_v2  }
0x1733   :  { %v4839_v59 = vpop.permute.xlu1 %4838 }
0x1735   :  { %v4859_v13 = vpop.permute.xlu0 %4858 }
0x1737   :  { %v4855_v50 = vpop.permute.xlu1 %4854 }
0x1739   :  { %v12448_v23 = vpop.permute.xlu0 %4906 }
0x173b   :  { %v4871_v43 = vpop.permute.xlu1 %4870 }
0x173d   :  { %v4875_v32 = vpop.permute.xlu0 %4874 }
0x173f   :  { %v4887_v27 = vpop.permute.xlu1 %4886 }
0x1741   :  { %v12450_v8 = vpop.permute.xlu0 %4918 }
0x1743   :  { %v4843_v31 = vpop.permute.xlu1 %4842 }
0x1745   :  { %v4841_v39 = vpop.permute.xlu0 %4840 }
0x1746   :  { %v4848_v11 = vsel %vm156_vm1, %v4839_v59, %v4841_v39 }
0x1747   :  { %v12452_v7 = vpop.permute.xlu1 %4902  ;;  %v4851_v5 = vmul.f32 %v4848_v11, %v14875_v36  ;;  %v4847_v36 = vsel %vm156_vm1, %v4841_v39, %v4843_v31 }
0x1749   :  { %v4857_v26 = vpop.permute.xlu0 %4856 }
0x174a   :  { %v4864_v60 = vsel %vm195_vm2, %v4855_v50, %v4857_v26  ;;  %v4863_v21 = vsel %vm195_vm2, %v4857_v26, %v4859_v13 }
0x174b   :  { %v4867_v48 = vmul.f32 %v4864_v60, %v14876_v55  ;;  %v4891_v28 = vpop.permute.xlu1 %4890  ;;  %v4868_v2 = vmul.f32 %v4863_v21, %v14877_v57  ;;  %v4852_v60 = vmul.f32 %v4847_v36, %v10869_v62  ;;  %v14949_v62 = vld [vmem:[#allocation13_spill] sm:$0xff]  ;;  %v14950_v21 = vld [vmem:[#allocation34_spill] sm:$0xff] }
0x174d   :  { %v4861_v18 = vpop.permute.xlu0 %4860  ;;  %v4967_v9 = vpack.c.bf16 %v4867_v48, %v4851_v5  ;;  %v4968_v34 = vpack.c.bf16 %v4868_v2, %v4852_v60 }
0x174e   :  { %v4865_v55 = vsel %vm195_vm2, %v4861_v18, %v4855_v50  ;;  %v4862_v11 = vsel %vm195_vm2, %v4859_v13, %v4861_v18 }
0x174f   :  { %5008 = vmatprep.subr.bf16.mxu0 %v4967_v9  ;;  %v12460_v1 = vpop.permute.xlu1 %4922  ;;  %v4866_v26 = vmul.f32 %v4865_v55, %v10860_v61  ;;  %v4869_v13 = vmul.f32 %v4862_v11, %v10863_v20 }
0x1751   :  { %v4873_v35 = vpop.permute.xlu0 %4872 }
0x1752   :  { %v4880_v5 = vsel %vm235_vm3, %v4871_v43, %v4873_v35 }
0x1753   :  { %v12462_v41 = vpop.permute.xlu1 %4938 }
0x1755   :  { %v4889_v12 = vpop.permute.xlu0 %4888 }
0x1756   :  { %v4896_v38 = vsel %vm275_vm4, %v4887_v27, %v4889_v12  ;;  %v4895_v50 = vsel %vm275_vm4, %v4889_v12, %v4891_v28  ;;  %v4883_v12 = vmul.f32 %v4880_v5, %v10866_v0 }
0x1757   :  { %v12466_v58 = vpop.permute.xlu1 %4934  ;;  %v4899_v48 = vmul.f32 %v4896_v38, %v14879_v63 }
0x1759   :  { %v4893_v25 = vpop.permute.xlu0 %4892  ;;  %v4971_v0 = vpack.c.bf16 %v4899_v48, %v4883_v12 }
0x175a   :  { %v4897_v61 = vsel %vm275_vm4, %v4893_v25, %v4887_v27  ;;  %v4894_v63 = vsel %vm275_vm4, %v4891_v28, %v4893_v25 }
0x175b   :  { %v4845_v39 = vpop.permute.xlu1 %4844  ;;  %v4898_v27 = vmul.f32 %v4897_v61, %v14885_v30  ;;  %v4901_v60 = vmul.f32 %v4894_v63, %v14883_v47 }
0x175c   :  { %v4846_v9 = vsel %vm156_vm1, %v4843_v31, %v4845_v39  ;;  %v4849_v57 = vsel %vm156_vm1, %v4845_v39, %v4839_v59  ;;  %v4879_v31 = vsel %vm235_vm3, %v4873_v35, %v4875_v32  ;;  %v4900_v59 = vmul.f32 %v4895_v50, %v14888_v51 }
0x175d   :  { %v4850_v18 = vmul.f32 %v4849_v57, %v14949_v62  ;;  %v4853_v36 = vmul.f32 %v4846_v9, %v14950_v21  ;;  %v4921_v55 = vpop.permute.xlu0 %4920  ;;  %v4884_v51 = vmul.f32 %v4879_v31, %v10899_v16 }
0x175e   :  { %v4928_v57 = vsel %vm355_vm7, %v12450_v8, %v4921_v55 }
0x175f   :  { %v4966_v20 = vpack.c.bf16 %v4866_v26, %v4850_v18  ;;  %v4877_v38 = vpop.permute.xlu1 %4876  ;;  %v4969_v11 = vpack.c.bf16 %v4869_v13, %v4853_v36  ;;  %v4972_v26 = vpack.c.bf16 %v4900_v59, %v4884_v51 }
0x1760   :  { %v4878_v39 = vsel %vm235_vm3, %v4875_v32, %v4877_v38  ;;  %v4881_v2 = vsel %vm235_vm3, %v4877_v38, %v4871_v43  ;;  %v4927_v43 = vsel %vm355_vm7, %v4921_v55, %v12460_v1 }
0x1761   :  { %v4882_v28 = vmul.f32 %v4881_v2, %v10902_v42  ;;  %v4885_v35 = vmul.f32 %v4878_v39, %v10908_v14  ;;  %v4937_v25 = vpop.permute.xlu0 %4936  ;;  %5009 = vmatpush1.bf16.msra.mxu0 %v4966_v20  ;;  %5049 = vmatprep.subr.bf16.mxu1 %v4969_v11  ;;  %v4931_v13 = vmul.f32 %v4927_v43, %v10975_v33  ;;  %v4986_v2 = vld [vmem:[%s12549_s27] sm:$0xf] }
0x1762   :  { %v4943_v30 = vsel %vm395_vm6, %v4937_v25, %v12462_v41  ;;  %5010 = vmatprep.subr.bf16.mxu0 %v4971_v0  ;;  %5050 = vmatpush1.bf16.msra.mxu1 %v4968_v34  ;;  %v4944_v14 = vsel %vm395_vm6, %v12466_v58, %v4937_v25 }
0x1763   :  { %v4970_v47 = vpack.c.bf16 %v4898_v27, %v4882_v28  ;;  %v4905_v32 = vpop.permute.xlu1 %4904  ;;  %v4973_v42 = vpack.c.bf16 %v4901_v60, %v4885_v35  ;;  %v4947_v5 = vmul.f32 %v4943_v30, %v14925_v49  ;;  %v4946_v33 = vmul.f32 %v4944_v14, %v14931_v3 }
0x1764   :  { %v4911_v16 = vsel %vm315_vm5, %v4905_v32, %v12448_v23  ;;  %v4912_v34 = vsel %vm315_vm5, %v12452_v7, %v4905_v32  ;;  %v14951_v28 = vmov 0  }
0x1765   :  { %v4914_v50 = vmul.f32 %v4912_v34, %v14901_v52  ;;  %v4915_v48 = vmul.f32 %v4911_v16, %v14895_v6  ;;  %v4909_v9 = vpop.permute.xlu0 %4908  ;;  %5011 = vmatpush1.bf16.msra.mxu0 %v4970_v47  ;;  %5051 = vmatprep.subr.bf16.mxu1 %v4973_v42  ;;  %v4979_v12 = vpack.c.bf16 %v4947_v5, %v4931_v13 }
0x1766   :  { %v4910_v61 = vsel %vm315_vm5, %v12448_v23, %v4909_v9  ;;  %v4913_v49 = vsel %vm315_vm5, %v4909_v9, %v12452_v7  ;;  %5052 = vmatpush1.bf16.msra.mxu1 %v4972_v26  ;;  %v4930_v7 = vmul.f32 %v4928_v57, %v10952_v56 }
0x1767   :  { %v4974_v6 = vpack.c.bf16 %v4914_v50, %v12364_v19  ;;  %v4916_v52 = vmul.f32 %v4910_v61, %v14908_v46  ;;  %v4917_v62 = vmul.f32 %v4913_v49, %v14896_v22  ;;  %v4951_v18 = vpop.permute.xlu1 %4950  ;;  %v4975_v21 = vpack.c.bf16 %v4915_v48, %v12384_v15  ;;  %v5094_v48 = vld [vmem:[%s12588_s7] sm:$0xf] }
0x1768   :  { %v4978_v3 = vpack.c.bf16 %v4946_v33, %v4930_v7 }
0x1769   :  { %v4976_v36 = vpack.c.bf16 %v4916_v52, %v12366_v53  ;;  %v4953_v55 = vpop.permute.xlu0 %4952  ;;  %5012 = vmatprep.subr.bf16.mxu0 %v4975_v21  ;;  %v4977_v23 = vpack.c.bf16 %v4917_v62, %v12394_v40 }
0x176a   :  { %v4960_v19 = vsel %vm435_vm8, %v4951_v18, %v4953_v55  ;;  %5013 = vmatpush1.bf16.msra.mxu0 %v4974_v6 }
0x176b   :  { %v4962_v22 = vmul.f32 %v4960_v19, %v14939_v37  ;;  %5053 = vmatprep.subr.bf16.mxu1 %v4977_v23  ;;  %5014 = vmatprep.subr.bf16.mxu0 %v4979_v12  ;;  %v4955_v46 = vpop.permute.xlu1 %4954 }
0x176c   :  { %5054 = vmatpush1.bf16.msra.mxu1 %v4976_v36  ;;  %v4959_v56 = vsel %vm435_vm8, %v4953_v55, %v4955_v46 }
0x176d   :  { %v4982_v53 = vpack.c.bf16 %v4962_v22, %v4962_v22  ;;  %v4963_v15 = vmul.f32 %v4959_v56, %v14938_v24  ;;  %v4925_v40 = vpop.permute.xlu0 %4924 }
0x176e   :  { %v4926_v63 = vsel %vm355_vm7, %v12460_v1, %v4925_v40  ;;  %v4929_v37 = vsel %vm355_vm7, %v4925_v40, %v12450_v8  ;;  %5015 = vmatpush1.bf16.msra.mxu0 %v4978_v3 }
0x176f   :  { %v4983_v31 = vpack.c.bf16 %v4963_v15, %v4963_v15  ;;  %v4941_v59 = vpop.permute.xlu1 %4940  ;;  %v4932_v20 = vmul.f32 %v4926_v63, %v10978_v17  ;;  %v4933_v1 = vmul.f32 %v4929_v37, %v10981_v54  ;;  %v4997_v39 = vsel %vm498_vm9, %v4982_v53, 0 }
0x1770   :  { %v4942_v38 = vsel %vm395_vm6, %v12462_v41, %v4941_v59  ;;  %v4945_v24 = vsel %vm395_vm6, %v4941_v59, %v12466_v58 }
0x1771   :  { %v4948_v11 = vmul.f32 %v4942_v38, %v14933_v29  ;;  %v4949_v8 = vmul.f32 %v4945_v24, %v14929_v45  ;;  %v4957_v27 = vpop.permute.xlu0 %4956  ;;  %8079 = vmatprep.subr.msk.bf16.mxu0 %vm498_vm9, %v4983_v31 }
0x1772   :  { %v4958_v17 = vsel %vm435_vm8, %v4955_v46, %v4957_v27  ;;  %v4961_v41 = vsel %vm435_vm8, %v4957_v27, %v4951_v18  ;;  %5017 = vmatpush1.bf16.msra.mxu0 %v4997_v39 }
0x1773   :  { %v4980_v58 = vpack.c.bf16 %v4948_v11, %v4932_v20  ;;  %v4964_v54 = vmul.f32 %v4958_v17, %v14943_v44  ;;  %v4965_v29 = vmul.f32 %v4961_v41, %v14944_v4  ;;  %v4981_v0 = vpack.c.bf16 %v4949_v8, %v4933_v1 }
0x1775   :  { %v4984_v45 = vpack.c.bf16 %v4964_v54, %v4964_v54  ;;  %v4985_v60 = vpack.c.bf16 %v4965_v29, %v4965_v29  ;;  %8080 = vmatmul.mubr.msk.bf16.vlgmr.msra.gmra.mrb[60].mxu0 %vm494_vm10, %v4986_v2  ;;  %5055 = vmatprep.subr.bf16.mxu1 %v4981_v0 }
0x1776   :  { %5056 = vmatpush1.bf16.msra.mxu1 %v4980_v58  ;;  %5152 = vmatprep.mubr.bf16.mxu0 %v14951_v28 }
0x1777   :  { %8081 = vmatprep.subr.msk.bf16.mxu1 %vm498_vm9, %v4985_v60  ;;  %v5003_v35 = vsel %vm498_vm9, %v4984_v45, 0 }
0x177a   :  { %5058 = vmatpush1.bf16.msra.mxu1 %v5003_v35 }
0x177d   :  { %8082 = vmatmul.mubr.msk.bf16.vlgmr.msra.gmra.mrb[52].mxu1 %vm494_vm10, %v4986_v2 }
0x1780   :  { %v4991_v25 = vpop.permute.xlu1 %4990 }
0x1782   :  { %v5103_v18 = vpop.permute.xlu0 %5102 }
0x1848   :  { %v5042_v44 = vpop.f32.mrb[60].mxu0 }
0x1849   :  { %v5043_v51 = vadd.f32 %v5042_v44, %v4991_v25  ;;  %v5044_v4 = vpop.f32.mrb[61].mxu0 }
0x184a   :  { %v5045_v30 = vadd.f32 %v5044_v4, %v4991_v25  ;;  %v5046_v43 = vpop.f32.mrb[62].mxu0 }
0x184b   :  { %v5090_v47 = vmax.f32 %v5043_v51, 0.0  ;;  %v5047_v32 = vpop.f32.mrb[63].mxu0 }
0x184c   :  { %v5091_v42 = vmax.f32 %v5045_v30, 0.0 }
0x184d   :  { %v5095_v26 = vpack.c.bf16 %v5090_v47, %v5090_v47 }
0x184e   :  { %v5096_v14 = vpack.c.bf16 %v5091_v42, %v5091_v42 }
0x184f   :  { %v5109_v16 = vsel %vm498_vm9, %v5095_v26, 0 }
0x1850   :  { %v5083_v34 = vpop.f32.mrb[52].mxu1  ;;  %8083 = vmatprep.subr.msk.bf16.mxu0 %vm498_vm9, %v5096_v14 }
0x1851   :  { %v5084_v5 = vadd.f32 %v5083_v34, %v4991_v25  ;;  %v5085_v50 = vpop.f32.mrb[53].mxu1  ;;  %5121 = vmatpush1.bf16.msra.mxu0 %v5109_v16 }
0x1852   :  { %v5086_v9 = vadd.f32 %v5085_v50, %v4991_v25  ;;  %v5087_v57 = vpop.f32.mrb[54].mxu1 }
0x1853   :  { %v5092_v13 = vmax.f32 %v5084_v5, 0.0  ;;  %v5088_v61 = vpop.f32.mrb[55].mxu1 }
0x1854   :  { %v5093_v49 = vmax.f32 %v5086_v9, 0.0  ;;  %8084 = vmatmul.mubr.msk.bf16.vlgmr.msra.gmra.mrb[64].mxu0 %vm2570_vm14, %v5094_v48 }
0x1855   :  { %v5097_v6 = vpack.c.bf16 %v5092_v13, %v5092_v13  ;;  %5193 = vmatprep.mubr.bf16.mxu0 %v14951_v28 }
0x1856   :  { %v5098_v52 = vpack.c.bf16 %v5093_v49, %v5093_v49 }
0x1857   :  { %v5115_v62 = vsel %vm498_vm9, %v5097_v6, 0 }
0x1858   :  { %8085 = vmatprep.subr.msk.bf16.mxu0 %vm498_vm9, %v5098_v52 }
0x1859   :  { %5162 = vmatpush1.bf16.msra.mxu0 %v5115_v62 }
0x185c   :  { %8086 = vmatmul.mubr.msk.bf16.vlgmr.msra.gmra.mrb[68].mxu0 %vm2570_vm14, %v5094_v48 }
0x1927   :  { %v5154_v21 = vpop.f32.mrb[64].mxu0 }
0x1928   :  { %v5155_v33 = vadd.f32 %v5154_v21, %v5103_v18   ;;  %v5156_v36 = vpop.f32.mrb[65].mxu0 }
0x1929   :  { %v5157_v55 = vadd.f32 %v5156_v36, %v5103_v18   ;;  %v5158_v23 = vpop.f32.mrb[66].mxu0 }
0x192a   :  { %v5159_v12 = vpop.f32.mrb[67].mxu0 }
0x192b   :  { %v5206_v7 = vcombine.low %v5155_v33, %v5157_v55 }
0x192d   :  { %5210 = vst [vmem:[%s10712_s18] sm:$0x33] %v5206_v7 }
0x192f   :  { %v5195_v19 = vpop.f32.mrb[68].mxu0 }
0x1930   :  { %v5196_v22 = vadd.f32 %v5195_v19, %v5103_v18   ;;  %v5197_v46 = vpop.f32.mrb[69].mxu0 }
0x1931   :  { %v5198_v3 = vadd.f32 %v5197_v46, %v5103_v18   ;;  %v5199_v56 = vpop.f32.mrb[70].mxu0 }
0x1932   :  { %v5200_v53 = vpop.f32.mrb[71].mxu0 }
0x1933   :  { %v5207_v15 = vcombine.low %v5196_v22, %v5198_v3 }
0x1935   :  { %5211 = vst [vmem:[%s10712_s18 + $0x8] sm:$0x33] %v5207_v15 }
0x1936 LB: > { %v5255_v40 = vsub.f32 0.0, %v8820_v33  ;;  %v5257_v63 = vsub.f32 0.0, %v8812_v22  ;;  %v5256_v37 = vsub.f32 0.0, %v8816_v55  ;;  %v5258_v20 = vsub.f32 0.0, %v8808_v3  ;;  %v14952_v58 = vld [vmem:[#allocation6_spill] sm:$0xff]  ;;  %v14954_v0 = vld [vmem:[#allocation11_spill] sm:$0xff]  ;;  %s8824_s0 = sphi %s12608_s0, %s5250_s0   ;;  %v8820_v33 = vphi %v5155_v33, %v7752_v33   ;;  %v8816_v55 = vphi %v5157_v55, %v7754_v55   ;;  %v8812_v22 = vphi %v5196_v22, %v7793_v22   ;;  %v8808_v3 = vphi %v5198_v3, %v7795_v3  }
0x1937   : > { %v14953_v54 = vld [vmem:[#allocation10_spill] sm:$0xff]  ;;  %v5290_v45 = vrot.slane %v14954_v0, %v14952_v58  ;;  %v14955_v60 = vld [vmem:[#allocation55_spill] sm:$0xff]  ;;  %s8871_s6 = smov 17   ;;  %s8872_s9 = smov 16   ;;  %v14565_v14 = vmov 0   ;;  %v14959_v18 = vld [vmem:[#allocation4_spill] sm:$0xff] }
0x1938   : > { %v5259_v31 = vmul.f32 1.442695, %v5255_v40  ;;  %v5263_v59 = vmul.f32 1.442695, %v5257_v63  ;;  %v5261_v38 = vmul.f32 1.442695, %v5256_v37  ;;  %v5282_v29 = vrot.slane %v14953_v54, %v14952_v58  ;;  %5677 = vmatprep.mubr.bf16.mxu0 %v14565_v14  ;;  %5718 = vmatprep.mubr.bf16.mxu1 %v14565_v14 }
0x1939   : > { %v5265_v24 = vmul.f32 1.442695, %v5258_v20  ;;  %v5286_v28 = vrot.slane %v14955_v60, %v14952_v58  ;;  %v14956_v25 = vld [vmem:[#allocation54_spill] sm:$0xff]  ;;  %s8873_s8 = smov 15   ;;  %s8874_s28 = smov 1   ;;  %8683 = vset.pattern.permute.xlu1 %v14565_v14  ;;  %8682 = vset.pattern.permute.xlu0 %v14565_v14  ;;  %v14958_v13 = vld [vmem:[#allocation3_spill] sm:$0xff] }
0x193a   : > { %8770 = vpow2.f32 %v5259_v31  ;;  %v5294_v44 = vrot.slane %v14956_v25, %v14952_v58  ;;  %s8875_s29 = smov 127   ;;  %s14576_s10 = smov 113   ;;  %v5624_v16 = vld [vmem:[%s10794_s23] sm:$0xff]  ;;  %v14961_v33 = vld [vmem:[#allocation5_spill] sm:$0xff]  ;;  %vm8885_vm11 = vmmov 0  }
0x193b   : > { %8772 = vpow2.f32 %v5263_v59  ;;  %s14574_s11 = smov 112   ;;  %s14572_s12 = smov 111   ;;  %v5311_v48 = vld [vmem:[%s8982_s21] ss:$8 sm:$0xf] }
0x193c   : > { %8774 = vpow2.f32 %v5261_v38  ;;  %v8088_v9 = vld [vmem:[%s8982_s21 + $0x1] ss:$8 sm:$0xf]  ;;  %v12713_v61 = vrot.slane %v5311_v48, %v14958_v13  ;;  %v12721_v21 = vrot.slane %v5311_v48, %v14959_v18  ;;  %v12724_v36 = vrot.slane %v5311_v48, %v14961_v33  ;;  %v8089_v54 = vld [vmem:[%s8982_s21 + $0x2] ss:$8 sm:$0xf] }
0x193d   : > { %8776 = vpow2.f32 %v5265_v24  ;;  %v12716_v49 = vrot.slane %v8088_v9, %v14958_v13  ;;  %v12729_v23 = vrot.slane %v8088_v9, %v14959_v18  ;;  %v12732_v12 = vrot.slane %v5311_v48, %v14952_v58  ;;  %v8090_v0 = vld [vmem:[%s8982_s21 + $0x3] ss:$8 sm:$0xf]  ;;  %s8881_s16 = smov 8   ;;  %s8882_s24 = smov 9  }
0x193e   : > { %14960 = vst [vmem:[#allocation79_spill] sm:$0xff] %v12721_v21  ;;  %14962 = vst [vmem:[#allocation80_spill] sm:$0xff] %v12724_v36  ;;  %v12735_v7 = vrot.slane %v8088_v9, %v14952_v58  ;;  %v12742_v3 = vrot.slane %v8088_v9, %v14961_v33  ;;  %v12763_v60 = vrot.slane %v8089_v54, %v14958_v13  ;;  %s8883_s25 = smov 7  }
0x193f   : > { %v12792_v9 = vrot.slane %v8090_v0, %v14961_v33 }
0x1941   : > { %14966 = vst [vmem:[#allocation84_spill] sm:$0xff] %v12792_v9 }
0x1944   : > { %v8771_v1 = vpop.eup %8770 }
0x1945   : > { %v8773_v11 = vpop.eup %8772  ;;  %v5267_v8 = vadd.f32 1.0, %v8771_v1 }
0x1946   : > { %v8775_v27 = vpop.eup %8774  ;;  %v5269_v39 = vadd.f32 1.0, %v8773_v11 }
0x1947   : > { %v8777_v17 = vpop.eup %8776  ;;  %8778 = vrcp.f32 %v5267_v8  ;;  %v5268_v41 = vadd.f32 1.0, %v8775_v27 }
0x1948   : > { %8780 = vrcp.f32 %v5269_v39  ;;  %v5270_v2 = vadd.f32 1.0, %v8777_v17 }
0x1949   : > { %8782 = vrcp.f32 %v5268_v41 }
0x194a   : > { %8784 = vrcp.f32 %v5270_v2 }
0x1951   : > { %v8779_v35 = vpop.eup %8778 }
0x1952   : > { %v8781_v51 = vpop.eup %8780  ;;  %v12627_v30 = vsel %vm5244_vm0, %v5282_v29, %v8779_v35 }
0x1953   : > { %v8783_v43 = vpop.eup %8782  ;;  %5299 = vrot.lane.b32.xlu0 %v12627_v30, %s8871_s6  ;;  %v12633_v47 = vsel %vm5244_vm0, %v5290_v45, %v8781_v51  ;;  %v12774_v51 = vrot.slane %v8089_v54, %v14959_v18 }
0x1954   : > { %v8785_v32 = vpop.eup %8784  ;;  %5303 = vrot.lane.b32.xlu1 %v12633_v47, %s8871_s6  ;;  %v12639_v42 = vsel %vm5244_vm0, %v5286_v28, %v8783_v43  ;;  %v12766_v28 = vrot.slane %v8090_v0, %v14958_v13  ;;  %v12777_v43 = vrot.slane %v8089_v54, %v14961_v33 }
0x1955   : > { %v12643_v26 = vsel %vm5244_vm0, %v5294_v44, %v8785_v32  ;;  %v12771_v44 = vrot.slane %v8089_v54, %v14952_v58 }
0x1956   : > { %14963 = vst [vmem:[#allocation81_spill] sm:$0xff] %v12766_v28 }
0x1957   : > { %5301 = vrot.lane.b32.xlu0 %v12639_v42, %s8871_s6 }
0x1958   : > { %5305 = vrot.lane.b32.xlu1 %v12643_v26, %s8871_s6 }
0x195b   : > { %5337 = vrot.lane.b32.xlu0 %v12627_v30, %s8872_s9 }
0x195c   : > { %5339 = vrot.lane.b32.xlu1 %v12639_v42, %s8872_s9 }
0x195f   : > { %5341 = vrot.lane.b32.xlu0 %v12633_v47, %s8872_s9 }
0x1960   : > { %5343 = vrot.lane.b32.xlu1 %v12643_v26, %s8872_s9 }
0x1963   : > { %5375 = vrot.lane.b32.xlu0 %v12627_v30, %s8873_s8 }
0x1964   : > { %5377 = vrot.lane.b32.xlu1 %v12639_v42, %s8873_s8 }
0x1967   : > { %5379 = vrot.lane.b32.xlu0 %v12633_v47, %s8873_s8 }
0x1968   : > { %5381 = vrot.lane.b32.xlu1 %v12643_v26, %s8873_s8 }
0x196b   : > { %5413 = vrot.lane.b32.xlu0 %v12627_v30, %s8874_s28 }
0x196c   : > { %5415 = vrot.lane.b32.xlu1 %v12639_v42, %s8874_s28 }
0x196f   : > { %5417 = vrot.lane.b32.xlu0 %v12633_v47, %s8874_s28 }
0x1970   : > { %5419 = vrot.lane.b32.xlu1 %v12643_v26, %s8874_s28 }
0x1973   : > { %5451 = vrot.lane.b32.xlu0 %v12627_v30, %s8875_s29 }
0x1974   : > { %5453 = vrot.lane.b32.xlu1 %v12639_v42, %s8875_s29 }
0x1977   : > { %5455 = vrot.lane.b32.xlu0 %v12633_v47, %s8875_s29 }
0x1978   : > { %5457 = vrot.lane.b32.xlu1 %v12643_v26, %s8875_s29 }
0x197b   : > { %5489 = vrot.lane.b32.xlu0 %v12627_v30, %s14576_s10 }
0x197c   : > { %5491 = vrot.lane.b32.xlu1 %v12639_v42, %s14576_s10 }
0x197f   : > { %5493 = vrot.lane.b32.xlu0 %v12633_v47, %s14576_s10 }
0x1980   : > { %5495 = vrot.lane.b32.xlu1 %v12643_v26, %s14576_s10 }
0x1983   : > { %5527 = vrot.lane.b32.xlu0 %v12627_v30, %s14574_s11 }
0x1984   : > { %5529 = vrot.lane.b32.xlu1 %v12639_v42, %s14574_s11 }
0x1987   : > { %5531 = vrot.lane.b32.xlu0 %v12633_v47, %s14574_s11 }
0x1988   : > { %5533 = vrot.lane.b32.xlu1 %v12643_v26, %s14574_s11 }
0x198b   : > { %5565 = vrot.lane.b32.xlu0 %v12627_v30, %s14572_s12 }
0x198c   : > { %5567 = vrot.lane.b32.xlu1 %v12639_v42, %s14572_s12 }
0x198f   : > { %5569 = vrot.lane.b32.xlu0 %v12633_v47, %s14572_s12 }
0x1990   : > { %5571 = vrot.lane.b32.xlu1 %v12643_v26, %s14572_s12 }
0x1993   : > { %5627 = vperm.xlu0 %8682, %v5624_v16   ;;  %v12782_v16 = vrot.slane %v8090_v0, %v14952_v58 }
0x1995   : > { %14964 = vst [vmem:[#allocation82_spill] sm:$0xff] %v12782_v16 }
0x19c5   : > { %v5300_v34 = vpop.permute.xlu0 %5299 }
0x19c6   : > { %v5304_v5 = vpop.permute.xlu1 %5303 }
0x19c9   : > { %v5302_v50 = vpop.permute.xlu0 %5301 }
0x19ca   : > { %v5306_v57 = vpop.permute.xlu1 %5305  ;;  %v5309_v52 = vsel %vm156_vm1, %v5300_v34, %v5302_v50  ;;  %v5308_v19 = vsel %vm156_vm1, %v5302_v50, %v5304_v5 }
0x19cb   : > { %v5334_v22 = vmul.f32 %v12713_v61, %v5309_v52  ;;  %v5310_v56 = vsel %vm156_vm1, %v5306_v57, %v5300_v34  ;;  %v5307_v15 = vsel %vm156_vm1, %v5304_v5, %v5306_v57  ;;  %v5335_v20 = vmul.f32 %v12732_v12, %v5308_v19 }
0x19cc   : > { %v5333_v24 = vmul.f32 %v12721_v21, %v5310_v56  ;;  %v5336_v11 = vmul.f32 %v12724_v36, %v5307_v15  ;;  %v12785_v34 = vrot.slane %v8090_v0, %v14959_v18  ;;  %v8091_v15 = vld [vmem:[%s8982_s21 + $0x5] ss:$8 sm:$0xf] }
0x19cd   : > { %v5338_v6 = vpop.permute.xlu0 %5337 }
0x19ce   : > { %v5340_v62 = vpop.permute.xlu1 %5339  ;;  %14965 = vst [vmem:[#allocation83_spill] sm:$0xff] %v12785_v34 }
0x19cf   : > { %v5347_v55 = vsel %vm195_vm2, %v5338_v6, %v5340_v62 }
0x19d0   : > { %v5372_v46 = vmul.f32 %v12716_v49, %v5347_v55 }
0x19d1   : > { %v5342_v53 = vpop.permute.xlu0 %5341 }
0x19d2   : > { %v5346_v40 = vsel %vm195_vm2, %v5340_v62, %v5342_v53  ;;  %v5344_v63 = vpop.permute.xlu1 %5343  ;;  %v5604_v37 = vpack.c.bf16 %v5372_v46, %v5334_v22 }
0x19d3   : > { %v5348_v31 = vsel %vm195_vm2, %v5344_v63, %v5338_v6  ;;  %v5345_v59 = vsel %vm195_vm2, %v5342_v53, %v5344_v63  ;;  %v5373_v38 = vmul.f32 %v12735_v7, %v5346_v40 }
0x19d4   : > { %5645 = vmatprep.subr.bf16.mxu0 %v5604_v37  ;;  %v5371_v1 = vmul.f32 %v12729_v23, %v5348_v31  ;;  %v5374_v8 = vmul.f32 %v12742_v3, %v5345_v59 }
0x19d5   : > { %v5376_v27 = vpop.permute.xlu0 %5375  ;;  %v5605_v39 = vpack.c.bf16 %v5373_v38, %v5335_v20  ;;  %v12812_v38 = vrot.slane %v8091_v15, %v14959_v18 }
0x19d6   : > { %v5378_v17 = vpop.permute.xlu1 %5377  ;;  %v5603_v41 = vpack.c.bf16 %v5371_v1, %v5333_v24  ;;  %v5606_v2 = vpack.c.bf16 %v5374_v8, %v5336_v11 }
0x19d7   : > { %v5385_v35 = vsel %vm235_vm3, %v5376_v27, %v5378_v17  ;;  %14967 = vst [vmem:[#allocation85_spill] sm:$0xff] %v12812_v38 }
0x19d8   : > { %5646 = vmatpush1.bf16.msra.mxu0 %v5603_v41  ;;  %5686 = vmatprep.subr.bf16.mxu1 %v5606_v2  ;;  %v5410_v5 = vmul.f32 %v12763_v60, %v5385_v35 }
0x19d9   : > { %5687 = vmatpush1.bf16.msra.mxu1 %v5605_v39  ;;  %v5380_v29 = vpop.permute.xlu0 %5379  ;;  %v12820_v39 = vrot.slane %v8091_v15, %v14952_v58 }
0x19da   : > { %v5382_v45 = vpop.permute.xlu1 %5381  ;;  %v5384_v50 = vsel %vm235_vm3, %v5378_v17, %v5380_v29  ;;  %v12823_v17 = vrot.slane %v8091_v15, %v14961_v33 }
0x19db   : > { %v5383_v57 = vsel %vm235_vm3, %v5380_v29, %v5382_v45  ;;  %v5386_v6 = vsel %vm235_vm3, %v5382_v45, %v5376_v27  ;;  %v5411_v22 = vmul.f32 %v12771_v44, %v5384_v50  ;;  %v12817_v27 = vrot.slane %v8091_v15, %v14958_v13  ;;  %14969 = vst [vmem:[#allocation87_spill] sm:$0xff] %v12820_v39 }
0x19dc   : > { %v5409_v40 = vmul.f32 %v12774_v51, %v5386_v6  ;;  %v5412_v63 = vmul.f32 %v12777_v43, %v5383_v57  ;;  %14970 = vst [vmem:[#allocation88_spill] sm:$0xff] %v12823_v17 }
0x19dd   : > { %v5414_v25 = vpop.permute.xlu0 %5413  ;;  %14968 = vst [vmem:[#allocation86_spill] sm:$0xff] %v12817_v27 }
0x19de   : > { %v5416_v4 = vpop.permute.xlu1 %5415 }
0x19df   : > { %v5423_v32 = vsel %vm275_vm4, %v5414_v25, %v5416_v4 }
0x19e0   : > { %v5448_v48 = vmul.f32 %v12766_v28, %v5423_v32 }
0x19e1   : > { %v5418_v52 = vpop.permute.xlu0 %5417 }
0x19e2   : > { %v5422_v62 = vsel %vm275_vm4, %v5416_v4, %v5418_v52  ;;  %v5420_v55 = vpop.permute.xlu1 %5419  ;;  %v5608_v19 = vpack.c.bf16 %v5448_v48, %v5410_v5 }
0x19e3   : > { %v5449_v46 = vmul.f32 %v12782_v16, %v5422_v62  ;;  %v5421_v56 = vsel %vm275_vm4, %v5418_v52, %v5420_v55  ;;  %v5424_v53 = vsel %vm275_vm4, %v5420_v55, %v5414_v25  ;;  %v8092_v55 = vld [vmem:[%s8982_s21 + $0x6] ss:$8 sm:$0xf] }
0x19e4   : > { %v5447_v37 = vmul.f32 %v12785_v34, %v5424_v53  ;;  %v5450_v31 = vmul.f32 %v12792_v9, %v5421_v56  ;;  %5647 = vmatprep.subr.bf16.mxu0 %v5608_v19  ;;  %v8093_v19 = vld [vmem:[%s8982_s21 + $0x7] ss:$8 sm:$0xf]  ;;  %v12853_v56 = vrot.slane %v8092_v55, %v14952_v58 }
0x19e5   : > { %v5452_v59 = vpop.permute.xlu0 %5451  ;;  %v5609_v20 = vpack.c.bf16 %v5449_v46, %v5411_v22  ;;  %v12842_v46 = vrot.slane %v8092_v55, %v14959_v18  ;;  %v12858_v15 = vrot.slane %v8093_v19, %v14958_v13 }
0x19e6   : > { %v5454_v24 = vpop.permute.xlu1 %5453  ;;  %v5607_v1 = vpack.c.bf16 %v5447_v37, %v5409_v40  ;;  %v5610_v11 = vpack.c.bf16 %v5450_v31, %v5412_v63  ;;  %v8094_v40 = vld [vmem:[%s8982_s21 + $0x20] ss:$8 sm:$0xf]  ;;  %v12864_v37 = vrot.slane %v8092_v55, %v14961_v33  ;;  %v12867_v31 = vrot.slane %v8093_v19, %v14952_v58 }
0x19e7   : > { %v5461_v8 = vsel %vm315_vm5, %v5452_v59, %v5454_v24  ;;  %14972 = vst [vmem:[#allocation90_spill] sm:$0xff] %v12858_v15 }
0x19e8   : > { %5648 = vmatpush1.bf16.msra.mxu0 %v5607_v1  ;;  %5688 = vmatprep.subr.bf16.mxu1 %v5610_v11  ;;  %v5485_v2 = vmul.f32 %v12812_v38, %v5461_v8  ;;  %14973 = vst [vmem:[#allocation91_spill] sm:$0xff] %v12867_v31 }
0x19e9   : > { %5689 = vmatpush1.bf16.msra.mxu1 %v5609_v20  ;;  %v5456_v41 = vpop.permute.xlu0 %5455 }
0x19ea   : > { %v5460_v54 = vsel %vm315_vm5, %v5454_v24, %v5456_v41  ;;  %v5458_v29 = vpop.permute.xlu1 %5457  ;;  %v5611_v57 = vpack.c.bf16 %v5485_v2, %v12627_v30  ;;  %v12848_v30 = vrot.slane %v8093_v19, %v14959_v18 }
0x19eb   : > { %v5486_v0 = vmul.f32 %v12817_v27, %v5460_v54  ;;  %v5459_v45 = vsel %vm315_vm5, %v5456_v41, %v5458_v29  ;;  %v5462_v35 = vsel %vm315_vm5, %v5458_v29, %v5452_v59  ;;  %v12870_v59 = vrot.slane %v8093_v19, %v14961_v33 }
0x19ec   : > { %v5487_v25 = vmul.f32 %v12820_v39, %v5459_v45  ;;  %v5488_v4 = vmul.f32 %v12823_v17, %v5462_v35  ;;  %14971 = vst [vmem:[#allocation89_spill] sm:$0xff] %v12848_v30  ;;  %v12881_v54 = vrot.slane %v8094_v40, %v14959_v18  ;;  %v12899_v19 = vrot.slane %v8094_v40, %v14961_v33 }
0x19ed   : > { %v5490_v32 = vpop.permute.xlu0 %5489  ;;  %v5612_v5 = vpack.c.bf16 %v5486_v0, %v12639_v42  ;;  %v12845_v42 = vrot.slane %v8092_v55, %v14958_v13  ;;  %14974 = vst [vmem:[#allocation92_spill] sm:$0xff] %v12870_v59  ;;  %v12896_v55 = vrot.slane %v8094_v40, %v14958_v13 }
0x19ee   : > { %v5492_v50 = vpop.permute.xlu1 %5491  ;;  %v5614_v48 = vpack.c.bf16 %v5488_v4, %v12643_v26  ;;  %v5613_v6 = vpack.c.bf16 %v5487_v25, %v12633_v47  ;;  %14975 = vst [vmem:[#allocation93_spill] sm:$0xff] %v12881_v54  ;;  %14977 = vst [vmem:[#allocation95_spill] sm:$0xff] %v12899_v19 }
0x19ef   : > { %5649 = vmatprep.subr.bf16.mxu0 %v5612_v5  ;;  %v5499_v26 = vsel %vm355_vm7, %v5490_v32, %v5492_v50  ;;  %14976 = vst [vmem:[#allocation94_spill] sm:$0xff] %v12896_v55 }
0x19f0   : > { %5690 = vmatprep.subr.bf16.mxu1 %v5614_v48  ;;  %5650 = vmatpush1.bf16.msra.mxu0 %v5611_v57  ;;  %v5523_v11 = vmul.f32 %v12842_v46, %v5499_v26 }
0x19f1   : > { %5691 = vmatpush1.bf16.msra.mxu1 %v5613_v6  ;;  %v5494_v52 = vpop.permute.xlu0 %5493 }
0x19f2   : > { %v5496_v62 = vpop.permute.xlu1 %5495  ;;  %v5498_v63 = vsel %vm355_vm7, %v5492_v50, %v5494_v52 }
0x19f3   : > { %v5497_v20 = vsel %vm355_vm7, %v5494_v52, %v5496_v62  ;;  %v5500_v24 = vsel %vm355_vm7, %v5496_v62, %v5490_v32  ;;  %v5524_v29 = vmul.f32 %v12845_v42, %v5498_v63 }
0x19f4   : > { %v5525_v25 = vmul.f32 %v12853_v56, %v5497_v20  ;;  %v5526_v4 = vmul.f32 %v12864_v37, %v5500_v24 }
0x19f5   : > { %v5528_v22 = vpop.permute.xlu0 %5527 }
0x19f6   : > { %v5530_v47 = vpop.permute.xlu1 %5529 }
0x19f7   : > { %v5537_v53 = vsel %vm395_vm6, %v5528_v22, %v5530_v47 }
0x19f8   : > { %v5561_v8 = vmul.f32 %v12848_v30, %v5537_v53 }
0x19f9   : > { %v5532_v1 = vpop.permute.xlu0 %5531 }
0x19fa   : > { %v5536_v41 = vsel %vm395_vm6, %v5530_v47, %v5532_v1  ;;  %v5534_v2 = vpop.permute.xlu1 %5533  ;;  %v5615_v6 = vpack.c.bf16 %v5561_v8, %v5523_v11  ;;  %v12903_v47 = vrot.slane %v8094_v40, %v14952_v58 }
0x19fb   : > { %v5562_v0 = vmul.f32 %v12858_v15, %v5536_v41  ;;  %v5535_v45 = vsel %vm395_vm6, %v5532_v1, %v5534_v2  ;;  %v5538_v35 = vsel %vm395_vm6, %v5534_v2, %v5528_v22 }
0x19fc   : > { %v5563_v32 = vmul.f32 %v12867_v31, %v5535_v45  ;;  %v5564_v5 = vmul.f32 %v12870_v59, %v5538_v35  ;;  %14978 = vst [vmem:[#allocation96_spill] sm:$0xff] %v12903_v47 }
0x19fd   : > { %v5566_v18 = vpop.permute.xlu0 %5565  ;;  %v5616_v50 = vpack.c.bf16 %v5562_v0, %v5524_v29  ;;  %v5623_v29 = vld [vmem:[%s11046_s30] sm:$0xf] }
0x19fe   : > { %v5568_v48 = vpop.permute.xlu1 %5567  ;;  %v5618_v57 = vpack.c.bf16 %v5564_v5, %v5526_v4  ;;  %v5617_v52 = vpack.c.bf16 %v5563_v32, %v5525_v25 }
0x19ff   : > { %v5575_v62 = vsel %vm435_vm8, %v5566_v18, %v5568_v48  ;;  %5651 = vmatprep.subr.bf16.mxu0 %v5616_v50 }
0x1a00   : > { %5692 = vmatprep.subr.bf16.mxu1 %v5618_v57  ;;  %5652 = vmatpush1.bf16.msra.mxu0 %v5615_v6  ;;  %v5599_v22 = vmul.f32 %v12881_v54, %v5575_v62 }
0x1a01   : > { %5693 = vmatpush1.bf16.msra.mxu1 %v5617_v52  ;;  %v5570_v26 = vpop.permute.xlu0 %5569 }
0x1a02   : > { %v5574_v53 = vsel %vm435_vm8, %v5568_v48, %v5570_v26  ;;  %v5572_v63 = vpop.permute.xlu1 %5571  ;;  %v5619_v24 = vpack.c.bf16 %v5599_v22, %v5599_v22 }
0x1a03   : > { %v5573_v13 = vsel %vm435_vm8, %v5570_v26, %v5572_v63  ;;  %v5576_v20 = vsel %vm435_vm8, %v5572_v63, %v5566_v18  ;;  %v5600_v33 = vmul.f32 %v12896_v55, %v5574_v53  ;;  %v5880_v63 = vld [vmem:[%s11135_s5] sm:$0xff] }
0x1a04   : > { %v5602_v1 = vmul.f32 %v12899_v19, %v5576_v20  ;;  %v5601_v58 = vmul.f32 %v12903_v47, %v5573_v13  ;;  %v5634_v41 = vsel %vm498_vm9, %v5619_v24, 0 }
0x1a05   : > { %v5620_v40 = vpack.c.bf16 %v5600_v33, %v5600_v33 }
0x1a06   : > { %v5622_v11 = vpack.c.bf16 %v5602_v1, %v5602_v1  ;;  %v5621_v8 = vpack.c.bf16 %v5601_v58, %v5601_v58 }
0x1a07   : > { %8095 = vmatprep.subr.msk.bf16.mxu0 %vm498_vm9, %v5620_v40 }
0x1a08   : > { %8097 = vmatprep.subr.msk.bf16.mxu1 %vm498_vm9, %v5622_v11  ;;  %5654 = vmatpush1.bf16.msra.mxu0 %v5634_v41  ;;  %v5640_v2 = vsel %vm498_vm9, %v5621_v8, 0 }
0x1a09   : > { %5695 = vmatpush1.bf16.msra.mxu1 %v5640_v2 }
0x1a0b   : > { %8096 = vmatmul.mubr.msk.bf16.vlgmr.msra.gmra.mrb[0].mxu0 %vm494_vm10, %v5623_v29 }
0x1a0c   : > { %8098 = vmatmul.mubr.msk.bf16.vlgmr.msra.gmra.mrb[0].mxu1 %vm494_vm10, %v5623_v29  ;;  %5933 = vmatprep.mubr.bf16.mxu0 %v14565_v14 }
0x1a0d   : > { %5974 = vmatprep.mubr.bf16.mxu1 %v14565_v14 }
0x1a12   : > { %v5628_v0 = vpop.permute.xlu0 %5627 }
0x1ade   : > { %v5679_v45 = vpop.f32.mrb[0].mxu0 }
0x1adf   : > { %v5680_v35 = vadd.f32 %v5679_v45, %v5628_v0  ;;  %v5720_v25 = vpop.f32.mrb[0].mxu1  ;;  %v5681_v4 = vpop.f32.mrb[1].mxu0 }
0x1ae0   : > { %v5721_v32 = vadd.f32 %v5720_v25, %v5628_v0  ;;  %v5722_v5 = vpop.f32.mrb[1].mxu1  ;;  %v5683_v18 = vpop.f32.mrb[2].mxu0  ;;  %v5682_v48 = vadd.f32 %v5681_v4, %v5628_v0 }
0x1ae1   : > { %v12923_v50 = vmax.f32 %v5680_v35, 0.0  ;;  %v5684_v57 = vpop.f32.mrb[3].mxu0  ;;  %v5724_v6 = vpop.f32.mrb[2].mxu1  ;;  %v5723_v26 = vadd.f32 %v5722_v5, %v5628_v0 }
0x1ae2   : > { %v12925_v52 = vmax.f32 %v5721_v32, 0.0  ;;  %v5725_v62 = vpop.f32.mrb[3].mxu1  ;;  %v12931_v22 = vmax.f32 %v5682_v48, 0.0 }
0x1ae3   : > { %5731 = vrot.lane.b32.xlu1 %v12923_v50, %s8871_s6  ;;  %v12937_v53 = vmax.f32 %v5723_v26, 0.0 }
0x1ae4   : > { %5735 = vrot.lane.b32.xlu0 %v12925_v52, %s8871_s6 }
0x1ae7   : > { %5733 = vrot.lane.b32.xlu1 %v12931_v22, %s8871_s6 }
0x1ae8   : > { %5747 = vrot.lane.b32.xlu0 %v12923_v50, %s8872_s9 }
0x1aeb   : > { %5737 = vrot.lane.b32.xlu1 %v12937_v53, %s8871_s6 }
0x1aec   : > { %5751 = vrot.lane.b32.xlu0 %v12925_v52, %s8872_s9 }
0x1aef   : > { %5749 = vrot.lane.b32.xlu1 %v12931_v22, %s8872_s9 }
0x1af0   : > { %5763 = vrot.lane.b32.xlu0 %v12923_v50, %s8873_s8 }
0x1af3   : > { %5753 = vrot.lane.b32.xlu1 %v12937_v53, %s8872_s9 }
0x1af4   : > { %5767 = vrot.lane.b32.xlu0 %v12925_v52, %s8873_s8 }
0x1af7   : > { %5765 = vrot.lane.b32.xlu1 %v12931_v22, %s8873_s8 }
0x1af8   : > { %5779 = vrot.lane.b32.xlu0 %v12923_v50, %s8874_s28 }
0x1afb   : > { %5769 = vrot.lane.b32.xlu1 %v12937_v53, %s8873_s8 }
0x1afc   : > { %5783 = vrot.lane.b32.xlu0 %v12925_v52, %s8874_s28 }
0x1aff   : > { %5781 = vrot.lane.b32.xlu1 %v12931_v22, %s8874_s28 }
0x1b00   : > { %5795 = vrot.lane.b32.xlu0 %v12923_v50, %s8875_s29 }
0x1b03   : > { %5785 = vrot.lane.b32.xlu1 %v12937_v53, %s8874_s28 }
0x1b04   : > { %5799 = vrot.lane.b32.xlu0 %v12925_v52, %s8875_s29 }
0x1b07   : > { %5797 = vrot.lane.b32.xlu1 %v12931_v22, %s8875_s29 }
0x1b08   : > { %5811 = vrot.lane.b32.xlu0 %v12923_v50, %s14576_s10 }
0x1b0b   : > { %5801 = vrot.lane.b32.xlu1 %v12937_v53, %s8875_s29 }
0x1b0c   : > { %5815 = vrot.lane.b32.xlu0 %v12925_v52, %s14576_s10 }
0x1b0f   : > { %5813 = vrot.lane.b32.xlu1 %v12931_v22, %s14576_s10 }
0x1b10   : > { %5827 = vrot.lane.b32.xlu0 %v12923_v50, %s14574_s11 }
0x1b13   : > { %5817 = vrot.lane.b32.xlu1 %v12937_v53, %s14576_s10  ;;  %s8887_s10 = smov 120  }
0x1b14   : > { %5831 = vrot.lane.b32.xlu0 %v12925_v52, %s14574_s11 }
0x1b17   : > { %5829 = vrot.lane.b32.xlu1 %v12931_v22, %s14574_s11 }
0x1b18   : > { %5843 = vrot.lane.b32.xlu0 %v12923_v50, %s14572_s12 }
0x1b1b   : > { %5833 = vrot.lane.b32.xlu1 %v12937_v53, %s14574_s11 }
0x1b1c   : > { %5847 = vrot.lane.b32.xlu0 %v12925_v52, %s14572_s12 }
0x1b1f   : > { %5845 = vrot.lane.b32.xlu1 %v12931_v22, %s14572_s12 }
0x1b20   : > { %5883 = vperm.xlu0 %8682, %v5880_v63  }
0x1b23   : > { %5849 = vrot.lane.b32.xlu1 %v12937_v53, %s14572_s12 }
0x1b55   : > { %v5732_v13 = vpop.permute.xlu1 %5731 }
0x1b56   : > { %v5736_v20 = vpop.permute.xlu0 %5735 }
0x1b59   : > { %v5734_v33 = vpop.permute.xlu1 %5733 }
0x1b5a   : > { %v5748_v24 = vpop.permute.xlu0 %5747  ;;  %v5741_v40 = vsel %vm156_vm1, %v5732_v13, %v5734_v33  ;;  %v5740_v25 = vsel %vm156_vm1, %v5734_v33, %v5736_v20 }
0x1b5b   : > { %v5744_v2 = vmul.f32 %v5741_v40, %v12713_v61 }
0x1b5d   : > { %v5738_v1 = vpop.permute.xlu1 %5737 }
0x1b5e   : > { %v5752_v58 = vpop.permute.xlu0 %5751  ;;  %v5739_v45 = vsel %vm156_vm1, %v5736_v20, %v5738_v1  ;;  %v5742_v35 = vsel %vm156_vm1, %v5738_v1, %v5732_v13  ;;  %v5745_v13 = vmul.f32 %v5740_v25, %v12732_v12 }
0x1b5f   : > { %v5743_v6 = vmul.f32 %v5742_v35, %v12721_v21  ;;  %v5746_v62 = vmul.f32 %v5739_v45, %v12724_v36 }
0x1b61   : > { %v5750_v11 = vpop.permute.xlu1 %5749 }
0x1b62   : > { %v5764_v8 = vpop.permute.xlu0 %5763  ;;  %v5757_v41 = vsel %vm195_vm2, %v5748_v24, %v5750_v11  ;;  %v5756_v29 = vsel %vm195_vm2, %v5750_v11, %v5752_v58 }
0x1b63   : > { %v5760_v0 = vmul.f32 %v5757_v41, %v12716_v49  ;;  %v5761_v5 = vmul.f32 %v5756_v29, %v12735_v7 }
0x1b65   : > { %v5754_v4 = vpop.permute.xlu1 %5753  ;;  %v5860_v32 = vpack.c.bf16 %v5760_v0, %v5744_v2  ;;  %v5861_v40 = vpack.c.bf16 %v5761_v5, %v5745_v13 }
0x1b66   : > { %v5768_v18 = vpop.permute.xlu0 %5767  ;;  %v5755_v48 = vsel %vm195_vm2, %v5752_v58, %v5754_v4  ;;  %v5758_v57 = vsel %vm195_vm2, %v5754_v4, %v5748_v24 }
0x1b67   : > { %v5759_v26 = vmul.f32 %v5758_v57, %v12729_v23  ;;  %v5762_v63 = vmul.f32 %v5755_v48, %v12742_v3  ;;  %5901 = vmatprep.subr.bf16.mxu0 %v5860_v32 }
0x1b69   : > { %v5859_v20 = vpack.c.bf16 %v5759_v26, %v5743_v6  ;;  %v5766_v33 = vpop.permute.xlu1 %5765  ;;  %v5862_v1 = vpack.c.bf16 %v5762_v63, %v5746_v62 }
0x1b6a   : > { %v5780_v11 = vpop.permute.xlu0 %5779  ;;  %v5773_v41 = vsel %vm235_vm3, %v5764_v8, %v5766_v33  ;;  %v5772_v5 = vsel %vm235_vm3, %v5766_v33, %v5768_v18 }
0x1b6b   : > { %5902 = vmatpush1.bf16.msra.mxu0 %v5859_v20  ;;  %5942 = vmatprep.subr.bf16.mxu1 %v5862_v1  ;;  %v5776_v45 = vmul.f32 %v5773_v41, %v12763_v60 }
0x1b6c   : > { %5943 = vmatpush1.bf16.msra.mxu1 %v5861_v40 }
0x1b6d   : > { %v5770_v24 = vpop.permute.xlu1 %5769 }
0x1b6e   : > { %v5784_v58 = vpop.permute.xlu0 %5783  ;;  %v5771_v4 = vsel %vm235_vm3, %v5768_v18, %v5770_v24  ;;  %v5774_v32 = vsel %vm235_vm3, %v5770_v24, %v5764_v8  ;;  %v5777_v18 = vmul.f32 %v5772_v5, %v12771_v44 }
0x1b6f   : > { %v5775_v13 = vmul.f32 %v5774_v32, %v12774_v51  ;;  %v5778_v20 = vmul.f32 %v5771_v4, %v12777_v43 }
0x1b71   : > { %v5782_v2 = vpop.permute.xlu1 %5781 }
0x1b72   : > { %v5796_v29 = vpop.permute.xlu0 %5795  ;;  %v5789_v0 = vsel %vm275_vm4, %v5780_v11, %v5782_v2  ;;  %v5788_v35 = vsel %vm275_vm4, %v5782_v2, %v5784_v58 }
0x1b73   : > { %v5792_v25 = vmul.f32 %v5789_v0, %v12766_v28  ;;  %v5793_v6 = vmul.f32 %v5788_v35, %v12782_v16 }
0x1b75   : > { %v5786_v48 = vpop.permute.xlu1 %5785  ;;  %v5864_v57 = vpack.c.bf16 %v5792_v25, %v5776_v45  ;;  %v5865_v41 = vpack.c.bf16 %v5793_v6, %v5777_v18 }
0x1b76   : > { %v5800_v62 = vpop.permute.xlu0 %5799  ;;  %v5787_v26 = vsel %vm275_vm4, %v5784_v58, %v5786_v48  ;;  %v5790_v63 = vsel %vm275_vm4, %v5786_v48, %v5780_v11 }
0x1b77   : > { %v5791_v8 = vmul.f32 %v5790_v63, %v12785_v34  ;;  %v5794_v1 = vmul.f32 %v5787_v26, %v12792_v9  ;;  %5903 = vmatprep.subr.bf16.mxu0 %v5864_v57 }
0x1b79   : > { %v5863_v33 = vpack.c.bf16 %v5791_v8, %v5775_v13  ;;  %v5798_v40 = vpop.permute.xlu1 %5797  ;;  %v5866_v24 = vpack.c.bf16 %v5794_v1, %v5778_v20 }
0x1b7a   : > { %v5812_v2 = vpop.permute.xlu0 %5811  ;;  %v5804_v58 = vsel %vm315_vm5, %v5798_v40, %v5800_v62  ;;  %v5805_v11 = vsel %vm315_vm5, %v5796_v29, %v5798_v40 }
0x1b7b   : > { %v5807_v0 = vmul.f32 %v5805_v11, %v12812_v38  ;;  %v5808_v45 = vmul.f32 %v5804_v58, %v12817_v27  ;;  %5904 = vmatpush1.bf16.msra.mxu0 %v5863_v33  ;;  %5944 = vmatprep.subr.bf16.mxu1 %v5866_v24 }
0x1b7c   : > { %5945 = vmatpush1.bf16.msra.mxu1 %v5865_v41 }
0x1b7d   : > { %v5867_v35 = vpack.c.bf16 %v5807_v0, %v12923_v50  ;;  %v5802_v25 = vpop.permute.xlu1 %5801  ;;  %v5868_v4 = vpack.c.bf16 %v5808_v45, %v12931_v22 }
0x1b7e   : > { %v5816_v32 = vpop.permute.xlu0 %5815  ;;  %v5803_v5 = vsel %vm315_vm5, %v5800_v62, %v5802_v25  ;;  %v5806_v48 = vsel %vm315_vm5, %v5802_v25, %v5796_v29 }
0x1b7f   : > { %v5809_v57 = vmul.f32 %v5803_v5, %v12820_v39  ;;  %v5810_v6 = vmul.f32 %v5806_v48, %v12823_v17  ;;  %5905 = vmatprep.subr.bf16.mxu0 %v5868_v4 }
0x1b80   : > { %5906 = vmatpush1.bf16.msra.mxu0 %v5867_v35 }
0x1b81   : > { %v5869_v26 = vpack.c.bf16 %v5809_v57, %v12925_v52  ;;  %v5814_v63 = vpop.permute.xlu1 %5813  ;;  %v5870_v50 = vpack.c.bf16 %v5810_v6, %v12937_v53 }
0x1b82   : > { %v5828_v13 = vpop.permute.xlu0 %5827  ;;  %v5820_v62 = vsel %vm355_vm7, %v5814_v63, %v5816_v32  ;;  %v5821_v29 = vsel %vm355_vm7, %v5812_v2, %v5814_v63 }
0x1b83   : > { %5946 = vmatprep.subr.bf16.mxu1 %v5870_v50  ;;  %v5823_v53 = vmul.f32 %v5821_v29, %v12842_v46  ;;  %v5824_v18 = vmul.f32 %v5820_v62, %v12845_v42 }
0x1b84   : > { %5947 = vmatpush1.bf16.msra.mxu1 %v5869_v26 }
0x1b85   : > { %v5818_v22 = vpop.permute.xlu1 %5817 }
0x1b86   : > { %v5832_v20 = vpop.permute.xlu0 %5831  ;;  %v5819_v41 = vsel %vm355_vm7, %v5816_v32, %v5818_v22  ;;  %v5822_v58 = vsel %vm355_vm7, %v5818_v22, %v5812_v2 }
0x1b87   : > { %v5825_v4 = vmul.f32 %v5819_v41, %v12853_v56  ;;  %v5826_v5 = vmul.f32 %v5822_v58, %v12864_v37  ;;  %v8684_v58 = vld [vmem:[%s9410_s14 + $0x40] sm:$0xff]  }
0x1b89   : > { %v5830_v8 = vpop.permute.xlu1 %5829 }
0x1b8a   : > { %v5836_v1 = vsel %vm395_vm6, %v5830_v8, %v5832_v20  ;;  %v5837_v52 = vsel %vm395_vm6, %v5828_v13, %v5830_v8  ;;  %v5844_v33 = vpop.permute.xlu0 %5843 }
0x1b8b   : > { %v5839_v40 = vmul.f32 %v5837_v52, %v12848_v30  ;;  %v5840_v24 = vmul.f32 %v5836_v1, %v12858_v15 }
0x1b8d   : > { %v5871_v11 = vpack.c.bf16 %v5839_v40, %v5823_v53  ;;  %v5834_v0 = vpop.permute.xlu1 %5833  ;;  %v5872_v45 = vpack.c.bf16 %v5840_v24, %v5824_v18  ;;  %v5879_v40 = vld [vmem:[%s11267_s20] sm:$0xf] }
0x1b8e   : > { %v5835_v35 = vsel %vm395_vm6, %v5832_v20, %v5834_v0  ;;  %v5838_v25 = vsel %vm395_vm6, %v5834_v0, %v5828_v13  ;;  %v5848_v2 = vpop.permute.xlu0 %5847  ;;  %v8686_v0 = vld [vmem:[%s9410_s14 + $0xc0] sm:$0xff]  }
0x1b8f   : > { %v5841_v48 = vmul.f32 %v5835_v35, %v12867_v31  ;;  %v5842_v32 = vmul.f32 %v5838_v25, %v12870_v59  ;;  %5907 = vmatprep.subr.bf16.mxu0 %v5872_v45  ;;  %v8687_v45 = vld [vmem:[%s9410_s14 + $0x80] sm:$0xff]   ;;  %v8688_v35 = vld [vmem:[%s9410_s14 + $0x48] sm:$0xff]  }
0x1b90   : > { %5908 = vmatpush1.bf16.msra.mxu0 %v5871_v11  ;;  %v8685_v11 = vld [vmem:[%s9410_s14] sm:$0xff]   ;;  %v8690_v25 = vld [vmem:[%s9410_s14 + $0xc8] sm:$0xff]  }
0x1b91   : > { %v5873_v57 = vpack.c.bf16 %v5841_v48, %v5825_v4  ;;  %v5846_v6 = vpop.permute.xlu1 %5845  ;;  %v5874_v26 = vpack.c.bf16 %v5842_v32, %v5826_v5  ;;  %v8689_v4 = vld [vmem:[%s9410_s14 + $0x8] sm:$0xff]   ;;  %v8692_v48 = vld [vmem:[%s9410_s14 + $0x50] sm:$0xff]  }
0x1b92   : > { %v5852_v63 = vsel %vm435_vm8, %v5846_v6, %v5848_v2  ;;  %v5853_v50 = vsel %vm435_vm8, %v5844_v33, %v5846_v6  ;;  %v8691_v5 = vld [vmem:[%s9410_s14 + $0x88] sm:$0xff]   ;;  %v8693_v32 = vld [vmem:[%s9410_s14 + $0x10] sm:$0xff]   ;;  %v8696_v6 = vld [vmem:[%s9410_s14 + $0x58] sm:$0xff]  }
0x1b93   : > { %5948 = vmatprep.subr.bf16.mxu1 %v5874_v26  ;;  %v5856_v13 = vmul.f32 %v5852_v63, %v12896_v55  ;;  %v5855_v22 = vmul.f32 %v5853_v50, %v12881_v54  ;;  %v8697_v26 = vld [vmem:[%s9410_s14 + $0x18] sm:$0xff]   ;;  %v8716_v54 = vld [vmem:[%s11426_s2] sm:$0xff]  }
0x1b94   : > { %5949 = vmatpush1.bf16.msra.mxu1 %v5873_v57  ;;  %v8695_v57 = vld [vmem:[%s9410_s14 + $0x90] sm:$0xff]   ;;  %v8698_v63 = vld [vmem:[%s9410_s14 + $0xd8] sm:$0xff]  }
0x1b95   : > { %v5850_v20 = vpop.permute.xlu1 %5849  ;;  %v5876_v62 = vpack.c.bf16 %v5856_v13, %v5856_v13  ;;  %v5875_v29 = vpack.c.bf16 %v5855_v22, %v5855_v22  ;;  %v8699_v50 = vld [vmem:[%s9410_s14 + $0x98] sm:$0xff]  }
0x1b96   : > { %v5851_v8 = vsel %vm435_vm8, %v5848_v2, %v5850_v20  ;;  %v5854_v1 = vsel %vm435_vm8, %v5850_v20, %v5844_v33  ;;  %v8694_v2 = vld [vmem:[%s9410_s14 + $0xd0] sm:$0xff]  }
0x1b97   : > { %8099 = vmatprep.subr.msk.bf16.mxu0 %vm498_vm9, %v5876_v62  ;;  %v5890_v52 = vsel %vm498_vm9, %v5875_v29, 0  ;;  %v5858_v53 = vmul.f32 %v5854_v1, %v12899_v19  ;;  %v5857_v18 = vmul.f32 %v5851_v8, %v12903_v47  ;;  %v8700_v29 = vld [vmem:[%s9410_s14 + $0x60] sm:$0xff]  }
0x1b98   : > { %5910 = vmatpush1.bf16.msra.mxu0 %v5890_v52  ;;  %v8701_v52 = vld [vmem:[%s9410_s14 + $0x20] sm:$0xff]  }
0x1b99   : > { %v5878_v24 = vpack.c.bf16 %v5858_v53, %v5858_v53  ;;  %v5877_v41 = vpack.c.bf16 %v5857_v18, %v5857_v18  ;;  %8298 = vmatprep.subr.bf16.mxu0 %v8684_v58  ;;  %v8702_v53 = vld [vmem:[%s9410_s14 + $0xe0] sm:$0xff]  }
0x1b9b   : > { %8100 = vmatmul.mubr.msk.bf16.vlgmr.msra.gmra.mrb[4].mxu0 %vm494_vm10, %v5879_v40  ;;  %8101 = vmatprep.subr.msk.bf16.mxu1 %vm498_vm9, %v5878_v24  ;;  %v5896_v33 = vsel %vm498_vm9, %v5877_v41, 0  ;;  %v8703_v24 = vld [vmem:[%s9410_s14 + $0xa0] sm:$0xff]  }
0x1b9c   : > { %5951 = vmatpush1.bf16.msra.mxu1 %v5896_v33  ;;  %8299 = vmatpush3.bf16.msra.mxu0 %v8685_v11 }
0x1b9d   : > { %8320 = vmatprep.subr.bf16.mxu1 %v8686_v0  ;;  %8300 = vmatprep.subr.bf16.mxu0 %v8688_v35  ;;  %v8704_v0 = vld [vmem:[%s9410_s14 + $0x68] sm:$0xff]  }
0x1b9f   : > { %8102 = vmatmul.mubr.msk.bf16.vlgmr.msra.gmra.mrb[4].mxu1 %vm494_vm10, %v5879_v40  ;;  %v5884_v13 = vpop.permute.xlu0 %5883 }
0x1ba0   : > { %8321 = vmatpush3.bf16.msra.mxu1 %v8687_v45  ;;  %8301 = vmatpush3.bf16.msra.mxu0 %v8689_v4  ;;  %v8706_v4 = vld [vmem:[%s9410_s14 + $0xe8] sm:$0xff]  }
0x1ba1   : > { %8322 = vmatprep.subr.bf16.mxu1 %v8690_v25  ;;  %8302 = vmatprep.subr.bf16.mxu0 %v8692_v48  ;;  %v8705_v25 = vld [vmem:[%s9410_s14 + $0x28] sm:$0xff]  }
0x1ba4   : > { %8323 = vmatpush3.bf16.msra.mxu1 %v8691_v5  ;;  %8303 = vmatpush3.bf16.msra.mxu0 %v8693_v32  ;;  %v8707_v32 = vld [vmem:[%s9410_s14 + $0xa8] sm:$0xff]  }
0x1ba5   : > { %8324 = vmatprep.subr.bf16.mxu1 %v8694_v2  ;;  %8304 = vmatprep.subr.bf16.mxu0 %v8696_v6  ;;  %v8709_v6 = vld [vmem:[%s9410_s14 + $0x30] sm:$0xff]  }
0x1ba8   : > { %8325 = vmatpush3.bf16.msra.mxu1 %v8695_v57  ;;  %8305 = vmatpush3.bf16.msra.mxu0 %v8697_v26  ;;  %v8708_v57 = vld [vmem:[%s9410_s14 + $0x70] sm:$0xff]  }
0x1ba9   : > { %8326 = vmatprep.subr.bf16.mxu1 %v8698_v63  ;;  %8306 = vmatprep.subr.bf16.mxu0 %v8700_v29  ;;  %v8710_v26 = vld [vmem:[%s9410_s14 + $0xf0] sm:$0xff]  }
0x1baa   : > { %v8711_v63 = vld [vmem:[%s9410_s14 + $0xb0] sm:$0xff]  }
0x1bac   : > { %8327 = vmatpush3.bf16.msra.mxu1 %v8699_v50  ;;  %8307 = vmatpush3.bf16.msra.mxu0 %v8701_v52  ;;  %v8712_v50 = vld [vmem:[%s9410_s14 + $0x78] sm:$0xff]  }
0x1bad   : > { %8328 = vmatprep.subr.bf16.mxu1 %v8702_v53  ;;  %8308 = vmatprep.subr.bf16.mxu0 %v8704_v0 }
0x1bb0   : > { %8329 = vmatpush3.bf16.msra.mxu1 %v8703_v24  ;;  %8309 = vmatpush3.bf16.msra.mxu0 %v8705_v25 }
0x1bb1   : > { %8330 = vmatprep.subr.bf16.mxu1 %v8706_v4  ;;  %8310 = vmatprep.subr.bf16.mxu0 %v8708_v57 }
0x1bb4   : > { %8331 = vmatpush3.bf16.msra.mxu1 %v8707_v32  ;;  %8311 = vmatpush3.bf16.msra.mxu0 %v8709_v6 }
0x1bb5   : > { %8332 = vmatprep.subr.bf16.mxu1 %v8710_v26  ;;  %8312 = vmatprep.subr.bf16.mxu0 %v8712_v50 }
0x1bb8   : > { %8333 = vmatpush3.bf16.msra.mxu1 %v8711_v63 }
0x1c6e   : > { %v5935_v22 = vpop.f32.mrb[4].mxu0 }
0x1c6f   : > { %v5936_v20 = vadd.f32 %v5935_v22, %v5884_v13  ;;  %v5937_v62 = vpop.f32.mrb[5].mxu0  ;;  %v8714_v22 = vld [vmem:[%s9410_s14 + $0xf8] sm:$0xff]  }
0x1c70   : > { %v5938_v8 = vadd.f32 %v5937_v62, %v5884_v13  ;;  %v5939_v1 = vpop.f32.mrb[6].mxu0  ;;  %8334 = vmatprep.subr.bf16.mxu1 %v8714_v22 }
0x1c71   : > { %v13122_v18 = vmax.f32 %v5936_v20, 0.0  ;;  %v5940_v40 = vpop.f32.mrb[7].mxu0  ;;  %v8715_v20 = vld [vmem:[%s9410_s14 + $0xb8] sm:$0xff]  }
0x1c72   : > { %v13125_v41 = vmax.f32 %v5938_v8, 0.0  ;;  %v5976_v33 = vpop.f32.mrb[4].mxu1  ;;  %8335 = vmatpush3.bf16.msra.mxu1 %v8715_v20 }
0x1c73   : > { %14979 = vst [vmem:[#allocation97_spill] sm:$0xff] %v13122_v18  ;;  %v5977_v58 = vadd.f32 %v5976_v33, %v5884_v13  ;;  %5987 = vrot.lane.b32.xlu1 %v13122_v18, %s8875_s29  ;;  %v5978_v11 = vpop.f32.mrb[5].mxu1  ;;  %6595 = vmatprep.subr.bf16.mxu1 %v14565_v14 }
0x1c74   : > { %14980 = vst [vmem:[#allocation98_spill] sm:$0xff] %v13125_v41  ;;  %v5979_v45 = vadd.f32 %v5978_v11, %v5884_v13  ;;  %5989 = vrot.lane.b32.xlu0 %v13125_v41, %s8875_s29  ;;  %v5980_v35 = vpop.f32.mrb[6].mxu1  ;;  %v8713_v13 = vld [vmem:[%s9410_s14 + $0x38] sm:$0xff]  }
0x1c75   : > { %v13134_v5 = vmax.f32 %v5977_v58, 0.0  ;;  %v5981_v48 = vpop.f32.mrb[7].mxu1  ;;  %8313 = vmatpush3.bf16.msra.mxu0 %v8713_v13 }
0x1c76   : > { %v13137_v2 = vmax.f32 %v5979_v45, 0.0 }
0x1c77   : > { %14981 = vst [vmem:[#allocation99_spill] sm:$0xff] %v13134_v5  ;;  %5991 = vrot.lane.b32.xlu1 %v13134_v5, %s8875_s29 }
0x1c78   : > { %14982 = vst [vmem:[#allocation100_spill] sm:$0xff] %v13137_v2  ;;  %5993 = vrot.lane.b32.xlu0 %v13137_v2, %s8875_s29 }
0x1c7b   : > { %6003 = vrot.lane.b32.xlu1 %v13122_v18, %s14574_s11 }
0x1c7c   : > { %6005 = vrot.lane.b32.xlu0 %v13125_v41, %s14574_s11 }
0x1c7f   : > { %6007 = vrot.lane.b32.xlu1 %v13134_v5, %s14574_s11 }
0x1c80   : > { %6009 = vrot.lane.b32.xlu0 %v13137_v2, %s14574_s11  ;;  %s8886_s11 = smov 119  }
0x1c83   : > { %6019 = vrot.lane.b32.xlu1 %v13122_v18, %s14572_s12 }
0x1c84   : > { %6021 = vrot.lane.b32.xlu0 %v13125_v41, %s14572_s12 }
0x1c87   : > { %6023 = vrot.lane.b32.xlu1 %v13134_v5, %s14572_s12 }
0x1c88   : > { %6025 = vrot.lane.b32.xlu0 %v13137_v2, %s14572_s12  ;;  %s8884_s12 = smov 121  }
0x1ce5   : > { %v5988_v62 = vpop.permute.xlu1 %5987 }
0x1ce6   : > { %v5990_v29 = vpop.permute.xlu0 %5989 }
0x1ce7   : > { %v13170_v33 = vsel %vm315_vm5, %v5988_v62, %v5990_v29 }
0x1ce8   : > { %14983 = vst [vmem:[#allocation101_spill] sm:$0xff] %v13170_v33  ;;  %v5999_v25 = vmax.f32 %v13122_v18, %v13170_v33 }
0x1ce9   : > { %v5992_v8 = vpop.permute.xlu1 %5991 }
0x1cea   : > { %v5994_v1 = vpop.permute.xlu0 %5993  ;;  %v13174_v58 = vsel %vm315_vm5, %v5990_v29, %v5992_v8 }
0x1ceb   : > { %14984 = vst [vmem:[#allocation102_spill] sm:$0xff] %v13174_v58  ;;  %v13178_v11 = vsel %vm315_vm5, %v5992_v8, %v5994_v1  ;;  %v13182_v0 = vsel %vm315_vm5, %v5994_v1, %v5988_v62  ;;  %v6000_v32 = vmax.f32 %v13125_v41, %v13174_v58 }
0x1cec   : > { %14985 = vst [vmem:[#allocation103_spill] sm:$0xff] %v13178_v11  ;;  %14986 = vst [vmem:[#allocation104_spill] sm:$0xff] %v13182_v0  ;;  %v6001_v63 = vmax.f32 %v13134_v5, %v13178_v11  ;;  %v6002_v50 = vmax.f32 %v13137_v2, %v13182_v0 }
0x1ced   : > { %v6004_v52 = vpop.permute.xlu1 %6003 }
0x1cee   : > { %v6006_v53 = vpop.permute.xlu0 %6005 }
0x1cef   : > { %v13186_v45 = vsel %vm395_vm6, %v6004_v52, %v6006_v53 }
0x1cf0   : > { %14987 = vst [vmem:[#allocation105_spill] sm:$0xff] %v13186_v45  ;;  %v6015_v13 = vmax.f32 %v5999_v25, %v13186_v45 }
0x1cf1   : > { %v6008_v40 = vpop.permute.xlu1 %6007 }
0x1cf2   : > { %v6010_v24 = vpop.permute.xlu0 %6009  ;;  %v13192_v4 = vsel %vm395_vm6, %v6006_v53, %v6008_v40 }
0x1cf3   : > { %14988 = vst [vmem:[#allocation106_spill] sm:$0xff] %v13192_v4  ;;  %v13198_v57 = vsel %vm395_vm6, %v6008_v40, %v6010_v24  ;;  %v13202_v6 = vsel %vm395_vm6, %v6010_v24, %v6004_v52  ;;  %v6016_v22 = vmax.f32 %v6000_v32, %v13192_v4 }
0x1cf4   : > { %14989 = vst [vmem:[#allocation107_spill] sm:$0xff] %v13198_v57  ;;  %14990 = vst [vmem:[#allocation108_spill] sm:$0xff] %v13202_v6  ;;  %v6017_v62 = vmax.f32 %v6001_v63, %v13198_v57  ;;  %v6018_v29 = vmax.f32 %v6002_v50, %v13202_v6 }
0x1cf5   : > { %v6020_v35 = vpop.permute.xlu1 %6019 }
0x1cf6   : > { %v6022_v48 = vpop.permute.xlu0 %6021 }
0x1cf7   : > { %v13206_v26 = vsel %vm435_vm8, %v6020_v35, %v6022_v48 }
0x1cf8   : > { %14991 = vst [vmem:[#allocation109_spill] sm:$0xff] %v13206_v26  ;;  %v6031_v8 = vmax.f32 %v6015_v13, %v13206_v26 }
0x1cf9   : > { %v6024_v20 = vpop.permute.xlu1 %6023 }
0x1cfa   : > { %v13219_v1 = vsel %vm435_vm8, %v6022_v48, %v6024_v20  ;;  %v6026_v52 = vpop.permute.xlu0 %6025  ;;  %v6035_v50 = vpack.c.bf16 %v6031_v8, %v6031_v8 }
0x1cfb   : > { %14992 = vst [vmem:[#allocation110_spill] sm:$0xff] %v13219_v1  ;;  %v13223_v53 = vsel %vm435_vm8, %v6024_v20, %v6026_v52  ;;  %v13227_v40 = vsel %vm435_vm8, %v6026_v52, %v6020_v35  ;;  %v6032_v24 = vmax.f32 %v6016_v22, %v13219_v1  ;;  %v8880_v20 = vmov 0.0  }
0x1cfc   : > { %14993 = vst [vmem:[#allocation111_spill] sm:$0xff] %v13223_v53  ;;  %14994 = vst [vmem:[#allocation112_spill] sm:$0xff] %v13227_v40  ;;  %v6033_v25 = vmax.f32 %v6017_v62, %v13223_v53  ;;  %v6034_v32 = vmax.f32 %v6018_v29, %v13227_v40  ;;  %8376 = vmatprep.subr.bf16.mxu0 %v8880_v20  ;;  %v13266_v40 = vld [vmem:[%s9563_s3 + $0x6] ss:$0 sm:$0xff] }
0x1cfd   : > { %v6036_v63 = vpack.c.bf16 %v6032_v24, %v6032_v24 }
0x1cfe   : > { %v6037_v13 = vpack.c.bf16 %v6033_v25, %v6033_v25  ;;  %v6038_v48 = vpack.c.bf16 %v6034_v32, %v6034_v32 }
0x1cff   : > { %6327 = vmatprep.mubr.bf16.mxu0 %v6036_v63 }
0x1d00   : > { %6328 = vmatmul.mubr.bf16.vlgmr.msra.gmra.mrb[8].mxu0 %v6035_v50  ;;  %6367 = vmatprep.mubr.bf16.mxu1 %v6038_v48  ;;  %v13256_v48 = vld [vmem:[%s9563_s3 + $0x2] ss:$0 sm:$0xff] }
0x1d01   : > { %6368 = vmatmul.mubr.bf16.vlgmr.msra.gmra.mrb[8].mxu1 %v6037_v13  ;;  %8386 = vmatprep.mubr.msk.bf16.mxu0 %vm8885_vm11, %v8880_v20  ;;  %v13253_v13 = vld [vmem:[%s9563_s3 + $0x3] ss:$0 sm:$0xff] }
0x1dd3   : > { %v8314_v14 = vpop.f32.mrb[8].mxu0 }
0x1dd4   : > { %v8315_v35 = vpop.f32.mrb[9].mxu0  ;;  %v8336_v52 = vpop.f32.mrb[8].mxu1 }
0x1dd5   : > { %v8316_v19 = vadd.f32 %v8315_v35, %v8314_v14  ;;  %v8317_v22 = vpop.f32.mrb[10].mxu0  ;;  %v8337_v47 = vpop.f32.mrb[9].mxu1  ;;  %v6447_v14 = vld [vmem:[%s11431_s13 + $0x8] sm:$0xff] }
0x1dd6   : > { %v8338_v62 = vadd.f32 %v8337_v47, %v8336_v52  ;;  %v8318_v53 = vpop.f32.mrb[11].mxu0  ;;  %v8339_v29 = vpop.f32.mrb[10].mxu1  ;;  %v13245_v47 = vld [vmem:[%s9563_s3 + $0x1] ss:$0 sm:$0xff] }
0x1dd7   : > { %v8340_v24 = vpop.f32.mrb[11].mxu1  ;;  %v13248_v53 = vld [vmem:[%s9563_s3] ss:$0 sm:$0xff] }
0x1dd8   : > { %v6370_v8 = vadd.f32 %v8338_v62, %v8316_v19  ;;  %v6446_v19 = vld [vmem:[%s11431_s13] sm:$0xff] }
0x1dd9   : > { %v13262_v24 = vld [vmem:[%s9563_s3 + $0x5] ss:$0 sm:$0xff] }
0x1dda   : > { %6383 = vrot.lane.b32.xlu0 %v6370_v8, %s8881_s16  ;;  %6375 = vrot.lane.b32.xlu1 %v6370_v8, %s8882_s24 }
0x1dde   : > { %6399 = vrot.lane.b32.xlu0 %v6370_v8, %s8874_s28  ;;  %6391 = vrot.lane.b32.xlu1 %v6370_v8, %s8883_s25 }
0x1de2   : > { %6415 = vrot.lane.b32.xlu0 %v6370_v8, %s8884_s12  ;;  %6407 = vrot.lane.b32.xlu1 %v6370_v8, %s8875_s29 }
0x1de6   : > { %6431 = vrot.lane.b32.xlu0 %v6370_v8, %s8886_s11  ;;  %6423 = vrot.lane.b32.xlu1 %v6370_v8, %s8887_s10 }
0x1dea   : > { %6455 = vperm.xlu0 %8682, %v6447_v14   ;;  %6450 = vperm.xlu1 %8683, %v6446_v19  }
0x1e4c   : > { %v6384_v25 = vpop.permute.xlu0 %6383  ;;  %v6376_v32 = vpop.permute.xlu1 %6375 }
0x1e4d   : > { %v6390_v63 = vmul.f32 %v13245_v47, %v6384_v25  ;;  %v6382_v50 = vmul.f32 %v13248_v53, %v6376_v32 }
0x1e4f   : > { %v6439_v35 = vpack.c.bf16 %v6390_v63, %v6382_v50  ;;  %v13269_v63 = vld [vmem:[%s9563_s3 + $0x8] ss:$0 sm:$0xff]  ;;  %v13273_v50 = vld [vmem:[%s9563_s3 + $0x7] ss:$0 sm:$0xff] }
0x1e50   : > { %v6400_v52 = vpop.permute.xlu0 %6399  ;;  %v6392_v22 = vpop.permute.xlu1 %6391 }
0x1e51   : > { %v6406_v62 = vmul.f32 %v13253_v13, %v6400_v52  ;;  %v6398_v29 = vmul.f32 %v13256_v48, %v6392_v22  ;;  %8377 = vmatpush3.bf16.msra.mxu0 %v6439_v35 }
0x1e52   : > { %8378 = vmatprep.subr.bf16.mxu0 %v8880_v20 }
0x1e53   : > { %v6440_v14 = vpack.c.bf16 %v6406_v62, %v6398_v29 }
0x1e54   : > { %v6416_v19 = vpop.permute.xlu0 %6415  ;;  %v6408_v25 = vpop.permute.xlu1 %6407 }
0x1e55   : > { %v6414_v32 = vmul.f32 %v13262_v24, %v6408_v25  ;;  %8379 = vmatpush3.bf16.msra.mxu0 %v6440_v14  ;;  %v6422_v1 = vmul.f32 %v13266_v40, %v6416_v19 }
0x1e56   : > { %8380 = vmatprep.subr.bf16.mxu0 %v8880_v20 }
0x1e57   : > { %v6441_v35 = vpack.c.bf16 %v6414_v32, %v6370_v8  ;;  %v14995_v8 = vmov 0  }
0x1e58   : > { %v6432_v52 = vpop.permute.xlu0 %6431  ;;  %v6424_v22 = vpop.permute.xlu1 %6423 }
0x1e59   : > { %v6438_v62 = vmul.f32 %v13269_v63, %v6432_v52  ;;  %v6430_v29 = vmul.f32 %v13273_v50, %v6424_v22  ;;  %8381 = vmatpush3.bf16.msra.mxu0 %v6441_v35 }
0x1e5a   : > { %8382 = vmatprep.subr.bf16.mxu0 %v8880_v20 }
0x1e5b   : > { %v6442_v14 = vpack.c.bf16 %v6430_v29, %v6422_v1  ;;  %v6443_v25 = vpack.c.bf16 %v6438_v62, %v6438_v62  ;;  %v6572_v29 = vld [vmem:[%s11510_s22 + $0x8] sm:$0xff] }
0x1e5d   : > { %8383 = vmatpush3.bf16.msra.mxu0 %v6442_v14  ;;  %v6467_v26 = vsel %vm498_vm9, %v6443_v25, 0  ;;  %v8720_v14 = vld [vmem:[%s9698_s26] ss:$16 sps:$4 sm:$0xff]   ;;  %v8722_v25 = vld [vmem:[%s9698_s26 + $0x4] ss:$16 sps:$4 sm:$0xff]  }
0x1e5e   : > { %8384 = vmatprep.subr.bf16.mxu0 %v8880_v20 }
0x1e61   : > { %8385 = vmatpush3.bf16.msra.mxu0 %v6467_v26  ;;  %v6571_v26 = vld [vmem:[%s11510_s22] sm:$0xff] }
0x1e62   : > { %6831 = vmatprep.subr.bf16.mxu0 %v8722_v25 }
0x1e64   : > { %8387 = vmatmul.mubr.msk.bf16.vlgmr.msra.gmra.mrb[12].mxu0 %vm494_vm10, %v8716_v54 }
0x1e65   : > { %6863 = vmatprep.mubr.bf16.mxu0 %v14995_v8  ;;  %6832 = vmatpush1.bf16.msra.mxu0 %v8720_v14 }
0x1e69   : > { %v6451_v19 = vpop.permute.xlu1 %6450  ;;  %v6456_v35 = vpop.permute.xlu0 %6455 }
0x1f37   : > { %v6503_v32 = vpop.f32.mrb[12].mxu0 }
0x1f38   : > { %v6504_v52 = vadd.f32 %v6503_v32, %v6451_v19  ;;  %v8388_v22 = vpop.f32.mrb[13].mxu0  ;;  %v8728_v19 = vld [vmem:[%s9698_s26 + $0x24] ss:$16 sps:$4 sm:$0xff]   ;;  %v8726_v32 = vld [vmem:[%s9698_s26 + $0x20] ss:$16 sps:$4 sm:$0xff]  }
0x1f39   : > { %v6506_v57 = vpop.f32.mrb[14].mxu0  ;;  %6833 = vmatprep.subr.bf16.mxu0 %v8728_v19  ;;  %v8732_v22 = vld [vmem:[%s9698_s26 + $0x40] ss:$16 sps:$4 sm:$0xff]  }
0x1f3a   : > { %v13284_v55 = vmax.f32 %v6504_v52, 0.0  ;;  %v6507_v1 = vadd.f32 %v6506_v57, %v6456_v35  ;;  %v8389_v62 = vpop.f32.mrb[15].mxu0  ;;  %v8719_v57 = vld [vmem:[%s11515_s17 + $0x4] ss:$8 sps:$4 sm:$0xff]   ;;  %6834 = vmatpush1.bf16.msra.mxu0 %v8726_v32 }
0x1f3b   : > { %8147 = vmatprep.mubr.msk.bf16.mxu1 %vm1458_vm12, %v8719_v57  ;;  %v8734_v52 = vld [vmem:[%s9698_s26 + $0x44] ss:$16 sps:$4 sm:$0xff]   ;;  %v8744_v57 = vld [vmem:[%s9698_s26 + $0x80] ss:$16 sps:$4 sm:$0xff]  }
0x1f3c   : > { %v13286_v20 = vmax.f32 %v6507_v1, 0.0  ;;  %6512 = vrot.lane.b32.xlu1 %v13284_v55, %s8882_s24  ;;  %6835 = vmatprep.subr.bf16.mxu0 %v8734_v52  ;;  %v8740_v35 = vld [vmem:[%s9698_s26 + $0x64] ss:$16 sps:$4 sm:$0xff]   ;;  %v8738_v1 = vld [vmem:[%s9698_s26 + $0x60] ss:$16 sps:$4 sm:$0xff]  }
0x1f3d   : > { %v8746_v62 = vld [vmem:[%s9698_s26 + $0x84] ss:$16 sps:$4 sm:$0xff]  }
0x1f3e   : > { %6514 = vrot.lane.b32.xlu0 %v13286_v20, %s8882_s24  ;;  %6836 = vmatpush1.bf16.msra.mxu0 %v8732_v22 }
0x1f3f   : > { %6837 = vmatprep.subr.bf16.mxu0 %v8740_v35 }
0x1f40   : > { %6518 = vrot.lane.b32.xlu1 %v13284_v55, %s8881_s16 }
0x1f42   : > { %6520 = vrot.lane.b32.xlu0 %v13286_v20, %s8881_s16  ;;  %6838 = vmatpush1.bf16.msra.mxu0 %v8738_v1 }
0x1f43   : > { %6839 = vmatprep.subr.bf16.mxu0 %v8746_v62 }
0x1f44   : > { %6524 = vrot.lane.b32.xlu1 %v13284_v55, %s8883_s25 }
0x1f46   : > { %6526 = vrot.lane.b32.xlu0 %v13286_v20, %s8883_s25  ;;  %6840 = vmatpush1.bf16.msra.mxu0 %v8744_v57 }
0x1f48   : > { %6530 = vrot.lane.b32.xlu1 %v13284_v55, %s8874_s28 }
0x1f4a   : > { %6532 = vrot.lane.b32.xlu0 %v13286_v20, %s8874_s28 }
0x1f4c   : > { %6536 = vrot.lane.b32.xlu1 %v13284_v55, %s8875_s29 }
0x1f4e   : > { %6538 = vrot.lane.b32.xlu0 %v13286_v20, %s8875_s29 }
0x1f50   : > { %6542 = vrot.lane.b32.xlu1 %v13284_v55, %s8884_s12 }
0x1f52   : > { %6544 = vrot.lane.b32.xlu0 %v13286_v20, %s8884_s12  ;;  %s15013_s12 = smov 111  }
0x1f54   : > { %6548 = vrot.lane.b32.xlu1 %v13284_v55, %s8887_s10 }
0x1f56   : > { %6550 = vrot.lane.b32.xlu0 %v13286_v20, %s8887_s10  ;;  %s14996_s10 = smov 113  }
0x1f58   : > { %6554 = vrot.lane.b32.xlu1 %v13284_v55, %s8886_s11 }
0x1f5a   : > { %6556 = vrot.lane.b32.xlu0 %v13286_v20, %s8886_s11  ;;  %s15012_s11 = smov 112  }
0x1f5c   : > { %6575 = vperm.xlu1 %8683, %v6571_v26   ;;  %v8752_v26 = vld [vmem:[%s9698_s26 + $0xa4] ss:$16 sps:$4 sm:$0xff]  }
0x1f5d   : > { %6841 = vmatprep.subr.bf16.mxu0 %v8752_v26 }
0x1f5e   : > { %6580 = vperm.xlu0 %8682, %v6572_v29   ;;  %v8750_v29 = vld [vmem:[%s9698_s26 + $0xa0] ss:$16 sps:$4 sm:$0xff]  }
0x1f5f   : > { %6842 = vmatpush1.bf16.msra.mxu0 %v8750_v29 }
0x1f60   : > { %6921 = vrot.lane.b32.xlu1 %v13122_v18, %s8871_s6 }
0x1f62   : > { %6927 = vrot.lane.b32.xlu0 %v13125_v41, %s8871_s6 }
0x1f64   : > { %6933 = vrot.lane.b32.xlu1 %v13134_v5, %s8871_s6 }
0x1f66   : > { %6939 = vrot.lane.b32.xlu0 %v13137_v2, %s8871_s6 }
0x1f68   : > { %7017 = vrot.lane.b32.xlu1 %v13122_v18, %s8873_s8 }
0x1f6a   : > { %6969 = vrot.lane.b32.xlu0 %v13122_v18, %s8872_s9 }
0x1f6c   : > { %7029 = vrot.lane.b32.xlu1 %v13134_v5, %s8873_s8 }
0x1f6e   : > { %6975 = vrot.lane.b32.xlu0 %v13125_v41, %s8872_s9 }
0x1f70   : > { %7155 = vrot.lane.b32.xlu1 %v13125_v41, %s14996_s10 }
0x1f72   : > { %6981 = vrot.lane.b32.xlu0 %v13134_v5, %s8872_s9 }
0x1f74   : > { %7149 = vrot.lane.b32.xlu1 %v13122_v18, %s14996_s10 }
0x1f76   : > { %6987 = vrot.lane.b32.xlu0 %v13137_v2, %s8872_s9 }
0x1f7a   : > { %7023 = vrot.lane.b32.xlu0 %v13125_v41, %s8873_s8 }
0x1f7e   : > { %7035 = vrot.lane.b32.xlu0 %v13137_v2, %s8873_s8 }
0x1f82   : > { %7065 = vrot.lane.b32.xlu0 %v13122_v18, %s8874_s28  ;;  %v13632_v18 = vld [vmem:[%s11837_s15] sm:$0xff] }
0x1f83   : > { %15021 = vst [vmem:[#allocation134_spill] sm:$0xff] %v13632_v18 }
0x1f86   : > { %7071 = vrot.lane.b32.xlu0 %v13125_v41, %s8874_s28 }
0x1f8a   : > { %7077 = vrot.lane.b32.xlu0 %v13134_v5, %s8874_s28 }
0x1f8e   : > { %7083 = vrot.lane.b32.xlu0 %v13137_v2, %s8874_s28 }
0x1f92   : > { %7161 = vrot.lane.b32.xlu0 %v13134_v5, %s14996_s10 }
0x1f96   : > { %7167 = vrot.lane.b32.xlu0 %v13137_v2, %s14996_s10  ;;  %v8181_v2 = vcombine.high %v13632_v18, %v13632_v18  ;;  %v7322_v18 = vld [vmem:[%s11844_s1] sm:$0xff] }
0x1fae   : > { %v6513_v14 = vpop.permute.xlu1 %6512 }
0x1faf   : > { %v6516_v19 = vmul.f32 %v13248_v53, %v6513_v14 }
0x1fb0   : > { %v6515_v25 = vpop.permute.xlu0 %6514 }
0x1fb1   : > { %v6517_v32 = vmul.f32 %v13248_v53, %v6515_v25 }
0x1fb2   : > { %v6519_v52 = vpop.permute.xlu1 %6518 }
0x1fb3   : > { %v6560_v54 = vpack.c.bf16 %v6517_v32, %v6516_v19  ;;  %v6522_v35 = vmul.f32 %v13245_v47, %v6519_v52 }
0x1fb4   : > { %v6521_v22 = vpop.permute.xlu0 %6520 }
0x1fb5   : > { %v6523_v1 = vmul.f32 %v13245_v47, %v6521_v22  ;;  %6596 = vmatpush1.bf16.msra.mxu1 %v6560_v54 }
0x1fb6   : > { %v6525_v62 = vpop.permute.xlu1 %6524  ;;  %6597 = vmatprep.subr.bf16.mxu1 %v14995_v8 }
0x1fb7   : > { %v6561_v57 = vpack.c.bf16 %v6523_v1, %v6522_v35  ;;  %v6528_v29 = vmul.f32 %v13256_v48, %v6525_v62  ;;  %v14997_v1 = vpack.c.bf16 %v13286_v20, %v13284_v55 }
0x1fb8   : > { %v6527_v26 = vpop.permute.xlu0 %6526 }
0x1fb9   : > { %v6529_v6 = vmul.f32 %v13256_v48, %v6527_v26  ;;  %6598 = vmatpush1.bf16.msra.mxu1 %v6561_v57 }
0x1fba   : > { %v6531_v14 = vpop.permute.xlu1 %6530  ;;  %6599 = vmatprep.subr.bf16.mxu1 %v14995_v8 }
0x1fbb   : > { %v6562_v53 = vpack.c.bf16 %v6529_v6, %v6528_v29  ;;  %v6534_v19 = vmul.f32 %v13253_v13, %v6531_v14 }
0x1fbc   : > { %v6533_v25 = vpop.permute.xlu0 %6532 }
0x1fbd   : > { %v6535_v47 = vmul.f32 %v13253_v13, %v6533_v25  ;;  %6600 = vmatpush1.bf16.msra.mxu1 %v6562_v53 }
0x1fbe   : > { %v6537_v54 = vpop.permute.xlu1 %6536  ;;  %6601 = vmatprep.subr.bf16.mxu1 %v14995_v8 }
0x1fbf   : > { %v6563_v32 = vpack.c.bf16 %v6535_v47, %v6534_v19  ;;  %v6540_v6 = vmul.f32 %v13262_v24, %v6537_v54  ;;  %v8725_v47 = vld [vmem:[%s9698_s26 + $0xc] ss:$16 sps:$4 sm:$0xff]  }
0x1fc0   : > { %v6539_v52 = vpop.permute.xlu0 %6538 }
0x1fc1   : > { %6602 = vmatpush1.bf16.msra.mxu1 %v6563_v32  ;;  %v6541_v48 = vmul.f32 %v13262_v24, %v6539_v52  ;;  %v8717_v32 = vld [vmem:[%s11515_s17] ss:$8 sps:$4 sm:$0xff]   ;;  %v8731_v52 = vld [vmem:[%s9698_s26 + $0x2c] ss:$16 sps:$4 sm:$0xff]  }
0x1fc2   : > { %v6543_v22 = vpop.permute.xlu1 %6542  ;;  %6603 = vmatprep.subr.bf16.mxu1 %v14995_v8 }
0x1fc3   : > { %v6565_v13 = vpack.c.bf16 %v6541_v48, %v6540_v6  ;;  %v6546_v29 = vmul.f32 %v13266_v40, %v6543_v22  ;;  %v8729_v22 = vld [vmem:[%s9698_s26 + $0x28] ss:$16 sps:$4 sm:$0xff]   ;;  %v8743_v6 = vld [vmem:[%s9698_s26 + $0x6c] ss:$16 sps:$4 sm:$0xff]  }
0x1fc4   : > { %v6545_v35 = vpop.permute.xlu0 %6544 }
0x1fc5   : > { %6604 = vmatpush1.bf16.msra.mxu1 %v14997_v1  ;;  %v6547_v62 = vmul.f32 %v13266_v40, %v6545_v35  ;;  %v8735_v35 = vld [vmem:[%s9698_s26 + $0x48] ss:$16 sps:$4 sm:$0xff]  }
0x1fc6   : > { %6605 = vmatprep.subr.bf16.mxu1 %v14995_v8  ;;  %v6549_v57 = vpop.permute.xlu1 %6548 }
0x1fc7   : > { %v6566_v14 = vpack.c.bf16 %v6547_v62, %v6546_v29  ;;  %v6552_v20 = vmul.f32 %v13273_v50, %v6549_v57  ;;  %v8749_v62 = vld [vmem:[%s9698_s26 + $0x8c] ss:$16 sps:$4 sm:$0xff]  }
0x1fc8   : > { %v6551_v26 = vpop.permute.xlu0 %6550  ;;  %v8755_v29 = vld [vmem:[%s9698_s26 + $0xac] ss:$16 sps:$4 sm:$0xff]  }
0x1fc9   : > { %6606 = vmatpush1.bf16.msra.mxu1 %v6565_v13  ;;  %v6553_v24 = vmul.f32 %v13273_v50, %v6551_v26  ;;  %v8723_v50 = vld [vmem:[%s9698_s26 + $0x8] ss:$16 sps:$4 sm:$0xff]  }
0x1fca   : > { %6607 = vmatprep.subr.bf16.mxu1 %v14995_v8  ;;  %v6555_v53 = vpop.permute.xlu1 %6554  ;;  %v8741_v13 = vld [vmem:[%s9698_s26 + $0x68] ss:$16 sps:$4 sm:$0xff]  }
0x1fcb   : > { %v6567_v25 = vpack.c.bf16 %v6553_v24, %v6552_v20  ;;  %v6558_v19 = vmul.f32 %v13269_v63, %v6555_v53  ;;  %v8747_v26 = vld [vmem:[%s9698_s26 + $0x88] ss:$16 sps:$4 sm:$0xff]  }
0x1fcc   : > { %v6557_v55 = vpop.permute.xlu0 %6556  ;;  %v8753_v24 = vld [vmem:[%s9698_s26 + $0xa8] ss:$16 sps:$4 sm:$0xff]  }
0x1fcd   : > { %6608 = vmatpush1.bf16.msra.mxu1 %v6566_v14  ;;  %v6559_v40 = vmul.f32 %v13269_v63, %v6557_v55  ;;  %v8737_v63 = vld [vmem:[%s9698_s26 + $0x4c] ss:$16 sps:$4 sm:$0xff]  }
0x1fce   : > { %6609 = vmatprep.subr.bf16.mxu1 %v14995_v8 }
0x1fcf   : > { %v6568_v54 = vpack.c.bf16 %v6559_v40, %v6558_v19 }
0x1fd1   : > { %6610 = vmatpush1.bf16.msra.mxu1 %v6567_v25 }
0x1fd2   : > { %6611 = vmatprep.subr.bf16.mxu1 %v14995_v8 }
0x1fd5   : > { %6612 = vmatpush1.bf16.msra.mxu1 %v6568_v54 }
0x1fd6   : > { %6874 = vmatprep.subr.bf16.mxu1 %v8725_v47 }
0x1fd8   : > { %6628 = vmatmul.mubr.bf16.vlgmr.msra.gmra.mrb[12].mxu1 %v8717_v32 }
0x1fd9   : > { %6875 = vmatpush1.bf16.msra.mxu1 %v8723_v50  ;;  %6906 = vmatprep.mubr.bf16.mxu1 %v14995_v8 }
0x1fda   : > { %6876 = vmatprep.subr.bf16.mxu1 %v8731_v52  ;;  %v8758_v52 = vld [vmem:[%s9698_s26 + $0xc4] ss:$16 sps:$4 sm:$0xff]  }
0x1fdb   : > { %6843 = vmatprep.subr.bf16.mxu0 %v8758_v52 }
0x1fdd   : > { %v6581_v48 = vpop.permute.xlu0 %6580  ;;  %6877 = vmatpush1.bf16.msra.mxu1 %v8729_v22  ;;  %v8761_v22 = vld [vmem:[%s9698_s26 + $0xcc] ss:$16 sps:$4 sm:$0xff]  }
0x1fde   : > { %6878 = vmatprep.subr.bf16.mxu1 %v8737_v63  ;;  %v8756_v63 = vld [vmem:[%s9698_s26 + $0xc0] ss:$16 sps:$4 sm:$0xff]  }
0x1fdf   : > { %6844 = vmatpush1.bf16.msra.mxu0 %v8756_v63 }
0x1fe1   : > { %v13414_v1 = vpop.permute.xlu0 %6927  ;;  %6879 = vmatpush1.bf16.msra.mxu1 %v8735_v35  ;;  %v8759_v35 = vld [vmem:[%s9698_s26 + $0xc8] ss:$16 sps:$4 sm:$0xff]  }
0x1fe2   : > { %6880 = vmatprep.subr.bf16.mxu1 %v8743_v6  ;;  %v8764_v6 = vld [vmem:[%s9698_s26 + $0xe4] ss:$16 sps:$4 sm:$0xff]  }
0x1fe3   : > { %6845 = vmatprep.subr.bf16.mxu0 %v8764_v6 }
0x1fe5   : > { %v13418_v57 = vpop.permute.xlu0 %6939  ;;  %6881 = vmatpush1.bf16.msra.mxu1 %v8741_v13  ;;  %v8767_v13 = vld [vmem:[%s9698_s26 + $0xec] ss:$16 sps:$4 sm:$0xff]  }
0x1fe6   : > { %6882 = vmatprep.subr.bf16.mxu1 %v8749_v62  ;;  %v8762_v62 = vld [vmem:[%s9698_s26 + $0xe0] ss:$16 sps:$4 sm:$0xff]  }
0x1fe7   : > { %6846 = vmatpush1.bf16.msra.mxu0 %v8762_v62 }
0x1fe9   : > { %v13422_v14 = vpop.permute.xlu0 %6969  ;;  %6883 = vmatpush1.bf16.msra.mxu1 %v8747_v26  ;;  %v8765_v26 = vld [vmem:[%s9698_s26 + $0xe8] ss:$16 sps:$4 sm:$0xff]  }
0x1fea   : > { %6884 = vmatprep.subr.bf16.mxu1 %v8755_v29  ;;  %v6576_v29 = vpop.permute.xlu1 %6575 }
0x1fed   : > { %v13425_v55 = vpop.permute.xlu0 %6975  ;;  %6885 = vmatpush1.bf16.msra.mxu1 %v8753_v24 }
0x1fee   : > { %6886 = vmatprep.subr.bf16.mxu1 %v8761_v22 }
0x1ff1   : > { %v13427_v20 = vpop.permute.xlu0 %6981  ;;  %6887 = vmatpush1.bf16.msra.mxu1 %v8759_v35 }
0x1ff2   : > { %6888 = vmatprep.subr.bf16.mxu1 %v8767_v13 }
0x1ff5   : > { %v13429_v53 = vpop.permute.xlu0 %6987  ;;  %6889 = vmatpush1.bf16.msra.mxu1 %v8765_v26  ;;  %v13561_v26 = vpop.permute.xlu1 %6921 }
0x1ff9   : > { %v13431_v25 = vpop.permute.xlu0 %7023 }
0x1ffd   : > { %v13433_v40 = vpop.permute.xlu0 %7035 }
0x1ffe   : > { %14998 = vst [vmem:[#allocation113_spill] sm:$0xff] %v13433_v40 }
0x2001   : > { %v13435_v19 = vpop.permute.xlu0 %7065 }
0x2002   : > { %14999 = vst [vmem:[#allocation114_spill] sm:$0xff] %v13435_v19 }
0x2005   : > { %v13437_v47 = vpop.permute.xlu0 %7071 }
0x2006   : > { %15000 = vst [vmem:[#allocation115_spill] sm:$0xff] %v13437_v47 }
0x2009   : > { %v13439_v54 = vpop.permute.xlu0 %7077 }
0x200a   : > { %15001 = vst [vmem:[#allocation116_spill] sm:$0xff] %v13439_v54 }
0x200d   : > { %v13441_v32 = vpop.permute.xlu0 %7083 }
0x200e   : > { %15002 = vst [vmem:[#allocation117_spill] sm:$0xff] %v13441_v32  ;;  %v13447_v50 = vsel %vm275_vm4, %v13439_v54, %v13441_v32 }
0x200f   : > { %15003 = vst [vmem:[#allocation118_spill] sm:$0xff] %v13447_v50 }
0x20ab   : > { %v6629_v24 = vpop.f32.mrb[12].mxu1 }
0x20ac   : > { %v6630_v8 = vadd.f32 %v6629_v24, %v6576_v29  ;;  %v6631_v45 = vpop.f32.mrb[13].mxu1  ;;  %v13571_v29 = vpop.permute.xlu1 %6933 }
0x20ad   : > { %v6632_v31 = vpop.f32.mrb[14].mxu1 }
0x20ae   : > { %v6633_v30 = vadd.f32 %v6632_v31, %v6581_v48  ;;  %v6634_v59 = vpop.f32.mrb[15].mxu1  ;;  %v6636_v4 = vmax.f32 %v6630_v8, 0.0  ;;  %v13595_v48 = vpop.permute.xlu0 %7161 }
0x20af   : > { %15016 = vst [vmem:[#allocation129_spill] sm:$0xff] %v13595_v48 }
0x20b0   : > { %v6637_v52 = vmax.f32 %v6633_v30, 0.0  ;;  %v13577_v24 = vpop.permute.xlu1 %7017 }
0x20b2   : > { %v6638_v22 = vpack.c.bf16 %v6637_v52, %v6636_v4  ;;  %v13607_v62 = vpop.permute.xlu0 %7167 }
0x20b3   : > { %15018 = vst [vmem:[#allocation131_spill] sm:$0xff] %v13607_v62 }
0x20b4   : > { %6864 = vmatmul.mubr.bf16.vlgmr.msra.gmra.mrb[16].mxu0 %v6638_v22  ;;  %6907 = vmatmul.mubr.bf16.vlgmr.msra.gmra.mrb[16].mxu1 %v6638_v22  ;;  %v13587_v52 = vpop.permute.xlu1 %7029 }
0x20b5   : > { %15014 = vst [vmem:[#allocation127_spill] sm:$0xff] %v13587_v52  ;;  %8183 = vmatprep.mubr.msk.bf16.mxu0 %vm2201_vm13, %v8181_v2  ;;  %8185 = vmatprep.mubr.msk.bf16.mxu1 %vm2201_vm13, %v8181_v2 }
0x20b8   : > { %v13593_v22 = vpop.permute.xlu1 %7155 }
0x20b9   : > { %15015 = vst [vmem:[#allocation128_spill] sm:$0xff] %v13593_v22 }
0x20bc   : > { %v13605_v8 = vpop.permute.xlu1 %7149 }
0x20bd   : > { %15017 = vst [vmem:[#allocation130_spill] sm:$0xff] %v13605_v8 }
0x2187   : > { %v13457_v63 = vpop.f32.mrb[16].mxu0  ;;  %v13459_v35 = vpop.f32.mrb[16].mxu1 }
0x2188   : > { %15004 = vst [vmem:[#allocation119_spill] sm:$0xff] %v13457_v63  ;;  %15005 = vst [vmem:[#allocation120_spill] sm:$0xff] %v13459_v35  ;;  %7117 = vrot.lane.b32.xlu0 %v13459_v35, %s8875_s29  ;;  %v13463_v6 = vpop.f32.mrb[17].mxu1  ;;  %6917 = vrot.lane.b32.xlu1 %v13457_v63, %s8871_s6  ;;  %v13467_v45 = vpop.f32.mrb[17].mxu0 }
0x2189   : > { %15006 = vst [vmem:[#allocation121_spill] sm:$0xff] %v13463_v6  ;;  %15007 = vst [vmem:[#allocation122_spill] sm:$0xff] %v13467_v45  ;;  %v13469_v31 = vpop.f32.mrb[18].mxu0  ;;  %v13471_v30 = vpop.f32.mrb[18].mxu1 }
0x218a   : > { %15008 = vst [vmem:[#allocation123_spill] sm:$0xff] %v13469_v31  ;;  %15009 = vst [vmem:[#allocation124_spill] sm:$0xff] %v13471_v30  ;;  %v13473_v59 = vpop.f32.mrb[19].mxu0  ;;  %v13475_v4 = vpop.f32.mrb[19].mxu1 }
0x218b   : > { %15010 = vst [vmem:[#allocation125_spill] sm:$0xff] %v13473_v59  ;;  %15011 = vst [vmem:[#allocation126_spill] sm:$0xff] %v13475_v4 }
0x218c   : > { %7201 = vrot.lane.b32.xlu0 %v13459_v35, %s15012_s11  ;;  %6929 = vrot.lane.b32.xlu1 %v13459_v35, %s8871_s6 }
0x2190   : > { %6965 = vrot.lane.b32.xlu1 %v13457_v63, %s8872_s9  ;;  %6971 = vrot.lane.b32.xlu0 %v13467_v45, %s8872_s9 }
0x2194   : > { %6977 = vrot.lane.b32.xlu1 %v13459_v35, %s8872_s9  ;;  %6983 = vrot.lane.b32.xlu0 %v13463_v6, %s8872_s9 }
0x2198   : > { %7013 = vrot.lane.b32.xlu1 %v13457_v63, %s8873_s8  ;;  %7067 = vrot.lane.b32.xlu0 %v13467_v45, %s8874_s28 }
0x219c   : > { %7025 = vrot.lane.b32.xlu1 %v13459_v35, %s8873_s8  ;;  %7079 = vrot.lane.b32.xlu0 %v13463_v6, %s8874_s28 }
0x21a0   : > { %7061 = vrot.lane.b32.xlu1 %v13457_v63, %s8874_s28  ;;  %7121 = vrot.lane.b32.xlu0 %v13463_v6, %s8875_s29 }
0x21a4   : > { %7073 = vrot.lane.b32.xlu1 %v13459_v35, %s8874_s28  ;;  %6919 = vrot.lane.b32.xlu0 %v13469_v31, %s8871_s6 }
0x21a8   : > { %7109 = vrot.lane.b32.xlu1 %v13457_v63, %s8875_s29  ;;  %6931 = vrot.lane.b32.xlu0 %v13471_v30, %s8871_s6 }
0x21ac   : > { %7157 = vrot.lane.b32.xlu1 %v13459_v35, %s14996_s10  ;;  %7015 = vrot.lane.b32.xlu0 %v13469_v31, %s8873_s8 }
0x21b0   : > { %7145 = vrot.lane.b32.xlu1 %v13457_v63, %s14996_s10  ;;  %7027 = vrot.lane.b32.xlu0 %v13471_v30, %s8873_s8 }
0x21b4   : > { %6923 = vrot.lane.b32.xlu1 %v13467_v45, %s8871_s6  ;;  %7119 = vrot.lane.b32.xlu0 %v13471_v30, %s8875_s29 }
0x21b8   : > { %6935 = vrot.lane.b32.xlu1 %v13463_v6, %s8871_s6  ;;  %7159 = vrot.lane.b32.xlu0 %v13471_v30, %s14996_s10 }
0x21bc   : > { %7019 = vrot.lane.b32.xlu1 %v13467_v45, %s8873_s8  ;;  %7147 = vrot.lane.b32.xlu0 %v13469_v31, %s14996_s10 }
0x21c0   : > { %7031 = vrot.lane.b32.xlu1 %v13463_v6, %s8873_s8  ;;  %6925 = vrot.lane.b32.xlu0 %v13473_v59, %s8871_s6 }
0x21c4   : > { %7113 = vrot.lane.b32.xlu1 %v13467_v45, %s8875_s29  ;;  %6937 = vrot.lane.b32.xlu0 %v13475_v4, %s8871_s6 }
0x21c8   : > { %7151 = vrot.lane.b32.xlu1 %v13467_v45, %s14996_s10  ;;  %7205 = vrot.lane.b32.xlu0 %v13463_v6, %s15012_s11 }
0x21cc   : > { %7163 = vrot.lane.b32.xlu1 %v13463_v6, %s14996_s10  ;;  %7021 = vrot.lane.b32.xlu0 %v13473_v59, %s8873_s8 }
0x21d0   : > { %7197 = vrot.lane.b32.xlu1 %v13467_v45, %s15012_s11  ;;  %7033 = vrot.lane.b32.xlu0 %v13475_v4, %s8873_s8 }
0x21d4   : > { %6967 = vrot.lane.b32.xlu1 %v13469_v31, %s8872_s9  ;;  %7203 = vrot.lane.b32.xlu0 %v13471_v30, %s15012_s11 }
0x21d8   : > { %6979 = vrot.lane.b32.xlu1 %v13471_v30, %s8872_s9  ;;  %7239 = vrot.lane.b32.xlu0 %v13471_v30, %s15013_s12 }
0x21dc   : > { %7063 = vrot.lane.b32.xlu1 %v13469_v31, %s8874_s28  ;;  %7123 = vrot.lane.b32.xlu0 %v13475_v4, %s8875_s29 }
0x21e0   : > { %7075 = vrot.lane.b32.xlu1 %v13471_v30, %s8874_s28  ;;  %7153 = vrot.lane.b32.xlu0 %v13473_v59, %s14996_s10 }
0x21e4   : > { %7111 = vrot.lane.b32.xlu1 %v13469_v31, %s8875_s29  ;;  %7165 = vrot.lane.b32.xlu0 %v13475_v4, %s14996_s10 }
0x21e8   : > { %6973 = vrot.lane.b32.xlu1 %v13473_v59, %s8872_s9  ;;  %7231 = vrot.lane.b32.xlu0 %v13469_v31, %s15013_s12 }
0x21ec   : > { %6985 = vrot.lane.b32.xlu1 %v13475_v4, %s8872_s9  ;;  %7207 = vrot.lane.b32.xlu0 %v13475_v4, %s15012_s11 }
0x21f0   : > { %7193 = vrot.lane.b32.xlu1 %v13457_v63, %s15012_s11  ;;  %7235 = vrot.lane.b32.xlu0 %v13473_v59, %s15013_s12 }
0x21f4   : > { %7069 = vrot.lane.b32.xlu1 %v13473_v59, %s8874_s28  ;;  %7243 = vrot.lane.b32.xlu0 %v13475_v4, %s15013_s12 }
0x21f8   : > { %7081 = vrot.lane.b32.xlu1 %v13475_v4, %s8874_s28 }
0x21fa   : > { %v13611_v13 = vpop.permute.xlu0 %7117  ;;  %v6918_v15 = vpop.permute.xlu1 %6917 }
0x21fb   : > { %15019 = vst [vmem:[#allocation132_spill] sm:$0xff] %v13611_v13 }
0x21fc   : > { %7195 = vrot.lane.b32.xlu1 %v13469_v31, %s15012_s11 }
0x21fe   : > { %v13615_v22 = vpop.permute.xlu0 %7201  ;;  %v6930_v48 = vpop.permute.xlu1 %6929 }
0x21ff   : > { %15020 = vst [vmem:[#allocation133_spill] sm:$0xff] %v13615_v22 }
0x2200   : > { %7115 = vrot.lane.b32.xlu1 %v13473_v59, %s8875_s29 }
0x2202   : > { %v6966_v11 = vpop.permute.xlu1 %6965  ;;  %v6972_v8 = vpop.permute.xlu0 %6971 }
0x2204   : > { %7233 = vrot.lane.b32.xlu1 %v13467_v45, %s15013_s12 }
0x2206   : > { %v6978_v62 = vpop.permute.xlu1 %6977  ;;  %v6984_v5 = vpop.permute.xlu0 %6983 }
0x2207   : > { %v6989_v16 = vsel %vm195_vm2, %v6978_v62, %v6984_v5 }
0x2208   : > { %7237 = vrot.lane.b32.xlu1 %v13459_v35, %s15013_s12 }
0x220a   : > { %v13623_v33 = vpop.permute.xlu1 %7013  ;;  %v7068_v0 = vpop.permute.xlu0 %7067 }
0x220c   : > { %7199 = vrot.lane.b32.xlu1 %v13473_v59, %s15012_s11 }
0x220e   : > { %v13627_v22 = vpop.permute.xlu1 %7025  ;;  %v7080_v30 = vpop.permute.xlu0 %7079 }
0x2210   : > { %7229 = vrot.lane.b32.xlu1 %v13457_v63, %s15013_s12 }
0x2212   : > { %v7062_v31 = vpop.permute.xlu1 %7061  ;;  %v7122_v35 = vpop.permute.xlu0 %7121 }
0x2213   : > { %v13638_v39 = vsel %vm275_vm4, %v7062_v31, %v7068_v0  ;;  %v13642_v58 = vsel %vm275_vm4, %v7080_v30, %v7062_v31  ;;  %v13647_v41 = vsel %vm315_vm5, %v13611_v13, %v7122_v35 }
0x2214   : > { %15022 = vst [vmem:[#allocation135_spill] sm:$0xff] %v13638_v39  ;;  %15023 = vst [vmem:[#allocation136_spill] sm:$0xff] %v13642_v58  ;;  %7241 = vrot.lane.b32.xlu1 %v13463_v6, %s15013_s12 }
0x2215   : > { %15024 = vst [vmem:[#allocation137_spill] sm:$0xff] %v13647_v41 }
0x2216   : > { %v7074_v63 = vpop.permute.xlu1 %7073  ;;  %v6920_v4 = vpop.permute.xlu0 %6919 }
0x2217   : > { %v13656_v38 = vsel %vm275_vm4, %v7074_v63, %v7080_v30  ;;  %v13660_v31 = vsel %vm275_vm4, %v7068_v0, %v7074_v63 }
0x2218   : > { %15025 = vst [vmem:[#allocation138_spill] sm:$0xff] %v13656_v38  ;;  %15026 = vst [vmem:[#allocation139_spill] sm:$0xff] %v13660_v31  ;;  %7325 = vperm.xlu1 %8683, %v7322_v18   ;;  %v6943_v38 = vsel %vm156_vm1, %v13571_v29, %v13418_v57 }
0x221a   : > { %v13662_v41 = vpop.permute.xlu1 %7109  ;;  %v6932_v45 = vpop.permute.xlu0 %6931 }
0x221b   : > { %15027 = vst [vmem:[#allocation140_spill] sm:$0xff] %v13662_v41  ;;  %v13667_v2 = vsel %vm315_vm5, %v7122_v35, %v13662_v41 }
0x221c   : > { %15028 = vst [vmem:[#allocation141_spill] sm:$0xff] %v13667_v2  ;;  %v6995_v2 = vsel %vm195_vm2, %v6966_v11, %v6972_v8 }
0x221d   : > { %v7002_v9 = vmul.f32 %v6995_v2, %v12716_v49  ;;  %v7004_v2 = vmul.f32 %v6989_v16, %v12742_v3  ;;  %v6946_v16 = vsel %vm156_vm1, %v13414_v1, %v13571_v29 }
0x221e   : > { %v13669_v6 = vpop.permute.xlu1 %7157  ;;  %v13671_v59 = vpop.permute.xlu0 %7015 }
0x2222   : > { %v13673_v17 = vpop.permute.xlu1 %7145  ;;  %v13675_v30 = vpop.permute.xlu0 %7027 }
0x2226   : > { %v6924_v27 = vpop.permute.xlu1 %6923  ;;  %v13677_v0 = vpop.permute.xlu0 %7119 }
0x2227   : > { %15029 = vst [vmem:[#allocation142_spill] sm:$0xff] %v13677_v0  ;;  %v6947_v35 = vsel %vm156_vm1, %v6918_v15, %v6924_v27  ;;  %v6949_v0 = vsel %vm156_vm1, %v13561_v26, %v13414_v1 }
0x2228   : > { %v6954_v32 = vmul.f32 %v6947_v35, %v12713_v61  ;;  %v6992_v35 = vsel %vm195_vm2, %v6972_v8, %v6978_v62 }
0x222a   : > { %v6936_v18 = vpop.permute.xlu1 %6935  ;;  %v13679_v63 = vpop.permute.xlu0 %7159 }
0x222b   : > { %v6941_v19 = vsel %vm156_vm1, %v6930_v48, %v6936_v18  ;;  %v6950_v47 = vsel %vm156_vm1, %v6936_v18, %v6918_v15 }
0x222c   : > { %v6953_v62 = vmul.f32 %v6950_v47, %v12721_v21 }
0x222e   : > { %v13681_v13 = vpop.permute.xlu1 %7019  ;;  %v13683_v50 = vpop.permute.xlu0 %7147 }
0x222f   : > { %v7040_v18 = vsel %vm235_vm3, %v13681_v13, %v13627_v22 }
0x2232   : > { %v13689_v41 = vpop.permute.xlu1 %7031  ;;  %v6926_v54 = vpop.permute.xlu0 %6925 }
0x2233   : > { %v6948_v31 = vsel %vm156_vm1, %v6920_v4, %v6926_v54  ;;  %v6945_v58 = vsel %vm156_vm1, %v6926_v54, %v6932_v45  ;;  %v6998_v54 = vsel %vm195_vm2, %v6984_v5, %v6966_v11  ;;  %v6956_v5 = vmul.f32 %v6941_v19, %v12724_v36 }
0x2234   : > { %v6958_v34 = vmul.f32 %v6948_v31, %v12713_v61  ;;  %v6944_v31 = vsel %vm156_vm1, %v6924_v27, %v6930_v48  ;;  %v6959_v40 = vmul.f32 %v6945_v58, %v12732_v12  ;;  %v6964_v19 = vmul.f32 %v6943_v38, %v12724_v36 }
0x2235   : > { %v6955_v58 = vmul.f32 %v6944_v31, %v12732_v12  ;;  %v7001_v47 = vmul.f32 %v6998_v54, %v12729_v23 }
0x2236   : > { %v13718_v39 = vpop.permute.xlu1 %7113  ;;  %v6938_v28 = vpop.permute.xlu0 %6937  ;;  %v7266_v52 = vpack.c.bf16 %v6958_v34, %v6954_v32  ;;  %v6962_v34 = vmul.f32 %v6949_v0, %v12713_v61  ;;  %v7272_v38 = vpack.c.bf16 %v7004_v2, %v6964_v19  ;;  %v13758_v2 = vmul.f32 %v7040_v18, %v12771_v44 }
0x2237   : > { %v6942_v15 = vsel %vm156_vm1, %v6932_v45, %v6938_v28  ;;  %v6951_v8 = vsel %vm156_vm1, %v6938_v28, %v6920_v4  ;;  %v6952_v28 = vsel %vm156_vm1, %v13418_v57, %v13561_v26  ;;  %v7267_v0 = vpack.c.bf16 %v6959_v40, %v6955_v58 }
0x2238   : > { %v6957_v27 = vmul.f32 %v6951_v8, %v12721_v21  ;;  %v6960_v11 = vmul.f32 %v6942_v15, %v12724_v36  ;;  %7349 = vmatprep.subr.bf16.mxu0 %v7266_v52  ;;  %v7003_v52 = vmul.f32 %v6992_v35, %v12735_v7  ;;  %v7270_v29 = vpack.c.bf16 %v7002_v9, %v6962_v34  ;;  %v15033_v8 = vld [vmem:[#allocation135_spill] sm:$0xff] }
0x2239   : > { %v6961_v57 = vmul.f32 %v6952_v28, %v12721_v21  ;;  %v6963_v26 = vmul.f32 %v6946_v16, %v12732_v12  ;;  %v15037_v21 = vld [vmem:[#allocation138_spill] sm:$0xff] }
0x223a   : > { %v7265_v32 = vpack.c.bf16 %v6957_v27, %v6953_v62  ;;  %v7152_v45 = vpop.permute.xlu1 %7151  ;;  %v13742_v4 = vpop.permute.xlu0 %7205  ;;  %v7268_v48 = vpack.c.bf16 %v6960_v11, %v6956_v5 }
0x223b   : > { %v7175_v1 = vsel %vm355_vm7, %v13673_v17, %v7152_v45  ;;  %v7269_v40 = vpack.c.bf16 %v7001_v47, %v6961_v57  ;;  %v7271_v31 = vpack.c.bf16 %v7003_v52, %v6963_v26  ;;  %v7172_v19 = vsel %vm355_vm7, %v7152_v45, %v13669_v6 }
0x223c   : > { %7350 = vmatpush1.bf16.msra.mxu0 %v7265_v32  ;;  %7390 = vmatprep.subr.bf16.mxu1 %v7268_v48 }
0x223d   : > { %7351 = vmatprep.subr.bf16.mxu0 %v7270_v29  ;;  %7391 = vmatpush1.bf16.msra.mxu1 %v7267_v0  ;;  %v13787_v0 = vmul.f32 %v7175_v1, %v12842_v46  ;;  %v13790_v29 = vmul.f32 %v7172_v19, %v12845_v42 }
0x223e   : > { %v7164_v35 = vpop.permute.xlu1 %7163  ;;  %7392 = vmatprep.subr.bf16.mxu1 %v7272_v38  ;;  %v7022_v54 = vpop.permute.xlu0 %7021 }
0x223f   : > { %v7041_v9 = vsel %vm235_vm3, %v7022_v54, %v13675_v30  ;;  %v7169_v38 = vsel %vm355_vm7, %v13669_v6, %v7164_v35  ;;  %v7178_v26 = vsel %vm355_vm7, %v7164_v35, %v13673_v17 }
0x2240   : > { %v13761_v15 = vmul.f32 %v7041_v9, %v12771_v44  ;;  %7352 = vmatpush1.bf16.msra.mxu0 %v7269_v40  ;;  %v13817_v19 = vmul.f32 %v7169_v38, %v12853_v56  ;;  %v13820_v17 = vmul.f32 %v7178_v26, %v12864_v37  ;;  %v6991_v26 = vsel %vm195_vm2, %v13427_v20, %v13429_v53 }
0x2241   : > { %7393 = vmatpush1.bf16.msra.mxu1 %v7271_v31  ;;  %v7012_v38 = vmul.f32 %v6991_v26, %v12742_v3 }
0x2242   : > { %v13765_v62 = vpop.permute.xlu1 %7197  ;;  %v7034_v5 = vpop.permute.xlu0 %7033 }
0x2246   : > { %v6968_v27 = vpop.permute.xlu1 %6967  ;;  %v13767_v11 = vpop.permute.xlu0 %7203 }
0x224a   : > { %v6980_v34 = vpop.permute.xlu1 %6979  ;;  %v13769_v16 = vpop.permute.xlu0 %7239 }
0x224e   : > { %v13771_v28 = vpop.permute.xlu1 %7063  ;;  %v13773_v58 = vpop.permute.xlu0 %7123 }
0x2252   : > { %v13778_v47 = vpop.permute.xlu1 %7075  ;;  %v7154_v32 = vpop.permute.xlu0 %7153 }
0x2253   : > { %v7173_v48 = vsel %vm355_vm7, %v7154_v32, %v13679_v63  ;;  %v7176_v52 = vsel %vm355_vm7, %v13683_v50, %v7154_v32 }
0x2254   : > { %v13793_v57 = vmul.f32 %v7176_v52, %v12842_v46  ;;  %v13796_v45 = vmul.f32 %v7173_v48, %v12845_v42  ;;  %v6994_v48 = vsel %vm195_vm2, %v13425_v55, %v13427_v20  ;;  %v7047_v20 = vsel %vm235_vm3, %v7034_v5, %v13671_v59 }
0x2256   : > { %v13806_v18 = vpop.permute.xlu1 %7111  ;;  %v7166_v40 = vpop.permute.xlu0 %7165 }
0x2257   : > { %v7170_v9 = vsel %vm355_vm7, %v13679_v63, %v7166_v40  ;;  %v7179_v6 = vsel %vm355_vm7, %v7166_v40, %v13683_v50  ;;  %v6997_v63 = vsel %vm195_vm2, %v13422_v14, %v13425_v55  ;;  %v7000_v50 = vsel %vm195_vm2, %v13429_v53, %v13422_v14 }
0x2258   : > { %v13823_v35 = vmul.f32 %v7170_v9, %v12853_v56  ;;  %v13826_v32 = vmul.f32 %v7179_v6, %v12864_v37  ;;  %v7010_v9 = vmul.f32 %v6997_v63, %v12716_v49  ;;  %v7044_v14 = vsel %vm235_vm3, %v13671_v59, %v7022_v54 }
0x2259   : > { %v7009_v1 = vmul.f32 %v7000_v50, %v12729_v23  ;;  %v7043_v63 = vsel %vm235_vm3, %v13623_v33, %v13681_v13  ;;  %v7038_v54 = vsel %vm235_vm3, %v13675_v30, %v7034_v5  ;;  %v7054_v55 = vmul.f32 %v7044_v14, %v12763_v60 }
0x225a   : > { %v6974_v52 = vpop.permute.xlu1 %6973  ;;  %v7037_v13 = vsel %vm235_vm3, %v13627_v22, %v13689_v41  ;;  %v7045_v59 = vsel %vm235_vm3, %v13577_v24, %v13431_v25  ;;  %v7050_v5 = vmul.f32 %v7043_v63, %v12763_v60  ;;  %v7056_v22 = vmul.f32 %v7038_v54, %v12777_v43 }
0x225b   : > { %v6996_v40 = vsel %vm195_vm2, %v6968_v27, %v6974_v52  ;;  %v6993_v53 = vsel %vm195_vm2, %v6974_v52, %v6980_v34  ;;  %v7053_v14 = vmul.f32 %v7047_v20, %v12774_v51  ;;  %v7058_v54 = vmul.f32 %v7045_v59, %v12763_v60  ;;  %v15034_v20 = vld [vmem:[#allocation115_spill] sm:$0xff] }
0x225c   : > { %v7006_v6 = vmul.f32 %v6996_v40, %v12716_v49  ;;  %v7007_v30 = vmul.f32 %v6993_v53, %v12735_v7 }
0x225e   : > { %v6986_v40 = vpop.permute.xlu1 %6985  ;;  %v7274_v31 = vpack.c.bf16 %v7010_v9, %v7006_v6 }
0x225f   : > { %v6990_v50 = vsel %vm195_vm2, %v6980_v34, %v6986_v40  ;;  %v6999_v52 = vsel %vm195_vm2, %v6986_v40, %v6968_v27  ;;  %v7046_v27 = vsel %vm235_vm3, %v13689_v41, %v13623_v33  ;;  %v7011_v34 = vmul.f32 %v6994_v48, %v12735_v7  ;;  %v15030_v40 = vld [vmem:[#allocation113_spill] sm:$0xff] }
0x2260   : > { %v7005_v26 = vmul.f32 %v6999_v52, %v12729_v23  ;;  %v7008_v9 = vmul.f32 %v6990_v50, %v12742_v3  ;;  %7353 = vmatprep.subr.bf16.mxu0 %v7274_v31  ;;  %v15031_v50 = vld [vmem:[#allocation127_spill] sm:$0xff]  ;;  %v15032_v52 = vld [vmem:[#allocation81_spill] sm:$0xff]  ;;  %v7052_v41 = vmul.f32 %v7037_v13, %v12777_v43  ;;  %v7278_v33 = vpack.c.bf16 %v7054_v55, %v7050_v5  ;;  %v15039_v5 = vld [vmem:[#allocation136_spill] sm:$0xff] }
0x2261   : > { %v7039_v63 = vsel %vm235_vm3, %v15031_v50, %v15030_v40  ;;  %v7098_v36 = vmul.f32 %v15033_v8, %v15032_v52  ;;  %v7049_v48 = vmul.f32 %v7046_v27, %v12774_v51  ;;  %v15036_v8 = vld [vmem:[#allocation84_spill] sm:$0xff] }
0x2262   : > { %v7273_v6 = vpack.c.bf16 %v7009_v1, %v7005_v26  ;;  %v13893_v31 = vpop.permute.xlu1 %7193  ;;  %v7276_v53 = vpack.c.bf16 %v7012_v38, %v7008_v9  ;;  %v7048_v1 = vsel %vm235_vm3, %v15030_v40, %v13577_v24  ;;  %v7275_v38 = vpack.c.bf16 %v7011_v34, %v7007_v30  ;;  %v15035_v26 = vld [vmem:[#allocation114_spill] sm:$0xff]  ;;  %v15038_v30 = vld [vmem:[#allocation83_spill] sm:$0xff]  ;;  %v15040_v40 = vld [vmem:[#allocation117_spill] sm:$0xff] }
0x2263   : > { %v7093_v9 = vsel %vm275_vm4, %v15035_v26, %v15034_v20  ;;  %v7100_v13 = vmul.f32 %v15037_v21, %v15036_v8  ;;  %v7280_v55 = vpack.c.bf16 %v7056_v22, %v7052_v41  ;;  %v7042_v24 = vsel %vm235_vm3, %v13431_v25, %v15031_v50  ;;  %v15042_v22 = vld [vmem:[#allocation139_spill] sm:$0xff] }
0x2264   : > { %7354 = vmatpush1.bf16.msra.mxu0 %v7273_v6  ;;  %7394 = vmatprep.subr.bf16.mxu1 %v7276_v53  ;;  %v7060_v59 = vmul.f32 %v7039_v63, %v12777_v43  ;;  %v7097_v27 = vmul.f32 %v15039_v5, %v15038_v30  ;;  %v7277_v34 = vpack.c.bf16 %v7053_v14, %v7049_v48  ;;  %v15041_v53 = vld [vmem:[#allocation82_spill] sm:$0xff]  ;;  %v15043_v5 = vld [vmem:[#allocation116_spill] sm:$0xff] }
0x2265   : > { %7355 = vmatprep.subr.bf16.mxu0 %v7278_v33  ;;  %7395 = vmatpush1.bf16.msra.mxu1 %v7275_v38  ;;  %v7096_v21 = vsel %vm275_vm4, %v15040_v40, %v15035_v26  ;;  %v7099_v41 = vmul.f32 %v15042_v22, %v15041_v53  ;;  %v7282_v50 = vpack.c.bf16 %v7098_v36, %v7058_v54 }
0x2266   : > { %v7070_v6 = vpop.permute.xlu1 %7069  ;;  %7396 = vmatprep.subr.bf16.mxu1 %v7280_v55  ;;  %v7057_v63 = vmul.f32 %v7048_v1, %v12774_v51  ;;  %v7106_v14 = vmul.f32 %v7093_v9, %v15032_v52  ;;  %v7059_v48 = vmul.f32 %v7042_v24, %v12771_v44  ;;  %v7284_v26 = vpack.c.bf16 %v7100_v13, %v7060_v59  ;;  %v15046_v59 = vld [vmem:[#allocation132_spill] sm:$0xff] }
0x2267   : > { %v7092_v25 = vsel %vm275_vm4, %v13771_v28, %v7070_v6  ;;  %v7089_v38 = vsel %vm275_vm4, %v7070_v6, %v13778_v47  ;;  %v7090_v36 = vsel %vm275_vm4, %v15034_v20, %v15043_v5  ;;  %v7105_v54 = vmul.f32 %v7096_v21, %v15038_v30 }
0x2268   : > { %v7102_v33 = vmul.f32 %v7092_v25, %v15032_v52  ;;  %7356 = vmatpush1.bf16.msra.mxu0 %v7277_v34  ;;  %v7281_v1 = vpack.c.bf16 %v7097_v27, %v7057_v63  ;;  %v15044_v9 = vpack.c.bf16 %v13761_v15, %v13758_v2  ;;  %v15045_v34 = vld [vmem:[#allocation118_spill] sm:$0xff]  ;;  %v7283_v6 = vpack.c.bf16 %v7099_v41, %v7059_v48  ;;  %v15047_v25 = vld [vmem:[#allocation140_spill] sm:$0xff] }
0x2269   : > { %7357 = vmatprep.subr.bf16.mxu0 %v7282_v50  ;;  %v7108_v40 = vmul.f32 %v15045_v34, %v15036_v8  ;;  %v7127_v2 = vsel %vm315_vm5, %v13718_v39, %v15046_v59  ;;  %v7103_v15 = vmul.f32 %v7089_v38, %v15041_v53  ;;  %v7129_v50 = vsel %vm315_vm5, %v15047_v25, %v13718_v39  ;;  %v15048_v63 = vld [vmem:[#allocation86_spill] sm:$0xff]  ;;  %v15049_v38 = vld [vmem:[#allocation88_spill] sm:$0xff] }
0x226a   : > { %7397 = vmatpush1.bf16.msra.mxu1 %v15044_v9  ;;  %v7082_v55 = vpop.permute.xlu1 %7081  ;;  %v7286_v24 = vpack.c.bf16 %v7106_v14, %v7102_v33  ;;  %v7134_v14 = vmul.f32 %v7127_v2, %v15048_v63  ;;  %v13968_v33 = vpop.permute.xlu0 %7231  ;;  %v15054_v9 = vld [vmem:[#allocation85_spill] sm:$0xff]  ;;  %v7132_v39 = vsel %vm315_vm5, %v13773_v58, %v13806_v18  ;;  %v15055_v34 = vld [vmem:[#allocation142_spill] sm:$0xff] }
0x226b   : > { %v7086_v13 = vsel %vm275_vm4, %v13778_v47, %v7082_v55  ;;  %v7095_v20 = vsel %vm275_vm4, %v7082_v55, %v13771_v28  ;;  %7398 = vmatprep.subr.bf16.mxu1 %v7284_v26  ;;  %v7107_v47 = vmul.f32 %v7090_v36, %v15041_v53  ;;  %v15050_v26 = vld [vmem:[#allocation141_spill] sm:$0xff]  ;;  %v7133_v55 = vmul.f32 %v7129_v50, %v15054_v9  ;;  %v15059_v2 = vld [vmem:[#allocation98_spill] sm:$0xff]  ;;  %v15063_v50 = vld [vmem:[#allocation123_spill] sm:$0xff] }
0x226c   : > { %v7101_v27 = vmul.f32 %v7095_v20, %v15038_v30  ;;  %v7104_v21 = vmul.f32 %v7086_v13, %v15036_v8  ;;  %7358 = vmatpush1.bf16.msra.mxu0 %v7281_v1  ;;  %v7136_v5 = vmul.f32 %v15050_v26, %v15049_v38  ;;  %v15051_v36 = vld [vmem:[#allocation125_spill] sm:$0xff]  ;;  %v15056_v13 = vld [vmem:[#allocation126_spill] sm:$0xff] }
0x226d   : > { %7359 = vmatprep.subr.bf16.mxu0 %v7286_v24  ;;  %v7287_v48 = vpack.c.bf16 %v7107_v47, %v7103_v15  ;;  %v15057_v20 = vld [vmem:[#allocation121_spill] sm:$0xff]  ;;  %v7294_v15 = vpack.c.bf16 %v7134_v14, %v15059_v2  ;;  %v15061_v47 = vld [vmem:[#allocation87_spill] sm:$0xff]  ;;  %v15066_v14 = vld [vmem:[#allocation100_spill] sm:$0xff] }
0x226e   : > { %v7285_v22 = vpack.c.bf16 %v7105_v54, %v7101_v27  ;;  %7399 = vmatpush1.bf16.msra.mxu1 %v7283_v6  ;;  %v13961_v41 = vpop.permute.xlu1 %7195  ;;  %v7288_v28 = vpack.c.bf16 %v7108_v40, %v7104_v21  ;;  %v15052_v54 = vld [vmem:[#allocation122_spill] sm:$0xff]  ;;  %v15058_v59 = vpack.c.bf16 %v15056_v13, %v15057_v20  ;;  %v7208_v13 = vpop.permute.xlu0 %7207 }
0x226f   : > { %v15053_v1 = vpack.c.bf16 %v15051_v36, %v15052_v54  ;;  %v15060_v27 = vld [vmem:[#allocation102_spill] sm:$0xff]  ;;  %v7140_v36 = vmul.f32 %v7132_v39, %v15049_v38  ;;  %v7296_v54 = vpack.c.bf16 %v7136_v5, %v15066_v14  ;;  %v15076_v14 = vld [vmem:[#allocation129_spill] sm:$0xff] }
0x2270   : > { %7360 = vmatpush1.bf16.msra.mxu0 %v7285_v22  ;;  %7400 = vmatprep.subr.bf16.mxu1 %v7288_v28  ;;  %v7142_v21 = vmul.f32 %v15060_v27, %v15048_v63  ;;  %v15062_v22 = vld [vmem:[#allocation137_spill] sm:$0xff] }
0x2271   : > { %7361 = vmatprep.subr.bf16.mxu0 %v15053_v1  ;;  %v7135_v28 = vmul.f32 %v15062_v22, %v15061_v47  ;;  %v15067_v1 = vld [vmem:[#allocation97_spill] sm:$0xff] }
0x2272   : > { %7401 = vmatpush1.bf16.msra.mxu1 %v7287_v48  ;;  %v7116_v24 = vpop.permute.xlu1 %7115  ;;  %v15064_v48 = vld [vmem:[#allocation119_spill] sm:$0xff] }
0x2273   : > { %v7128_v40 = vsel %vm315_vm5, %v7116_v24, %v15055_v34  ;;  %v7130_v6 = vsel %vm315_vm5, %v13806_v18, %v7116_v24  ;;  %7402 = vmatprep.subr.bf16.mxu1 %v15058_v59  ;;  %v15065_v26 = vpack.c.bf16 %v15063_v50, %v15064_v48  ;;  %v7126_v18 = vsel %vm315_vm5, %v15055_v34, %v13773_v58  ;;  %v15069_v59 = vld [vmem:[#allocation120_spill] sm:$0xff]  ;;  %v15072_v58 = vld [vmem:[#allocation101_spill] sm:$0xff]  ;;  %v15073_v34 = vld [vmem:[#allocation99_spill] sm:$0xff] }
0x2274   : > { %v7138_v25 = vmul.f32 %v7128_v40, %v15048_v63  ;;  %v7293_v24 = vpack.c.bf16 %v7133_v55, %v15067_v1  ;;  %v7137_v20 = vmul.f32 %v7130_v6, %v15054_v9  ;;  %v15068_v40 = vld [vmem:[#allocation124_spill] sm:$0xff]  ;;  %v7141_v39 = vmul.f32 %v15072_v58, %v15054_v9 }
0x2275   : > { %7362 = vmatpush1.bf16.msra.mxu0 %v15065_v26  ;;  %v15070_v2 = vpack.c.bf16 %v15068_v40, %v15069_v59  ;;  %v15071_v50 = vld [vmem:[#allocation104_spill] sm:$0xff]  ;;  %v7295_v5 = vpack.c.bf16 %v7135_v28, %v15073_v34  ;;  %v7139_v6 = vmul.f32 %v7126_v18, %v15061_v47  ;;  %v7215_v28 = vsel %vm395_vm6, %v13742_v4, %v13893_v31  ;;  %v15078_v18 = vld [vmem:[#allocation90_spill] sm:$0xff] }
0x2276   : > { %7363 = vmatprep.subr.bf16.mxu0 %v7294_v15  ;;  %v7234_v27 = vpop.permute.xlu1 %7233  ;;  %v7298_v22 = vpack.c.bf16 %v7142_v21, %v7138_v25  ;;  %v7144_v48 = vmul.f32 %v15071_v50, %v15049_v38  ;;  %v15074_v15 = vld [vmem:[#allocation133_spill] sm:$0xff]  ;;  %v15075_v21 = vld [vmem:[#allocation103_spill] sm:$0xff]  ;;  %v7297_v40 = vpack.c.bf16 %v7141_v39, %v7137_v20  ;;  %v15080_v50 = vld [vmem:[#allocation130_spill] sm:$0xff]  ;;  %v7236_v39 = vpop.permute.xlu0 %7235 }
0x2277   : > { %7403 = vmatpush1.bf16.msra.mxu1 %v15070_v2  ;;  %v7211_v55 = vsel %vm395_vm6, %v13765_v62, %v15074_v15  ;;  %v7143_v25 = vmul.f32 %v15075_v21, %v15061_v47  ;;  %v15079_v2 = vld [vmem:[#allocation106_spill] sm:$0xff]  ;;  %v7210_v21 = vsel %vm395_vm6, %v13767_v11, %v7208_v13 }
0x2278   : > { %7404 = vmatprep.subr.bf16.mxu1 %v7296_v54  ;;  %v7300_v26 = vpack.c.bf16 %v7144_v48, %v7140_v36  ;;  %v15077_v54 = vld [vmem:[#allocation128_spill] sm:$0xff]  ;;  %v7213_v36 = vsel %vm395_vm6, %v13893_v31, %v13765_v62  ;;  %v15081_v48 = vld [vmem:[#allocation131_spill] sm:$0xff]  ;;  %v7209_v62 = vsel %vm395_vm6, %v15074_v15, %v13742_v4  ;;  %v7216_v4 = vsel %vm395_vm6, %v7208_v13, %v13961_v41 }
0x2279   : > { %7364 = vmatpush1.bf16.msra.mxu0 %v7293_v24  ;;  %v7174_v1 = vsel %vm355_vm7, %v15077_v54, %v15076_v14  ;;  %v7218_v24 = vmul.f32 %v7211_v55, %v15078_v18  ;;  %v7180_v58 = vsel %vm355_vm7, %v15081_v48, %v15080_v50  ;;  %v7299_v20 = vpack.c.bf16 %v7143_v25, %v7139_v6  ;;  %v15082_v31 = vld [vmem:[#allocation92_spill] sm:$0xff]  ;;  %v15084_v25 = vld [vmem:[#allocation89_spill] sm:$0xff]  ;;  %v15086_v13 = vld [vmem:[#allocation91_spill] sm:$0xff] }
0x227a   : > { %7365 = vmatprep.subr.bf16.mxu0 %v7298_v22  ;;  %v14029_v59 = vpop.permute.xlu1 %7237  ;;  %v7226_v22 = vmul.f32 %v15079_v2, %v15078_v18  ;;  %v7177_v34 = vsel %vm355_vm7, %v15080_v50, %v15077_v54  ;;  %v7220_v55 = vmul.f32 %v7215_v28, %v15082_v31  ;;  %v7171_v6 = vsel %vm355_vm7, %v15076_v14, %v15081_v48 }
0x227b   : > { %7405 = vmatpush1.bf16.msra.mxu1 %v7295_v5  ;;  %v7190_v5 = vmul.f32 %v7174_v1, %v12845_v42  ;;  %v7217_v54 = vmul.f32 %v7213_v36, %v15084_v25  ;;  %v15085_v1 = vpack.c.bf16 %v13826_v32, %v13820_v17  ;;  %v7219_v36 = vmul.f32 %v7209_v62, %v15086_v13  ;;  %v15089_v62 = vld [vmem:[#allocation105_spill] sm:$0xff] }
0x227c   : > { %7406 = vmatprep.subr.bf16.mxu1 %v7300_v26  ;;  %v15083_v26 = vpack.c.bf16 %v13796_v45, %v13790_v29  ;;  %v7192_v29 = vmul.f32 %v7180_v58, %v12864_v37  ;;  %v7247_v2 = vsel %vm435_vm8, %v7234_v27, %v14029_v59  ;;  %v7223_v17 = vmul.f32 %v7210_v21, %v15086_v13  ;;  %v15091_v21 = vld [vmem:[#allocation94_spill] sm:$0xff] }
0x227d   : > { %7366 = vmatpush1.bf16.msra.mxu0 %v7297_v40  ;;  %v7306_v28 = vpack.c.bf16 %v7218_v24, %v7190_v5  ;;  %v7189_v40 = vmul.f32 %v7177_v34, %v12842_v46  ;;  %v7224_v32 = vmul.f32 %v7216_v4, %v15082_v31  ;;  %v7248_v58 = vsel %vm435_vm8, %v7236_v39, %v13769_v16 }
0x227e   : > { %7367 = vmatprep.subr.bf16.mxu0 %v15083_v26  ;;  %v7200_v15 = vpop.permute.xlu1 %7199  ;;  %v7308_v24 = vpack.c.bf16 %v7220_v55, %v7192_v29  ;;  %v7225_v26 = vmul.f32 %v15089_v62, %v15084_v25 }
0x227f   : > { %7407 = vmatpush1.bf16.msra.mxu1 %v7299_v20  ;;  %v7212_v45 = vsel %vm395_vm6, %v7200_v15, %v13767_v11  ;;  %v7214_v14 = vsel %vm395_vm6, %v13961_v41, %v7200_v15  ;;  %v15087_v11 = vpack.c.bf16 %v13793_v57, %v13787_v0  ;;  %v7191_v41 = vmul.f32 %v7171_v6, %v12853_v56  ;;  %v7244_v20 = vpop.permute.xlu0 %7243  ;;  %v15090_v6 = vld [vmem:[#allocation108_spill] sm:$0xff]  ;;  %v15092_v15 = vld [vmem:[#allocation107_spill] sm:$0xff] }
0x2280   : > { %7408 = vmatprep.subr.bf16.mxu1 %v15085_v1  ;;  %v7222_v50 = vmul.f32 %v7212_v45, %v15078_v18  ;;  %v7305_v48 = vpack.c.bf16 %v7217_v54, %v7189_v40  ;;  %v7221_v34 = vmul.f32 %v7214_v14, %v15084_v25  ;;  %v15088_v0 = vpack.c.bf16 %v13823_v35, %v13817_v19  ;;  %v15093_v35 = vld [vmem:[#allocation93_spill] sm:$0xff] }
0x2281   : > { %7368 = vmatpush1.bf16.msra.mxu0 %v15087_v11  ;;  %v7228_v55 = vmul.f32 %v15090_v6, %v15082_v31  ;;  %v7254_v54 = vmul.f32 %v7247_v2, %v15091_v21  ;;  %v7227_v29 = vmul.f32 %v15092_v15, %v15086_v13  ;;  %v7307_v45 = vpack.c.bf16 %v7219_v36, %v7191_v41  ;;  %v15095_v11 = vld [vmem:[#allocation110_spill] sm:$0xff] }
0x2282   : > { %7369 = vmatprep.subr.bf16.mxu0 %v7306_v28  ;;  %v7230_v57 = vpop.permute.xlu1 %7229  ;;  %v7310_v5 = vpack.c.bf16 %v7226_v22, %v7222_v50  ;;  %v7250_v19 = vsel %vm435_vm8, %v13968_v33, %v7236_v39  ;;  %v15094_v22 = vld [vmem:[#allocation109_spill] sm:$0xff]  ;;  %v7258_v1 = vmul.f32 %v7248_v58, %v15091_v21  ;;  %v7246_v28 = vsel %vm435_vm8, %v13769_v16, %v7244_v20  ;;  %v15097_v58 = vld [vmem:[#allocation95_spill] sm:$0xff] }
0x2283   : > { %7409 = vmatpush1.bf16.msra.mxu1 %v15088_v0  ;;  %v7249_v4 = vsel %vm435_vm8, %v7230_v57, %v7234_v27  ;;  %v7261_v14 = vmul.f32 %v15094_v22, %v15093_v35  ;;  %v7252_v27 = vsel %vm435_vm8, %v7244_v20, %v13968_v33  ;;  %v7312_v40 = vpack.c.bf16 %v7228_v55, %v7224_v32 }
0x2284   : > { %7410 = vmatprep.subr.bf16.mxu1 %v7308_v24  ;;  %v7311_v36 = vpack.c.bf16 %v7227_v29, %v7223_v17  ;;  %v7309_v2 = vpack.c.bf16 %v7225_v26, %v7221_v34  ;;  %v7253_v39 = vmul.f32 %v7249_v4, %v15093_v35  ;;  %v7262_v41 = vmul.f32 %v15095_v11, %v15091_v21  ;;  %v15096_v17 = vld [vmem:[#allocation96_spill] sm:$0xff] }
0x2285   : > { %7370 = vmatpush1.bf16.msra.mxu0 %v7305_v48  ;;  %v7257_v24 = vmul.f32 %v7250_v19, %v15093_v35  ;;  %v7314_v32 = vpack.c.bf16 %v7258_v1, %v7254_v54  ;;  %v7259_v48 = vmul.f32 %v7246_v28, %v15096_v17  ;;  %v7260_v20 = vmul.f32 %v7252_v27, %v15097_v58  ;;  %v15100_v19 = vld [vmem:[#allocation134_spill] sm:$0xff] }
0x2286   : > { %7371 = vmatprep.subr.bf16.mxu0 %v7310_v5  ;;  %v7242_v50 = vpop.permute.xlu1 %7241  ;;  %v15098_v5 = vld [vmem:[#allocation112_spill] sm:$0xff]  ;;  %v7318_v54 = vpack.c.bf16 %v7262_v41, %v7262_v41  ;;  %v7317_v4 = vpack.c.bf16 %v7261_v14, %v7261_v14  ;;  %v8180_v22 = vcombine.low %v15100_v19, %v15100_v19  ;;  %v15101_v14 = vmov 0  }
0x2287   : > { %7411 = vmatpush1.bf16.msra.mxu1 %v7307_v45  ;;  %v7245_v16 = vsel %vm435_vm8, %v14029_v59, %v7242_v50  ;;  %v7251_v33 = vsel %vm435_vm8, %v7242_v50, %v7230_v57  ;;  %v7264_v62 = vmul.f32 %v15098_v5, %v15097_v58  ;;  %v15099_v59 = vld [vmem:[#allocation111_spill] sm:$0xff]  ;;  %v7313_v6 = vpack.c.bf16 %v7257_v24, %v7253_v39  ;;  %v7584_v5 = vld [vmem:[%s12429_s4] sm:$0xff] }
0x2288   : > { %7412 = vmatprep.subr.bf16.mxu1 %v7312_v40  ;;  %v7255_v34 = vmul.f32 %v7245_v16, %v15096_v17  ;;  %v7256_v0 = vmul.f32 %v7251_v33, %v15097_v58  ;;  %v7263_v26 = vmul.f32 %v15099_v59, %v15096_v17  ;;  %v7338_v45 = vsel %vm498_vm9, %v7317_v4, 0 }
0x2289   : > { %7372 = vmatpush1.bf16.msra.mxu0 %v7309_v2  ;;  %v7320_v15 = vpack.c.bf16 %v7264_v62, %v7264_v62  ;;  %v7696_v62 = vld [vmem:[%s12436_s19] sm:$0xff] }
0x228a   : > { %7373 = vmatprep.subr.bf16.mxu0 %v7314_v32  ;;  %v7315_v57 = vpack.c.bf16 %v7259_v48, %v7255_v34  ;;  %v7316_v55 = vpack.c.bf16 %v7260_v20, %v7256_v0  ;;  %v7319_v29 = vpack.c.bf16 %v7263_v26, %v7263_v26 }
0x228b   : > { %7413 = vmatpush1.bf16.msra.mxu1 %v7311_v36 }
0x228c   : > { %7414 = vmatprep.subr.bf16.mxu1 %v7316_v55  ;;  %v7344_v1 = vsel %vm498_vm9, %v7319_v29, 0 }
0x228d   : > { %7374 = vmatpush1.bf16.msra.mxu0 %v7313_v6 }
0x228e   : > { %8182 = vmatprep.subr.msk.bf16.mxu0 %vm498_vm9, %v7318_v54 }
0x228f   : > { %7415 = vmatpush1.bf16.msra.mxu1 %v7315_v57 }
0x2290   : > { %8184 = vmatprep.subr.msk.bf16.mxu1 %vm498_vm9, %v7320_v15 }
0x2291   : > { %7376 = vmatpush1.bf16.msra.mxu0 %v7338_v45 }
0x2293   : > { %7417 = vmatpush1.bf16.msra.mxu1 %v7344_v1 }
0x2294   : > { %7382 = vmatmul.mubr.bf16.vlgmr.msra.gmra.mrb[20].mxu0 %v8180_v22 }
0x2295   : > { %7637 = vmatprep.mubr.bf16.mxu0 %v15101_v14 }
0x2296   : > { %7423 = vmatmul.mubr.bf16.vlgmr.msra.gmra.mrb[20].mxu1 %v8180_v22 }
0x2297   : > { %7678 = vmatprep.mubr.bf16.mxu1 %v15101_v14  ;;  %v7326_v28 = vpop.permute.xlu1 %7325 }
0x2367   : > { %v7383_v27 = vpop.f32.mrb[20].mxu0 }
0x2368   : > { %v7384_v40 = vadd.f32 %v7383_v27, %v7326_v28  ;;  %v7385_v36 = vpop.f32.mrb[21].mxu0 }
0x2369   : > { %v7424_v2 = vpop.f32.mrb[20].mxu1  ;;  %v7387_v39 = vpop.f32.mrb[22].mxu0  ;;  %v7386_v48 = vadd.f32 %v7385_v36, %v7326_v28 }
0x236a   : > { %v14141_v50 = vmax.f32 %v7384_v40, 0.0  ;;  %v7425_v11 = vadd.f32 %v7424_v2, %v7326_v28  ;;  %v7426_v41 = vpop.f32.mrb[21].mxu1  ;;  %v7388_v24 = vpop.f32.mrb[23].mxu0 }
0x236b   : > { %v7428_v16 = vpop.f32.mrb[22].mxu1  ;;  %v14161_v20 = vmax.f32 %v7386_v48, 0.0  ;;  %v7427_v34 = vadd.f32 %v7426_v41, %v7326_v28 }
0x236c   : > { %v14143_v33 = vmax.f32 %v7425_v11, 0.0  ;;  %v7429_v32 = vpop.f32.mrb[23].mxu1  ;;  %7435 = vrot.lane.b32.xlu0 %v14141_v50, %s8871_s6 }
0x236d   : > { %v14171_v0 = vmax.f32 %v7427_v34, 0.0 }
0x236e   : > { %7455 = vrot.lane.b32.xlu1 %v14143_v33, %s8872_s9 }
0x2370   : > { %7451 = vrot.lane.b32.xlu0 %v14141_v50, %s8872_s9 }
0x2372   : > { %7503 = vrot.lane.b32.xlu1 %v14143_v33, %s8875_s29 }
0x2374   : > { %7467 = vrot.lane.b32.xlu0 %v14141_v50, %s8873_s8 }
0x2376   : > { %7471 = vrot.lane.b32.xlu1 %v14143_v33, %s8873_s8 }
0x2378   : > { %7483 = vrot.lane.b32.xlu0 %v14141_v50, %s8874_s28 }
0x237a   : > { %7515 = vrot.lane.b32.xlu1 %v14141_v50, %s14996_s10 }
0x237c   : > { %7439 = vrot.lane.b32.xlu0 %v14143_v33, %s8871_s6 }
0x237e   : > { %7437 = vrot.lane.b32.xlu1 %v14161_v20, %s8871_s6 }
0x2380   : > { %7499 = vrot.lane.b32.xlu0 %v14141_v50, %s8875_s29 }
0x2382   : > { %7453 = vrot.lane.b32.xlu1 %v14161_v20, %s8872_s9 }
0x2384   : > { %7487 = vrot.lane.b32.xlu0 %v14143_v33, %s8874_s28 }
0x2386   : > { %7457 = vrot.lane.b32.xlu1 %v14171_v0, %s8872_s9 }
0x2388   : > { %7519 = vrot.lane.b32.xlu0 %v14143_v33, %s14996_s10 }
0x238a   : > { %7469 = vrot.lane.b32.xlu1 %v14161_v20, %s8873_s8 }
0x238c   : > { %7535 = vrot.lane.b32.xlu0 %v14143_v33, %s15012_s11 }
0x238e   : > { %7485 = vrot.lane.b32.xlu1 %v14161_v20, %s8874_s28 }
0x2390   : > { %7531 = vrot.lane.b32.xlu0 %v14141_v50, %s15012_s11 }
0x2392   : > { %7489 = vrot.lane.b32.xlu1 %v14171_v0, %s8874_s28 }
0x2394   : > { %7441 = vrot.lane.b32.xlu0 %v14171_v0, %s8871_s6  ;;  %s8197_s6 = sshll.u32 %s8824_s0, 4  ;;  %s5250_s0 = sadd.s32 1, %s8824_s0  }
0x2395   : > { %s7809_s9 = scalar_lea.vmem %s10712_s18, %s8197_s6  ;;  %p5247_p0 = scmp.ge.s32.totalorder %s5250_s0, 6  }
0x2396   : > { %7517 = vrot.lane.b32.xlu1 %v14161_v20, %s14996_s10 }
0x2398   : > { %7473 = vrot.lane.b32.xlu0 %v14171_v0, %s8873_s8 }
0x239a   : > { %7533 = vrot.lane.b32.xlu1 %v14161_v20, %s15012_s11 }
0x239c   : > { %7501 = vrot.lane.b32.xlu0 %v14161_v20, %s8875_s29 }
0x239e   : > { %7505 = vrot.lane.b32.xlu1 %v14171_v0, %s8875_s29 }
0x23a0   : > { %7547 = vrot.lane.b32.xlu0 %v14141_v50, %s15013_s12 }
0x23a2   : > { %7549 = vrot.lane.b32.xlu1 %v14161_v20, %s15013_s12 }
0x23a4   : > { %7551 = vrot.lane.b32.xlu0 %v14143_v33, %s15013_s12 }
0x23a6   : > { %7521 = vrot.lane.b32.xlu1 %v14171_v0, %s14996_s10 }
0x23a8   : > { %7537 = vrot.lane.b32.xlu0 %v14171_v0, %s15012_s11 }
0x23aa   : > { %7553 = vrot.lane.b32.xlu1 %v14171_v0, %s15013_s12 }
0x23ac   : > { %7587 = vperm.xlu0 %8682, %v7584_v5  }
0x23ae   : > { %7699 = vperm.xlu1 %8683, %v7696_v62  }
0x23de   : > { %v7436_v59 = vpop.permute.xlu0 %7435 }
0x23e0   : > { %v7456_v26 = vpop.permute.xlu1 %7455 }
0x23e2   : > { %v7452_v6 = vpop.permute.xlu0 %7451 }
0x23e4   : > { %v14215_v57 = vpop.permute.xlu1 %7503 }
0x23e6   : > { %v7468_v55 = vpop.permute.xlu0 %7467 }
0x23e8   : > { %v7472_v54 = vpop.permute.xlu1 %7471 }
0x23ea   : > { %v7484_v4 = vpop.permute.xlu0 %7483 }
0x23ec   : > { %v14217_v15 = vpop.permute.xlu1 %7515 }
0x23ee   : > { %v7440_v29 = vpop.permute.xlu0 %7439 }
0x23f0   : > { %v7438_v45 = vpop.permute.xlu1 %7437 }
0x23f1   : > { %v7445_v22 = vsel %vm156_vm1, %v7436_v59, %v7438_v45 }
0x23f2   : > { %v14219_v19 = vpop.permute.xlu0 %7499  ;;  %v7448_v27 = vmul.f32 %v7445_v22, %v12713_v61  ;;  %v7444_v61 = vsel %vm156_vm1, %v7438_v45, %v7440_v29 }
0x23f4   : > { %v7454_v1 = vpop.permute.xlu1 %7453 }
0x23f5   : > { %v7461_v28 = vsel %vm195_vm2, %v7452_v6, %v7454_v1  ;;  %v7460_v32 = vsel %vm195_vm2, %v7454_v1, %v7456_v26 }
0x23f6   : > { %v7464_v40 = vmul.f32 %v7461_v28, %v12716_v49  ;;  %v7488_v36 = vpop.permute.xlu0 %7487  ;;  %v7465_v62 = vmul.f32 %v7460_v32, %v12735_v7  ;;  %v7449_v28 = vmul.f32 %v7444_v61, %v12732_v12  ;;  %v15102_v12 = vld [vmem:[#allocation79_spill] sm:$0xff]  ;;  %v15103_v32 = vld [vmem:[#allocation80_spill] sm:$0xff] }
0x23f8   : > { %v7458_v2 = vpop.permute.xlu1 %7457  ;;  %v7564_v39 = vpack.c.bf16 %v7464_v40, %v7448_v27  ;;  %v7565_v14 = vpack.c.bf16 %v7465_v62, %v7449_v28 }
0x23f9   : > { %v7462_v49 = vsel %vm195_vm2, %v7458_v2, %v7452_v6  ;;  %v7459_v22 = vsel %vm195_vm2, %v7456_v26, %v7458_v2 }
0x23fa   : > { %7605 = vmatprep.subr.bf16.mxu0 %v7564_v39  ;;  %v14227_v11 = vpop.permute.xlu0 %7519  ;;  %v7463_v1 = vmul.f32 %v7462_v49, %v12729_v23  ;;  %v7466_v26 = vmul.f32 %v7459_v22, %v12742_v3 }
0x23fc   : > { %v7470_v41 = vpop.permute.xlu1 %7469 }
0x23fd   : > { %v7477_v27 = vsel %vm235_vm3, %v7468_v55, %v7470_v41 }
0x23fe   : > { %v14229_v24 = vpop.permute.xlu0 %7535 }
0x2400   : > { %v7486_v16 = vpop.permute.xlu1 %7485 }
0x2401   : > { %v7493_v34 = vsel %vm275_vm4, %v7484_v4, %v7486_v16  ;;  %v7492_v6 = vsel %vm275_vm4, %v7486_v16, %v7488_v36  ;;  %v7480_v16 = vmul.f32 %v7477_v27, %v12763_v60 }
0x2402   : > { %v14233_v48 = vpop.permute.xlu0 %7531  ;;  %v7496_v40 = vmul.f32 %v7493_v34, %v15032_v52 }
0x2404   : > { %v7490_v5 = vpop.permute.xlu1 %7489  ;;  %v7568_v60 = vpack.c.bf16 %v7496_v40, %v7480_v16 }
0x2405   : > { %v7494_v23 = vsel %vm275_vm4, %v7490_v5, %v7484_v4  ;;  %v7491_v52 = vsel %vm275_vm4, %v7488_v36, %v7490_v5 }
0x2406   : > { %v7442_v45 = vpop.permute.xlu0 %7441  ;;  %v7495_v4 = vmul.f32 %v7494_v23, %v15038_v30  ;;  %v7498_v28 = vmul.f32 %v7491_v52, %v15036_v8 }
0x2407   : > { %v7443_v39 = vsel %vm156_vm1, %v7440_v29, %v7442_v45  ;;  %v7446_v7 = vsel %vm156_vm1, %v7442_v45, %v7436_v59  ;;  %v7476_v29 = vsel %vm235_vm3, %v7470_v41, %v7472_v54  ;;  %v7497_v59 = vmul.f32 %v7492_v6, %v15041_v53 }
0x2408   : > { %v7447_v2 = vmul.f32 %v7446_v7, %v15102_v12  ;;  %v7450_v61 = vmul.f32 %v7443_v39, %v15103_v32  ;;  %v7518_v49 = vpop.permute.xlu1 %7517  ;;  %v7481_v53 = vmul.f32 %v7476_v29, %v12771_v44 }
0x2409   : > { %v7525_v7 = vsel %vm355_vm7, %v14217_v15, %v7518_v49 }
0x240a   : > { %v7563_v3 = vpack.c.bf16 %v7463_v1, %v7447_v2  ;;  %v7474_v34 = vpop.permute.xlu0 %7473  ;;  %v7566_v22 = vpack.c.bf16 %v7466_v26, %v7450_v61  ;;  %v7569_v1 = vpack.c.bf16 %v7497_v59, %v7481_v53 }
0x240b   : > { %v7475_v45 = vsel %vm235_vm3, %v7472_v54, %v7474_v34  ;;  %v7478_v62 = vsel %vm235_vm3, %v7474_v34, %v7468_v55  ;;  %v7524_v55 = vsel %vm355_vm7, %v7518_v49, %v14227_v11 }
0x240c   : > { %v7479_v36 = vmul.f32 %v7478_v62, %v12774_v51  ;;  %v7482_v41 = vmul.f32 %v7475_v45, %v12777_v43  ;;  %v7534_v5 = vpop.permute.xlu1 %7533  ;;  %7606 = vmatpush1.bf16.msra.mxu0 %v7563_v3  ;;  %7646 = vmatprep.subr.bf16.mxu1 %v7566_v22  ;;  %v7528_v26 = vmul.f32 %v7524_v55, %v12845_v42  ;;  %v7583_v62 = vld [vmem:[%s12549_s27] sm:$0xf] }
0x240d   : > { %v7540_v30 = vsel %vm395_vm6, %v7534_v5, %v14229_v24  ;;  %7607 = vmatprep.subr.bf16.mxu0 %v7568_v60  ;;  %7647 = vmatpush1.bf16.msra.mxu1 %v7565_v14  ;;  %v7541_v43 = vsel %vm395_vm6, %v14233_v48, %v7534_v5 }
0x240e   : > { %v7567_v8 = vpack.c.bf16 %v7495_v4, %v7479_v36  ;;  %v7502_v54 = vpop.permute.xlu0 %7501  ;;  %v7570_v51 = vpack.c.bf16 %v7498_v28, %v7482_v41  ;;  %v7544_v27 = vmul.f32 %v7540_v30, %v15078_v18  ;;  %v7543_v42 = vmul.f32 %v7541_v43, %v15084_v25 }
0x240f   : > { %v7508_v44 = vsel %vm315_vm5, %v7502_v54, %v14215_v57  ;;  %v7509_v14 = vsel %vm315_vm5, %v14219_v19, %v7502_v54  ;;  %v15104_v36 = vmov 0  }
0x2410   : > { %v7511_v6 = vmul.f32 %v7509_v14, %v15054_v9  ;;  %v7512_v40 = vmul.f32 %v7508_v44, %v15048_v63  ;;  %v7506_v39 = vpop.permute.xlu1 %7505  ;;  %7608 = vmatpush1.bf16.msra.mxu0 %v7567_v8  ;;  %7648 = vmatprep.subr.bf16.mxu1 %v7570_v51  ;;  %v7576_v16 = vpack.c.bf16 %v7544_v27, %v7528_v26 }
0x2411   : > { %v7507_v23 = vsel %vm315_vm5, %v14215_v57, %v7506_v39  ;;  %v7510_v18 = vsel %vm315_vm5, %v7506_v39, %v14219_v19  ;;  %7649 = vmatpush1.bf16.msra.mxu1 %v7569_v1  ;;  %v7527_v19 = vmul.f32 %v7525_v7, %v12842_v46 }
0x2412   : > { %v7571_v63 = vpack.c.bf16 %v7511_v6, %v14141_v50  ;;  %v7513_v9 = vmul.f32 %v7507_v23, %v15061_v47  ;;  %v7514_v12 = vmul.f32 %v7510_v18, %v15049_v38  ;;  %v7548_v2 = vpop.permute.xlu0 %7547  ;;  %v7572_v32 = vpack.c.bf16 %v7512_v40, %v14161_v20  ;;  %v7691_v40 = vld [vmem:[%s12588_s7] sm:$0xf] }
0x2413   : > { %v7575_v20 = vpack.c.bf16 %v7543_v42, %v7527_v19 }
0x2414   : > { %v7573_v61 = vpack.c.bf16 %v7513_v9, %v14143_v33  ;;  %v7550_v49 = vpop.permute.xlu1 %7549  ;;  %7609 = vmatprep.subr.bf16.mxu0 %v7572_v32  ;;  %v7574_v57 = vpack.c.bf16 %v7514_v12, %v14171_v0 }
0x2415   : > { %v7557_v50 = vsel %vm435_vm8, %v7548_v2, %v7550_v49  ;;  %7610 = vmatpush1.bf16.msra.mxu0 %v7571_v63 }
0x2416   : > { %v7559_v38 = vmul.f32 %v7557_v50, %v15093_v35  ;;  %7650 = vmatprep.subr.bf16.mxu1 %v7574_v57  ;;  %7611 = vmatprep.subr.bf16.mxu0 %v7576_v16  ;;  %v7552_v47 = vpop.permute.xlu0 %7551 }
0x2417   : > { %7651 = vmatpush1.bf16.msra.mxu1 %v7573_v61  ;;  %v7556_v25 = vsel %vm435_vm8, %v7550_v49, %v7552_v47 }
0x2418   : > { %v7579_v33 = vpack.c.bf16 %v7559_v38, %v7559_v38  ;;  %v7560_v0 = vmul.f32 %v7556_v25, %v15091_v21  ;;  %v7522_v52 = vpop.permute.xlu1 %7521 }
0x2419   : > { %v7523_v46 = vsel %vm355_vm7, %v14227_v11, %v7522_v52  ;;  %v7526_v35 = vsel %vm355_vm7, %v7522_v52, %v14217_v15  ;;  %7612 = vmatpush1.bf16.msra.mxu0 %v7575_v20 }
0x241a   : > { %v7580_v29 = vpack.c.bf16 %v7560_v0, %v7560_v0  ;;  %v7538_v59 = vpop.permute.xlu0 %7537  ;;  %v7529_v3 = vmul.f32 %v7523_v46, %v12853_v56  ;;  %v7530_v11 = vmul.f32 %v7526_v35, %v12864_v37  ;;  %v7594_v45 = vsel %vm498_vm9, %v7579_v33, 0 }
0x241b   : > { %v7539_v34 = vsel %vm395_vm6, %v14229_v24, %v7538_v59  ;;  %v7542_v21 = vsel %vm395_vm6, %v7538_v59, %v14233_v48 }
0x241c   : > { %v7545_v22 = vmul.f32 %v7539_v34, %v15086_v13  ;;  %v7546_v15 = vmul.f32 %v7542_v21, %v15082_v31  ;;  %v7554_v4 = vpop.permute.xlu1 %7553  ;;  %8186 = vmatprep.subr.msk.bf16.mxu0 %vm498_vm9, %v7580_v29 }
0x241d   : > { %v7555_v56 = vsel %vm435_vm8, %v7552_v47, %v7554_v4  ;;  %v7558_v24 = vsel %vm435_vm8, %v7554_v4, %v7548_v2  ;;  %7614 = vmatpush1.bf16.msra.mxu0 %v7594_v45  ;;  %v15105_v2 = vld [vmem:[#allocation12_spill] sm:$0xff] }
0x241e   : > { %v7577_v48 = vpack.c.bf16 %v7545_v22, %v7529_v3  ;;  %v7561_v37 = vmul.f32 %v7555_v56, %v15096_v17  ;;  %v7562_v13 = vmul.f32 %v7558_v24, %v15097_v58  ;;  %v7578_v60 = vpack.c.bf16 %v7546_v15, %v7530_v11  ;;  %8196 = vst.msk [vmem:[%s7809_s9 + $0x2] ss:$4 sm:$0xf] %vm10716_vm15, %v15105_v2 }
0x2420   : > { %v7581_v31 = vpack.c.bf16 %v7561_v37, %v7561_v37  ;;  %v7582_v28 = vpack.c.bf16 %v7562_v13, %v7562_v13  ;;  %8187 = vmatmul.mubr.msk.bf16.vlgmr.msra.gmra.mrb[24].mxu0 %vm494_vm10, %v7583_v62  ;;  %7652 = vmatprep.subr.bf16.mxu1 %v7578_v60 }
0x2421   : > { %7653 = vmatpush1.bf16.msra.mxu1 %v7577_v48  ;;  %7749 = vmatprep.mubr.bf16.mxu0 %v15104_v36 }
0x2422   : > { %8188 = vmatprep.subr.msk.bf16.mxu1 %vm498_vm9, %v7582_v28  ;;  %v7600_v41 = vsel %vm498_vm9, %v7581_v31, 0 }
0x2425   : > { %7655 = vmatpush1.bf16.msra.mxu1 %v7600_v41 }
0x2428   : > { %8189 = vmatmul.mubr.msk.bf16.vlgmr.msra.gmra.mrb[24].mxu1 %vm494_vm10, %v7583_v62 }
0x242b   : > { %v7588_v5 = vpop.permute.xlu0 %7587 }
0x242d   : > { %v7700_v42 = vpop.permute.xlu1 %7699 }
0x24f3   : > { %v7639_v17 = vpop.f32.mrb[24].mxu0 }
0x24f4   : > { %v7640_v58 = vadd.f32 %v7639_v17, %v7588_v5  ;;  %v7641_v53 = vpop.f32.mrb[25].mxu0 }
0x24f5   : > { %v7642_v30 = vadd.f32 %v7641_v53, %v7588_v5  ;;  %v7643_v55 = vpop.f32.mrb[26].mxu0 }
0x24f6   : > { %v7687_v8 = vmax.f32 %v7640_v58, 0.0  ;;  %v7644_v54 = vpop.f32.mrb[27].mxu0 }
0x24f7   : > { %v7688_v51 = vmax.f32 %v7642_v30, 0.0 }
0x24f8   : > { %v7692_v1 = vpack.c.bf16 %v7687_v8, %v7687_v8 }
0x24f9   : > { %v7693_v43 = vpack.c.bf16 %v7688_v51, %v7688_v51 }
0x24fa   : > { %v7706_v44 = vsel %vm498_vm9, %v7692_v1, 0 }
0x24fb   : > { %v7680_v14 = vpop.f32.mrb[24].mxu1  ;;  %8190 = vmatprep.subr.msk.bf16.mxu0 %vm498_vm9, %v7693_v43 }
0x24fc   : > { %v7681_v27 = vadd.f32 %v7680_v14, %v7588_v5  ;;  %v7682_v6 = vpop.f32.mrb[25].mxu1  ;;  %7718 = vmatpush1.bf16.msra.mxu0 %v7706_v44 }
0x24fd   : > { %v7683_v39 = vadd.f32 %v7682_v6, %v7588_v5  ;;  %v7684_v7 = vpop.f32.mrb[26].mxu1 }
0x24fe   : > { %v7689_v26 = vmax.f32 %v7681_v27, 0.0  ;;  %v7685_v23 = vpop.f32.mrb[27].mxu1 }
0x24ff   : > { %v7690_v18 = vmax.f32 %v7683_v39, 0.0  ;;  %8191 = vmatmul.mubr.msk.bf16.vlgmr.msra.gmra.mrb[28].mxu0 %vm2570_vm14, %v7691_v40 }
0x2500   : > { %v7694_v63 = vpack.c.bf16 %v7689_v26, %v7689_v26  ;;  %7790 = vmatprep.mubr.bf16.mxu0 %v15104_v36 }
0x2501   : > { %v7695_v9 = vpack.c.bf16 %v7690_v18, %v7690_v18 }
0x2502   : > { %v7712_v12 = vsel %vm498_vm9, %v7694_v63, 0 }
0x2503   : > { %8192 = vmatprep.subr.msk.bf16.mxu0 %vm498_vm9, %v7695_v9 }
0x2504   : > { %7759 = vmatpush1.bf16.msra.mxu0 %v7712_v12 }
0x2507   : > { %8193 = vmatmul.mubr.msk.bf16.vlgmr.msra.gmra.mrb[32].mxu0 %vm2570_vm14, %v7691_v40 }
0x25d2   : > { %v7751_v61 = vpop.f32.mrb[28].mxu0 }
0x25d3   : > { %v7752_v33 = vadd.f32 %v7751_v61, %v7700_v42   ;;  %v7753_v49 = vpop.f32.mrb[29].mxu0 }
0x25d4   : > { %v7754_v55 = vadd.f32 %v7753_v49, %v7700_v42   ;;  %v7755_v57 = vpop.f32.mrb[30].mxu0 }
0x25d5   : > { %v7756_v16 = vpop.f32.mrb[31].mxu0 }
0x25d6   : > { %v7803_v19 = vcombine.low %v7752_v33, %v7754_v55 }
0x25d8   : > { %7810 = vst [vmem:[%s7809_s9] sm:$0x33] %v7803_v19 }
0x25da   : > { %v7792_v50 = vpop.f32.mrb[32].mxu0  ;;  %5249 = sbr.rel (!%p5247_p0) target bundleno = 6454 (0x1936), region = 211 }
0x25db   : > { %v7793_v22 = vadd.f32 %v7792_v50, %v7700_v42   ;;  %v7794_v38 = vpop.f32.mrb[33].mxu0 }
0x25dc   : > { %v7795_v3 = vadd.f32 %v7794_v38, %v7700_v42   ;;  %v7796_v47 = vpop.f32.mrb[34].mxu0 }
0x25dd   : > { %v7797_v20 = vpop.f32.mrb[35].mxu0 }
0x25de   : > { %v7804_v25 = vcombine.low %v7793_v22, %v7795_v3 }
0x25e0   : > { %7811 = vst [vmem:[%s7809_s9 + $0x8] sm:$0x33] %v7804_v25 }

</bundles_post_ra>
